<compile_context>
chip_gen: v5e
topology: v5e:2x2
jax: 0.10.0
libtpu: 0.0.40
codegen_flags: <defaults>
</compile_context>

<pallas_src>
import jax
import jax.numpy as jnp
from jax.experimental import pallas as pl
from jax.experimental.pallas import tpu as pltpu

TB = 8  # images per grid step (= row count of every MXU matmul)


# ---------------------------------------------------------------------------
# Kernel: whole network for one batch tile of TB images.
# ---------------------------------------------------------------------------
def lenet_kernel(x_ref, m1_ref, b1_ref, m2_ref, b2_ref,
                 wf1_ref, bf1_ref, wf2_ref, bf2_ref, wf3_ref, bf3_ref,
                 logits_ref, logp_ref):
    f32, bf16 = jnp.float32, jnp.bfloat16
    m1 = m1_ref[...]            # (192, 336) bf16  conv1 Toeplitz (+ pool phases)
    m2 = m2_ref[...]            # (504, 320) bf16  conv2 Toeplitz (+ pool phases)
    b1 = b1_ref[...]            # (1, 84)  f32     conv1 bias tiled over width
    b2 = b2_ref[...]            # (1, 80)  f32     conv2 bias tiled over width

    # ---- conv1(5x5, pad=2) + ReLU + 2x2 maxpool: 1 matmul / pooled row ----
    p1 = []                     # 14 rows of (TB, 84), lane = w*6 + c
    for i in range(14):
        taps = jnp.concatenate([x_ref[:, 2 * i + m, :] for m in range(6)],
                               axis=-1).astype(bf16)                  # (TB,192)
        y = jnp.dot(taps, m1, preferred_element_type=f32)             # (TB,336)
        y = jnp.maximum(jnp.maximum(y[:, 0:84],    y[:, 84:168]),
                        jnp.maximum(y[:, 168:252], y[:, 252:336]))    # pool max
        p1.append(jnp.maximum(y + b1, 0.0))

    # ---- conv2(5x5, pad=0) + ReLU + 2x2 maxpool -----------------------------
    p2 = []                     # 5 rows of (TB, 80), lane = w*16 + c
    for i in range(5):
        taps = jnp.concatenate([p1[2 * i + m] for m in range(6)],
                               axis=-1).astype(bf16)                  # (TB,504)
        y = jnp.dot(taps, m2, preferred_element_type=f32)             # (TB,320)
        y = jnp.maximum(jnp.maximum(y[:, 0:80],    y[:, 80:160]),
                        jnp.maximum(y[:, 160:240], y[:, 240:320]))
        p2.append(jnp.maximum(y + b2, 0.0))

    # ---- fc head (torch NCHW flatten folded into wf1's row permutation) ----
    # TODO(synk): nn.Dropout is treated as eval-mode identity (no RNG masking).
    acc = jnp.dot(p2[0].astype(bf16), wf1_ref[0], preferred_element_type=f32)
    for i in range(1, 5):
        acc = acc + jnp.dot(p2[i].astype(bf16), wf1_ref[i],
                            preferred_element_type=f32)
    h = jnp.maximum(acc + bf1_ref[...], 0.0)                          # (TB,120)

    h = jnp.maximum(jnp.dot(h.astype(bf16), wf2_ref[...],
                            preferred_element_type=f32) + bf2_ref[...], 0.0)
    logits = jnp.dot(h.astype(bf16), wf3_ref[...],
                     preferred_element_type=f32) + bf3_ref[...]       # (TB,10)
    logits_ref[...] = logits

    zmax = jnp.max(logits, axis=-1, keepdims=True)
    z = logits - zmax
    lse = jnp.log(jnp.sum(jnp.exp(z), axis=-1, keepdims=True))
    logp_ref[...] = z - lse                                           # log_softmax


# ---------------------------------------------------------------------------
# Toeplitz weight construction (pure XLA, tiny, runs once inside jit).
# ---------------------------------------------------------------------------
def _conv1_toeplitz(w1):
    """(6,1,5,5) torch conv1 weight -> (192, 336).

    row = m*32 + c        (m: input-row offset 0..5 inside the 6-row band,
                           c: padded input column 0..31)
    col = p*168 + q*84 + j*6 + co   (p,q: pool phases, j: pooled col, co: chan)
    """
    w = w1[:, 0]                                    # (6, 5, 5)
    m = jnp.arange(6).reshape(6, 1, 1, 1, 1, 1)
    c = jnp.arange(32).reshape(1, 32, 1, 1, 1, 1)
    p = jnp.arange(2).reshape(1, 1, 2, 1, 1, 1)
    q = jnp.arange(2).reshape(1, 1, 1, 2, 1, 1)
    j = jnp.arange(14).reshape(1, 1, 1, 1, 14, 1)
    co = jnp.arange(6).reshape(1, 1, 1, 1, 1, 6)
    kh = m - p
    kw = c - 2 * j - q
    ok = (kh >= 0) & (kh < 5) & (kw >= 0) & (kw < 5)
    v = w[co, jnp.clip(kh, 0, 4), jnp.clip(kw, 0, 4)]
    return jnp.where(ok, v, 0.0).reshape(6 * 32, 2 * 2 * 14 * 6)


def _conv2_toeplitz(w2):
    """(16,6,5,5) torch conv2 weight -> (504, 320).

    row = m*84 + j*6 + ci     (m: input-row offset, j: input col, ci: in chan)
    col = p*160 + q*80 + j2*16 + co
    """
    m = jnp.arange(6).reshape(6, 1, 1, 1, 1, 1, 1)
    j = jnp.arange(14).reshape(1, 14, 1, 1, 1, 1, 1)
    ci = jnp.arange(6).reshape(1, 1, 6, 1, 1, 1, 1)
    p = jnp.arange(2).reshape(1, 1, 1, 2, 1, 1, 1)
    q = jnp.arange(2).reshape(1, 1, 1, 1, 2, 1, 1)
    j2 = jnp.arange(5).reshape(1, 1, 1, 1, 1, 5, 1)
    co = jnp.arange(16).reshape(1, 1, 1, 1, 1, 1, 16)
    kh = m - p
    kw = j - 2 * j2 - q
    ok = (kh >= 0) & (kh < 5) & (kw >= 0) & (kw < 5)
    v = w2[co, ci, jnp.clip(kh, 0, 4), jnp.clip(kw, 0, 4)]
    return jnp.where(ok, v, 0.0).reshape(6 * 14 * 6, 2 * 2 * 5 * 16)


# ---------------------------------------------------------------------------
# Public wrapper
# ---------------------------------------------------------------------------
def lenet_forward(x_nchw, params):
    """x_nchw: (B, 1, 28, 28) f32.  Returns (logits, log_probs), both (B, 10)."""
    B = x_nchw.shape[0]
    f32, bf16 = jnp.float32, jnp.bfloat16

    # Kernel-ready parameters (all VMEM-resident inside the kernel).
    m1 = _conv1_toeplitz(params["conv1_w"].astype(f32)).astype(bf16)
    m2 = _conv2_toeplitz(params["conv2_w"].astype(f32)).astype(bf16)
    b1 = jnp.tile(params["conv1_b"], 14).reshape(1, 84).astype(f32)
    b2 = jnp.tile(params["conv2_b"], 5).reshape(1, 80).astype(f32)
    # Fold the torch NCHW flatten (idx = c*25 + h*5 + w) into fc1's weight.
    wf1 = (params["fc1_w"].reshape(120, 16, 5, 5)
           .transpose(2, 3, 1, 0).reshape(5, 80, 120).astype(bf16))
    wf2 = params["fc2_w"].T.astype(bf16)                 # (120, 84)
    wf3 = params["fc3_w"].T.astype(bf16)                 # (84, 10)
    bf1 = params["fc1_b"].reshape(1, 120).astype(f32)
    bf2 = params["fc2_b"].reshape(1, 84).astype(f32)
    bf3 = params["fc3_b"].reshape(1, 10).astype(f32)
    consts = (m1, b1, m2, b2, wf1, bf1, wf2, bf2, wf3, bf3)

    # Input: NCHW -> padded (B, 32, 32) plane (conv1 padding=2), batch->TB mult.
    x = jnp.pad(x_nchw[:, 0], ((0, 0), (2, 2), (2, 2)))
    Bp = ((B + TB - 1) // TB) * TB
    if Bp != B:
        x = jnp.pad(x, ((0, Bp - B), (0, 0), (0, 0)))

    def resident(a):
        zeros = (0,) * a.ndim
        return pl.BlockSpec(a.shape, lambda i, _z=zeros: _z)

    flops = 2 * Bp * (14 * 192 * 336 + 5 * 504 * 320
                      + 400 * 120 + 120 * 84 + 84 * 10)
    bytes_accessed = (x.size * 4
                      + sum(c.size * c.dtype.itemsize for c in consts)
                      + 2 * Bp * 10 * 4)

    logits, logp = pl.pallas_call(
        lenet_kernel,
        out_shape=(jax.ShapeDtypeStruct((Bp, 10), f32),
                   jax.ShapeDtypeStruct((Bp, 10), f32)),
        grid_spec=pltpu.PrefetchScalarGridSpec(
            num_scalar_prefetch=0,
            grid=(Bp // TB,),
            in_specs=[pl.BlockSpec((TB, 32, 32), lambda i: (i, 0, 0))]
                     + [resident(c) for c in consts],
            out_specs=(pl.BlockSpec((TB, 10), lambda i: (i, 0)),
                       pl.BlockSpec((TB, 10), lambda i: (i, 0)))),
        compiler_params=pltpu.CompilerParams(
            dimension_semantics=("parallel",),
            vmem_limit_bytes=32 * 1024 * 1024),
        cost_estimate=pl.CostEstimate(flops=flops, transcendentals=11 * Bp,
                                      bytes_accessed=bytes_accessed),
    )(x, *consts)
    return logits[:B], logp[:B]


# ---------------------------------------------------------------------------
# Pure-JAX reference (eval mode, dropout = identity)
# ---------------------------------------------------------------------------
def lenet_reference(x, p):
    def conv(x, w, b, pad):
        y = jax.lax.conv_general_dilated(
            x, w, (1, 1), pad, dimension_numbers=("NCHW", "OIHW", "NCHW"))
        return y + b.reshape(1, -1, 1, 1)

    def pool(x):
        return jax.lax.reduce_window(x, -jnp.inf, jax.lax.max,
                                     (1, 1, 2, 2), (1, 1, 2, 2), "VALID")

    y = pool(jnp.maximum(conv(x, p["conv1_w"], p["conv1_b"], ((2, 2), (2, 2))), 0.0))
    y = pool(jnp.maximum(conv(y, p["conv2_w"], p["conv2_b"], ((0, 0), (0, 0))), 0.0))
    y = y.reshape(y.shape[0], -1)
    y = jnp.maximum(y @ p["fc1_w"].T + p["fc1_b"], 0.0)
    y = jnp.maximum(y @ p["fc2_w"].T + p["fc2_b"], 0.0)
    logits = y @ p["fc3_w"].T + p["fc3_b"]
    return logits, jax.nn.log_softmax(logits, axis=1)


# ---------------------------------------------------------------------------
if __name__ == "__main__":
    key = jax.random.PRNGKey(0)
    keys = jax.random.split(key, 11)

    def u(k, shape, fan_in):
        bound = 1.0 / (fan_in ** 0.5)
        return jax.random.uniform(k, shape, jnp.float32, -bound, bound)

    # Parameters kept in torch layouts: conv (Cout,Cin,KH,KW), linear (out,in).
    params = {
        "conv1_w": u(keys[0], (6, 1, 5, 5), 1 * 5 * 5),
        "conv1_b": u(keys[1], (6,), 1 * 5 * 5),
        "conv2_w": u(keys[2], (16, 6, 5, 5), 6 * 5 * 5),
        "conv2_b": u(keys[3], (16,), 6 * 5 * 5),
        "fc1_w": u(keys[4], (120, 400), 400),
        "fc1_b": u(keys[5], (120,), 400),
        "fc2_w": u(keys[6], (84, 120), 120),
        "fc2_b": u(keys[7], (84,), 120),
        "fc3_w": u(keys[8], (10, 84), 84),
        "fc3_b": u(keys[9], (10,), 84),
    }

    # MNIST-shaped input (28x28 is required by fc1 = 16*5*5); B=32 -> grid of 4.
    x = jax.random.normal(keys[10], (32, 1, 28, 28), jnp.float32)

    logits, log_probs = jax.jit(lenet_forward)(x, params)
    jax.block_until_ready((logits, log_probs))

    ref_logits, ref_logp = lenet_reference(x, params)
    # bf16 MXU operands (f32 accumulation) -> looser tolerance than pure f32.
    assert jnp.allclose(logits, ref_logits, atol=5e-2, rtol=5e-2), "logits mismatch"
    assert jnp.allclose(log_probs, ref_logp, atol=5e-2, rtol=5e-2), "log_softmax mismatch"

    print("KERNEL_OK")
</pallas_src>

<mosaic_0001>
module attributes {stable_mosaic.version = 11 : i64} {
  func.func @lenet_kernel(%arg0: i32, %arg1: memref<8x32x32xf32, #tpu.memory_space<vmem>>, %arg2: memref<192x336xbf16, #tpu.memory_space<vmem>>, %arg3: memref<1x84xf32, #tpu.memory_space<vmem>>, %arg4: memref<504x320xbf16, #tpu.memory_space<vmem>>, %arg5: memref<1x80xf32, #tpu.memory_space<vmem>>, %arg6: memref<5x80x120xbf16, #tpu.memory_space<vmem>>, %arg7: memref<1x120xf32, #tpu.memory_space<vmem>>, %arg8: memref<120x84xbf16, #tpu.memory_space<vmem>>, %arg9: memref<1x84xf32, #tpu.memory_space<vmem>>, %arg10: memref<84x10xbf16, #tpu.memory_space<vmem>>, %arg11: memref<1x10xf32, #tpu.memory_space<vmem>>, %arg12: memref<8x10xf32, #tpu.memory_space<vmem>>, %arg13: memref<8x10xf32, #tpu.memory_space<vmem>>) attributes {dimension_semantics = [#tpu.dimension_semantics<parallel>], iteration_bounds = array<i64: 4>, scalar_prefetch = 0 : i64, scratch_operands = 0 : i64, tpu.core_type = #tpu.core_type<tc>, window_params = [{transform_indices = @transform_0, window_bounds = array<i64: 8, 32, 32>}, {pipeline_mode = #tpu.pipeline_mode<synchronous>, transform_indices = @transform_1, window_bounds = array<i64: 192, 336>}, {pipeline_mode = #tpu.pipeline_mode<synchronous>, transform_indices = @transform_2, window_bounds = array<i64: 1, 84>}, {pipeline_mode = #tpu.pipeline_mode<synchronous>, transform_indices = @transform_3, window_bounds = array<i64: 504, 320>}, {pipeline_mode = #tpu.pipeline_mode<synchronous>, transform_indices = @transform_4, window_bounds = array<i64: 1, 80>}, {pipeline_mode = #tpu.pipeline_mode<synchronous>, transform_indices = @transform_5, window_bounds = array<i64: 5, 80, 120>}, {pipeline_mode = #tpu.pipeline_mode<synchronous>, transform_indices = @transform_6, window_bounds = array<i64: 1, 120>}, {pipeline_mode = #tpu.pipeline_mode<synchronous>, transform_indices = @transform_7, window_bounds = array<i64: 120, 84>}, {pipeline_mode = #tpu.pipeline_mode<synchronous>, transform_indices = @transform_8, window_bounds = array<i64: 1, 84>}, {pipeline_mode = #tpu.pipeline_mode<synchronous>, transform_indices = @transform_9, window_bounds = array<i64: 84, 10>}, {pipeline_mode = #tpu.pipeline_mode<synchronous>, transform_indices = @transform_10, window_bounds = array<i64: 1, 10>}, {transform_indices = @transform_11, window_bounds = array<i64: 8, 10>}, {transform_indices = @transform_12, window_bounds = array<i64: 8, 10>}]} {
    %c0 = arith.constant 0 : index
    %c0_0 = arith.constant 0 : index
    %0 = vector.load %arg2[%c0, %c0_0] : memref<192x336xbf16, #tpu.memory_space<vmem>>, vector<192x336xbf16>
    %c0_1 = arith.constant 0 : index
    %c0_2 = arith.constant 0 : index
    %1 = vector.load %arg4[%c0_1, %c0_2] : memref<504x320xbf16, #tpu.memory_space<vmem>>, vector<504x320xbf16>
    %c0_3 = arith.constant 0 : index
    %c0_4 = arith.constant 0 : index
    %2 = vector.load %arg3[%c0_3, %c0_4] : memref<1x84xf32, #tpu.memory_space<vmem>>, vector<1x84xf32>
    %c0_5 = arith.constant 0 : index
    %c0_6 = arith.constant 0 : index
    %3 = vector.load %arg5[%c0_5, %c0_6] : memref<1x80xf32, #tpu.memory_space<vmem>>, vector<1x80xf32>
    %c0_7 = arith.constant 0 : index
    %c0_8 = arith.constant 0 : index
    %c0_9 = arith.constant 0 : index
    %4 = vector.load %arg1[%c0_7, %c0_8, %c0_9] : memref<8x32x32xf32, #tpu.memory_space<vmem>>, vector<8x1x32xf32>
    %5 = vector.shape_cast %4 : vector<8x1x32xf32> to vector<8x32xf32>
    %c0_10 = arith.constant 0 : index
    %c1 = arith.constant 1 : index
    %c0_11 = arith.constant 0 : index
    %6 = vector.load %arg1[%c0_10, %c1, %c0_11] : memref<8x32x32xf32, #tpu.memory_space<vmem>>, vector<8x1x32xf32>
    %7 = vector.shape_cast %6 : vector<8x1x32xf32> to vector<8x32xf32>
    %c0_12 = arith.constant 0 : index
    %c2 = arith.constant 2 : index
    %c0_13 = arith.constant 0 : index
    %8 = vector.load %arg1[%c0_12, %c2, %c0_13] : memref<8x32x32xf32, #tpu.memory_space<vmem>>, vector<8x1x32xf32>
    %9 = vector.shape_cast %8 : vector<8x1x32xf32> to vector<8x32xf32>
    %c0_14 = arith.constant 0 : index
    %c3 = arith.constant 3 : index
    %c0_15 = arith.constant 0 : index
    %10 = vector.load %arg1[%c0_14, %c3, %c0_15] : memref<8x32x32xf32, #tpu.memory_space<vmem>>, vector<8x1x32xf32>
    %11 = vector.shape_cast %10 : vector<8x1x32xf32> to vector<8x32xf32>
    %c0_16 = arith.constant 0 : index
    %c4 = arith.constant 4 : index
    %c0_17 = arith.constant 0 : index
    %12 = vector.load %arg1[%c0_16, %c4, %c0_17] : memref<8x32x32xf32, #tpu.memory_space<vmem>>, vector<8x1x32xf32>
    %13 = vector.shape_cast %12 : vector<8x1x32xf32> to vector<8x32xf32>
    %c0_18 = arith.constant 0 : index
    %c5 = arith.constant 5 : index
    %c0_19 = arith.constant 0 : index
    %14 = vector.load %arg1[%c0_18, %c5, %c0_19] : memref<8x32x32xf32, #tpu.memory_space<vmem>>, vector<8x1x32xf32>
    %15 = vector.shape_cast %14 : vector<8x1x32xf32> to vector<8x32xf32>
    %16 = tpu.concatenate %5, %7, %9, %11, %13, %15 in 1 : vector<8x32xf32>, vector<8x32xf32>, vector<8x32xf32>, vector<8x32xf32>, vector<8x32xf32>, vector<8x32xf32> -> vector<8x192xf32>
    %17 = arith.truncf %16 : vector<8x192xf32> to vector<8x192xbf16>
    %cst = arith.constant dense<0.000000e+00> : vector<8x336xf32>
    %18 = tpu.matmul %17, %0, %cst {dimension_numbers = #tpu.dot_dimension_numbers<[1], [0], [0], [1], [0, 0, 1, 1], [], []>} : vector<8x192xbf16>, vector<192x336xbf16>, vector<8x336xf32> -> vector<8x336xf32>
    %19 = vector.extract_strided_slice %18 {offsets = [0, 0], sizes = [8, 84], strides = [1, 1]} : vector<8x336xf32> to vector<8x84xf32>
    %20 = vector.extract_strided_slice %18 {offsets = [0, 84], sizes = [8, 84], strides = [1, 1]} : vector<8x336xf32> to vector<8x84xf32>
    %21 = arith.maximumf %19, %20 : vector<8x84xf32>
    %22 = vector.extract_strided_slice %18 {offsets = [0, 168], sizes = [8, 84], strides = [1, 1]} : vector<8x336xf32> to vector<8x84xf32>
    %23 = vector.extract_strided_slice %18 {offsets = [0, 252], sizes = [8, 84], strides = [1, 1]} : vector<8x336xf32> to vector<8x84xf32>
    %24 = arith.maximumf %22, %23 : vector<8x84xf32>
    %25 = arith.maximumf %21, %24 : vector<8x84xf32>
    %26 = vector.broadcast %2 : vector<1x84xf32> to vector<8x84xf32>
    %27 = arith.addf %25, %26 : vector<8x84xf32>
    %cst_20 = arith.constant 0.000000e+00 : f32
    %28 = vector.broadcast %cst_20 : f32 to vector<8x84xf32>
    %29 = arith.maximumf %27, %28 : vector<8x84xf32>
    %c0_21 = arith.constant 0 : index
    %c2_22 = arith.constant 2 : index
    %c0_23 = arith.constant 0 : index
    %30 = vector.load %arg1[%c0_21, %c2_22, %c0_23] : memref<8x32x32xf32, #tpu.memory_space<vmem>>, vector<8x1x32xf32>
    %31 = vector.shape_cast %30 : vector<8x1x32xf32> to vector<8x32xf32>
    %c0_24 = arith.constant 0 : index
    %c3_25 = arith.constant 3 : index
    %c0_26 = arith.constant 0 : index
    %32 = vector.load %arg1[%c0_24, %c3_25, %c0_26] : memref<8x32x32xf32, #tpu.memory_space<vmem>>, vector<8x1x32xf32>
    %33 = vector.shape_cast %32 : vector<8x1x32xf32> to vector<8x32xf32>
    %c0_27 = arith.constant 0 : index
    %c4_28 = arith.constant 4 : index
    %c0_29 = arith.constant 0 : index
    %34 = vector.load %arg1[%c0_27, %c4_28, %c0_29] : memref<8x32x32xf32, #tpu.memory_space<vmem>>, vector<8x1x32xf32>
    %35 = vector.shape_cast %34 : vector<8x1x32xf32> to vector<8x32xf32>
    %c0_30 = arith.constant 0 : index
    %c5_31 = arith.constant 5 : index
    %c0_32 = arith.constant 0 : index
    %36 = vector.load %arg1[%c0_30, %c5_31, %c0_32] : memref<8x32x32xf32, #tpu.memory_space<vmem>>, vector<8x1x32xf32>
    %37 = vector.shape_cast %36 : vector<8x1x32xf32> to vector<8x32xf32>
    %c0_33 = arith.constant 0 : index
    %c6 = arith.constant 6 : index
    %c0_34 = arith.constant 0 : index
    %38 = vector.load %arg1[%c0_33, %c6, %c0_34] : memref<8x32x32xf32, #tpu.memory_space<vmem>>, vector<8x1x32xf32>
    %39 = vector.shape_cast %38 : vector<8x1x32xf32> to vector<8x32xf32>
    %c0_35 = arith.constant 0 : index
    %c7 = arith.constant 7 : index
    %c0_36 = arith.constant 0 : index
    %40 = vector.load %arg1[%c0_35, %c7, %c0_36] : memref<8x32x32xf32, #tpu.memory_space<vmem>>, vector<8x1x32xf32>
    %41 = vector.shape_cast %40 : vector<8x1x32xf32> to vector<8x32xf32>
    %42 = tpu.concatenate %31, %33, %35, %37, %39, %41 in 1 : vector<8x32xf32>, vector<8x32xf32>, vector<8x32xf32>, vector<8x32xf32>, vector<8x32xf32>, vector<8x32xf32> -> vector<8x192xf32>
    %43 = arith.truncf %42 : vector<8x192xf32> to vector<8x192xbf16>
    %cst_37 = arith.constant dense<0.000000e+00> : vector<8x336xf32>
    %44 = tpu.matmul %43, %0, %cst_37 {dimension_numbers = #tpu.dot_dimension_numbers<[1], [0], [0], [1], [0, 0, 1, 1], [], []>} : vector<8x192xbf16>, vector<192x336xbf16>, vector<8x336xf32> -> vector<8x336xf32>
    %45 = vector.extract_strided_slice %44 {offsets = [0, 0], sizes = [8, 84], strides = [1, 1]} : vector<8x336xf32> to vector<8x84xf32>
    %46 = vector.extract_strided_slice %44 {offsets = [0, 84], sizes = [8, 84], strides = [1, 1]} : vector<8x336xf32> to vector<8x84xf32>
    %47 = arith.maximumf %45, %46 : vector<8x84xf32>
    %48 = vector.extract_strided_slice %44 {offsets = [0, 168], sizes = [8, 84], strides = [1, 1]} : vector<8x336xf32> to vector<8x84xf32>
    %49 = vector.extract_strided_slice %44 {offsets = [0, 252], sizes = [8, 84], strides = [1, 1]} : vector<8x336xf32> to vector<8x84xf32>
    %50 = arith.maximumf %48, %49 : vector<8x84xf32>
    %51 = arith.maximumf %47, %50 : vector<8x84xf32>
    %52 = vector.broadcast %2 : vector<1x84xf32> to vector<8x84xf32>
    %53 = arith.addf %51, %52 : vector<8x84xf32>
    %cst_38 = arith.constant 0.000000e+00 : f32
    %54 = vector.broadcast %cst_38 : f32 to vector<8x84xf32>
    %55 = arith.maximumf %53, %54 : vector<8x84xf32>
    %c0_39 = arith.constant 0 : index
    %c4_40 = arith.constant 4 : index
    %c0_41 = arith.constant 0 : index
    %56 = vector.load %arg1[%c0_39, %c4_40, %c0_41] : memref<8x32x32xf32, #tpu.memory_space<vmem>>, vector<8x1x32xf32>
    %57 = vector.shape_cast %56 : vector<8x1x32xf32> to vector<8x32xf32>
    %c0_42 = arith.constant 0 : index
    %c5_43 = arith.constant 5 : index
    %c0_44 = arith.constant 0 : index
    %58 = vector.load %arg1[%c0_42, %c5_43, %c0_44] : memref<8x32x32xf32, #tpu.memory_space<vmem>>, vector<8x1x32xf32>
    %59 = vector.shape_cast %58 : vector<8x1x32xf32> to vector<8x32xf32>
    %c0_45 = arith.constant 0 : index
    %c6_46 = arith.constant 6 : index
    %c0_47 = arith.constant 0 : index
    %60 = vector.load %arg1[%c0_45, %c6_46, %c0_47] : memref<8x32x32xf32, #tpu.memory_space<vmem>>, vector<8x1x32xf32>
    %61 = vector.shape_cast %60 : vector<8x1x32xf32> to vector<8x32xf32>
    %c0_48 = arith.constant 0 : index
    %c7_49 = arith.constant 7 : index
    %c0_50 = arith.constant 0 : index
    %62 = vector.load %arg1[%c0_48, %c7_49, %c0_50] : memref<8x32x32xf32, #tpu.memory_space<vmem>>, vector<8x1x32xf32>
    %63 = vector.shape_cast %62 : vector<8x1x32xf32> to vector<8x32xf32>
    %c0_51 = arith.constant 0 : index
    %c8 = arith.constant 8 : index
    %c0_52 = arith.constant 0 : index
    %64 = vector.load %arg1[%c0_51, %c8, %c0_52] : memref<8x32x32xf32, #tpu.memory_space<vmem>>, vector<8x1x32xf32>
    %65 = vector.shape_cast %64 : vector<8x1x32xf32> to vector<8x32xf32>
    %c0_53 = arith.constant 0 : index
    %c9 = arith.constant 9 : index
    %c0_54 = arith.constant 0 : index
    %66 = vector.load %arg1[%c0_53, %c9, %c0_54] : memref<8x32x32xf32, #tpu.memory_space<vmem>>, vector<8x1x32xf32>
    %67 = vector.shape_cast %66 : vector<8x1x32xf32> to vector<8x32xf32>
    %68 = tpu.concatenate %57, %59, %61, %63, %65, %67 in 1 : vector<8x32xf32>, vector<8x32xf32>, vector<8x32xf32>, vector<8x32xf32>, vector<8x32xf32>, vector<8x32xf32> -> vector<8x192xf32>
    %69 = arith.truncf %68 : vector<8x192xf32> to vector<8x192xbf16>
    %cst_55 = arith.constant dense<0.000000e+00> : vector<8x336xf32>
    %70 = tpu.matmul %69, %0, %cst_55 {dimension_numbers = #tpu.dot_dimension_numbers<[1], [0], [0], [1], [0, 0, 1, 1], [], []>} : vector<8x192xbf16>, vector<192x336xbf16>, vector<8x336xf32> -> vector<8x336xf32>
    %71 = vector.extract_strided_slice %70 {offsets = [0, 0], sizes = [8, 84], strides = [1, 1]} : vector<8x336xf32> to vector<8x84xf32>
    %72 = vector.extract_strided_slice %70 {offsets = [0, 84], sizes = [8, 84], strides = [1, 1]} : vector<8x336xf32> to vector<8x84xf32>
    %73 = arith.maximumf %71, %72 : vector<8x84xf32>
    %74 = vector.extract_strided_slice %70 {offsets = [0, 168], sizes = [8, 84], strides = [1, 1]} : vector<8x336xf32> to vector<8x84xf32>
    %75 = vector.extract_strided_slice %70 {offsets = [0, 252], sizes = [8, 84], strides = [1, 1]} : vector<8x336xf32> to vector<8x84xf32>
    %76 = arith.maximumf %74, %75 : vector<8x84xf32>
    %77 = arith.maximumf %73, %76 : vector<8x84xf32>
    %78 = vector.broadcast %2 : vector<1x84xf32> to vector<8x84xf32>
    %79 = arith.addf %77, %78 : vector<8x84xf32>
    %cst_56 = arith.constant 0.000000e+00 : f32
    %80 = vector.broadcast %cst_56 : f32 to vector<8x84xf32>
    %81 = arith.maximumf %79, %80 : vector<8x84xf32>
    %c0_57 = arith.constant 0 : index
    %c6_58 = arith.constant 6 : index
    %c0_59 = arith.constant 0 : index
    %82 = vector.load %arg1[%c0_57, %c6_58, %c0_59] : memref<8x32x32xf32, #tpu.memory_space<vmem>>, vector<8x1x32xf32>
    %83 = vector.shape_cast %82 : vector<8x1x32xf32> to vector<8x32xf32>
    %c0_60 = arith.constant 0 : index
    %c7_61 = arith.constant 7 : index
    %c0_62 = arith.constant 0 : index
    %84 = vector.load %arg1[%c0_60, %c7_61, %c0_62] : memref<8x32x32xf32, #tpu.memory_space<vmem>>, vector<8x1x32xf32>
    %85 = vector.shape_cast %84 : vector<8x1x32xf32> to vector<8x32xf32>
    %c0_63 = arith.constant 0 : index
    %c8_64 = arith.constant 8 : index
    %c0_65 = arith.constant 0 : index
    %86 = vector.load %arg1[%c0_63, %c8_64, %c0_65] : memref<8x32x32xf32, #tpu.memory_space<vmem>>, vector<8x1x32xf32>
    %87 = vector.shape_cast %86 : vector<8x1x32xf32> to vector<8x32xf32>
    %c0_66 = arith.constant 0 : index
    %c9_67 = arith.constant 9 : index
    %c0_68 = arith.constant 0 : index
    %88 = vector.load %arg1[%c0_66, %c9_67, %c0_68] : memref<8x32x32xf32, #tpu.memory_space<vmem>>, vector<8x1x32xf32>
    %89 = vector.shape_cast %88 : vector<8x1x32xf32> to vector<8x32xf32>
    %c0_69 = arith.constant 0 : index
    %c10 = arith.constant 10 : index
    %c0_70 = arith.constant 0 : index
    %90 = vector.load %arg1[%c0_69, %c10, %c0_70] : memref<8x32x32xf32, #tpu.memory_space<vmem>>, vector<8x1x32xf32>
    %91 = vector.shape_cast %90 : vector<8x1x32xf32> to vector<8x32xf32>
    %c0_71 = arith.constant 0 : index
    %c11 = arith.constant 11 : index
    %c0_72 = arith.constant 0 : index
    %92 = vector.load %arg1[%c0_71, %c11, %c0_72] : memref<8x32x32xf32, #tpu.memory_space<vmem>>, vector<8x1x32xf32>
    %93 = vector.shape_cast %92 : vector<8x1x32xf32> to vector<8x32xf32>
    %94 = tpu.concatenate %83, %85, %87, %89, %91, %93 in 1 : vector<8x32xf32>, vector<8x32xf32>, vector<8x32xf32>, vector<8x32xf32>, vector<8x32xf32>, vector<8x32xf32> -> vector<8x192xf32>
    %95 = arith.truncf %94 : vector<8x192xf32> to vector<8x192xbf16>
    %cst_73 = arith.constant dense<0.000000e+00> : vector<8x336xf32>
    %96 = tpu.matmul %95, %0, %cst_73 {dimension_numbers = #tpu.dot_dimension_numbers<[1], [0], [0], [1], [0, 0, 1, 1], [], []>} : vector<8x192xbf16>, vector<192x336xbf16>, vector<8x336xf32> -> vector<8x336xf32>
    %97 = vector.extract_strided_slice %96 {offsets = [0, 0], sizes = [8, 84], strides = [1, 1]} : vector<8x336xf32> to vector<8x84xf32>
    %98 = vector.extract_strided_slice %96 {offsets = [0, 84], sizes = [8, 84], strides = [1, 1]} : vector<8x336xf32> to vector<8x84xf32>
    %99 = arith.maximumf %97, %98 : vector<8x84xf32>
    %100 = vector.extract_strided_slice %96 {offsets = [0, 168], sizes = [8, 84], strides = [1, 1]} : vector<8x336xf32> to vector<8x84xf32>
    %101 = vector.extract_strided_slice %96 {offsets = [0, 252], sizes = [8, 84], strides = [1, 1]} : vector<8x336xf32> to vector<8x84xf32>
    %102 = arith.maximumf %100, %101 : vector<8x84xf32>
    %103 = arith.maximumf %99, %102 : vector<8x84xf32>
    %104 = vector.broadcast %2 : vector<1x84xf32> to vector<8x84xf32>
    %105 = arith.addf %103, %104 : vector<8x84xf32>
    %cst_74 = arith.constant 0.000000e+00 : f32
    %106 = vector.broadcast %cst_74 : f32 to vector<8x84xf32>
    %107 = arith.maximumf %105, %106 : vector<8x84xf32>
    %c0_75 = arith.constant 0 : index
    %c8_76 = arith.constant 8 : index
    %c0_77 = arith.constant 0 : index
    %108 = vector.load %arg1[%c0_75, %c8_76, %c0_77] : memref<8x32x32xf32, #tpu.memory_space<vmem>>, vector<8x1x32xf32>
    %109 = vector.shape_cast %108 : vector<8x1x32xf32> to vector<8x32xf32>
    %c0_78 = arith.constant 0 : index
    %c9_79 = arith.constant 9 : index
    %c0_80 = arith.constant 0 : index
    %110 = vector.load %arg1[%c0_78, %c9_79, %c0_80] : memref<8x32x32xf32, #tpu.memory_space<vmem>>, vector<8x1x32xf32>
    %111 = vector.shape_cast %110 : vector<8x1x32xf32> to vector<8x32xf32>
    %c0_81 = arith.constant 0 : index
    %c10_82 = arith.constant 10 : index
    %c0_83 = arith.constant 0 : index
    %112 = vector.load %arg1[%c0_81, %c10_82, %c0_83] : memref<8x32x32xf32, #tpu.memory_space<vmem>>, vector<8x1x32xf32>
    %113 = vector.shape_cast %112 : vector<8x1x32xf32> to vector<8x32xf32>
    %c0_84 = arith.constant 0 : index
    %c11_85 = arith.constant 11 : index
    %c0_86 = arith.constant 0 : index
    %114 = vector.load %arg1[%c0_84, %c11_85, %c0_86] : memref<8x32x32xf32, #tpu.memory_space<vmem>>, vector<8x1x32xf32>
    %115 = vector.shape_cast %114 : vector<8x1x32xf32> to vector<8x32xf32>
    %c0_87 = arith.constant 0 : index
    %c12 = arith.constant 12 : index
    %c0_88 = arith.constant 0 : index
    %116 = vector.load %arg1[%c0_87, %c12, %c0_88] : memref<8x32x32xf32, #tpu.memory_space<vmem>>, vector<8x1x32xf32>
    %117 = vector.shape_cast %116 : vector<8x1x32xf32> to vector<8x32xf32>
    %c0_89 = arith.constant 0 : index
    %c13 = arith.constant 13 : index
    %c0_90 = arith.constant 0 : index
    %118 = vector.load %arg1[%c0_89, %c13, %c0_90] : memref<8x32x32xf32, #tpu.memory_space<vmem>>, vector<8x1x32xf32>
    %119 = vector.shape_cast %118 : vector<8x1x32xf32> to vector<8x32xf32>
    %120 = tpu.concatenate %109, %111, %113, %115, %117, %119 in 1 : vector<8x32xf32>, vector<8x32xf32>, vector<8x32xf32>, vector<8x32xf32>, vector<8x32xf32>, vector<8x32xf32> -> vector<8x192xf32>
    %121 = arith.truncf %120 : vector<8x192xf32> to vector<8x192xbf16>
    %cst_91 = arith.constant dense<0.000000e+00> : vector<8x336xf32>
    %122 = tpu.matmul %121, %0, %cst_91 {dimension_numbers = #tpu.dot_dimension_numbers<[1], [0], [0], [1], [0, 0, 1, 1], [], []>} : vector<8x192xbf16>, vector<192x336xbf16>, vector<8x336xf32> -> vector<8x336xf32>
    %123 = vector.extract_strided_slice %122 {offsets = [0, 0], sizes = [8, 84], strides = [1, 1]} : vector<8x336xf32> to vector<8x84xf32>
    %124 = vector.extract_strided_slice %122 {offsets = [0, 84], sizes = [8, 84], strides = [1, 1]} : vector<8x336xf32> to vector<8x84xf32>
    %125 = arith.maximumf %123, %124 : vector<8x84xf32>
    %126 = vector.extract_strided_slice %122 {offsets = [0, 168], sizes = [8, 84], strides = [1, 1]} : vector<8x336xf32> to vector<8x84xf32>
    %127 = vector.extract_strided_slice %122 {offsets = [0, 252], sizes = [8, 84], strides = [1, 1]} : vector<8x336xf32> to vector<8x84xf32>
    %128 = arith.maximumf %126, %127 : vector<8x84xf32>
    %129 = arith.maximumf %125, %128 : vector<8x84xf32>
    %130 = vector.broadcast %2 : vector<1x84xf32> to vector<8x84xf32>
    %131 = arith.addf %129, %130 : vector<8x84xf32>
    %cst_92 = arith.constant 0.000000e+00 : f32
    %132 = vector.broadcast %cst_92 : f32 to vector<8x84xf32>
    %133 = arith.maximumf %131, %132 : vector<8x84xf32>
    %c0_93 = arith.constant 0 : index
    %c10_94 = arith.constant 10 : index
    %c0_95 = arith.constant 0 : index
    %134 = vector.load %arg1[%c0_93, %c10_94, %c0_95] : memref<8x32x32xf32, #tpu.memory_space<vmem>>, vector<8x1x32xf32>
    %135 = vector.shape_cast %134 : vector<8x1x32xf32> to vector<8x32xf32>
    %c0_96 = arith.constant 0 : index
    %c11_97 = arith.constant 11 : index
    %c0_98 = arith.constant 0 : index
    %136 = vector.load %arg1[%c0_96, %c11_97, %c0_98] : memref<8x32x32xf32, #tpu.memory_space<vmem>>, vector<8x1x32xf32>
    %137 = vector.shape_cast %136 : vector<8x1x32xf32> to vector<8x32xf32>
    %c0_99 = arith.constant 0 : index
    %c12_100 = arith.constant 12 : index
    %c0_101 = arith.constant 0 : index
    %138 = vector.load %arg1[%c0_99, %c12_100, %c0_101] : memref<8x32x32xf32, #tpu.memory_space<vmem>>, vector<8x1x32xf32>
    %139 = vector.shape_cast %138 : vector<8x1x32xf32> to vector<8x32xf32>
    %c0_102 = arith.constant 0 : index
    %c13_103 = arith.constant 13 : index
    %c0_104 = arith.constant 0 : index
    %140 = vector.load %arg1[%c0_102, %c13_103, %c0_104] : memref<8x32x32xf32, #tpu.memory_space<vmem>>, vector<8x1x32xf32>
    %141 = vector.shape_cast %140 : vector<8x1x32xf32> to vector<8x32xf32>
    %c0_105 = arith.constant 0 : index
    %c14 = arith.constant 14 : index
    %c0_106 = arith.constant 0 : index
    %142 = vector.load %arg1[%c0_105, %c14, %c0_106] : memref<8x32x32xf32, #tpu.memory_space<vmem>>, vector<8x1x32xf32>
    %143 = vector.shape_cast %142 : vector<8x1x32xf32> to vector<8x32xf32>
    %c0_107 = arith.constant 0 : index
    %c15 = arith.constant 15 : index
    %c0_108 = arith.constant 0 : index
    %144 = vector.load %arg1[%c0_107, %c15, %c0_108] : memref<8x32x32xf32, #tpu.memory_space<vmem>>, vector<8x1x32xf32>
    %145 = vector.shape_cast %144 : vector<8x1x32xf32> to vector<8x32xf32>
    %146 = tpu.concatenate %135, %137, %139, %141, %143, %145 in 1 : vector<8x32xf32>, vector<8x32xf32>, vector<8x32xf32>, vector<8x32xf32>, vector<8x32xf32>, vector<8x32xf32> -> vector<8x192xf32>
    %147 = arith.truncf %146 : vector<8x192xf32> to vector<8x192xbf16>
    %cst_109 = arith.constant dense<0.000000e+00> : vector<8x336xf32>
    %148 = tpu.matmul %147, %0, %cst_109 {dimension_numbers = #tpu.dot_dimension_numbers<[1], [0], [0], [1], [0, 0, 1, 1], [], []>} : vector<8x192xbf16>, vector<192x336xbf16>, vector<8x336xf32> -> vector<8x336xf32>
    %149 = vector.extract_strided_slice %148 {offsets = [0, 0], sizes = [8, 84], strides = [1, 1]} : vector<8x336xf32> to vector<8x84xf32>
    %150 = vector.extract_strided_slice %148 {offsets = [0, 84], sizes = [8, 84], strides = [1, 1]} : vector<8x336xf32> to vector<8x84xf32>
    %151 = arith.maximumf %149, %150 : vector<8x84xf32>
    %152 = vector.extract_strided_slice %148 {offsets = [0, 168], sizes = [8, 84], strides = [1, 1]} : vector<8x336xf32> to vector<8x84xf32>
    %153 = vector.extract_strided_slice %148 {offsets = [0, 252], sizes = [8, 84], strides = [1, 1]} : vector<8x336xf32> to vector<8x84xf32>
    %154 = arith.maximumf %152, %153 : vector<8x84xf32>
    %155 = arith.maximumf %151, %154 : vector<8x84xf32>
    %156 = vector.broadcast %2 : vector<1x84xf32> to vector<8x84xf32>
    %157 = arith.addf %155, %156 : vector<8x84xf32>
    %cst_110 = arith.constant 0.000000e+00 : f32
    %158 = vector.broadcast %cst_110 : f32 to vector<8x84xf32>
    %159 = arith.maximumf %157, %158 : vector<8x84xf32>
    %c0_111 = arith.constant 0 : index
    %c12_112 = arith.constant 12 : index
    %c0_113 = arith.constant 0 : index
    %160 = vector.load %arg1[%c0_111, %c12_112, %c0_113] : memref<8x32x32xf32, #tpu.memory_space<vmem>>, vector<8x1x32xf32>
    %161 = vector.shape_cast %160 : vector<8x1x32xf32> to vector<8x32xf32>
    %c0_114 = arith.constant 0 : index
    %c13_115 = arith.constant 13 : index
    %c0_116 = arith.constant 0 : index
    %162 = vector.load %arg1[%c0_114, %c13_115, %c0_116] : memref<8x32x32xf32, #tpu.memory_space<vmem>>, vector<8x1x32xf32>
    %163 = vector.shape_cast %162 : vector<8x1x32xf32> to vector<8x32xf32>
    %c0_117 = arith.constant 0 : index
    %c14_118 = arith.constant 14 : index
    %c0_119 = arith.constant 0 : index
    %164 = vector.load %arg1[%c0_117, %c14_118, %c0_119] : memref<8x32x32xf32, #tpu.memory_space<vmem>>, vector<8x1x32xf32>
    %165 = vector.shape_cast %164 : vector<8x1x32xf32> to vector<8x32xf32>
    %c0_120 = arith.constant 0 : index
    %c15_121 = arith.constant 15 : index
    %c0_122 = arith.constant 0 : index
    %166 = vector.load %arg1[%c0_120, %c15_121, %c0_122] : memref<8x32x32xf32, #tpu.memory_space<vmem>>, vector<8x1x32xf32>
    %167 = vector.shape_cast %166 : vector<8x1x32xf32> to vector<8x32xf32>
    %c0_123 = arith.constant 0 : index
    %c16 = arith.constant 16 : index
    %c0_124 = arith.constant 0 : index
    %168 = vector.load %arg1[%c0_123, %c16, %c0_124] : memref<8x32x32xf32, #tpu.memory_space<vmem>>, vector<8x1x32xf32>
    %169 = vector.shape_cast %168 : vector<8x1x32xf32> to vector<8x32xf32>
    %c0_125 = arith.constant 0 : index
    %c17 = arith.constant 17 : index
    %c0_126 = arith.constant 0 : index
    %170 = vector.load %arg1[%c0_125, %c17, %c0_126] : memref<8x32x32xf32, #tpu.memory_space<vmem>>, vector<8x1x32xf32>
    %171 = vector.shape_cast %170 : vector<8x1x32xf32> to vector<8x32xf32>
    %172 = tpu.concatenate %161, %163, %165, %167, %169, %171 in 1 : vector<8x32xf32>, vector<8x32xf32>, vector<8x32xf32>, vector<8x32xf32>, vector<8x32xf32>, vector<8x32xf32> -> vector<8x192xf32>
    %173 = arith.truncf %172 : vector<8x192xf32> to vector<8x192xbf16>
    %cst_127 = arith.constant dense<0.000000e+00> : vector<8x336xf32>
    %174 = tpu.matmul %173, %0, %cst_127 {dimension_numbers = #tpu.dot_dimension_numbers<[1], [0], [0], [1], [0, 0, 1, 1], [], []>} : vector<8x192xbf16>, vector<192x336xbf16>, vector<8x336xf32> -> vector<8x336xf32>
    %175 = vector.extract_strided_slice %174 {offsets = [0, 0], sizes = [8, 84], strides = [1, 1]} : vector<8x336xf32> to vector<8x84xf32>
    %176 = vector.extract_strided_slice %174 {offsets = [0, 84], sizes = [8, 84], strides = [1, 1]} : vector<8x336xf32> to vector<8x84xf32>
    %177 = arith.maximumf %175, %176 : vector<8x84xf32>
    %178 = vector.extract_strided_slice %174 {offsets = [0, 168], sizes = [8, 84], strides = [1, 1]} : vector<8x336xf32> to vector<8x84xf32>
    %179 = vector.extract_strided_slice %174 {offsets = [0, 252], sizes = [8, 84], strides = [1, 1]} : vector<8x336xf32> to vector<8x84xf32>
    %180 = arith.maximumf %178, %179 : vector<8x84xf32>
    %181 = arith.maximumf %177, %180 : vector<8x84xf32>
    %182 = vector.broadcast %2 : vector<1x84xf32> to vector<8x84xf32>
    %183 = arith.addf %181, %182 : vector<8x84xf32>
    %cst_128 = arith.constant 0.000000e+00 : f32
    %184 = vector.broadcast %cst_128 : f32 to vector<8x84xf32>
    %185 = arith.maximumf %183, %184 : vector<8x84xf32>
    %c0_129 = arith.constant 0 : index
    %c14_130 = arith.constant 14 : index
    %c0_131 = arith.constant 0 : index
    %186 = vector.load %arg1[%c0_129, %c14_130, %c0_131] : memref<8x32x32xf32, #tpu.memory_space<vmem>>, vector<8x1x32xf32>
    %187 = vector.shape_cast %186 : vector<8x1x32xf32> to vector<8x32xf32>
    %c0_132 = arith.constant 0 : index
    %c15_133 = arith.constant 15 : index
    %c0_134 = arith.constant 0 : index
    %188 = vector.load %arg1[%c0_132, %c15_133, %c0_134] : memref<8x32x32xf32, #tpu.memory_space<vmem>>, vector<8x1x32xf32>
    %189 = vector.shape_cast %188 : vector<8x1x32xf32> to vector<8x32xf32>
    %c0_135 = arith.constant 0 : index
    %c16_136 = arith.constant 16 : index
    %c0_137 = arith.constant 0 : index
    %190 = vector.load %arg1[%c0_135, %c16_136, %c0_137] : memref<8x32x32xf32, #tpu.memory_space<vmem>>, vector<8x1x32xf32>
    %191 = vector.shape_cast %190 : vector<8x1x32xf32> to vector<8x32xf32>
    %c0_138 = arith.constant 0 : index
    %c17_139 = arith.constant 17 : index
    %c0_140 = arith.constant 0 : index
    %192 = vector.load %arg1[%c0_138, %c17_139, %c0_140] : memref<8x32x32xf32, #tpu.memory_space<vmem>>, vector<8x1x32xf32>
    %193 = vector.shape_cast %192 : vector<8x1x32xf32> to vector<8x32xf32>
    %c0_141 = arith.constant 0 : index
    %c18 = arith.constant 18 : index
    %c0_142 = arith.constant 0 : index
    %194 = vector.load %arg1[%c0_141, %c18, %c0_142] : memref<8x32x32xf32, #tpu.memory_space<vmem>>, vector<8x1x32xf32>
    %195 = vector.shape_cast %194 : vector<8x1x32xf32> to vector<8x32xf32>
    %c0_143 = arith.constant 0 : index
    %c19 = arith.constant 19 : index
    %c0_144 = arith.constant 0 : index
    %196 = vector.load %arg1[%c0_143, %c19, %c0_144] : memref<8x32x32xf32, #tpu.memory_space<vmem>>, vector<8x1x32xf32>
    %197 = vector.shape_cast %196 : vector<8x1x32xf32> to vector<8x32xf32>
    %198 = tpu.concatenate %187, %189, %191, %193, %195, %197 in 1 : vector<8x32xf32>, vector<8x32xf32>, vector<8x32xf32>, vector<8x32xf32>, vector<8x32xf32>, vector<8x32xf32> -> vector<8x192xf32>
    %199 = arith.truncf %198 : vector<8x192xf32> to vector<8x192xbf16>
    %cst_145 = arith.constant dense<0.000000e+00> : vector<8x336xf32>
    %200 = tpu.matmul %199, %0, %cst_145 {dimension_numbers = #tpu.dot_dimension_numbers<[1], [0], [0], [1], [0, 0, 1, 1], [], []>} : vector<8x192xbf16>, vector<192x336xbf16>, vector<8x336xf32> -> vector<8x336xf32>
    %201 = vector.extract_strided_slice %200 {offsets = [0, 0], sizes = [8, 84], strides = [1, 1]} : vector<8x336xf32> to vector<8x84xf32>
    %202 = vector.extract_strided_slice %200 {offsets = [0, 84], sizes = [8, 84], strides = [1, 1]} : vector<8x336xf32> to vector<8x84xf32>
    %203 = arith.maximumf %201, %202 : vector<8x84xf32>
    %204 = vector.extract_strided_slice %200 {offsets = [0, 168], sizes = [8, 84], strides = [1, 1]} : vector<8x336xf32> to vector<8x84xf32>
    %205 = vector.extract_strided_slice %200 {offsets = [0, 252], sizes = [8, 84], strides = [1, 1]} : vector<8x336xf32> to vector<8x84xf32>
    %206 = arith.maximumf %204, %205 : vector<8x84xf32>
    %207 = arith.maximumf %203, %206 : vector<8x84xf32>
    %208 = vector.broadcast %2 : vector<1x84xf32> to vector<8x84xf32>
    %209 = arith.addf %207, %208 : vector<8x84xf32>
    %cst_146 = arith.constant 0.000000e+00 : f32
    %210 = vector.broadcast %cst_146 : f32 to vector<8x84xf32>
    %211 = arith.maximumf %209, %210 : vector<8x84xf32>
    %c0_147 = arith.constant 0 : index
    %c16_148 = arith.constant 16 : index
    %c0_149 = arith.constant 0 : index
    %212 = vector.load %arg1[%c0_147, %c16_148, %c0_149] : memref<8x32x32xf32, #tpu.memory_space<vmem>>, vector<8x1x32xf32>
    %213 = vector.shape_cast %212 : vector<8x1x32xf32> to vector<8x32xf32>
    %c0_150 = arith.constant 0 : index
    %c17_151 = arith.constant 17 : index
    %c0_152 = arith.constant 0 : index
    %214 = vector.load %arg1[%c0_150, %c17_151, %c0_152] : memref<8x32x32xf32, #tpu.memory_space<vmem>>, vector<8x1x32xf32>
    %215 = vector.shape_cast %214 : vector<8x1x32xf32> to vector<8x32xf32>
    %c0_153 = arith.constant 0 : index
    %c18_154 = arith.constant 18 : index
    %c0_155 = arith.constant 0 : index
    %216 = vector.load %arg1[%c0_153, %c18_154, %c0_155] : memref<8x32x32xf32, #tpu.memory_space<vmem>>, vector<8x1x32xf32>
    %217 = vector.shape_cast %216 : vector<8x1x32xf32> to vector<8x32xf32>
    %c0_156 = arith.constant 0 : index
    %c19_157 = arith.constant 19 : index
    %c0_158 = arith.constant 0 : index
    %218 = vector.load %arg1[%c0_156, %c19_157, %c0_158] : memref<8x32x32xf32, #tpu.memory_space<vmem>>, vector<8x1x32xf32>
    %219 = vector.shape_cast %218 : vector<8x1x32xf32> to vector<8x32xf32>
    %c0_159 = arith.constant 0 : index
    %c20 = arith.constant 20 : index
    %c0_160 = arith.constant 0 : index
    %220 = vector.load %arg1[%c0_159, %c20, %c0_160] : memref<8x32x32xf32, #tpu.memory_space<vmem>>, vector<8x1x32xf32>
    %221 = vector.shape_cast %220 : vector<8x1x32xf32> to vector<8x32xf32>
    %c0_161 = arith.constant 0 : index
    %c21 = arith.constant 21 : index
    %c0_162 = arith.constant 0 : index
    %222 = vector.load %arg1[%c0_161, %c21, %c0_162] : memref<8x32x32xf32, #tpu.memory_space<vmem>>, vector<8x1x32xf32>
    %223 = vector.shape_cast %222 : vector<8x1x32xf32> to vector<8x32xf32>
    %224 = tpu.concatenate %213, %215, %217, %219, %221, %223 in 1 : vector<8x32xf32>, vector<8x32xf32>, vector<8x32xf32>, vector<8x32xf32>, vector<8x32xf32>, vector<8x32xf32> -> vector<8x192xf32>
    %225 = arith.truncf %224 : vector<8x192xf32> to vector<8x192xbf16>
    %cst_163 = arith.constant dense<0.000000e+00> : vector<8x336xf32>
    %226 = tpu.matmul %225, %0, %cst_163 {dimension_numbers = #tpu.dot_dimension_numbers<[1], [0], [0], [1], [0, 0, 1, 1], [], []>} : vector<8x192xbf16>, vector<192x336xbf16>, vector<8x336xf32> -> vector<8x336xf32>
    %227 = vector.extract_strided_slice %226 {offsets = [0, 0], sizes = [8, 84], strides = [1, 1]} : vector<8x336xf32> to vector<8x84xf32>
    %228 = vector.extract_strided_slice %226 {offsets = [0, 84], sizes = [8, 84], strides = [1, 1]} : vector<8x336xf32> to vector<8x84xf32>
    %229 = arith.maximumf %227, %228 : vector<8x84xf32>
    %230 = vector.extract_strided_slice %226 {offsets = [0, 168], sizes = [8, 84], strides = [1, 1]} : vector<8x336xf32> to vector<8x84xf32>
    %231 = vector.extract_strided_slice %226 {offsets = [0, 252], sizes = [8, 84], strides = [1, 1]} : vector<8x336xf32> to vector<8x84xf32>
    %232 = arith.maximumf %230, %231 : vector<8x84xf32>
    %233 = arith.maximumf %229, %232 : vector<8x84xf32>
    %234 = vector.broadcast %2 : vector<1x84xf32> to vector<8x84xf32>
    %235 = arith.addf %233, %234 : vector<8x84xf32>
    %cst_164 = arith.constant 0.000000e+00 : f32
    %236 = vector.broadcast %cst_164 : f32 to vector<8x84xf32>
    %237 = arith.maximumf %235, %236 : vector<8x84xf32>
    %c0_165 = arith.constant 0 : index
    %c18_166 = arith.constant 18 : index
    %c0_167 = arith.constant 0 : index
    %238 = vector.load %arg1[%c0_165, %c18_166, %c0_167] : memref<8x32x32xf32, #tpu.memory_space<vmem>>, vector<8x1x32xf32>
    %239 = vector.shape_cast %238 : vector<8x1x32xf32> to vector<8x32xf32>
    %c0_168 = arith.constant 0 : index
    %c19_169 = arith.constant 19 : index
    %c0_170 = arith.constant 0 : index
    %240 = vector.load %arg1[%c0_168, %c19_169, %c0_170] : memref<8x32x32xf32, #tpu.memory_space<vmem>>, vector<8x1x32xf32>
    %241 = vector.shape_cast %240 : vector<8x1x32xf32> to vector<8x32xf32>
    %c0_171 = arith.constant 0 : index
    %c20_172 = arith.constant 20 : index
    %c0_173 = arith.constant 0 : index
    %242 = vector.load %arg1[%c0_171, %c20_172, %c0_173] : memref<8x32x32xf32, #tpu.memory_space<vmem>>, vector<8x1x32xf32>
    %243 = vector.shape_cast %242 : vector<8x1x32xf32> to vector<8x32xf32>
    %c0_174 = arith.constant 0 : index
    %c21_175 = arith.constant 21 : index
    %c0_176 = arith.constant 0 : index
    %244 = vector.load %arg1[%c0_174, %c21_175, %c0_176] : memref<8x32x32xf32, #tpu.memory_space<vmem>>, vector<8x1x32xf32>
    %245 = vector.shape_cast %244 : vector<8x1x32xf32> to vector<8x32xf32>
    %c0_177 = arith.constant 0 : index
    %c22 = arith.constant 22 : index
    %c0_178 = arith.constant 0 : index
    %246 = vector.load %arg1[%c0_177, %c22, %c0_178] : memref<8x32x32xf32, #tpu.memory_space<vmem>>, vector<8x1x32xf32>
    %247 = vector.shape_cast %246 : vector<8x1x32xf32> to vector<8x32xf32>
    %c0_179 = arith.constant 0 : index
    %c23 = arith.constant 23 : index
    %c0_180 = arith.constant 0 : index
    %248 = vector.load %arg1[%c0_179, %c23, %c0_180] : memref<8x32x32xf32, #tpu.memory_space<vmem>>, vector<8x1x32xf32>
    %249 = vector.shape_cast %248 : vector<8x1x32xf32> to vector<8x32xf32>
    %250 = tpu.concatenate %239, %241, %243, %245, %247, %249 in 1 : vector<8x32xf32>, vector<8x32xf32>, vector<8x32xf32>, vector<8x32xf32>, vector<8x32xf32>, vector<8x32xf32> -> vector<8x192xf32>
    %251 = arith.truncf %250 : vector<8x192xf32> to vector<8x192xbf16>
    %cst_181 = arith.constant dense<0.000000e+00> : vector<8x336xf32>
    %252 = tpu.matmul %251, %0, %cst_181 {dimension_numbers = #tpu.dot_dimension_numbers<[1], [0], [0], [1], [0, 0, 1, 1], [], []>} : vector<8x192xbf16>, vector<192x336xbf16>, vector<8x336xf32> -> vector<8x336xf32>
    %253 = vector.extract_strided_slice %252 {offsets = [0, 0], sizes = [8, 84], strides = [1, 1]} : vector<8x336xf32> to vector<8x84xf32>
    %254 = vector.extract_strided_slice %252 {offsets = [0, 84], sizes = [8, 84], strides = [1, 1]} : vector<8x336xf32> to vector<8x84xf32>
    %255 = arith.maximumf %253, %254 : vector<8x84xf32>
    %256 = vector.extract_strided_slice %252 {offsets = [0, 168], sizes = [8, 84], strides = [1, 1]} : vector<8x336xf32> to vector<8x84xf32>
    %257 = vector.extract_strided_slice %252 {offsets = [0, 252], sizes = [8, 84], strides = [1, 1]} : vector<8x336xf32> to vector<8x84xf32>
    %258 = arith.maximumf %256, %257 : vector<8x84xf32>
    %259 = arith.maximumf %255, %258 : vector<8x84xf32>
    %260 = vector.broadcast %2 : vector<1x84xf32> to vector<8x84xf32>
    %261 = arith.addf %259, %260 : vector<8x84xf32>
    %cst_182 = arith.constant 0.000000e+00 : f32
    %262 = vector.broadcast %cst_182 : f32 to vector<8x84xf32>
    %263 = arith.maximumf %261, %262 : vector<8x84xf32>
    %c0_183 = arith.constant 0 : index
    %c20_184 = arith.constant 20 : index
    %c0_185 = arith.constant 0 : index
    %264 = vector.load %arg1[%c0_183, %c20_184, %c0_185] : memref<8x32x32xf32, #tpu.memory_space<vmem>>, vector<8x1x32xf32>
    %265 = vector.shape_cast %264 : vector<8x1x32xf32> to vector<8x32xf32>
    %c0_186 = arith.constant 0 : index
    %c21_187 = arith.constant 21 : index
    %c0_188 = arith.constant 0 : index
    %266 = vector.load %arg1[%c0_186, %c21_187, %c0_188] : memref<8x32x32xf32, #tpu.memory_space<vmem>>, vector<8x1x32xf32>
    %267 = vector.shape_cast %266 : vector<8x1x32xf32> to vector<8x32xf32>
    %c0_189 = arith.constant 0 : index
    %c22_190 = arith.constant 22 : index
    %c0_191 = arith.constant 0 : index
    %268 = vector.load %arg1[%c0_189, %c22_190, %c0_191] : memref<8x32x32xf32, #tpu.memory_space<vmem>>, vector<8x1x32xf32>
    %269 = vector.shape_cast %268 : vector<8x1x32xf32> to vector<8x32xf32>
    %c0_192 = arith.constant 0 : index
    %c23_193 = arith.constant 23 : index
    %c0_194 = arith.constant 0 : index
    %270 = vector.load %arg1[%c0_192, %c23_193, %c0_194] : memref<8x32x32xf32, #tpu.memory_space<vmem>>, vector<8x1x32xf32>
    %271 = vector.shape_cast %270 : vector<8x1x32xf32> to vector<8x32xf32>
    %c0_195 = arith.constant 0 : index
    %c24 = arith.constant 24 : index
    %c0_196 = arith.constant 0 : index
    %272 = vector.load %arg1[%c0_195, %c24, %c0_196] : memref<8x32x32xf32, #tpu.memory_space<vmem>>, vector<8x1x32xf32>
    %273 = vector.shape_cast %272 : vector<8x1x32xf32> to vector<8x32xf32>
    %c0_197 = arith.constant 0 : index
    %c25 = arith.constant 25 : index
    %c0_198 = arith.constant 0 : index
    %274 = vector.load %arg1[%c0_197, %c25, %c0_198] : memref<8x32x32xf32, #tpu.memory_space<vmem>>, vector<8x1x32xf32>
    %275 = vector.shape_cast %274 : vector<8x1x32xf32> to vector<8x32xf32>
    %276 = tpu.concatenate %265, %267, %269, %271, %273, %275 in 1 : vector<8x32xf32>, vector<8x32xf32>, vector<8x32xf32>, vector<8x32xf32>, vector<8x32xf32>, vector<8x32xf32> -> vector<8x192xf32>
    %277 = arith.truncf %276 : vector<8x192xf32> to vector<8x192xbf16>
    %cst_199 = arith.constant dense<0.000000e+00> : vector<8x336xf32>
    %278 = tpu.matmul %277, %0, %cst_199 {dimension_numbers = #tpu.dot_dimension_numbers<[1], [0], [0], [1], [0, 0, 1, 1], [], []>} : vector<8x192xbf16>, vector<192x336xbf16>, vector<8x336xf32> -> vector<8x336xf32>
    %279 = vector.extract_strided_slice %278 {offsets = [0, 0], sizes = [8, 84], strides = [1, 1]} : vector<8x336xf32> to vector<8x84xf32>
    %280 = vector.extract_strided_slice %278 {offsets = [0, 84], sizes = [8, 84], strides = [1, 1]} : vector<8x336xf32> to vector<8x84xf32>
    %281 = arith.maximumf %279, %280 : vector<8x84xf32>
    %282 = vector.extract_strided_slice %278 {offsets = [0, 168], sizes = [8, 84], strides = [1, 1]} : vector<8x336xf32> to vector<8x84xf32>
    %283 = vector.extract_strided_slice %278 {offsets = [0, 252], sizes = [8, 84], strides = [1, 1]} : vector<8x336xf32> to vector<8x84xf32>
    %284 = arith.maximumf %282, %283 : vector<8x84xf32>
    %285 = arith.maximumf %281, %284 : vector<8x84xf32>
    %286 = vector.broadcast %2 : vector<1x84xf32> to vector<8x84xf32>
    %287 = arith.addf %285, %286 : vector<8x84xf32>
    %cst_200 = arith.constant 0.000000e+00 : f32
    %288 = vector.broadcast %cst_200 : f32 to vector<8x84xf32>
    %289 = arith.maximumf %287, %288 : vector<8x84xf32>
    %c0_201 = arith.constant 0 : index
    %c22_202 = arith.constant 22 : index
    %c0_203 = arith.constant 0 : index
    %290 = vector.load %arg1[%c0_201, %c22_202, %c0_203] : memref<8x32x32xf32, #tpu.memory_space<vmem>>, vector<8x1x32xf32>
    %291 = vector.shape_cast %290 : vector<8x1x32xf32> to vector<8x32xf32>
    %c0_204 = arith.constant 0 : index
    %c23_205 = arith.constant 23 : index
    %c0_206 = arith.constant 0 : index
    %292 = vector.load %arg1[%c0_204, %c23_205, %c0_206] : memref<8x32x32xf32, #tpu.memory_space<vmem>>, vector<8x1x32xf32>
    %293 = vector.shape_cast %292 : vector<8x1x32xf32> to vector<8x32xf32>
    %c0_207 = arith.constant 0 : index
    %c24_208 = arith.constant 24 : index
    %c0_209 = arith.constant 0 : index
    %294 = vector.load %arg1[%c0_207, %c24_208, %c0_209] : memref<8x32x32xf32, #tpu.memory_space<vmem>>, vector<8x1x32xf32>
    %295 = vector.shape_cast %294 : vector<8x1x32xf32> to vector<8x32xf32>
    %c0_210 = arith.constant 0 : index
    %c25_211 = arith.constant 25 : index
    %c0_212 = arith.constant 0 : index
    %296 = vector.load %arg1[%c0_210, %c25_211, %c0_212] : memref<8x32x32xf32, #tpu.memory_space<vmem>>, vector<8x1x32xf32>
    %297 = vector.shape_cast %296 : vector<8x1x32xf32> to vector<8x32xf32>
    %c0_213 = arith.constant 0 : index
    %c26 = arith.constant 26 : index
    %c0_214 = arith.constant 0 : index
    %298 = vector.load %arg1[%c0_213, %c26, %c0_214] : memref<8x32x32xf32, #tpu.memory_space<vmem>>, vector<8x1x32xf32>
    %299 = vector.shape_cast %298 : vector<8x1x32xf32> to vector<8x32xf32>
    %c0_215 = arith.constant 0 : index
    %c27 = arith.constant 27 : index
    %c0_216 = arith.constant 0 : index
    %300 = vector.load %arg1[%c0_215, %c27, %c0_216] : memref<8x32x32xf32, #tpu.memory_space<vmem>>, vector<8x1x32xf32>
    %301 = vector.shape_cast %300 : vector<8x1x32xf32> to vector<8x32xf32>
    %302 = tpu.concatenate %291, %293, %295, %297, %299, %301 in 1 : vector<8x32xf32>, vector<8x32xf32>, vector<8x32xf32>, vector<8x32xf32>, vector<8x32xf32>, vector<8x32xf32> -> vector<8x192xf32>
    %303 = arith.truncf %302 : vector<8x192xf32> to vector<8x192xbf16>
    %cst_217 = arith.constant dense<0.000000e+00> : vector<8x336xf32>
    %304 = tpu.matmul %303, %0, %cst_217 {dimension_numbers = #tpu.dot_dimension_numbers<[1], [0], [0], [1], [0, 0, 1, 1], [], []>} : vector<8x192xbf16>, vector<192x336xbf16>, vector<8x336xf32> -> vector<8x336xf32>
    %305 = vector.extract_strided_slice %304 {offsets = [0, 0], sizes = [8, 84], strides = [1, 1]} : vector<8x336xf32> to vector<8x84xf32>
    %306 = vector.extract_strided_slice %304 {offsets = [0, 84], sizes = [8, 84], strides = [1, 1]} : vector<8x336xf32> to vector<8x84xf32>
    %307 = arith.maximumf %305, %306 : vector<8x84xf32>
    %308 = vector.extract_strided_slice %304 {offsets = [0, 168], sizes = [8, 84], strides = [1, 1]} : vector<8x336xf32> to vector<8x84xf32>
    %309 = vector.extract_strided_slice %304 {offsets = [0, 252], sizes = [8, 84], strides = [1, 1]} : vector<8x336xf32> to vector<8x84xf32>
    %310 = arith.maximumf %308, %309 : vector<8x84xf32>
    %311 = arith.maximumf %307, %310 : vector<8x84xf32>
    %312 = vector.broadcast %2 : vector<1x84xf32> to vector<8x84xf32>
    %313 = arith.addf %311, %312 : vector<8x84xf32>
    %cst_218 = arith.constant 0.000000e+00 : f32
    %314 = vector.broadcast %cst_218 : f32 to vector<8x84xf32>
    %315 = arith.maximumf %313, %314 : vector<8x84xf32>
    %c0_219 = arith.constant 0 : index
    %c24_220 = arith.constant 24 : index
    %c0_221 = arith.constant 0 : index
    %316 = vector.load %arg1[%c0_219, %c24_220, %c0_221] : memref<8x32x32xf32, #tpu.memory_space<vmem>>, vector<8x1x32xf32>
    %317 = vector.shape_cast %316 : vector<8x1x32xf32> to vector<8x32xf32>
    %c0_222 = arith.constant 0 : index
    %c25_223 = arith.constant 25 : index
    %c0_224 = arith.constant 0 : index
    %318 = vector.load %arg1[%c0_222, %c25_223, %c0_224] : memref<8x32x32xf32, #tpu.memory_space<vmem>>, vector<8x1x32xf32>
    %319 = vector.shape_cast %318 : vector<8x1x32xf32> to vector<8x32xf32>
    %c0_225 = arith.constant 0 : index
    %c26_226 = arith.constant 26 : index
    %c0_227 = arith.constant 0 : index
    %320 = vector.load %arg1[%c0_225, %c26_226, %c0_227] : memref<8x32x32xf32, #tpu.memory_space<vmem>>, vector<8x1x32xf32>
    %321 = vector.shape_cast %320 : vector<8x1x32xf32> to vector<8x32xf32>
    %c0_228 = arith.constant 0 : index
    %c27_229 = arith.constant 27 : index
    %c0_230 = arith.constant 0 : index
    %322 = vector.load %arg1[%c0_228, %c27_229, %c0_230] : memref<8x32x32xf32, #tpu.memory_space<vmem>>, vector<8x1x32xf32>
    %323 = vector.shape_cast %322 : vector<8x1x32xf32> to vector<8x32xf32>
    %c0_231 = arith.constant 0 : index
    %c28 = arith.constant 28 : index
    %c0_232 = arith.constant 0 : index
    %324 = vector.load %arg1[%c0_231, %c28, %c0_232] : memref<8x32x32xf32, #tpu.memory_space<vmem>>, vector<8x1x32xf32>
    %325 = vector.shape_cast %324 : vector<8x1x32xf32> to vector<8x32xf32>
    %c0_233 = arith.constant 0 : index
    %c29 = arith.constant 29 : index
    %c0_234 = arith.constant 0 : index
    %326 = vector.load %arg1[%c0_233, %c29, %c0_234] : memref<8x32x32xf32, #tpu.memory_space<vmem>>, vector<8x1x32xf32>
    %327 = vector.shape_cast %326 : vector<8x1x32xf32> to vector<8x32xf32>
    %328 = tpu.concatenate %317, %319, %321, %323, %325, %327 in 1 : vector<8x32xf32>, vector<8x32xf32>, vector<8x32xf32>, vector<8x32xf32>, vector<8x32xf32>, vector<8x32xf32> -> vector<8x192xf32>
    %329 = arith.truncf %328 : vector<8x192xf32> to vector<8x192xbf16>
    %cst_235 = arith.constant dense<0.000000e+00> : vector<8x336xf32>
    %330 = tpu.matmul %329, %0, %cst_235 {dimension_numbers = #tpu.dot_dimension_numbers<[1], [0], [0], [1], [0, 0, 1, 1], [], []>} : vector<8x192xbf16>, vector<192x336xbf16>, vector<8x336xf32> -> vector<8x336xf32>
    %331 = vector.extract_strided_slice %330 {offsets = [0, 0], sizes = [8, 84], strides = [1, 1]} : vector<8x336xf32> to vector<8x84xf32>
    %332 = vector.extract_strided_slice %330 {offsets = [0, 84], sizes = [8, 84], strides = [1, 1]} : vector<8x336xf32> to vector<8x84xf32>
    %333 = arith.maximumf %331, %332 : vector<8x84xf32>
    %334 = vector.extract_strided_slice %330 {offsets = [0, 168], sizes = [8, 84], strides = [1, 1]} : vector<8x336xf32> to vector<8x84xf32>
    %335 = vector.extract_strided_slice %330 {offsets = [0, 252], sizes = [8, 84], strides = [1, 1]} : vector<8x336xf32> to vector<8x84xf32>
    %336 = arith.maximumf %334, %335 : vector<8x84xf32>
    %337 = arith.maximumf %333, %336 : vector<8x84xf32>
    %338 = vector.broadcast %2 : vector<1x84xf32> to vector<8x84xf32>
    %339 = arith.addf %337, %338 : vector<8x84xf32>
    %cst_236 = arith.constant 0.000000e+00 : f32
    %340 = vector.broadcast %cst_236 : f32 to vector<8x84xf32>
    %341 = arith.maximumf %339, %340 : vector<8x84xf32>
    %c0_237 = arith.constant 0 : index
    %c26_238 = arith.constant 26 : index
    %c0_239 = arith.constant 0 : index
    %342 = vector.load %arg1[%c0_237, %c26_238, %c0_239] : memref<8x32x32xf32, #tpu.memory_space<vmem>>, vector<8x1x32xf32>
    %343 = vector.shape_cast %342 : vector<8x1x32xf32> to vector<8x32xf32>
    %c0_240 = arith.constant 0 : index
    %c27_241 = arith.constant 27 : index
    %c0_242 = arith.constant 0 : index
    %344 = vector.load %arg1[%c0_240, %c27_241, %c0_242] : memref<8x32x32xf32, #tpu.memory_space<vmem>>, vector<8x1x32xf32>
    %345 = vector.shape_cast %344 : vector<8x1x32xf32> to vector<8x32xf32>
    %c0_243 = arith.constant 0 : index
    %c28_244 = arith.constant 28 : index
    %c0_245 = arith.constant 0 : index
    %346 = vector.load %arg1[%c0_243, %c28_244, %c0_245] : memref<8x32x32xf32, #tpu.memory_space<vmem>>, vector<8x1x32xf32>
    %347 = vector.shape_cast %346 : vector<8x1x32xf32> to vector<8x32xf32>
    %c0_246 = arith.constant 0 : index
    %c29_247 = arith.constant 29 : index
    %c0_248 = arith.constant 0 : index
    %348 = vector.load %arg1[%c0_246, %c29_247, %c0_248] : memref<8x32x32xf32, #tpu.memory_space<vmem>>, vector<8x1x32xf32>
    %349 = vector.shape_cast %348 : vector<8x1x32xf32> to vector<8x32xf32>
    %c0_249 = arith.constant 0 : index
    %c30 = arith.constant 30 : index
    %c0_250 = arith.constant 0 : index
    %350 = vector.load %arg1[%c0_249, %c30, %c0_250] : memref<8x32x32xf32, #tpu.memory_space<vmem>>, vector<8x1x32xf32>
    %351 = vector.shape_cast %350 : vector<8x1x32xf32> to vector<8x32xf32>
    %c0_251 = arith.constant 0 : index
    %c31 = arith.constant 31 : index
    %c0_252 = arith.constant 0 : index
    %352 = vector.load %arg1[%c0_251, %c31, %c0_252] : memref<8x32x32xf32, #tpu.memory_space<vmem>>, vector<8x1x32xf32>
    %353 = vector.shape_cast %352 : vector<8x1x32xf32> to vector<8x32xf32>
    %354 = tpu.concatenate %343, %345, %347, %349, %351, %353 in 1 : vector<8x32xf32>, vector<8x32xf32>, vector<8x32xf32>, vector<8x32xf32>, vector<8x32xf32>, vector<8x32xf32> -> vector<8x192xf32>
    %355 = arith.truncf %354 : vector<8x192xf32> to vector<8x192xbf16>
    %cst_253 = arith.constant dense<0.000000e+00> : vector<8x336xf32>
    %356 = tpu.matmul %355, %0, %cst_253 {dimension_numbers = #tpu.dot_dimension_numbers<[1], [0], [0], [1], [0, 0, 1, 1], [], []>} : vector<8x192xbf16>, vector<192x336xbf16>, vector<8x336xf32> -> vector<8x336xf32>
    %357 = vector.extract_strided_slice %356 {offsets = [0, 0], sizes = [8, 84], strides = [1, 1]} : vector<8x336xf32> to vector<8x84xf32>
    %358 = vector.extract_strided_slice %356 {offsets = [0, 84], sizes = [8, 84], strides = [1, 1]} : vector<8x336xf32> to vector<8x84xf32>
    %359 = arith.maximumf %357, %358 : vector<8x84xf32>
    %360 = vector.extract_strided_slice %356 {offsets = [0, 168], sizes = [8, 84], strides = [1, 1]} : vector<8x336xf32> to vector<8x84xf32>
    %361 = vector.extract_strided_slice %356 {offsets = [0, 252], sizes = [8, 84], strides = [1, 1]} : vector<8x336xf32> to vector<8x84xf32>
    %362 = arith.maximumf %360, %361 : vector<8x84xf32>
    %363 = arith.maximumf %359, %362 : vector<8x84xf32>
    %364 = vector.broadcast %2 : vector<1x84xf32> to vector<8x84xf32>
    %365 = arith.addf %363, %364 : vector<8x84xf32>
    %cst_254 = arith.constant 0.000000e+00 : f32
    %366 = vector.broadcast %cst_254 : f32 to vector<8x84xf32>
    %367 = arith.maximumf %365, %366 : vector<8x84xf32>
    %368 = tpu.concatenate %29, %55, %81, %107, %133, %159 in 1 : vector<8x84xf32>, vector<8x84xf32>, vector<8x84xf32>, vector<8x84xf32>, vector<8x84xf32>, vector<8x84xf32> -> vector<8x504xf32>
    %369 = arith.truncf %368 : vector<8x504xf32> to vector<8x504xbf16>
    %cst_255 = arith.constant dense<0.000000e+00> : vector<8x320xf32>
    %370 = tpu.matmul %369, %1, %cst_255 {dimension_numbers = #tpu.dot_dimension_numbers<[1], [0], [0], [1], [0, 0, 1, 1], [], []>} : vector<8x504xbf16>, vector<504x320xbf16>, vector<8x320xf32> -> vector<8x320xf32>
    %371 = vector.extract_strided_slice %370 {offsets = [0, 0], sizes = [8, 80], strides = [1, 1]} : vector<8x320xf32> to vector<8x80xf32>
    %372 = vector.extract_strided_slice %370 {offsets = [0, 80], sizes = [8, 80], strides = [1, 1]} : vector<8x320xf32> to vector<8x80xf32>
    %373 = arith.maximumf %371, %372 : vector<8x80xf32>
    %374 = vector.extract_strided_slice %370 {offsets = [0, 160], sizes = [8, 80], strides = [1, 1]} : vector<8x320xf32> to vector<8x80xf32>
    %375 = vector.extract_strided_slice %370 {offsets = [0, 240], sizes = [8, 80], strides = [1, 1]} : vector<8x320xf32> to vector<8x80xf32>
    %376 = arith.maximumf %374, %375 : vector<8x80xf32>
    %377 = arith.maximumf %373, %376 : vector<8x80xf32>
    %378 = vector.broadcast %3 : vector<1x80xf32> to vector<8x80xf32>
    %379 = arith.addf %377, %378 : vector<8x80xf32>
    %cst_256 = arith.constant 0.000000e+00 : f32
    %380 = vector.broadcast %cst_256 : f32 to vector<8x80xf32>
    %381 = arith.maximumf %379, %380 : vector<8x80xf32>
    %382 = tpu.concatenate %81, %107, %133, %159, %185, %211 in 1 : vector<8x84xf32>, vector<8x84xf32>, vector<8x84xf32>, vector<8x84xf32>, vector<8x84xf32>, vector<8x84xf32> -> vector<8x504xf32>
    %383 = arith.truncf %382 : vector<8x504xf32> to vector<8x504xbf16>
    %cst_257 = arith.constant dense<0.000000e+00> : vector<8x320xf32>
    %384 = tpu.matmul %383, %1, %cst_257 {dimension_numbers = #tpu.dot_dimension_numbers<[1], [0], [0], [1], [0, 0, 1, 1], [], []>} : vector<8x504xbf16>, vector<504x320xbf16>, vector<8x320xf32> -> vector<8x320xf32>
    %385 = vector.extract_strided_slice %384 {offsets = [0, 0], sizes = [8, 80], strides = [1, 1]} : vector<8x320xf32> to vector<8x80xf32>
    %386 = vector.extract_strided_slice %384 {offsets = [0, 80], sizes = [8, 80], strides = [1, 1]} : vector<8x320xf32> to vector<8x80xf32>
    %387 = arith.maximumf %385, %386 : vector<8x80xf32>
    %388 = vector.extract_strided_slice %384 {offsets = [0, 160], sizes = [8, 80], strides = [1, 1]} : vector<8x320xf32> to vector<8x80xf32>
    %389 = vector.extract_strided_slice %384 {offsets = [0, 240], sizes = [8, 80], strides = [1, 1]} : vector<8x320xf32> to vector<8x80xf32>
    %390 = arith.maximumf %388, %389 : vector<8x80xf32>
    %391 = arith.maximumf %387, %390 : vector<8x80xf32>
    %392 = vector.broadcast %3 : vector<1x80xf32> to vector<8x80xf32>
    %393 = arith.addf %391, %392 : vector<8x80xf32>
    %cst_258 = arith.constant 0.000000e+00 : f32
    %394 = vector.broadcast %cst_258 : f32 to vector<8x80xf32>
    %395 = arith.maximumf %393, %394 : vector<8x80xf32>
    %396 = tpu.concatenate %133, %159, %185, %211, %237, %263 in 1 : vector<8x84xf32>, vector<8x84xf32>, vector<8x84xf32>, vector<8x84xf32>, vector<8x84xf32>, vector<8x84xf32> -> vector<8x504xf32>
    %397 = arith.truncf %396 : vector<8x504xf32> to vector<8x504xbf16>
    %cst_259 = arith.constant dense<0.000000e+00> : vector<8x320xf32>
    %398 = tpu.matmul %397, %1, %cst_259 {dimension_numbers = #tpu.dot_dimension_numbers<[1], [0], [0], [1], [0, 0, 1, 1], [], []>} : vector<8x504xbf16>, vector<504x320xbf16>, vector<8x320xf32> -> vector<8x320xf32>
    %399 = vector.extract_strided_slice %398 {offsets = [0, 0], sizes = [8, 80], strides = [1, 1]} : vector<8x320xf32> to vector<8x80xf32>
    %400 = vector.extract_strided_slice %398 {offsets = [0, 80], sizes = [8, 80], strides = [1, 1]} : vector<8x320xf32> to vector<8x80xf32>
    %401 = arith.maximumf %399, %400 : vector<8x80xf32>
    %402 = vector.extract_strided_slice %398 {offsets = [0, 160], sizes = [8, 80], strides = [1, 1]} : vector<8x320xf32> to vector<8x80xf32>
    %403 = vector.extract_strided_slice %398 {offsets = [0, 240], sizes = [8, 80], strides = [1, 1]} : vector<8x320xf32> to vector<8x80xf32>
    %404 = arith.maximumf %402, %403 : vector<8x80xf32>
    %405 = arith.maximumf %401, %404 : vector<8x80xf32>
    %406 = vector.broadcast %3 : vector<1x80xf32> to vector<8x80xf32>
    %407 = arith.addf %405, %406 : vector<8x80xf32>
    %cst_260 = arith.constant 0.000000e+00 : f32
    %408 = vector.broadcast %cst_260 : f32 to vector<8x80xf32>
    %409 = arith.maximumf %407, %408 : vector<8x80xf32>
    %410 = tpu.concatenate %185, %211, %237, %263, %289, %315 in 1 : vector<8x84xf32>, vector<8x84xf32>, vector<8x84xf32>, vector<8x84xf32>, vector<8x84xf32>, vector<8x84xf32> -> vector<8x504xf32>
    %411 = arith.truncf %410 : vector<8x504xf32> to vector<8x504xbf16>
    %cst_261 = arith.constant dense<0.000000e+00> : vector<8x320xf32>
    %412 = tpu.matmul %411, %1, %cst_261 {dimension_numbers = #tpu.dot_dimension_numbers<[1], [0], [0], [1], [0, 0, 1, 1], [], []>} : vector<8x504xbf16>, vector<504x320xbf16>, vector<8x320xf32> -> vector<8x320xf32>
    %413 = vector.extract_strided_slice %412 {offsets = [0, 0], sizes = [8, 80], strides = [1, 1]} : vector<8x320xf32> to vector<8x80xf32>
    %414 = vector.extract_strided_slice %412 {offsets = [0, 80], sizes = [8, 80], strides = [1, 1]} : vector<8x320xf32> to vector<8x80xf32>
    %415 = arith.maximumf %413, %414 : vector<8x80xf32>
    %416 = vector.extract_strided_slice %412 {offsets = [0, 160], sizes = [8, 80], strides = [1, 1]} : vector<8x320xf32> to vector<8x80xf32>
    %417 = vector.extract_strided_slice %412 {offsets = [0, 240], sizes = [8, 80], strides = [1, 1]} : vector<8x320xf32> to vector<8x80xf32>
    %418 = arith.maximumf %416, %417 : vector<8x80xf32>
    %419 = arith.maximumf %415, %418 : vector<8x80xf32>
    %420 = vector.broadcast %3 : vector<1x80xf32> to vector<8x80xf32>
    %421 = arith.addf %419, %420 : vector<8x80xf32>
    %cst_262 = arith.constant 0.000000e+00 : f32
    %422 = vector.broadcast %cst_262 : f32 to vector<8x80xf32>
    %423 = arith.maximumf %421, %422 : vector<8x80xf32>
    %424 = tpu.concatenate %237, %263, %289, %315, %341, %367 in 1 : vector<8x84xf32>, vector<8x84xf32>, vector<8x84xf32>, vector<8x84xf32>, vector<8x84xf32>, vector<8x84xf32> -> vector<8x504xf32>
    %425 = arith.truncf %424 : vector<8x504xf32> to vector<8x504xbf16>
    %cst_263 = arith.constant dense<0.000000e+00> : vector<8x320xf32>
    %426 = tpu.matmul %425, %1, %cst_263 {dimension_numbers = #tpu.dot_dimension_numbers<[1], [0], [0], [1], [0, 0, 1, 1], [], []>} : vector<8x504xbf16>, vector<504x320xbf16>, vector<8x320xf32> -> vector<8x320xf32>
    %427 = vector.extract_strided_slice %426 {offsets = [0, 0], sizes = [8, 80], strides = [1, 1]} : vector<8x320xf32> to vector<8x80xf32>
    %428 = vector.extract_strided_slice %426 {offsets = [0, 80], sizes = [8, 80], strides = [1, 1]} : vector<8x320xf32> to vector<8x80xf32>
    %429 = arith.maximumf %427, %428 : vector<8x80xf32>
    %430 = vector.extract_strided_slice %426 {offsets = [0, 160], sizes = [8, 80], strides = [1, 1]} : vector<8x320xf32> to vector<8x80xf32>
    %431 = vector.extract_strided_slice %426 {offsets = [0, 240], sizes = [8, 80], strides = [1, 1]} : vector<8x320xf32> to vector<8x80xf32>
    %432 = arith.maximumf %430, %431 : vector<8x80xf32>
    %433 = arith.maximumf %429, %432 : vector<8x80xf32>
    %434 = vector.broadcast %3 : vector<1x80xf32> to vector<8x80xf32>
    %435 = arith.addf %433, %434 : vector<8x80xf32>
    %cst_264 = arith.constant 0.000000e+00 : f32
    %436 = vector.broadcast %cst_264 : f32 to vector<8x80xf32>
    %437 = arith.maximumf %435, %436 : vector<8x80xf32>
    %438 = arith.truncf %381 : vector<8x80xf32> to vector<8x80xbf16>
    %c0_265 = arith.constant 0 : index
    %c0_266 = arith.constant 0 : index
    %c0_267 = arith.constant 0 : index
    %439 = vector.load %arg6[%c0_265, %c0_266, %c0_267] : memref<5x80x120xbf16, #tpu.memory_space<vmem>>, vector<1x80x120xbf16>
    %440 = vector.shape_cast %439 : vector<1x80x120xbf16> to vector<80x120xbf16>
    %cst_268 = arith.constant dense<0.000000e+00> : vector<8x120xf32>
    %441 = tpu.matmul %438, %440, %cst_268 {dimension_numbers = #tpu.dot_dimension_numbers<[1], [0], [0], [1], [0, 0, 1, 1], [], []>} : vector<8x80xbf16>, vector<80x120xbf16>, vector<8x120xf32> -> vector<8x120xf32>
    %442 = arith.truncf %395 : vector<8x80xf32> to vector<8x80xbf16>
    %c1_269 = arith.constant 1 : index
    %c0_270 = arith.constant 0 : index
    %c0_271 = arith.constant 0 : index
    %443 = vector.load %arg6[%c1_269, %c0_270, %c0_271] : memref<5x80x120xbf16, #tpu.memory_space<vmem>>, vector<1x80x120xbf16>
    %444 = vector.shape_cast %443 : vector<1x80x120xbf16> to vector<80x120xbf16>
    %cst_272 = arith.constant dense<0.000000e+00> : vector<8x120xf32>
    %445 = tpu.matmul %442, %444, %cst_272 {dimension_numbers = #tpu.dot_dimension_numbers<[1], [0], [0], [1], [0, 0, 1, 1], [], []>} : vector<8x80xbf16>, vector<80x120xbf16>, vector<8x120xf32> -> vector<8x120xf32>
    %446 = arith.addf %441, %445 : vector<8x120xf32>
    %447 = arith.truncf %409 : vector<8x80xf32> to vector<8x80xbf16>
    %c2_273 = arith.constant 2 : index
    %c0_274 = arith.constant 0 : index
    %c0_275 = arith.constant 0 : index
    %448 = vector.load %arg6[%c2_273, %c0_274, %c0_275] : memref<5x80x120xbf16, #tpu.memory_space<vmem>>, vector<1x80x120xbf16>
    %449 = vector.shape_cast %448 : vector<1x80x120xbf16> to vector<80x120xbf16>
    %cst_276 = arith.constant dense<0.000000e+00> : vector<8x120xf32>
    %450 = tpu.matmul %447, %449, %cst_276 {dimension_numbers = #tpu.dot_dimension_numbers<[1], [0], [0], [1], [0, 0, 1, 1], [], []>} : vector<8x80xbf16>, vector<80x120xbf16>, vector<8x120xf32> -> vector<8x120xf32>
    %451 = arith.addf %446, %450 : vector<8x120xf32>
    %452 = arith.truncf %423 : vector<8x80xf32> to vector<8x80xbf16>
    %c3_277 = arith.constant 3 : index
    %c0_278 = arith.constant 0 : index
    %c0_279 = arith.constant 0 : index
    %453 = vector.load %arg6[%c3_277, %c0_278, %c0_279] : memref<5x80x120xbf16, #tpu.memory_space<vmem>>, vector<1x80x120xbf16>
    %454 = vector.shape_cast %453 : vector<1x80x120xbf16> to vector<80x120xbf16>
    %cst_280 = arith.constant dense<0.000000e+00> : vector<8x120xf32>
    %455 = tpu.matmul %452, %454, %cst_280 {dimension_numbers = #tpu.dot_dimension_numbers<[1], [0], [0], [1], [0, 0, 1, 1], [], []>} : vector<8x80xbf16>, vector<80x120xbf16>, vector<8x120xf32> -> vector<8x120xf32>
    %456 = arith.addf %451, %455 : vector<8x120xf32>
    %457 = arith.truncf %437 : vector<8x80xf32> to vector<8x80xbf16>
    %c4_281 = arith.constant 4 : index
    %c0_282 = arith.constant 0 : index
    %c0_283 = arith.constant 0 : index
    %458 = vector.load %arg6[%c4_281, %c0_282, %c0_283] : memref<5x80x120xbf16, #tpu.memory_space<vmem>>, vector<1x80x120xbf16>
    %459 = vector.shape_cast %458 : vector<1x80x120xbf16> to vector<80x120xbf16>
    %cst_284 = arith.constant dense<0.000000e+00> : vector<8x120xf32>
    %460 = tpu.matmul %457, %459, %cst_284 {dimension_numbers = #tpu.dot_dimension_numbers<[1], [0], [0], [1], [0, 0, 1, 1], [], []>} : vector<8x80xbf16>, vector<80x120xbf16>, vector<8x120xf32> -> vector<8x120xf32>
    %461 = arith.addf %456, %460 : vector<8x120xf32>
    %c0_285 = arith.constant 0 : index
    %c0_286 = arith.constant 0 : index
    %462 = vector.load %arg7[%c0_285, %c0_286] : memref<1x120xf32, #tpu.memory_space<vmem>>, vector<1x120xf32>
    %463 = vector.broadcast %462 : vector<1x120xf32> to vector<8x120xf32>
    %464 = arith.addf %461, %463 : vector<8x120xf32>
    %cst_287 = arith.constant 0.000000e+00 : f32
    %465 = vector.broadcast %cst_287 : f32 to vector<8x120xf32>
    %466 = arith.maximumf %464, %465 : vector<8x120xf32>
    %467 = arith.truncf %466 : vector<8x120xf32> to vector<8x120xbf16>
    %c0_288 = arith.constant 0 : index
    %c0_289 = arith.constant 0 : index
    %468 = vector.load %arg8[%c0_288, %c0_289] : memref<120x84xbf16, #tpu.memory_space<vmem>>, vector<120x84xbf16>
    %cst_290 = arith.constant dense<0.000000e+00> : vector<8x84xf32>
    %469 = tpu.matmul %467, %468, %cst_290 {dimension_numbers = #tpu.dot_dimension_numbers<[1], [0], [0], [1], [0, 0, 1, 1], [], []>} : vector<8x120xbf16>, vector<120x84xbf16>, vector<8x84xf32> -> vector<8x84xf32>
    %c0_291 = arith.constant 0 : index
    %c0_292 = arith.constant 0 : index
    %470 = vector.load %arg9[%c0_291, %c0_292] : memref<1x84xf32, #tpu.memory_space<vmem>>, vector<1x84xf32>
    %471 = vector.broadcast %470 : vector<1x84xf32> to vector<8x84xf32>
    %472 = arith.addf %469, %471 : vector<8x84xf32>
    %cst_293 = arith.constant 0.000000e+00 : f32
    %473 = vector.broadcast %cst_293 : f32 to vector<8x84xf32>
    %474 = arith.maximumf %472, %473 : vector<8x84xf32>
    %475 = arith.truncf %474 : vector<8x84xf32> to vector<8x84xbf16>
    %c0_294 = arith.constant 0 : index
    %c0_295 = arith.constant 0 : index
    %476 = vector.load %arg10[%c0_294, %c0_295] : memref<84x10xbf16, #tpu.memory_space<vmem>>, vector<84x10xbf16>
    %cst_296 = arith.constant dense<0.000000e+00> : vector<8x10xf32>
    %477 = tpu.matmul %475, %476, %cst_296 {dimension_numbers = #tpu.dot_dimension_numbers<[1], [0], [0], [1], [0, 0, 1, 1], [], []>} : vector<8x84xbf16>, vector<84x10xbf16>, vector<8x10xf32> -> vector<8x10xf32>
    %c0_297 = arith.constant 0 : index
    %c0_298 = arith.constant 0 : index
    %478 = vector.load %arg11[%c0_297, %c0_298] : memref<1x10xf32, #tpu.memory_space<vmem>>, vector<1x10xf32>
    %479 = vector.broadcast %478 : vector<1x10xf32> to vector<8x10xf32>
    %480 = arith.addf %477, %479 : vector<8x10xf32>
    %c0_299 = arith.constant 0 : index
    %c0_300 = arith.constant 0 : index
    %481 = vector.load %arg12[%c0_299, %c0_300] : memref<8x10xf32, #tpu.memory_space<vmem>>, vector<8x10xf32>
    tpu.vector_store %arg12[%c0_299, %c0_300], %480 {strides = array<i32>} : memref<8x10xf32, #tpu.memory_space<vmem>>, vector<8x10xf32>,
    %cst_301 = arith.constant dense<0xFF800000> : vector<8xf32>
    %482 = vector.multi_reduction <maximumf>, %480, %cst_301 [1] : vector<8x10xf32> to vector<8xf32>
    %483 = vector.shape_cast %482 : vector<8xf32> to vector<8x1xf32>
    %484 = vector.broadcast %483 : vector<8x1xf32> to vector<8x10xf32>
    %485 = arith.subf %480, %484 : vector<8x10xf32>
    %486 = math.exp %485 : vector<8x10xf32>
    %cst_302 = arith.constant dense<0.000000e+00> : vector<8xf32>
    %487 = vector.multi_reduction <add>, %486, %cst_302 [1] : vector<8x10xf32> to vector<8xf32>
    %488 = vector.shape_cast %487 : vector<8xf32> to vector<8x1xf32>
    %489 = math.log %488 : vector<8x1xf32>
    %490 = vector.broadcast %489 : vector<8x1xf32> to vector<8x10xf32>
    %491 = arith.subf %485, %490 : vector<8x10xf32>
    %c0_303 = arith.constant 0 : index
    %c0_304 = arith.constant 0 : index
    %492 = vector.load %arg13[%c0_303, %c0_304] : memref<8x10xf32, #tpu.memory_space<vmem>>, vector<8x10xf32>
    tpu.vector_store %arg13[%c0_303, %c0_304], %491 {strides = array<i32>} : memref<8x10xf32, #tpu.memory_space<vmem>>, vector<8x10xf32>,
    return
  }
  func.func @transform_0(%arg0: i32) -> (i32, i32, i32) {
    %c0_i32 = arith.constant 0 : i32
    %c0_i32_0 = arith.constant 0 : i32
    %c0_i32_1 = arith.constant 0 : i32
    return %arg0, %c0_i32, %c0_i32_0 : i32, i32, i32
  }
  func.func @transform_1(%arg0: i32) -> (i32, i32) {
    %c0_i32 = arith.constant 0 : i32
    %c0_i32_0 = arith.constant 0 : i32
    %c0_i32_1 = arith.constant 0 : i32
    return %c0_i32, %c0_i32_0 : i32, i32
  }
  func.func @transform_2(%arg0: i32) -> (i32, i32) {
    %c0_i32 = arith.constant 0 : i32
    %c0_i32_0 = arith.constant 0 : i32
    %c0_i32_1 = arith.constant 0 : i32
    return %c0_i32, %c0_i32_0 : i32, i32
  }
  func.func @transform_3(%arg0: i32) -> (i32, i32) {
    %c0_i32 = arith.constant 0 : i32
    %c0_i32_0 = arith.constant 0 : i32
    %c0_i32_1 = arith.constant 0 : i32
    return %c0_i32, %c0_i32_0 : i32, i32
  }
  func.func @transform_4(%arg0: i32) -> (i32, i32) {
    %c0_i32 = arith.constant 0 : i32
    %c0_i32_0 = arith.constant 0 : i32
    %c0_i32_1 = arith.constant 0 : i32
    return %c0_i32, %c0_i32_0 : i32, i32
  }
  func.func @transform_5(%arg0: i32) -> (i32, i32, i32) {
    %c0_i32 = arith.constant 0 : i32
    %c0_i32_0 = arith.constant 0 : i32
    %c0_i32_1 = arith.constant 0 : i32
    %c0_i32_2 = arith.constant 0 : i32
    return %c0_i32, %c0_i32_0, %c0_i32_1 : i32, i32, i32
  }
  func.func @transform_6(%arg0: i32) -> (i32, i32) {
    %c0_i32 = arith.constant 0 : i32
    %c0_i32_0 = arith.constant 0 : i32
    %c0_i32_1 = arith.constant 0 : i32
    return %c0_i32, %c0_i32_0 : i32, i32
  }
  func.func @transform_7(%arg0: i32) -> (i32, i32) {
    %c0_i32 = arith.constant 0 : i32
    %c0_i32_0 = arith.constant 0 : i32
    %c0_i32_1 = arith.constant 0 : i32
    return %c0_i32, %c0_i32_0 : i32, i32
  }
  func.func @transform_8(%arg0: i32) -> (i32, i32) {
    %c0_i32 = arith.constant 0 : i32
    %c0_i32_0 = arith.constant 0 : i32
    %c0_i32_1 = arith.constant 0 : i32
    return %c0_i32, %c0_i32_0 : i32, i32
  }
  func.func @transform_9(%arg0: i32) -> (i32, i32) {
    %c0_i32 = arith.constant 0 : i32
    %c0_i32_0 = arith.constant 0 : i32
    %c0_i32_1 = arith.constant 0 : i32
    return %c0_i32, %c0_i32_0 : i32, i32
  }
  func.func @transform_10(%arg0: i32) -> (i32, i32) {
    %c0_i32 = arith.constant 0 : i32
    %c0_i32_0 = arith.constant 0 : i32
    %c0_i32_1 = arith.constant 0 : i32
    return %c0_i32, %c0_i32_0 : i32, i32
  }
  func.func @transform_11(%arg0: i32) -> (i32, i32) {
    %c0_i32 = arith.constant 0 : i32
    %c0_i32_0 = arith.constant 0 : i32
    return %arg0, %c0_i32 : i32, i32
  }
  func.func @transform_12(%arg0: i32) -> (i32, i32) {
    %c0_i32 = arith.constant 0 : i32
    %c0_i32_0 = arith.constant 0 : i32
    return %arg0, %c0_i32 : i32, i32
  }
}

</mosaic_0001>

<bundles_post_ra>
// kernel: tile.13
= control target key start
LH: loop header
LB: loop body
LE: loop exit
PB: predicated region body
PF: predicated region fallthrough
CT: control target
= control target key end

     0   :  { %s28_s0 = inlined_call_operand.vmem [shape: f32[6], index: 0, kind: input, shape index: {}]   ;;  %s29_s1 = inlined_call_operand.vmem [shape: f32[14,6], index: 1, kind: output, shape index: {}]  }
   0x1   :  { %v4_v0 = vld [vmem:[%s28_s0] ss:$0 sm:$0xff] }
   0x2   :  { %5 = vst [vmem:[%s29_s1] sm:$0xff] %v4_v0 }
   0x3   :  { %8 = vst [vmem:[%s29_s1 + $0x8] sm:$0xff] %v4_v0 }

// kernel: tile.14
= control target key start
LH: loop header
LB: loop body
LE: loop exit
PB: predicated region body
PF: predicated region fallthrough
CT: control target
= control target key end

     0   :  { %s115_s10 = smov 78   ;;  %s116_s11 = smov 66   ;;  %vm3_vm0 = vcmask 48128   ;;  %vm9_vm1 = vcmask 687728   ;;  %vm15_vm2 = vcmask 638528   ;;  %vm21_vm3 = vcmask 589328   ;;  %s183_s0 = inlined_call_operand.vmem [shape: f32[14,6], index: 0, kind: input, shape index: {}]   ;;  %s184_s1 = inlined_call_operand.vmem [shape: f32[1,84], index: 1, kind: output, shape index: {}]  }
   0x1   :  { %v89_v0 = vld [vmem:[%s183_s0 + $0xd] sm:$0x1]   ;;  %v91_v1 = vld [vmem:[%s183_s0 + $0xb] sm:$0x1]   ;;  %v93_v2 = vld [vmem:[%s183_s0 + $0x9] sm:$0x1]  }
   0x2   :  { %7 = vrot.lane.b32.xlu0 %v89_v0, %s115_s10  ;;  %19 = vrot.lane.b32.xlu1 %v91_v1, %s116_s11  ;;  %s117_s14 = smov 54   ;;  %v90_v3 = vld [vmem:[%s183_s0 + $0xc] sm:$0x1]   ;;  %v92_v4 = vld [vmem:[%s183_s0 + $0xa] sm:$0x1]   ;;  %s118_s19 = smov 72  }
   0x3   :  { %31 = vrot.lane.b32.xlu2 %v93_v2, %s117_s14  ;;  %s119_s20 = smov 60   ;;  %v94_v5 = vld [vmem:[%s183_s0 + $0x8] sm:$0x1]   ;;  %s120_s23 = smov 48   ;;  %v95_v6 = vld [vmem:[%s183_s0 + $0x7] sm:$0x1]  }
   0x4   :  { %v96_v7 = vld [vmem:[%s183_s0 + $0x6] sm:$0x1]   ;;  %s121_s28 = smov 42   ;;  %s122_s29 = smov 36   ;;  %v97_v8 = vld [vmem:[%s183_s0 + $0x5] sm:$0x1]  }
   0x5   :  { %s123_s3 = smov 30   ;;  %v98_v9 = vld [vmem:[%s183_s0 + $0x4] sm:$0x1]   ;;  %v99_v10 = vld [vmem:[%s183_s0 + $0x3] sm:$0x1]   ;;  %s124_s8 = smov 24  }
   0x6   :  { %s125_s9 = smov 18   ;;  %v100_v11 = vld [vmem:[%s183_s0 + $0x2] sm:$0x1]   ;;  %s126_s12 = smov 12   ;;  %v101_v12 = vld [vmem:[%s183_s0 + $0x1] sm:$0x1]  }
   0x7   :  { %s127_s15 = smov 6   ;;  %v2_v13 = vld [vmem:[%s183_s0] sm:$0x1]   ;;  %vm27_vm4 = vcmask 540128   ;;  %vm33_vm5 = vcmask 490928   ;;  %vm39_vm6 = vcmask 441728  }
   0x8   :  { %4 = vst.msk [vmem:[#allocation0] sm:$0x1] %vm3_vm0, %v2_v13   ;;  %vm45_vm7 = vcmask 392528   ;;  %vm51_vm8 = vcmask 343328   ;;  %vm57_vm9 = vcmask 294128   ;;  %vm63_vm10 = vcmask 244928  }
   0x9   :  { %vm69_vm11 = vcmask 195728   ;;  %vm75_vm12 = vcmask 146528   ;;  %vm81_vm13 = vcmask 97328  }
   0xa   :  { %13 = vrot.lane.b32.xlu0 %v90_v3, %s118_s19  ;;  %25 = vrot.lane.b32.xlu1 %v92_v4, %s119_s20 }
   0xb   :  { %37 = vrot.lane.b32.xlu2 %v94_v5, %s120_s23 }
  0x12   :  { %43 = vrot.lane.b32.xlu0 %v95_v6, %s121_s28  ;;  %49 = vrot.lane.b32.xlu1 %v96_v7, %s122_s29 }
  0x13   :  { %55 = vrot.lane.b32.xlu2 %v97_v8, %s123_s3 }
  0x1a   :  { %61 = vrot.lane.b32.xlu0 %v98_v9, %s124_s8  ;;  %67 = vrot.lane.b32.xlu1 %v99_v10, %s125_s9 }
  0x1b   :  { %73 = vrot.lane.b32.xlu2 %v100_v11, %s126_s12 }
  0x22   :  { %79 = vrot.lane.b32.xlu0 %v101_v12, %s127_s15 }
  0x5d   :  { %v32_v14 = vpop.permute.xlu2 %31  }
  0x65   :  { %v38_v15 = vpop.permute.xlu2 %37  }
  0x6d   :  { %v56_v16 = vpop.permute.xlu2 %55  }
  0x74   :  { %v8_v17 = vpop.permute.xlu0 %7   ;;  %v20_v18 = vpop.permute.xlu1 %19  }
  0x75   :  { %10 = vst.msk [vmem:[#allocation0] sm:$0x1] %vm9_vm1, %v8_v17   ;;  %v74_v19 = vpop.permute.xlu2 %73  }
  0x7c   :  { %v14_v20 = vpop.permute.xlu0 %13   ;;  %v26_v21 = vpop.permute.xlu1 %25  }
  0x7d   :  { %16 = vst.msk [vmem:[#allocation0] sm:$0x1] %vm15_vm2, %v14_v20  }
  0x7e   :  { %22 = vst.msk [vmem:[#allocation0] sm:$0x1] %vm21_vm3, %v20_v18  }
  0x7f   :  { %28 = vst.msk [vmem:[#allocation0] sm:$0x1] %vm27_vm4, %v26_v21  }
  0x80   :  { %34 = vst.msk [vmem:[#allocation0] sm:$0x1] %vm33_vm5, %v32_v14  }
  0x81   :  { %40 = vst.msk [vmem:[#allocation0] sm:$0x1] %vm39_vm6, %v38_v15  }
  0x84   :  { %v44_v22 = vpop.permute.xlu0 %43   ;;  %v50_v23 = vpop.permute.xlu1 %49  }
  0x85   :  { %46 = vst.msk [vmem:[#allocation0] sm:$0x1] %vm45_vm7, %v44_v22  }
  0x86   :  { %52 = vst.msk [vmem:[#allocation0] sm:$0x1] %vm51_vm8, %v50_v23  }
  0x87   :  { %58 = vst.msk [vmem:[#allocation0] sm:$0x1] %vm57_vm9, %v56_v16  }
  0x8c   :  { %v62_v24 = vpop.permute.xlu0 %61   ;;  %v68_v25 = vpop.permute.xlu1 %67  }
  0x8d   :  { %64 = vst.msk [vmem:[#allocation0] sm:$0x1] %vm63_vm10, %v62_v24  }
  0x8e   :  { %70 = vst.msk [vmem:[#allocation0] sm:$0x1] %vm69_vm11, %v68_v25  }
  0x8f   :  { %76 = vst.msk [vmem:[#allocation0] sm:$0x1] %vm75_vm12, %v74_v19  }
  0x94   :  { %v80_v26 = vpop.permute.xlu0 %79  }
  0x95   :  { %82 = vst.msk [vmem:[#allocation0] sm:$0x1] %vm81_vm13, %v80_v26  }
  0x9c   :  { %v85_v27 = vld [vmem:[#allocation0] sm:$0x1] }
  0x9d   :  { %88 = vst [vmem:[%s184_s1] sm:$0x1] %v85_v27 }

// kernel: tile.18
= control target key start
LH: loop header
LB: loop body
LE: loop exit
PB: predicated region body
PF: predicated region fallthrough
CT: control target
= control target key end

     0   :  { %s22_s0 = inlined_call_operand.vmem [shape: f32[16], index: 0, kind: input, shape index: {}]   ;;  %s23_s1 = inlined_call_operand.vmem [shape: f32[5,16], index: 1, kind: output, shape index: {}]  }
   0x1   :  { %v4_v0 = vld [vmem:[%s22_s0] ss:$0 sm:$0xff] }
   0x2   :  { %5 = vst [vmem:[%s23_s1] sm:$0xff] %v4_v0 }

// kernel: tile.19
= control target key start
LH: loop header
LB: loop body
LE: loop exit
PB: predicated region body
PF: predicated region fallthrough
CT: control target
= control target key end

     0   :  { %s43_s10 = smov 64   ;;  %s44_s11 = smov 32   ;;  %vm3_vm0 = vcmask 130048   ;;  %vm9_vm1 = vcmask 654848   ;;  %vm15_vm2 = vcmask 523648   ;;  %vm21_vm3 = vcmask 392448   ;;  %s75_s0 = inlined_call_operand.vmem [shape: f32[5,16], index: 0, kind: input, shape index: {}]   ;;  %s76_s1 = inlined_call_operand.vmem [shape: f32[1,80], index: 1, kind: output, shape index: {}]  }
   0x1   :  { %v35_v0 = vld [vmem:[%s75_s0 + $0x4] sm:$0x1]   ;;  %v37_v1 = vld [vmem:[%s75_s0 + $0x2] sm:$0x1]   ;;  %v36_v2 = vld [vmem:[%s75_s0 + $0x3] sm:$0x1]  }
   0x2   :  { %7 = vrot.lane.b32.xlu0 %v35_v0, %s43_s10  ;;  %19 = vrot.lane.b32.xlu1 %v37_v1, %s44_s11  ;;  %v38_v3 = vld [vmem:[%s75_s0 + $0x1] sm:$0x1]   ;;  %s45_s16 = smov 48   ;;  %s46_s17 = smov 16   ;;  %v2_v4 = vld [vmem:[%s75_s0] sm:$0x1]  }
   0x3   :  { %4 = vst.msk [vmem:[#allocation0] sm:$0x1] %vm3_vm0, %v2_v4   ;;  %vm27_vm4 = vcmask 261248  }
   0xa   :  { %13 = vrot.lane.b32.xlu0 %v36_v2, %s45_s16  ;;  %25 = vrot.lane.b32.xlu1 %v38_v3, %s46_s17 }
  0x74   :  { %v8_v5 = vpop.permute.xlu0 %7   ;;  %v20_v6 = vpop.permute.xlu1 %19  }
  0x75   :  { %10 = vst.msk [vmem:[#allocation0] sm:$0x1] %vm9_vm1, %v8_v5  }
  0x7c   :  { %v14_v7 = vpop.permute.xlu0 %13   ;;  %v26_v8 = vpop.permute.xlu1 %25  }
  0x7d   :  { %16 = vst.msk [vmem:[#allocation0] sm:$0x1] %vm15_vm2, %v14_v7  }
  0x7e   :  { %22 = vst.msk [vmem:[#allocation0] sm:$0x1] %vm21_vm3, %v20_v6  }
  0x7f   :  { %28 = vst.msk [vmem:[#allocation0] sm:$0x1] %vm27_vm4, %v26_v8  }
  0x86   :  { %v31_v9 = vld [vmem:[#allocation0] sm:$0x1] }
  0x87   :  { %34 = vst [vmem:[%s76_s1] sm:$0x1] %v31_v9 }

// kernel: lenet_forward.1
= control target key start
LH: loop header
LB: loop body
LE: loop exit
PB: predicated region body
PF: predicated region fallthrough
CT: control target
= control target key end

     0   :  { %s6612_s21 = smov 0   ;;  %s10354_s0 = inlined_call_operand.vmem [shape: f32[32,32,32], index: 0, kind: input, shape index: {}]   ;;  %s10355_s1 = inlined_call_operand.vmem [shape: bf16[192,336], index: 1, kind: input, shape index: {}]   ;;  %s10356_s2 = inlined_call_operand.vmem [shape: f32[1,84], index: 2, kind: input, shape index: {}]   ;;  %s10357_s3 = inlined_call_operand.vmem [shape: bf16[504,320], index: 3, kind: input, shape index: {}]   ;;  %s10358_s4 = inlined_call_operand.vmem [shape: f32[1,80], index: 4, kind: input, shape index: {}]   ;;  %s10359_s5 = inlined_call_operand.vmem [shape: bf16[5,80,120], index: 5, kind: input, shape index: {}]   ;;  %s10360_s6 = inlined_call_operand.vmem [shape: f32[1,120], index: 6, kind: input, shape index: {}]   ;;  %s10361_s7 = inlined_call_operand.vmem [shape: bf16[120,84], index: 7, kind: input, shape index: {}]   ;;  %s10362_s8 = inlined_call_operand.vmem [shape: f32[1,84], index: 8, kind: input, shape index: {}]   ;;  %s10363_s9 = inlined_call_operand.vmem [shape: bf16[84,10], index: 9, kind: input, shape index: {}]   ;;  %s10364_s10 = inlined_call_operand.vmem [shape: f32[1,10], index: 10, kind: input, shape index: {}]   ;;  %s10365_s11 = inlined_call_operand.vmem [shape: f32[32,10], index: 11, kind: output, shape index: {0}]   ;;  %s10366_s12 = inlined_call_operand.vmem [shape: f32[32,10], index: 12, kind: output, shape index: {1}]  }
   0x1 LB: > { %s6618_s22 = sadd.s32 4294967295, %s6534_s21   ;;  %p5550_p0 = scmp.ge.s32.totalorder %s6534_s21, 1  ;;  %s6534_s21 = sphi %s6612_s21, %s23_s21  }
   0x2   : > { %p367_p1 = scmp.lt.s32.totalorder %s6534_s21, 5 }
   0x4   : > { %p368_p2 = pnand %p5550_p0, %p367_p1 }
   0x6   : > { %371 = sbr.rel (%p368_p2) target bundleno = 2414 (0x96e), region = 64 }
   0xb   : > { %s5551_s23 = sshll.u32 %s6618_s22, 3  ;;  %vm662_vm0 = vcmask 1041409   ;;  %vm665_vm1 = vcmask 1042434   ;;  %vm668_vm2 = vcmask 1043459   ;;  %vm671_vm3 = vcmask 1044484   ;;  %s10382_s28 = smov 96  }
   0xc   : > { %p414_p3 = scmp.lt.s32.totalorder %s5551_s23, 31  ;;  %vm674_vm4 = vcmask 1045509   ;;  %vm677_vm5 = vcmask 1046534   ;;  %vm680_vm6 = vcmask 1047559   ;;  %s6537_s29 = smov 32   ;;  %vm806_vm7 = vcmask 261120  }
   0xd   : > { %s6538_s30 = smov 64   ;;  %vm808_vm8 = vcmask 523264   ;;  %vm810_vm9 = vcmask 785408   ;;  %s6539_s13 = smov 44   ;;  %vm1094_vm10 = vcmask 359424   ;;  %vm3975_vm11 = vcmask 1043456  }
   0xe   : > { %s10962_s23 = smov (!%p414_p3, %s5551_s23), 31  ;;  %s6541_s14 = smov 84   ;;  %vm3453_vm12 = vcmask 687104   ;;  %vm3455_vm13 = vcmask 326656   ;;  %vm3457_vm14 = vcmask 1014784   ;;  %vm3459_vm15 = vcmask 654336  }
   0xf   : > { %s6326_s24 = sshll.u32 %s10962_s23, 5  ;;  %s10431_s15 = smov 40  }
  0x10   : > { %s6626_s27 = scalar_lea.vmem %s10354_s0, %s6326_s24  ;;  %s10425_s16 = smov 124  }
  0x11   : > { %v629_v0 = vld [vmem:[%s6626_s27 + $0x3] sm:$0x1]  ;;  %v613_v13 = vld [vmem:[%s6626_s27 + $0x1] sm:$0x1]  ;;  %v645_v32 = vld [vmem:[%s6626_s27 + $0x5] sm:$0x1] }
  0x12   : > { %v630_v1 = vld [vmem:[%s6626_s27 + $0x23] sm:$0x1]  ;;  %v614_v17 = vld [vmem:[%s6626_s27 + $0x21] sm:$0x1]  ;;  %v646_v37 = vld [vmem:[%s6626_s27 + $0x25] sm:$0x1] }
  0x13   : > { %v631_v2 = vld [vmem:[%s6626_s27 + $0x43] sm:$0x1]  ;;  %v741_v8 = vrot.slane %v630_v1, 7  ;;  %v615_v18 = vld [vmem:[%s6626_s27 + $0x41] sm:$0x1]  ;;  %v691_v26 = vrot.slane %v614_v17, 7 }
  0x14   : > { %v632_v3 = vld [vmem:[%s6626_s27 + $0x63] sm:$0x1]  ;;  %v743_v9 = vrot.slane %v631_v2, 6  ;;  %v616_v20 = vld [vmem:[%s6626_s27 + $0x61] sm:$0x1]  ;;  %v693_v27 = vrot.slane %v615_v18, 6 }
  0x15   : > { %v633_v4 = vld [vmem:[%s6626_s27 + $0x83] sm:$0x1]  ;;  %v745_v10 = vrot.slane %v632_v3, 5  ;;  %v742_v14 = vsel %vm662_vm0, %v741_v8, %v629_v0  ;;  %v617_v21 = vld [vmem:[%s6626_s27 + $0x81] sm:$0x1]  ;;  %v695_v29 = vrot.slane %v616_v20, 5  ;;  %v692_v34 = vsel %vm662_vm0, %v691_v26, %v613_v13 }
  0x16   : > { %v634_v5 = vld [vmem:[%s6626_s27 + $0xa3] sm:$0x1]  ;;  %v747_v11 = vrot.slane %v633_v4, 4  ;;  %v744_v19 = vsel %vm665_vm1, %v743_v9, %v742_v14  ;;  %v618_v22 = vld [vmem:[%s6626_s27 + $0xa1] sm:$0x1]  ;;  %v697_v30 = vrot.slane %v617_v21, 4  ;;  %v694_v40 = vsel %vm665_vm1, %v693_v27, %v692_v34 }
  0x17   : > { %v635_v6 = vld [vmem:[%s6626_s27 + $0xc3] sm:$0x1]  ;;  %v749_v12 = vrot.slane %v634_v5, 3  ;;  %v746_v23 = vsel %vm668_vm2, %v745_v10, %v744_v19  ;;  %v619_v24 = vld [vmem:[%s6626_s27 + $0xc1] sm:$0x1]  ;;  %v699_v31 = vrot.slane %v618_v22, 3  ;;  %v696_v45 = vsel %vm668_vm2, %v695_v29, %v694_v40 }
  0x18   : > { %v636_v7 = vld [vmem:[%s6626_s27 + $0xe3] sm:$0x1]  ;;  %v751_v15 = vrot.slane %v635_v6, 2  ;;  %v620_v25 = vld [vmem:[%s6626_s27 + $0xe1] sm:$0x1]  ;;  %v748_v28 = vsel %vm671_vm3, %v747_v11, %v746_v23  ;;  %v701_v35 = vrot.slane %v619_v24, 2  ;;  %v698_v50 = vsel %vm671_vm3, %v697_v30, %v696_v45 }
  0x19   : > { %v753_v16 = vrot.slane %v636_v7, 1  ;;  %v750_v33 = vsel %vm674_vm4, %v749_v12, %v748_v28  ;;  %v703_v36 = vrot.slane %v620_v25, 1  ;;  %v647_v38 = vld [vmem:[%s6626_s27 + $0x45] sm:$0x1]  ;;  %v789_v48 = vrot.slane %v646_v37, 7  ;;  %s6544_s23 = smov 80  }
  0x1a   : > { %v752_v39 = vsel %vm677_vm5, %v751_v15, %v750_v33  ;;  %v648_v41 = vld [vmem:[%s6626_s27 + $0x65] sm:$0x1]  ;;  %v791_v49 = vrot.slane %v647_v38, 6  ;;  %v1122_v54 = vld [vmem:[%s6626_s27 + $0x7] sm:$0x1]  ;;  %v700_v55 = vsel %vm674_vm4, %v699_v31, %v698_v50  ;;  %s10433_s25 = smov 36  }
  0x1b   : > { %v649_v42 = vld [vmem:[%s6626_s27 + $0x85] sm:$0x1]  ;;  %v754_v44 = vsel %vm680_vm6, %v753_v16, %v752_v39  ;;  %v793_v51 = vrot.slane %v648_v41, 5  ;;  %v790_v56 = vsel %vm662_vm0, %v789_v48, %v645_v32  ;;  %v1123_v59 = vld [vmem:[%s6626_s27 + $0x27] sm:$0x1]  ;;  %v702_v61 = vsel %vm677_vm5, %v701_v35, %v700_v55  ;;  %p420_p4 = scmp.lt.s32.totalorder %s6618_s22, 3 }
  0x1c   : > { %v650_v43 = vld [vmem:[%s6626_s27 + $0xa5] sm:$0x1]  ;;  %755 = vrot.lane.b32.xlu1 %v754_v44, %s10382_s28  ;;  %v795_v52 = vrot.slane %v649_v42, 4  ;;  %1131 = vrot.lane.b32.xlu2 %v754_v44, %s6537_s29  ;;  %v1124_v60 = vld [vmem:[%s6626_s27 + $0x47] sm:$0x1]  ;;  %v792_v62 = vsel %vm665_vm1, %v791_v49, %v790_v56  ;;  %v704_v2 = vsel %vm680_vm6, %v703_v36, %v702_v61  ;;  %v1171_v6 = vrot.slane %v1123_v59, 7 }
  0x1d   : > { %v651_v46 = vld [vmem:[%s6626_s27 + $0xc5] sm:$0x1]  ;;  %v797_v53 = vrot.slane %v650_v43, 3  ;;  %v1125_v63 = vld [vmem:[%s6626_s27 + $0x67] sm:$0x1]  ;;  %v794_v3 = vsel %vm668_vm2, %v793_v51, %v792_v62  ;;  %v1173_v7 = vrot.slane %v1124_v60, 6  ;;  %705 = vrot.lane.b32.xlu0 %v704_v2, %s6537_s29 }
  0x1e   : > { %v652_v47 = vld [vmem:[%s6626_s27 + $0xe5] sm:$0x1]  ;;  %v799_v57 = vrot.slane %v651_v46, 2  ;;  %v1126_v0 = vld [vmem:[%s6626_s27 + $0x87] sm:$0x1]  ;;  %v796_v8 = vsel %vm671_vm3, %v795_v52, %v794_v3  ;;  %v1175_v9 = vrot.slane %v1125_v63, 5  ;;  %v1172_v14 = vsel %vm662_vm0, %v1171_v6, %v1122_v54 }
  0x1f   : > { %v801_v58 = vrot.slane %v652_v47, 1  ;;  %v1127_v1 = vld [vmem:[%s6626_s27 + $0xa7] sm:$0x1]  ;;  %v1177_v10 = vrot.slane %v1126_v0, 4  ;;  %v621_v12 = vld [vmem:[%s6626_s27 + $0x2] sm:$0x1]  ;;  %v798_v13 = vsel %vm674_vm4, %v797_v53, %v796_v8  ;;  %v1174_v20 = vsel %vm665_vm1, %v1173_v7, %v1172_v14 }
  0x20   : > { %v1128_v4 = vld [vmem:[%s6626_s27 + $0xc7] sm:$0x1]  ;;  %v1179_v11 = vrot.slane %v1127_v1, 3  ;;  %v622_v17 = vld [vmem:[%s6626_s27 + $0x22] sm:$0x1]  ;;  %v800_v19 = vsel %vm677_vm5, %v799_v57, %v798_v13  ;;  %v1176_v25 = vsel %vm668_vm2, %v1175_v9, %v1174_v20  ;;  %s10964_s22 = smov (!%p420_p4, %s6618_s22), 3 }
  0x21   : > { %v1129_v5 = vld [vmem:[%s6626_s27 + $0xe7] sm:$0x1]  ;;  %v1181_v15 = vrot.slane %v1128_v4, 2  ;;  %v623_v18 = vld [vmem:[%s6626_s27 + $0x42] sm:$0x1]  ;;  %v6692_v24 = vsel %vm680_vm6, %v801_v58, %v800_v19  ;;  %v716_v28 = vrot.slane %v622_v17, 7  ;;  %v1178_v30 = vsel %vm671_vm3, %v1177_v10, %v1176_v25 }
  0x22   : > { %v1183_v16 = vrot.slane %v1129_v5, 1  ;;  %v624_v21 = vld [vmem:[%s6626_s27 + $0x62] sm:$0x1]  ;;  %v718_v29 = vrot.slane %v623_v18, 6  ;;  %v1305_v34 = vld [vmem:[%s6626_s27 + $0x9] sm:$0x1]  ;;  %v1180_v35 = vsel %vm674_vm4, %v1179_v11, %v1178_v30 }
  0x23   : > { %v625_v22 = vld [vmem:[%s6626_s27 + $0x82] sm:$0x1]  ;;  %v720_v31 = vrot.slane %v624_v21, 5  ;;  %v717_v36 = vsel %vm662_vm0, %v716_v28, %v621_v12  ;;  %v1306_v39 = vld [vmem:[%s6626_s27 + $0x29] sm:$0x1]  ;;  %v1182_v41 = vsel %vm677_vm5, %v1181_v15, %v1180_v35 }
  0x24   : > { %v626_v23 = vld [vmem:[%s6626_s27 + $0xa2] sm:$0x1]  ;;  %v722_v32 = vrot.slane %v625_v22, 4  ;;  %v1307_v40 = vld [vmem:[%s6626_s27 + $0x49] sm:$0x1]  ;;  %v719_v42 = vsel %vm665_vm1, %v718_v29, %v717_v36  ;;  %v6709_v46 = vsel %vm680_vm6, %v1183_v16, %v1182_v41  ;;  %v1350_v50 = vrot.slane %v1306_v39, 7 }
  0x25   : > { %v627_v26 = vld [vmem:[%s6626_s27 + $0xc2] sm:$0x1]  ;;  %v724_v33 = vrot.slane %v626_v23, 3  ;;  %v1308_v43 = vld [vmem:[%s6626_s27 + $0x69] sm:$0x1]  ;;  %v721_v47 = vsel %vm668_vm2, %v720_v31, %v719_v42  ;;  %v1352_v51 = vrot.slane %v1307_v40, 6  ;;  %v6512_v52 = vpack.i.bf16 %v6709_v46, %v6692_v24 }
  0x26   : > { %v628_v27 = vld [vmem:[%s6626_s27 + $0xe2] sm:$0x1]  ;;  %v726_v37 = vrot.slane %v627_v26, 2  ;;  %v1309_v44 = vld [vmem:[%s6626_s27 + $0x89] sm:$0x1]  ;;  %v723_v53 = vsel %vm671_vm3, %v722_v32, %v721_v47  ;;  %v1354_v54 = vrot.slane %v1308_v43, 5  ;;  %v1351_v59 = vsel %vm662_vm0, %v1350_v50, %v1305_v34 }
  0x27   : > { %v728_v38 = vrot.slane %v628_v27, 1  ;;  %v1310_v45 = vld [vmem:[%s6626_s27 + $0xa9] sm:$0x1]  ;;  %v1356_v55 = vrot.slane %v1309_v44, 4  ;;  %v1297_v56 = vld [vmem:[%s6626_s27 + $0x8] sm:$0x1]  ;;  %v725_v58 = vsel %vm674_vm4, %v724_v33, %v723_v53  ;;  %6513 = vrot.lane.b32.xlu1 %v6512_v52, %s6537_s29  ;;  %v1353_v1 = vsel %vm665_vm1, %v1352_v51, %v1351_v59 }
  0x28   : > { %v1311_v48 = vld [vmem:[%s6626_s27 + $0xc9] sm:$0x1]  ;;  %v1298_v57 = vld [vmem:[%s6626_s27 + $0x28] sm:$0x1]  ;;  %v1358_v60 = vrot.slane %v1310_v45, 3  ;;  %v727_v0 = vsel %vm677_vm5, %v726_v37, %v725_v58  ;;  %v1355_v7 = vsel %vm668_vm2, %v1354_v54, %v1353_v1 }
  0x29   : > { %v1312_v49 = vld [vmem:[%s6626_s27 + $0xe9] sm:$0x1]  ;;  %v1360_v61 = vrot.slane %v1311_v48, 2  ;;  %v1299_v62 = vld [vmem:[%s6626_s27 + $0x48] sm:$0x1]  ;;  %v1327_v5 = vrot.slane %v1298_v57, 7  ;;  %v6729_v6 = vsel %vm680_vm6, %v728_v38, %v727_v0  ;;  %v1357_v12 = vsel %vm671_vm3, %v1356_v55, %v1355_v7 }
  0x2a   : > { %v1300_v63 = vld [vmem:[%s6626_s27 + $0x68] sm:$0x1]  ;;  %v1362_v2 = vrot.slane %v1312_v49, 1  ;;  %v1329_v10 = vrot.slane %v1299_v62, 6  ;;  %730 = vrot.lane.b32.xlu0 %v6729_v6, %s6538_s30  ;;  %v637_v16 = vld [vmem:[%s6626_s27 + $0x4] sm:$0x1]  ;;  %v1359_v18 = vsel %vm674_vm4, %v1358_v60, %v1357_v12 }
  0x2b   : > { %v1301_v3 = vld [vmem:[%s6626_s27 + $0x88] sm:$0x1]  ;;  %v1331_v11 = vrot.slane %v1300_v63, 5  ;;  %v1328_v13 = vsel %vm662_vm0, %v1327_v5, %v1297_v56  ;;  %v638_v17 = vld [vmem:[%s6626_s27 + $0x24] sm:$0x1]  ;;  %v1361_v25 = vsel %vm677_vm5, %v1360_v61, %v1359_v18 }
  0x2c   : > { %v1302_v4 = vld [vmem:[%s6626_s27 + $0xa8] sm:$0x1]  ;;  %v1333_v14 = vrot.slane %v1301_v3, 4  ;;  %v1330_v19 = vsel %vm665_vm1, %v1329_v10, %v1328_v13  ;;  %v639_v22 = vld [vmem:[%s6626_s27 + $0x44] sm:$0x1]  ;;  %v6750_v30 = vsel %vm680_vm6, %v1362_v2, %v1361_v25  ;;  %v766_v33 = vrot.slane %v638_v17, 7 }
  0x2d   : > { %v1303_v8 = vld [vmem:[%s6626_s27 + $0xc8] sm:$0x1]  ;;  %v1335_v15 = vrot.slane %v1302_v4, 3  ;;  %v640_v23 = vld [vmem:[%s6626_s27 + $0x64] sm:$0x1]  ;;  %v1332_v26 = vsel %vm668_vm2, %v1331_v11, %v1330_v19  ;;  %v768_v34 = vrot.slane %v639_v22, 6 }
  0x2e   : > { %v1304_v9 = vld [vmem:[%s6626_s27 + $0xe8] sm:$0x1]  ;;  %v1337_v20 = vrot.slane %v1303_v8, 2  ;;  %v641_v27 = vld [vmem:[%s6626_s27 + $0x84] sm:$0x1]  ;;  %v1334_v31 = vsel %vm671_vm3, %v1333_v14, %v1332_v26  ;;  %v770_v36 = vrot.slane %v640_v23, 5  ;;  %v767_v41 = vsel %vm662_vm0, %v766_v33, %v637_v16 }
  0x2f   : > { %v1339_v21 = vrot.slane %v1304_v9, 1  ;;  %v642_v28 = vld [vmem:[%s6626_s27 + $0xa4] sm:$0x1]  ;;  %v1336_v35 = vsel %vm674_vm4, %v1335_v15, %v1334_v31  ;;  %v772_v37 = vrot.slane %v641_v27, 4  ;;  %v1114_v39 = vld [vmem:[%s6626_s27 + $0x6] sm:$0x1]  ;;  %1364 = vrot.lane.b32.xlu1 %v6750_v30, %s6537_s29  ;;  %v769_v48 = vsel %vm665_vm1, %v768_v34, %v767_v41 }
  0x30   : > { %v643_v29 = vld [vmem:[%s6626_s27 + $0xc4] sm:$0x1]  ;;  %v774_v38 = vrot.slane %v642_v28, 3  ;;  %v1115_v40 = vld [vmem:[%s6626_s27 + $0x26] sm:$0x1]  ;;  %v1338_v47 = vsel %vm677_vm5, %v1337_v20, %v1336_v35  ;;  %v771_v52 = vsel %vm668_vm2, %v770_v36, %v769_v48 }
  0x31   : > { %v644_v32 = vld [vmem:[%s6626_s27 + $0xe4] sm:$0x1]  ;;  %v776_v42 = vrot.slane %v643_v29, 2  ;;  %v1116_v44 = vld [vmem:[%s6626_s27 + $0x46] sm:$0x1]  ;;  %v1148_v53 = vrot.slane %v1115_v40, 7  ;;  %v773_v56 = vsel %vm671_vm3, %v772_v37, %v771_v52  ;;  %v6778_v2 = vsel %vm680_vm6, %v1339_v21, %v1338_v47 }
  0x32   : > { %v778_v43 = vrot.slane %v644_v32, 1  ;;  %v1117_v45 = vld [vmem:[%s6626_s27 + $0x66] sm:$0x1]  ;;  %v1150_v54 = vrot.slane %v1116_v44, 6  ;;  %1137 = vrot.lane.b32.xlu0 %v6692_v24, %s10382_s28  ;;  %v775_v61 = vsel %vm674_vm4, %v774_v38, %v773_v56  ;;  %v1483_v63 = vld [vmem:[%s6626_s27 + $0xb] sm:$0x1] }
  0x33   : > { %v1118_v49 = vld [vmem:[%s6626_s27 + $0x86] sm:$0x1]  ;;  %v1152_v55 = vrot.slane %v1117_v45, 5  ;;  %v1149_v62 = vsel %vm662_vm0, %v1148_v53, %v1114_v39  ;;  %v1484_v0 = vld [vmem:[%s6626_s27 + $0x2b] sm:$0x1]  ;;  %10606 = vst [vmem:[#allocation2_spill] sm:$0xff] %v6778_v2  ;;  %v777_v24 = vsel %vm677_vm5, %v776_v42, %v775_v61 }
  0x34   : > { %v1119_v50 = vld [vmem:[%s6626_s27 + $0xa6] sm:$0x1]  ;;  %v1154_v58 = vrot.slane %v1118_v49, 4  ;;  %v1485_v1 = vld [vmem:[%s6626_s27 + $0x4b] sm:$0x1]  ;;  %v1151_v3 = vsel %vm665_vm1, %v1150_v54, %v1149_v62  ;;  %v6786_v8 = vsel %vm680_vm6, %v778_v43, %v777_v24  ;;  %v1528_v11 = vrot.slane %v1484_v0, 7 }
  0x35   : > { %v1120_v51 = vld [vmem:[%s6626_s27 + $0xc6] sm:$0x1]  ;;  %v1156_v59 = vrot.slane %v1119_v50, 3  ;;  %v1486_v4 = vld [vmem:[%s6626_s27 + $0x6b] sm:$0x1]  ;;  %v1153_v9 = vsel %vm668_vm2, %v1152_v55, %v1151_v3  ;;  %v1530_v12 = vrot.slane %v1485_v1, 6  ;;  %1134 = vrot.lane.b32.xlu2 %v6786_v8, %s6538_s30 }
  0x36   : > { %v1121_v57 = vld [vmem:[%s6626_s27 + $0xe6] sm:$0x1]  ;;  %v1158_v60 = vrot.slane %v1120_v51, 2  ;;  %v1487_v5 = vld [vmem:[%s6626_s27 + $0x8b] sm:$0x1]  ;;  %v1155_v13 = vsel %vm671_vm3, %v1154_v58, %v1153_v9  ;;  %v1532_v15 = vrot.slane %v1486_v4, 5  ;;  %v1529_v20 = vsel %vm662_vm0, %v1528_v11, %v1483_v63 }
  0x37   : > { %v1488_v7 = vld [vmem:[%s6626_s27 + $0xab] sm:$0x1]  ;;  %v1534_v16 = vrot.slane %v1487_v5, 4  ;;  %v1157_v18 = vsel %vm674_vm4, %v1156_v59, %v1155_v13  ;;  %v1160_v19 = vrot.slane %v1121_v57, 1  ;;  %v6349_v22 = vld [vmem:[%s10355_s1 + $0xb0] sm:$0xf0]  ;;  %1491 = vrot.lane.b32.xlu1 %v6778_v2, %s6538_s30  ;;  %v1531_v26 = vsel %vm665_vm1, %v1530_v12, %v1529_v20 }
  0x38   : > { %v1489_v10 = vld [vmem:[%s6626_s27 + $0xcb] sm:$0x1]  ;;  %v1536_v21 = vrot.slane %v1488_v7, 3  ;;  %v5630_v23 = vld [vmem:[%s10355_s1 + $0x90] sm:$0xf]  ;;  %v1159_v25 = vsel %vm677_vm5, %v1158_v60, %v1157_v18  ;;  %v1533_v31 = vsel %vm668_vm2, %v1532_v15, %v1531_v26 }
  0x39   : > { %v1490_v14 = vld [vmem:[%s6626_s27 + $0xeb] sm:$0x1]  ;;  %v1538_v27 = vrot.slane %v1489_v10, 2  ;;  %v6346_v29 = vld [vmem:[%s10355_s1 + $0x98] sm:$0xf0]  ;;  %v1535_v32 = vsel %vm671_vm3, %v1534_v16, %v1533_v31  ;;  %v6828_v37 = vsel %vm680_vm6, %v1160_v19, %v1159_v25 }
  0x3a   : > { %v5642_v17 = vld [vmem:[%s10355_s1 + $0xa8] sm:$0xf]  ;;  %1316 = vrot.lane.b32.xlu0 %v6709_v46, %s10382_s28  ;;  %v1540_v33 = vrot.slane %v1490_v14, 1  ;;  %v6819_v34 = vor.u32 %v6346_v29, %v5630_v23  ;;  %v6348_v35 = vld [vmem:[%s10355_s1 + $0xac] sm:$0xf]  ;;  %v1537_v46 = vsel %vm674_vm4, %v1536_v21, %v1535_v32 }
  0x3b   : > { %v6809_v28 = vor.u32 %v6349_v22, %v5642_v17  ;;  %v5644_v36 = vld [vmem:[%s10355_s1 + $0xb4] sm:$0xf0]  ;;  %v6343_v39 = vld [vmem:[%s10355_s1 + $0x80] sm:$0xf0]  ;;  %v5690_v41 = vld [vmem:[%s10355_s1 + $0x108] sm:$0xf]  ;;  %v1539_v42 = vsel %vm677_vm5, %v1538_v27, %v1537_v46 }
  0x3c   : > { %v5618_v38 = vld [vmem:[%s10355_s1 + $0x78] sm:$0xf]  ;;  %v6837_v40 = vor.u32 %v6348_v35, %v5644_v36  ;;  %v6361_v43 = vld [vmem:[%s10355_s1 + $0x110] sm:$0xf0]  ;;  %v5632_v45 = vld [vmem:[%s10355_s1 + $0x9c] sm:$0xf0]  ;;  %v6872_v57 = vsel %vm680_vm6, %v1540_v33, %v1539_v42 }
  0x3d   : > { %1010 = vmatpush.bf16.msra.mxu0 %v6809_v28  ;;  %v6345_v44 = vld [vmem:[%s10355_s1 + $0x94] sm:$0xf]  ;;  %v5606_v47 = vld [vmem:[%s10355_s1 + $0x60] sm:$0xf]  ;;  %v6856_v48 = vor.u32 %v6361_v43, %v5690_v41  ;;  %v1475_v50 = vld [vmem:[%s6626_s27 + $0xa] sm:$0x1]  ;;  %1313 = vrot.lane.b32.xlu2 %v6828_v37, %s6538_s30  ;;  %v6866_v53 = vor.u32 %v6343_v39, %v5618_v38 }
  0x3e   : > { %1036 = vmatpush.bf16.msra.mxu2 %v6837_v40  ;;  %v6858_v49 = vor.u32 %v6345_v44, %v5632_v45  ;;  %v1476_v51 = vld [vmem:[%s6626_s27 + $0x2a] sm:$0x1]  ;;  %v6340_v58 = vld [vmem:[%s10355_s1 + $0x68] sm:$0xf0]  ;;  %v5678_v5 = vld [vmem:[%s10355_s1 + $0xf0] sm:$0xf] }
  0x3f   : > { %v1477_v52 = vld [vmem:[%s6626_s27 + $0x4a] sm:$0x1]  ;;  %1027 = vmatpush.bf16.msra.mxu1 %v6856_v48  ;;  %v1505_v60 = vrot.slane %v1476_v51, 7  ;;  %v6891_v7 = vor.u32 %v6340_v58, %v5606_v47  ;;  %v6358_v10 = vld [vmem:[%s10355_s1 + $0xf8] sm:$0xf0] }
  0x40   : > { %v1478_v54 = vld [vmem:[%s6626_s27 + $0x6a] sm:$0x1]  ;;  %v1507_v61 = vrot.slane %v1477_v52, 6  ;;  %v6342_v11 = vld [vmem:[%s10355_s1 + $0x7c] sm:$0xf]  ;;  %v6907_v16 = vor.u32 %v6358_v10, %v5678_v5 }
  0x41   : > { %1011 = vmatpush.bf16.msra.mxu0 %v6819_v34  ;;  %v1479_v55 = vld [vmem:[%s6626_s27 + $0x8a] sm:$0x1]  ;;  %v1509_v63 = vrot.slane %v1478_v54, 5  ;;  %v1506_v24 = vsel %vm662_vm0, %v1505_v60, %v1475_v50  ;;  %v6337_v13 = vld [vmem:[%s10355_s1 + $0x50] sm:$0xf0] }
  0x42   : > { %v1480_v56 = vld [vmem:[%s6626_s27 + $0xaa] sm:$0x1]  ;;  %v1511_v0 = vrot.slane %v1479_v55, 4  ;;  %1037 = vmatpush.bf16.msra.mxu2 %v6858_v49  ;;  %1542 = vrot.lane.b32.xlu0 %v6872_v57, %s6537_s29  ;;  %v1508_v9 = vsel %vm665_vm1, %v1507_v61, %v1506_v24  ;;  %v5666_v18 = vld [vmem:[%s10355_s1 + $0xd8] sm:$0xf] }
  0x43   : > { %v1481_v59 = vld [vmem:[%s6626_s27 + $0xca] sm:$0x1]  ;;  %v1513_v3 = vrot.slane %v1480_v56, 3  ;;  %v1510_v14 = vsel %vm668_vm2, %v1509_v63, %v1508_v9  ;;  %v6355_v20 = vld [vmem:[%s10355_s1 + $0xe0] sm:$0xf0]  ;;  %1028 = vmatpush.bf16.msra.mxu1 %v6907_v16 }
  0x44   : > { %v1482_v62 = vld [vmem:[%s6626_s27 + $0xea] sm:$0x1]  ;;  %v1515_v4 = vrot.slane %v1481_v59, 2  ;;  %v1512_v19 = vsel %vm671_vm3, %v1511_v0, %v1510_v14  ;;  %v6339_v21 = vld [vmem:[%s10355_s1 + $0x64] sm:$0xf]  ;;  %v6930_v26 = vor.u32 %v6355_v20, %v5666_v18 }
  0x45   : > { %v5594_v1 = vld [vmem:[%s10355_s1 + $0x48] sm:$0xf]  ;;  %1012 = vmatpush.bf16.msra.mxu0 %v6866_v53  ;;  %v1517_v15 = vrot.slane %v1482_v62, 1  ;;  %v5608_v22 = vld [vmem:[%s10355_s1 + $0x6c] sm:$0xf0]  ;;  %v1514_v25 = vsel %vm674_vm4, %v1513_v3, %v1512_v19  ;;  %1494 = vrot.lane.b32.xlu2 %v6750_v30, %s10382_s28 }
  0x46   : > { %v5620_v12 = vld [vmem:[%s10355_s1 + $0x84] sm:$0xf0]  ;;  %v5582_v23 = vld [vmem:[%s10355_s1 + $0x30] sm:$0xf]  ;;  %v6932_v27 = vor.u32 %v6339_v21, %v5608_v22  ;;  %v5654_v29 = vld [vmem:[%s10355_s1 + $0xc0] sm:$0xf]  ;;  %v6946_v33 = vor.u32 %v6337_v13, %v5594_v1  ;;  %v1516_v35 = vsel %vm677_vm5, %v1515_v4, %v1514_v25 }
  0x47   : > { %v6909_v17 = vor.u32 %v6342_v11, %v5620_v12  ;;  %v6352_v31 = vld [vmem:[%s10355_s1 + $0xc8] sm:$0xf0]  ;;  %v5596_v36 = vld [vmem:[%s10355_s1 + $0x54] sm:$0xf0]  ;;  %v6334_v30 = vld [vmem:[%s10355_s1 + $0x38] sm:$0xf0]  ;;  %v6962_v39 = vsel %vm680_vm6, %v1517_v15, %v1516_v35  ;;  %1029 = vmatpush.bf16.msra.mxu1 %v6930_v26 }
  0x48   : > { %v6336_v32 = vld [vmem:[%s10355_s1 + $0x4c] sm:$0xf]  ;;  %v5692_v38 = vld [vmem:[%s10355_s1 + $0x114] sm:$0xf0]  ;;  %10607 = vst [vmem:[#allocation3_spill] sm:$0xff] %v6962_v39  ;;  %1669 = vrot.lane.b32.xlu1 %v6962_v39, %s6538_s30  ;;  %v6991_v52 = vor.u32 %v6352_v31, %v5654_v29  ;;  %v7005_v59 = vor.u32 %v6334_v30, %v5582_v23 }
  0x49   : > { %1038 = vmatpush.bf16.msra.mxu2 %v6909_v17  ;;  %1013 = vmatpush.bf16.msra.mxu0 %v6891_v7  ;;  %v6360_v46 = vld [vmem:[%s10355_s1 + $0x10c] sm:$0xf]  ;;  %v5650_v42 = vld [vmem:[%s10355_s1 + $0xb0] sm:$0xf]  ;;  %v6350_v43 = vld [vmem:[%s10355_s1 + $0xb8] sm:$0xf0]  ;;  %v6993_v54 = vor.u32 %v6336_v32, %v5596_v36 }
  0x4a   : > { %v6964_v41 = vor.u32 %v6360_v46, %v5692_v38  ;;  %v6333_v44 = vld [vmem:[%s10355_s1 + $0x34] sm:$0xf]  ;;  %v5680_v47 = vld [vmem:[%s10355_s1 + $0xfc] sm:$0xf0]  ;;  %v5570_v50 = vld [vmem:[%s10355_s1 + $0x18] sm:$0xf]  ;;  %v7008_v60 = vor.u32 %v6350_v43, %v5650_v42 }
  0x4b   : > { %v6357_v45 = vld [vmem:[%s10355_s1 + $0xf4] sm:$0xf]  ;;  %v6331_v51 = vld [vmem:[%s10355_s1 + $0x20] sm:$0xf0]  ;;  %10608 = vst [vmem:[#allocation4_spill] sm:$0xff] %v6991_v52  ;;  %1030 = vmatpush.bf16.msra.mxu1 %v6991_v52 }
  0x4c   : > { %v5584_v55 = vld [vmem:[%s10355_s1 + $0x3c] sm:$0xf0]  ;;  %v5638_v56 = vld [vmem:[%s10355_s1 + $0x98] sm:$0xf]  ;;  %v6347_v58 = vld [vmem:[%s10355_s1 + $0xa0] sm:$0xf0]  ;;  %1053 = vmatpush.bf16.msra.mxu3 %v6964_v41  ;;  %v7013_v0 = vor.u32 %v6357_v45, %v5680_v47  ;;  %v7034_v20 = vor.u32 %v6331_v51, %v5570_v50 }
  0x4d   : > { %1039 = vmatpush.bf16.msra.mxu2 %v6932_v27  ;;  %1014 = vmatpush.bf16.msra.mxu0 %v6946_v33  ;;  %v1662_v61 = vld [vmem:[%s6626_s27 + $0x2d] sm:$0x1]  ;;  %v5558_v11 = vld [vmem:[%s10355_s1] sm:$0xf]  ;;  %v7027_v13 = vor.u32 %v6333_v44, %v5584_v55  ;;  %v6330_v19 = vld [vmem:[%s10355_s1 + $0x1c] sm:$0xf]  ;;  %v7037_v21 = vor.u32 %v6347_v58, %v5638_v56 }
  0x4e   : > { %v1663_v62 = vld [vmem:[%s6626_s27 + $0x4d] sm:$0x1]  ;;  %v1706_v5 = vrot.slane %v1662_v61, 7  ;;  %v5572_v23 = vld [vmem:[%s10355_s1 + $0x24] sm:$0xf0]  ;;  %1672 = vrot.lane.b32.xlu2 %v6872_v57, %s10382_s28 }
  0x4f   : > { %v1664_v63 = vld [vmem:[%s6626_s27 + $0x6d] sm:$0x1]  ;;  %v1708_v9 = vrot.slane %v1663_v62, 6  ;;  %1062 = vmatpush.bf16.msrb.mxu1 %v7008_v60  ;;  %v6354_v25 = vld [vmem:[%s10355_s1 + $0xdc] sm:$0xf]  ;;  %v7070_v45 = vor.u32 %v6330_v19, %v5572_v23 }
  0x50   : > { %v1661_v1 = vld [vmem:[%s6626_s27 + $0xd] sm:$0x1]  ;;  %v1710_v10 = vrot.slane %v1664_v63, 5  ;;  %v5668_v29 = vld [vmem:[%s10355_s1 + $0xe4] sm:$0xf0]  ;;  %1054 = vmatpush.bf16.msra.mxu3 %v7013_v0 }
  0x51   : > { %v1665_v24 = vld [vmem:[%s6626_s27 + $0x8d] sm:$0x1]  ;;  %1040 = vmatpush.bf16.msra.mxu2 %v6993_v54  ;;  %1015 = vmatpush.bf16.msra.mxu0 %v7005_v59  ;;  %v1707_v22 = vsel %vm662_vm0, %v1706_v5, %v1661_v1  ;;  %v7051_v35 = vor.u32 %v6354_v25, %v5668_v29  ;;  %v5626_v36 = vld [vmem:[%s10355_s1 + $0x80] sm:$0xf]  ;;  %v6351_v42 = vld [vmem:[%s10355_s1 + $0xc4] sm:$0xf] }
  0x52   : > { %v1666_v3 = vld [vmem:[%s6626_s27 + $0xad] sm:$0x1]  ;;  %v1712_v15 = vrot.slane %v1665_v24, 4  ;;  %v1709_v31 = vsel %vm665_vm1, %v1708_v9, %v1707_v22  ;;  %v5656_v43 = vld [vmem:[%s10355_s1 + $0xcc] sm:$0xf0] }
  0x53   : > { %v1667_v4 = vld [vmem:[%s6626_s27 + $0xcd] sm:$0x1]  ;;  %v1714_v18 = vrot.slane %v1666_v3, 3  ;;  %v1711_v38 = vsel %vm668_vm2, %v1710_v10, %v1709_v31  ;;  %1063 = vmatpush.bf16.msrb.mxu1 %v7037_v21  ;;  %v6327_v51 = vld [vmem:[%s10355_s1 + $0x4] sm:$0xf]  ;;  %v7087_v58 = vor.u32 %v6351_v42, %v5656_v43 }
  0x54   : > { %v6328_v12 = vld [vmem:[%s10355_s1 + $0x8] sm:$0xf0]  ;;  %v1716_v32 = vrot.slane %v1667_v4, 2  ;;  %v1713_v44 = vsel %vm671_vm3, %v1712_v15, %v1711_v38  ;;  %v5560_v55 = vld [vmem:[%s10355_s1 + $0xc] sm:$0xf0]  ;;  %1055 = vmatpush.bf16.msra.mxu3 %v7051_v35 }
  0x55   : > { %v1668_v14 = vld [vmem:[%s6626_s27 + $0xed] sm:$0x1]  ;;  %1041 = vmatpush.bf16.msra.mxu2 %v7027_v13  ;;  %1016 = vmatpush.bf16.msra.mxu0 %v7034_v20  ;;  %v7073_v57 = vor.u32 %v6328_v12, %v5558_v11  ;;  %v1715_v47 = vsel %vm674_vm4, %v1714_v18, %v1713_v44  ;;  %v5614_v61 = vld [vmem:[%s10355_s1 + $0x68] sm:$0xf]  ;;  %v6341_v62 = vld [vmem:[%s10355_s1 + $0x70] sm:$0xf0]  ;;  %v7098_v1 = vor.u32 %v6327_v51, %v5560_v55 }
  0x56   : > { %v6344_v46 = vld [vmem:[%s10355_s1 + $0x88] sm:$0xf0]  ;;  %v1718_v30 = vrot.slane %v1668_v14, 1  ;;  %v1717_v56 = vsel %vm677_vm5, %v1716_v32, %v1715_v47  ;;  %v7102_v24 = vor.u32 %v6341_v62, %v5614_v61  ;;  %v5698_v3 = vld [vmem:[%s10355_s1 + $0x110] sm:$0xf] }
  0x57   : > { %10609 = vst [vmem:[#allocation5_spill] sm:$0xff] %v7073_v57  ;;  %v7077_v50 = vor.u32 %v6344_v46, %v5626_v36  ;;  %v6362_v4 = vld [vmem:[%s10355_s1 + $0x118] sm:$0xf0]  ;;  %v5602_v9 = vld [vmem:[%s10355_s1 + $0x50] sm:$0xf] }
  0x58   : > { %v1719_v63 = vsel %vm680_vm6, %v1718_v30, %v1717_v56  ;;  %1056 = vmatpush.bf16.msra.mxu3 %v7087_v58  ;;  %v7125_v5 = vor.u32 %v6362_v4, %v5698_v3  ;;  %v6338_v10 = vld [vmem:[%s10355_s1 + $0x58] sm:$0xf0]  ;;  %v5686_v11 = vld [vmem:[%s10355_s1 + $0xf8] sm:$0xf]  ;;  %v6359_v14 = vld [vmem:[%s10355_s1 + $0x100] sm:$0xf0] }
  0x59   : > { %1720 = vrot.lane.b32.xlu0 %v1719_v63, %s6537_s29  ;;  %1042 = vmatpush.bf16.msra.mxu2 %v7070_v45  ;;  %v7136_v12 = vor.u32 %v6338_v10, %v5602_v9  ;;  %v5590_v15 = vld [vmem:[%s10355_s1 + $0x38] sm:$0xf]  ;;  %v6335_v18 = vld [vmem:[%s10355_s1 + $0x40] sm:$0xf0]  ;;  %v7149_v19 = vor.u32 %v6359_v14, %v5686_v11  ;;  %v5674_v23 = vld [vmem:[%s10355_s1 + $0xe0] sm:$0xf] }
  0x5a   : > { %1017 = vmatpush.bf16.msra.mxu0 %v7073_v57  ;;  %1064 = vmatpush.bf16.msrb.mxu1 %v7077_v50  ;;  %v7152_v22 = vor.u32 %v6335_v18, %v5590_v15  ;;  %v6356_v25 = vld [vmem:[%s10355_s1 + $0xe8] sm:$0xf0]  ;;  %v5578_v31 = vld [vmem:[%s10355_s1 + $0x20] sm:$0xf]  ;;  %v5662_v46 = vld [vmem:[%s10355_s1 + $0xc8] sm:$0xf] }
  0x5b   : > { %v7162_v29 = vor.u32 %v6356_v25, %v5674_v23  ;;  %v6332_v32 = vld [vmem:[%s10355_s1 + $0x28] sm:$0xf0]  ;;  %v6353_v38 = vld [vmem:[%s10355_s1 + $0xd0] sm:$0xf0]  ;;  %v606_v42 = vld [vmem:[%s6626_s27 + $0x20] sm:$0x1] }
  0x5c   : > { %1079 = vmatpush.bf16.msrb.mxu3 %v7125_v5  ;;  %v7171_v36 = vor.u32 %v6332_v32, %v5578_v31  ;;  %v7179_v30 = vor.u32 %v6353_v38, %v5662_v46  ;;  %v5566_v43 = vld [vmem:[%s10355_s1 + $0x8] sm:$0xf]  ;;  %v6329_v44 = vld [vmem:[%s10355_s1 + $0x10] sm:$0xf0]  ;;  %v607_v47 = vld [vmem:[%s6626_s27 + $0x40] sm:$0x1] }
  0x5d   : > { %1043 = vmatpush.bf16.msra.mxu2 %v7098_v1  ;;  %v661_v51 = vrot.slane %v606_v42, 7  ;;  %v7191_v55 = vor.u32 %v6329_v44, %v5566_v43  ;;  %v605_v56 = vld [vmem:[%s6626_s27] sm:$0x1]  ;;  %v664_v62 = vrot.slane %v607_v47, 6  ;;  %v1654_v11 = vld [vmem:[%s6626_s27 + $0x2c] sm:$0x1] }
  0x5e   : > { %1197 = vmatpush.bf16.msrb.mxu0 %v6809_v28  ;;  %1065 = vmatpush.bf16.msrb.mxu1 %v7102_v24  ;;  %v608_v61 = vld [vmem:[%s6626_s27 + $0x60] sm:$0x1]  ;;  %v1655_v18 = vld [vmem:[%s6626_s27 + $0x4c] sm:$0x1]  ;;  %v1683_v23 = vrot.slane %v1654_v11, 7 }
  0x5f   : > { %v609_v3 = vld [vmem:[%s6626_s27 + $0x80] sm:$0x1]  ;;  %v667_v4 = vrot.slane %v608_v61, 5  ;;  %v1653_v31 = vld [vmem:[%s6626_s27 + $0xc] sm:$0x1]  ;;  %v1685_v46 = vrot.slane %v1655_v18, 6 }
  0x60   : > { %1080 = vmatpush.bf16.msrb.mxu3 %v7149_v19  ;;  %v610_v10 = vld [vmem:[%s6626_s27 + $0xa0] sm:$0x1]  ;;  %v670_v15 = vrot.slane %v609_v3, 4  ;;  %v1656_v32 = vld [vmem:[%s6626_s27 + $0x6c] sm:$0x1]  ;;  %v1684_v43 = vsel %vm662_vm0, %v1683_v23, %v1653_v31 }
  0x61   : > { %1214 = vmatpush.bf16.msrb.mxu2 %v6856_v48  ;;  %1850 = vrot.lane.b32.xlu0 %v1719_v63, %s10382_s28  ;;  %v663_v63 = vsel %vm662_vm0, %v661_v51, %v605_v56  ;;  %v611_v14 = vld [vmem:[%s6626_s27 + $0xc0] sm:$0x1]  ;;  %v673_v38 = vrot.slane %v610_v10, 3  ;;  %v1657_v42 = vld [vmem:[%s6626_s27 + $0x8c] sm:$0x1]  ;;  %v1687_v44 = vrot.slane %v1656_v32, 5  ;;  %v1686_v56 = vsel %vm665_vm1, %v1685_v46, %v1684_v43 }
  0x62   : > { %1198 = vmatpush.bf16.msrb.mxu0 %v6819_v34  ;;  %1066 = vmatpush.bf16.msrb.mxu1 %v7136_v12  ;;  %v666_v9 = vsel %vm665_vm1, %v664_v62, %v663_v63  ;;  %v1840_v47 = vld [vmem:[%s6626_s27 + $0x2f] sm:$0x1]  ;;  %v1658_v51 = vld [vmem:[%s6626_s27 + $0xac] sm:$0x1]  ;;  %v1689_v61 = vrot.slane %v1657_v42, 4  ;;  %v676_v31 = vrot.slane %v611_v14, 2 }
  0x63   : > { %v669_v25 = vsel %vm668_vm2, %v667_v4, %v666_v9  ;;  %v1839_v62 = vld [vmem:[%s6626_s27 + $0xf] sm:$0x1]  ;;  %v1884_v63 = vrot.slane %v1840_v47, 7  ;;  %v612_v4 = vld [vmem:[%s6626_s27 + $0xe0] sm:$0x1]  ;;  %v1688_v11 = vsel %vm668_vm2, %v1687_v44, %v1686_v56  ;;  %v1691_v18 = vrot.slane %v1658_v51, 3 }
  0x64   : > { %1081 = vmatpush.bf16.msrb.mxu3 %v7162_v29  ;;  %v672_v9 = vsel %vm671_vm3, %v670_v15, %v669_v25  ;;  %v1659_v10 = vld [vmem:[%s6626_s27 + $0xcc] sm:$0x1]  ;;  %v1841_v23 = vld [vmem:[%s6626_s27 + $0x4f] sm:$0x1]  ;;  %v1690_v46 = vsel %vm671_vm3, %v1689_v61, %v1688_v11 }
  0x65   : > { %1215 = vmatpush.bf16.msrb.mxu2 %v6907_v16  ;;  %v1660_v32 = vld [vmem:[%s6626_s27 + $0xec] sm:$0x1]  ;;  %v1693_v42 = vrot.slane %v1659_v10, 2  ;;  %v1842_v43 = vld [vmem:[%s6626_s27 + $0x6f] sm:$0x1]  ;;  %v1885_v15 = vsel %vm662_vm0, %v1884_v63, %v1839_v62  ;;  %v1886_v25 = vrot.slane %v1841_v23, 6  ;;  %v675_v44 = vsel %vm674_vm4, %v673_v38, %v672_v9 }
  0x66   : > { %1199 = vmatpush.bf16.msrb.mxu0 %v6866_v53  ;;  %1067 = vmatpush.bf16.msrb.mxu1 %v7152_v22  ;;  %v1695_v39 = vrot.slane %v1660_v32, 1  ;;  %v1843_v2 = vld [vmem:[%s6626_s27 + $0x8f] sm:$0x1]  ;;  %v1888_v61 = vrot.slane %v1842_v43, 5  ;;  %v679_v63 = vrot.slane %v612_v4, 1 }
  0x67   : > { %v1845_v14 = vld [vmem:[%s6626_s27 + $0xcf] sm:$0x1]  ;;  %v1890_v10 = vrot.slane %v1843_v2, 4  ;;  %v2018_v9 = vld [vmem:[%s6626_s27 + $0x31] sm:$0x1]  ;;  %v678_v2 = vsel %vm677_vm5, %v676_v31, %v675_v44 }
  0x68   : > { %1082 = vmatpush.bf16.msrb.mxu3 %v7179_v30  ;;  %v1846_v56 = vld [vmem:[%s6626_s27 + $0xef] sm:$0x1]  ;;  %v1894_v62 = vrot.slane %v1845_v14, 2  ;;  %v2020_v43 = vld [vmem:[%s6626_s27 + $0x71] sm:$0x1]  ;;  %v681_v31 = vsel %vm680_vm6, %v679_v63, %v678_v2 }
  0x69   : > { %1216 = vmatpush.bf16.msrb.mxu2 %v6930_v26  ;;  %v1896_v38 = vrot.slane %v1846_v56, 1  ;;  %v2066_v14 = vrot.slane %v2020_v43, 5  ;;  %v2022_v56 = vld [vmem:[%s6626_s27 + $0xb1] sm:$0x1] }
  0x6a   : > { %1200 = vmatpush.bf16.msrb.mxu0 %v6891_v7  ;;  %1068 = vmatpush.bf16.msrb.mxu1 %v7171_v36 }
  0x6d   : > { %1217 = vmatpush.bf16.msrb.mxu2 %v6991_v52  ;;  %v1844_v52 = vld [vmem:[%s6626_s27 + $0xaf] sm:$0x1] }
  0x6e   : > { %1201 = vmatpush.bf16.msrb.mxu0 %v6946_v33  ;;  %1069 = vmatpush.bf16.msrb.mxu1 %v7191_v55  ;;  %v1892_v32 = vrot.slane %v1844_v52, 3  ;;  %v2017_v52 = vld [vmem:[%s6626_s27 + $0x11] sm:$0x1] }
  0x72   : > { %1202 = vmatpush.bf16.msrb.mxu0 %v7005_v59 }
  0x76   : > { %1203 = vmatpush.bf16.msrb.mxu0 %v7034_v20 }
  0x7a   : > { %1204 = vmatpush.bf16.msrb.mxu0 %v7073_v57  ;;  %v1692_v57 = vsel %vm674_vm4, %v1691_v18, %v1690_v46  ;;  %v1887_v18 = vsel %vm665_vm1, %v1886_v25, %v1885_v15  ;;  %v2062_v46 = vrot.slane %v2018_v9, 7  ;;  %v2021_v25 = vld [vmem:[%s6626_s27 + $0x91] sm:$0x1] }
  0x7b   : > { %v1694_v51 = vsel %vm677_vm5, %v1693_v42, %v1692_v57  ;;  %v1889_v57 = vsel %vm668_vm2, %v1888_v61, %v1887_v18 }
  0x7c   : > { %v7231_v11 = vsel %vm680_vm6, %v1695_v39, %v1694_v51  ;;  %v1891_v23 = vsel %vm671_vm3, %v1890_v10, %v1889_v57  ;;  %v2019_v39 = vld [vmem:[%s6626_s27 + $0x51] sm:$0x1]  ;;  %v2063_v51 = vsel %vm662_vm0, %v2062_v46, %v2017_v52  ;;  %v2068_v10 = vrot.slane %v2021_v25, 4 }
  0x7d   : > { %1847 = vrot.lane.b32.xlu2 %v7231_v11, %s6538_s30  ;;  %v1893_v42 = vsel %vm674_vm4, %v1892_v32, %v1891_v23  ;;  %v2064_v4 = vrot.slane %v2019_v39, 6  ;;  %v2023_v32 = vld [vmem:[%s6626_s27 + $0xd1] sm:$0x1]  ;;  %v2070_v57 = vrot.slane %v2022_v56, 3  ;;  %v1132_v39 = vpop.permute.xlu2 %1131 }
  0x7e   : > { %v1895_v15 = vsel %vm677_vm5, %v1894_v62, %v1893_v42  ;;  %v2072_v2 = vrot.slane %v2023_v32, 2 }
  0x7f   : > { %v1897_v44 = vsel %vm680_vm6, %v1896_v38, %v1895_v15  ;;  %v2065_v61 = vsel %vm665_vm1, %v2064_v4, %v2063_v51  ;;  %v2024_v38 = vld [vmem:[%s6626_s27 + $0xf1] sm:$0x1]  ;;  %v2010_v51 = vld [vmem:[%s6626_s27 + $0x30] sm:$0x1] }
  0x80   : > { %1898 = vrot.lane.b32.xlu1 %v1897_v44, %s6537_s29  ;;  %2028 = vrot.lane.b32.xlu0 %v1897_v44, %s10382_s28  ;;  %v2067_v62 = vsel %vm668_vm2, %v2066_v14, %v2065_v61  ;;  %v2074_v4 = vrot.slane %v2024_v38, 1  ;;  %v2039_v44 = vrot.slane %v2010_v51, 7 }
  0x81   : > { %v2069_v9 = vsel %vm671_vm3, %v2068_v10, %v2067_v62  ;;  %v2013_v10 = vld [vmem:[%s6626_s27 + $0x90] sm:$0x1] }
  0x82   : > { %v2071_v42 = vsel %vm674_vm4, %v2070_v57, %v2069_v9  ;;  %v2014_v57 = vld [vmem:[%s6626_s27 + $0xb0] sm:$0x1]  ;;  %v2045_v38 = vrot.slane %v2013_v10, 4  ;;  %v1832_v10 = vld [vmem:[%s6626_s27 + $0x2e] sm:$0x1] }
  0x83   : > { %v2073_v25 = vsel %vm677_vm5, %v2072_v2, %v2071_v42  ;;  %v2015_v9 = vld [vmem:[%s6626_s27 + $0xd0] sm:$0x1] }
  0x84   : > { %v7283_v61 = vsel %vm680_vm6, %v2074_v4, %v2073_v25  ;;  %v2016_v42 = vld [vmem:[%s6626_s27 + $0xf0] sm:$0x1]  ;;  %v2049_v4 = vrot.slane %v2015_v9, 2  ;;  %v1835_v9 = vld [vmem:[%s6626_s27 + $0x8e] sm:$0x1] }
  0x85   : > { %v2051_v25 = vrot.slane %v2016_v42, 1 }
  0x88   : > { %2076 = vrot.lane.b32.xlu1 %v7283_v61, %s6537_s29 }
  0x8e   : > { %v7212_v3 = vpop.permute.xlu1 %755 }
  0x8f   : > { %v706_v47 = vpop.permute.xlu0 %705  ;;  %v1135_v51 = vpop.permute.xlu2 %1134 }
  0x90   : > { %v807_v23 = vsel %vm806_vm7, %v681_v31, %v706_v47  ;;  %v2011_v31 = vld [vmem:[%s6626_s27 + $0x50] sm:$0x1] }
  0x91   : > { %v2041_v56 = vrot.slane %v2011_v31, 6 }
  0x99   : > { %v7251_v18 = vpop.permute.xlu1 %6513 }
  0x9a   : > { %v6515_v63 = vunpack.i.l.bf16 %v7251_v18 }
  0x9c   : > { %v731_v46 = vpop.permute.xlu0 %730  ;;  %v7265_v43 = vsel %vm806_vm7, %v6786_v8, %v6515_v63  ;;  %v2009_v8 = vld [vmem:[%s6626_s27 + $0x10] sm:$0x1] }
  0x9d   : > { %v809_v52 = vsel %vm808_vm8, %v807_v23, %v731_v46  ;;  %v7271_v47 = vpack.c.bf16 %v7265_v43, %v7265_v43  ;;  %v2040_v32 = vsel %vm662_vm0, %v2039_v44, %v2009_v8  ;;  %v2047_v23 = vrot.slane %v2014_v57, 3 }
  0x9e   : > { %v811_v15 = vsel %vm810_vm9, %v809_v52, %v7212_v3  ;;  %v2012_v3 = vld [vmem:[%s6626_s27 + $0x70] sm:$0x1]  ;;  %v2042_v63 = vsel %vm665_vm1, %v2041_v56, %v2040_v32  ;;  %v1188_v46 = vsel %vm806_vm7, %v6729_v6, %v1132_v39  ;;  %v6516_v39 = vunpack.i.h.bf16 %v7251_v18  ;;  %v1833_v32 = vld [vmem:[%s6626_s27 + $0x4e] sm:$0x1] }
  0x9f   : > { %v813_v14 = vpack.c.bf16 %v811_v15, %v811_v15  ;;  %5700 = vmatmul.msk.bf16.vlgmr.msra.gmra.mxu1 %vm808_vm8, %v7271_v47  ;;  %5701 = vmatmul.msk.bf16.vlgmr.msra.gmra.mxu3 %vm808_vm8, %v7271_v47  ;;  %v2043_v62 = vrot.slane %v2012_v3, 5  ;;  %v1189_v6 = vsel %vm808_vm8, %v1188_v46, %v1135_v51  ;;  %v1836_v46 = vld [vmem:[%s6626_s27 + $0xae] sm:$0x1] }
  0xa0   : > { %1223 = vmatpush.bf16.msra.mxu3 %v6837_v40  ;;  %1240 = vmatpush.bf16.msra.mxu1 %v6964_v41  ;;  %v7319_v56 = vsel %vm806_vm7, %v6828_v37, %v6516_v39  ;;  %v1831_v37 = vld [vmem:[%s6626_s27 + $0xe] sm:$0x1] }
  0xa1   : > { %1018 = vmatmul.bf16.vlgmr.msra.gmra.mxu0 %v813_v14  ;;  %1044 = vmatmul.bf16.vlgmr.msra.gmra.mxu2 %v813_v14  ;;  %v2044_v2 = vsel %vm668_vm2, %v2043_v62, %v2042_v63  ;;  %v1861_v62 = vrot.slane %v1832_v10, 7  ;;  %v7331_v57 = vpack.c.bf16 %v7319_v56, %v7319_v56  ;;  %v1834_v63 = vld [vmem:[%s6626_s27 + $0x6e] sm:$0x1] }
  0xa2   : > { %1249 = vmatpush.bf16.msra.mxu2 %v7008_v60  ;;  %1401 = vmatpush.bf16.msra.mxu0 %v6837_v40  ;;  %v2046_v52 = vsel %vm671_vm3, %v2045_v38, %v2044_v2  ;;  %v1863_v38 = vrot.slane %v1833_v32, 6 }
  0xa3   : > { %v2048_v15 = vsel %vm674_vm4, %v2047_v23, %v2046_v52  ;;  %v1862_v2 = vsel %vm662_vm0, %v1861_v62, %v1831_v37  ;;  %v1865_v23 = vrot.slane %v1834_v63, 5  ;;  %v1867_v52 = vrot.slane %v1835_v9, 4  ;;  %v2196_v62 = vld [vmem:[%s6626_s27 + $0x33] sm:$0x1] }
  0xa4   : > { %v2050_v31 = vsel %vm677_vm5, %v2049_v4, %v2048_v15  ;;  %1224 = vmatpush.bf16.msra.mxu3 %v6858_v49  ;;  %1241 = vmatpush.bf16.msra.mxu1 %v7013_v0  ;;  %v1138_v44 = vpop.permute.xlu0 %1137  ;;  %v1864_v42 = vsel %vm665_vm1, %v1863_v38, %v1862_v2  ;;  %v1869_v4 = vrot.slane %v1836_v46, 3  ;;  %v1838_v15 = vld [vmem:[%s6626_s27 + $0xee] sm:$0x1]  ;;  %v2197_v37 = vld [vmem:[%s6626_s27 + $0x53] sm:$0x1]  ;;  %v2240_v63 = vrot.slane %v2196_v62, 7 }
  0xa5   : > { %v7310_v8 = vsel %vm680_vm6, %v2051_v25, %v2050_v31  ;;  %v1190_v3 = vsel %vm810_vm9, %v1189_v6, %v1138_v44  ;;  %v1873_v6 = vrot.slane %v1838_v15, 1  ;;  %v2195_v9 = vld [vmem:[%s6626_s27 + $0x13] sm:$0x1] }
  0xa6   : > { %1250 = vmatpush.bf16.msra.mxu2 %v7037_v21  ;;  %1402 = vmatpush.bf16.msra.mxu0 %v6858_v49  ;;  %v7323_v18 = vpack.c.bf16 %v1190_v3, %v1190_v3  ;;  %v1314_v3 = vpop.permute.xlu2 %1313  ;;  %v2198_v2 = vld [vmem:[%s6626_s27 + $0x73] sm:$0x1]  ;;  %v2241_v46 = vsel %vm662_vm0, %v2240_v63, %v2195_v9  ;;  %v10612_v9 = vld [vmem:[#allocation3_spill] sm:$0xff] }
  0xa7   : > { %2203 = vrot.lane.b32.xlu1 %v7310_v8, %s6538_s30  ;;  %v1367_v10 = vsel %vm808_vm8, %v7265_v43, %v1314_v3  ;;  %v2199_v43 = vld [vmem:[%s6626_s27 + $0x93] sm:$0x1] }
  0xa8   : > { %1225 = vmatpush.bf16.msra.mxu3 %v6909_v17  ;;  %1242 = vmatpush.bf16.msra.mxu1 %v7051_v35  ;;  %v2201_v15 = vld [vmem:[%s6626_s27 + $0xd3] sm:$0x1] }
  0xa9   : > { %v10610_v63 = vld [vmem:[#allocation4_spill] sm:$0xff] }
  0xaa   : > { %1251 = vmatpush.bf16.msra.mxu2 %v7077_v50  ;;  %1403 = vmatpush.bf16.msra.mxu0 %v6909_v17 }
  0xac   : > { %1226 = vmatpush.bf16.msra.mxu3 %v6932_v27  ;;  %1243 = vmatpush.bf16.msra.mxu1 %v7087_v58  ;;  %v1317_v32 = vpop.permute.xlu0 %1316 }
  0xad   : > { %v1368_v38 = vsel %vm810_vm9, %v1367_v10, %v1317_v32 }
  0xae   : > { %1252 = vmatpush.bf16.msra.mxu2 %v7102_v24  ;;  %1404 = vmatpush.bf16.msra.mxu0 %v6932_v27 }
  0xaf   : > { %1070 = vmatmul.bf16.vlgmr.msrb.gmra.mxu1 %v813_v14  ;;  %5702 = vmatmul.msk.bf16.vlgmr.msrb.gmra.mxu3 %vm808_vm8, %v7271_v47  ;;  %v1837_v14 = vld [vmem:[%s6626_s27 + $0xce] sm:$0x1]  ;;  %v1866_v47 = vsel %vm668_vm2, %v1865_v23, %v1864_v42  ;;  %v2242_v23 = vrot.slane %v2197_v37, 6  ;;  %v2244_v42 = vrot.slane %v2198_v2, 5  ;;  %v1365_v37 = vpop.permute.xlu1 %1364 }
  0xb0   : > { %1227 = vmatpush.bf16.msra.mxu3 %v6993_v54  ;;  %1375 = vmatpush.bf16.msrb.mxu1 %v6809_v28  ;;  %v1868_v25 = vsel %vm671_vm3, %v1867_v52, %v1866_v47  ;;  %v1871_v51 = vrot.slane %v1837_v14, 2  ;;  %v2200_v52 = vld [vmem:[%s6626_s27 + $0xb3] sm:$0x1]  ;;  %v2246_v47 = vrot.slane %v2199_v43, 4  ;;  %v10613_v43 = vld [vmem:[#allocation5_spill] sm:$0xff] }
  0xb1   : > { %1205 = vmatmul.bf16.vlgmr.msrb.gmra.mxu0 %v7323_v18  ;;  %5703 = vmatmul.msk.bf16.vlgmr.msrb.gmra.mxu2 %vm808_vm8, %v7331_v57  ;;  %v1870_v31 = vsel %vm674_vm4, %v1869_v4, %v1868_v25  ;;  %v2243_v14 = vsel %vm665_vm1, %v2242_v23, %v2241_v46  ;;  %v7384_v4 = vpack.c.bf16 %v1368_v38, %v1368_v38  ;;  %v10611_v38 = vld [vmem:[#allocation2_spill] sm:$0xff] }
  0xb2   : > { %1253 = vmatpush.bf16.msra.mxu2 %v7136_v12  ;;  %1405 = vmatpush.bf16.msra.mxu0 %v6993_v54  ;;  %v1872_v39 = vsel %vm677_vm5, %v1871_v51, %v1870_v31  ;;  %v2245_v25 = vsel %vm668_vm2, %v2244_v42, %v2243_v14  ;;  %v2248_v51 = vrot.slane %v2200_v52, 3  ;;  %v2202_v31 = vld [vmem:[%s6626_s27 + $0xf3] sm:$0x1]  ;;  %v1495_v52 = vpop.permute.xlu2 %1494 }
  0xb3   : > { %v7359_v44 = vsel %vm680_vm6, %v1873_v6, %v1872_v39  ;;  %v2247_v6 = vsel %vm671_vm3, %v2246_v47, %v2245_v25  ;;  %v2250_v39 = vrot.slane %v2201_v15, 2  ;;  %v2252_v10 = vrot.slane %v2202_v31, 1  ;;  %v2374_v15 = vld [vmem:[%s6626_s27 + $0x35] sm:$0x1]  ;;  %v2188_v31 = vld [vmem:[%s6626_s27 + $0x32] sm:$0x1] }
  0xb4   : > { %1228 = vmatpush.bf16.msra.mxu3 %v7027_v13  ;;  %1376 = vmatpush.bf16.msrb.mxu1 %v6819_v34  ;;  %v2249_v3 = vsel %vm674_vm4, %v2248_v51, %v2247_v6  ;;  %v2375_v25 = vld [vmem:[%s6626_s27 + $0x55] sm:$0x1]  ;;  %v2418_v51 = vrot.slane %v2374_v15, 7  ;;  %v2190_v15 = vld [vmem:[%s6626_s27 + $0x72] sm:$0x1] }
  0xb5   : > { %2025 = vrot.lane.b32.xlu2 %v7359_v44, %s6538_s30  ;;  %v2251_v32 = vsel %vm677_vm5, %v2250_v39, %v2249_v3  ;;  %v2373_v6 = vld [vmem:[%s6626_s27 + $0x15] sm:$0x1]  ;;  %v2420_v3 = vrot.slane %v2375_v25, 6 }
  0xb6   : > { %1254 = vmatpush.bf16.msra.mxu2 %v7152_v22  ;;  %1406 = vmatpush.bf16.msra.mxu0 %v7027_v13  ;;  %v2253_v62 = vsel %vm680_vm6, %v2252_v10, %v2251_v32  ;;  %v2376_v39 = vld [vmem:[%s6626_s27 + $0x75] sm:$0x1] }
  0xb7   : > { %2254 = vrot.lane.b32.xlu0 %v2253_v62, %s6537_s29  ;;  %v2377_v32 = vld [vmem:[%s6626_s27 + $0x95] sm:$0x1] }
  0xb8   : > { %1229 = vmatpush.bf16.msra.mxu3 %v7070_v45  ;;  %1377 = vmatpush.bf16.msrb.mxu1 %v6866_v53 }
  0xba   : > { %1255 = vmatpush.bf16.msra.mxu2 %v7171_v36  ;;  %1407 = vmatpush.bf16.msra.mxu0 %v7070_v45 }
  0xbc   : > { %1230 = vmatpush.bf16.msra.mxu3 %v7098_v1  ;;  %1378 = vmatpush.bf16.msrb.mxu1 %v6891_v7 }
  0xbd   : > { %2206 = vrot.lane.b32.xlu2 %v7283_v61, %s10382_s28  ;;  %v7417_v61 = vsel %vm806_vm7, %v10611_v38, %v1365_v37  ;;  %v2187_v37 = vld [vmem:[%s6626_s27 + $0x12] sm:$0x1]  ;;  %v2378_v38 = vld [vmem:[%s6626_s27 + $0xb5] sm:$0x1] }
  0xbe   : > { %1256 = vmatpush.bf16.msra.mxu2 %v7191_v55  ;;  %1408 = vmatpush.bf16.msra.mxu0 %v7098_v1  ;;  %v1371_v23 = vpack.c.bf16 %v7417_v61, %v7417_v61 }
  0xbf   : > { %1231 = vmatmul.bf16.vlgmr.msra.gmra.mxu3 %v7323_v18  ;;  %5704 = vmatmul.msk.bf16.vlgmr.msra.gmra.mxu1 %vm808_vm8, %v7331_v57 }
  0xc0   : > { %1392 = vmatpush.bf16.msrb.mxu3 %v6856_v48  ;;  %1379 = vmatpush.bf16.msrb.mxu1 %v6946_v33 }
  0xc1   : > { %1257 = vmatmul.bf16.vlgmr.msra.gmra.mxu2 %v7323_v18  ;;  %1409 = vmatmul.bf16.vlgmr.msra.gmra.mxu0 %v7384_v4  ;;  %v1543_v18 = vpop.permute.xlu0 %1542 }
  0xc2   : > { %1266 = vmatpush.bf16.msrb.mxu2 %v7125_v5  ;;  %1570 = vmatpush.bf16.msrb.mxu0 %v6856_v48  ;;  %v7423_v2 = vsel %vm806_vm7, %v10612_v9, %v1543_v18  ;;  %v2422_v18 = vrot.slane %v2376_v39, 5  ;;  %v2191_v39 = vld [vmem:[%s6626_s27 + $0x92] sm:$0x1] }
  0xc3   : > { %v7433_v46 = vpack.c.bf16 %v7423_v2, %v7423_v2 }
  0xc4   : > { %1393 = vmatpush.bf16.msrb.mxu3 %v6907_v16  ;;  %1380 = vmatpush.bf16.msrb.mxu1 %v7005_v59 }
  0xc5   : > { %2384 = vrot.lane.b32.xlu2 %v2253_v62, %s10382_s28  ;;  %v2419_v62 = vsel %vm662_vm0, %v2418_v51, %v2373_v6  ;;  %v2380_v51 = vld [vmem:[%s6626_s27 + $0xf5] sm:$0x1] }
  0xc6   : > { %1267 = vmatpush.bf16.msrb.mxu2 %v7149_v19  ;;  %1571 = vmatpush.bf16.msrb.mxu0 %v6907_v16  ;;  %v2421_v9 = vsel %vm665_vm1, %v2420_v3, %v2419_v62  ;;  %v2221_v3 = vrot.slane %v2190_v15, 5  ;;  %v2192_v62 = vld [vmem:[%s6626_s27 + $0xb2] sm:$0x1]  ;;  %v7541_v15 = vpop.permute.xlu2 %1672 }
  0xc8   : > { %1394 = vmatpush.bf16.msrb.mxu3 %v6930_v26  ;;  %1381 = vmatpush.bf16.msrb.mxu1 %v7034_v20 }
  0xca   : > { %1268 = vmatpush.bf16.msrb.mxu2 %v7162_v29  ;;  %1572 = vmatpush.bf16.msrb.mxu0 %v6930_v26 }
  0xcc   : > { %1395 = vmatpush.bf16.msrb.mxu3 %v10610_v63  ;;  %1382 = vmatpush.bf16.msrb.mxu1 %v10613_v43 }
  0xce   : > { %1269 = vmatpush.bf16.msrb.mxu2 %v7179_v30  ;;  %1573 = vmatpush.bf16.msrb.mxu0 %v10610_v63 }
  0xcf   : > { %1383 = vmatmul.bf16.vlgmr.msrb.gmra.mxu1 %v7384_v4  ;;  %5706 = vmatmul.msk.bf16.vlgmr.msrb.gmra.mxu3 %vm808_vm8, %v1371_v23 }
  0xd0   : > { %1427 = vmatpush.bf16.msra.mxu3 %v7008_v60  ;;  %1444 = vmatpush.bf16.msra.mxu1 %v7125_v5 }
  0xd1   : > { %5705 = vmatmul.msk.bf16.vlgmr.msrb.gmra.mxu2 %vm808_vm8, %v7331_v57  ;;  %5709 = vmatmul.msk.bf16.vlgmr.msrb.gmra.mxu0 %vm808_vm8, %v7433_v46  ;;  %v1492_v57 = vpop.permute.xlu1 %1491 }
  0xd2   : > { %1418 = vmatpush.bf16.msra.mxu2 %v6964_v41  ;;  %1605 = vmatpush.bf16.msra.mxu0 %v7008_v60  ;;  %v1545_v42 = vsel %vm808_vm8, %v7319_v56, %v1492_v57  ;;  %v1721_v56 = vpop.permute.xlu0 %1720  ;;  %v2189_v57 = vld [vmem:[%s6626_s27 + $0x52] sm:$0x1] }
  0xd3   : > { %v1546_v14 = vsel %vm810_vm9, %v1545_v42, %v1495_v52  ;;  %v2379_v52 = vld [vmem:[%s6626_s27 + $0xd5] sm:$0x1]  ;;  %v2219_v25 = vrot.slane %v2189_v57, 6  ;;  %v2225_v57 = vrot.slane %v2192_v62, 3 }
  0xd4   : > { %1428 = vmatpush.bf16.msra.mxu3 %v7037_v21  ;;  %1445 = vmatpush.bf16.msra.mxu1 %v7149_v19  ;;  %v1548_v47 = vpack.c.bf16 %v1546_v14, %v1546_v14  ;;  %v2423_v14 = vsel %vm668_vm2, %v2422_v18, %v2421_v9  ;;  %v2428_v6 = vrot.slane %v2379_v52, 2  ;;  %v2193_v18 = vld [vmem:[%s6626_s27 + $0xd2] sm:$0x1] }
  0xd5   : > { %v2194_v9 = vld [vmem:[%s6626_s27 + $0xf2] sm:$0x1]  ;;  %v2227_v52 = vrot.slane %v2193_v18, 2  ;;  %v2555_v18 = vld [vmem:[%s6626_s27 + $0x97] sm:$0x1] }
  0xd6   : > { %1419 = vmatpush.bf16.msra.mxu2 %v7013_v0  ;;  %1606 = vmatpush.bf16.msra.mxu0 %v7037_v21 }
  0xd8   : > { %1429 = vmatpush.bf16.msra.mxu3 %v7077_v50  ;;  %1446 = vmatpush.bf16.msra.mxu1 %v7162_v29 }
  0xda   : > { %1420 = vmatpush.bf16.msra.mxu2 %v7051_v35  ;;  %1607 = vmatpush.bf16.msra.mxu0 %v7077_v50 }
  0xdc   : > { %1430 = vmatpush.bf16.msra.mxu3 %v7102_v24  ;;  %1447 = vmatpush.bf16.msra.mxu1 %v7179_v30 }
  0xde   : > { %1421 = vmatpush.bf16.msra.mxu2 %v7087_v58  ;;  %1608 = vmatpush.bf16.msra.mxu0 %v7102_v24 }
  0xdf   : > { %5708 = vmatmul.msk.bf16.vlgmr.msra.gmra.mxu1 %vm808_vm8, %v1371_v23 }
  0xe0   : > { %1431 = vmatpush.bf16.msra.mxu3 %v7136_v12  ;;  %1579 = vmatpush.bf16.msrb.mxu1 %v6837_v40 }
  0xe1   : > { %5707 = vmatmul.msk.bf16.vlgmr.msra.gmra.mxu2 %vm808_vm8, %v1371_v23  ;;  %v2424_v23 = vrot.slane %v2377_v32, 4  ;;  %v2430_v32 = vrot.slane %v2380_v51, 1 }
  0xe2   : > { %1553 = vmatpush.bf16.msrb.mxu2 %v6809_v28  ;;  %1609 = vmatpush.bf16.msra.mxu0 %v7136_v12 }
  0xe4   : > { %1432 = vmatpush.bf16.msra.mxu3 %v7152_v22  ;;  %1580 = vmatpush.bf16.msrb.mxu1 %v6858_v49 }
  0xe6   : > { %1554 = vmatpush.bf16.msrb.mxu2 %v6819_v34  ;;  %1610 = vmatpush.bf16.msra.mxu0 %v7152_v22 }
  0xe8   : > { %1433 = vmatpush.bf16.msra.mxu3 %v7171_v36  ;;  %1581 = vmatpush.bf16.msrb.mxu1 %v6909_v17 }
  0xea   : > { %1555 = vmatpush.bf16.msrb.mxu2 %v6866_v53  ;;  %1611 = vmatpush.bf16.msra.mxu0 %v7171_v36 }
  0xec   : > { %1434 = vmatpush.bf16.msra.mxu3 %v7191_v55  ;;  %1582 = vmatpush.bf16.msrb.mxu1 %v6932_v27 }
  0xee   : > { %1556 = vmatpush.bf16.msrb.mxu2 %v6891_v7  ;;  %1612 = vmatpush.bf16.msra.mxu0 %v7191_v55 }
  0xef   : > { %1435 = vmatmul.bf16.vlgmr.msra.gmra.mxu3 %v7384_v4  ;;  %v7493_v4 = vsel %vm806_vm7, %v7231_v11, %v1721_v56  ;;  %v2217_v11 = vrot.slane %v2188_v31, 7  ;;  %v2426_v56 = vrot.slane %v2378_v38, 3  ;;  %v2425_v31 = vsel %vm671_vm3, %v2424_v23, %v2423_v14 }
  0xf0   : > { %1596 = vmatpush.bf16.msrb.mxu3 %v6964_v41  ;;  %1583 = vmatpush.bf16.msrb.mxu1 %v6993_v54  ;;  %v7506_v10 = vpack.c.bf16 %v7493_v4, %v7493_v4 }
  0xf1   : > { %1613 = vmatmul.bf16.vlgmr.msra.gmra.mxu0 %v1548_v47  ;;  %v2218_v42 = vsel %vm662_vm0, %v2217_v11, %v2187_v37  ;;  %v2427_v11 = vsel %vm674_vm4, %v2426_v56, %v2425_v31  ;;  %v2223_v37 = vrot.slane %v2191_v39, 4  ;;  %v2229_v56 = vrot.slane %v2194_v9, 1  ;;  %v2552_v31 = vld [vmem:[%s6626_s27 + $0x37] sm:$0x1] }
  0xf2   : > { %1557 = vmatpush.bf16.msrb.mxu2 %v6946_v33  ;;  %1774 = vmatpush.bf16.msrb.mxu0 %v6964_v41  ;;  %v2429_v38 = vsel %vm677_vm5, %v2428_v6, %v2427_v11  ;;  %v2553_v39 = vld [vmem:[%s6626_s27 + $0x57] sm:$0x1] }
  0xf3   : > { %v2431_v14 = vsel %vm680_vm6, %v2430_v32, %v2429_v38  ;;  %v2551_v11 = vld [vmem:[%s6626_s27 + $0x17] sm:$0x1]  ;;  %v2598_v62 = vrot.slane %v2553_v39, 6 }
  0xf4   : > { %1597 = vmatpush.bf16.msrb.mxu3 %v7013_v0  ;;  %1584 = vmatpush.bf16.msrb.mxu1 %v7027_v13  ;;  %v2554_v32 = vld [vmem:[%s6626_s27 + $0x77] sm:$0x1] }
  0xf5   : > { %2432 = vrot.lane.b32.xlu0 %v2431_v14, %s6537_s29  ;;  %v2556_v38 = vld [vmem:[%s6626_s27 + $0xb7] sm:$0x1] }
  0xf6   : > { %1558 = vmatpush.bf16.msrb.mxu2 %v7005_v59  ;;  %1775 = vmatpush.bf16.msrb.mxu0 %v7013_v0 }
  0xf8   : > { %1598 = vmatpush.bf16.msrb.mxu3 %v7051_v35  ;;  %1585 = vmatpush.bf16.msrb.mxu1 %v7070_v45 }
  0xfa   : > { %1559 = vmatpush.bf16.msrb.mxu2 %v7034_v20  ;;  %1776 = vmatpush.bf16.msrb.mxu0 %v7051_v35 }
  0xfc   : > { %1599 = vmatpush.bf16.msrb.mxu3 %v7087_v58  ;;  %1586 = vmatpush.bf16.msrb.mxu1 %v7098_v1 }
  0xfd   : > { %2562 = vrot.lane.b32.xlu0 %v2431_v14, %s10382_s28 }
  0xfe   : > { %1560 = vmatpush.bf16.msrb.mxu2 %v10613_v43  ;;  %1777 = vmatpush.bf16.msrb.mxu0 %v7087_v58 }
  0xff   : > { %1587 = vmatmul.bf16.vlgmr.msrb.gmra.mxu1 %v1548_v47  ;;  %5710 = vmatmul.msk.bf16.vlgmr.msrb.gmra.mxu3 %vm808_vm8, %v7433_v46 }
 0x100   : > { %1731 = vmatpush.bf16.msra.mxu3 %v6809_v28  ;;  %1748 = vmatpush.bf16.msra.mxu1 %v6856_v48 }
 0x101   : > { %1561 = vmatmul.bf16.vlgmr.msrb.gmra.mxu2 %v1548_v47  ;;  %5713 = vmatmul.msk.bf16.vlgmr.msrb.gmra.mxu0 %vm808_vm8, %v7506_v10  ;;  %v2220_v47 = vsel %vm665_vm1, %v2219_v25, %v2218_v42 }
 0x102   : > { %1622 = vmatpush.bf16.msra.mxu2 %v7125_v5  ;;  %1909 = vmatpush.bf16.msra.mxu0 %v6809_v28  ;;  %v2222_v23 = vsel %vm668_vm2, %v2221_v3, %v2220_v47  ;;  %v2596_v3 = vrot.slane %v2552_v31, 7  ;;  %v1848_v31 = vpop.permute.xlu2 %1847 }
 0x103   : > { %v2224_v42 = vsel %vm671_vm3, %v2223_v37, %v2222_v23  ;;  %v2600_v37 = vrot.slane %v2554_v32, 5  ;;  %v2602_v23 = vrot.slane %v2555_v18, 4 }
 0x104   : > { %1732 = vmatpush.bf16.msra.mxu3 %v6819_v34  ;;  %1749 = vmatpush.bf16.msra.mxu1 %v6907_v16  ;;  %v2226_v25 = vsel %vm674_vm4, %v2225_v57, %v2224_v42  ;;  %v2597_v47 = vsel %vm662_vm0, %v2596_v3, %v2551_v11  ;;  %v2557_v57 = vld [vmem:[%s6626_s27 + $0xd7] sm:$0x1]  ;;  %v2604_v42 = vrot.slane %v2556_v38, 3  ;;  %v2366_v11 = vld [vmem:[%s6626_s27 + $0x34] sm:$0x1] }
 0x105   : > { %v2228_v51 = vsel %vm677_vm5, %v2227_v52, %v2226_v25  ;;  %v2599_v9 = vsel %vm665_vm1, %v2598_v62, %v2597_v47  ;;  %v2367_v62 = vld [vmem:[%s6626_s27 + $0x54] sm:$0x1]  ;;  %v2395_v18 = vrot.slane %v2366_v11, 7  ;;  %v2730_v47 = vld [vmem:[%s6626_s27 + $0x39] sm:$0x1] }
 0x106   : > { %1623 = vmatpush.bf16.msra.mxu2 %v7149_v19  ;;  %1910 = vmatpush.bf16.msra.mxu0 %v6819_v34  ;;  %v7550_v6 = vsel %vm680_vm6, %v2229_v56, %v2228_v51  ;;  %v2601_v52 = vsel %vm668_vm2, %v2600_v37, %v2599_v9  ;;  %v2558_v56 = vld [vmem:[%s6626_s27 + $0xf7] sm:$0x1]  ;;  %v2606_v51 = vrot.slane %v2557_v57, 2  ;;  %v1670_v37 = vpop.permute.xlu1 %1669  ;;  %v2365_v9 = vld [vmem:[%s6626_s27 + $0x14] sm:$0x1]  ;;  %v2397_v57 = vrot.slane %v2367_v62, 6 }
 0x107   : > { %2381 = vrot.lane.b32.xlu1 %v7550_v6, %s6538_s30  ;;  %v2603_v25 = vsel %vm671_vm3, %v2602_v23, %v2601_v52  ;;  %v2608_v3 = vrot.slane %v2558_v56, 1  ;;  %v2368_v23 = vld [vmem:[%s6626_s27 + $0x74] sm:$0x1]  ;;  %v2774_v52 = vrot.slane %v2730_v47, 7  ;;  %v2396_v14 = vsel %vm662_vm0, %v2395_v18, %v2365_v9  ;;  %v2732_v9 = vld [vmem:[%s6626_s27 + $0x79] sm:$0x1] }
 0x108   : > { %1733 = vmatpush.bf16.msra.mxu3 %v6866_v53  ;;  %1750 = vmatpush.bf16.msra.mxu1 %v6930_v26  ;;  %v2605_v39 = vsel %vm674_vm4, %v2604_v42, %v2603_v25  ;;  %v1851_v42 = vpop.permute.xlu0 %1850  ;;  %v2369_v56 = vld [vmem:[%s6626_s27 + $0x94] sm:$0x1]  ;;  %v2399_v25 = vrot.slane %v2368_v23, 5 }
 0x109   : > { %v2607_v32 = vsel %vm677_vm5, %v2606_v51, %v2605_v39  ;;  %v2729_v51 = vld [vmem:[%s6626_s27 + $0x19] sm:$0x1]  ;;  %v2370_v39 = vld [vmem:[%s6626_s27 + $0xb4] sm:$0x1]  ;;  %v2401_v11 = vrot.slane %v2369_v56, 4 }
 0x10a   : > { %1624 = vmatpush.bf16.msra.mxu2 %v7162_v29  ;;  %1911 = vmatpush.bf16.msra.mxu0 %v6866_v53  ;;  %v2609_v38 = vsel %vm680_vm6, %v2608_v3, %v2607_v32  ;;  %v2398_v3 = vsel %vm665_vm1, %v2397_v57, %v2396_v14  ;;  %v2731_v32 = vld [vmem:[%s6626_s27 + $0x59] sm:$0x1]  ;;  %v2371_v62 = vld [vmem:[%s6626_s27 + $0xd4] sm:$0x1]  ;;  %v2403_v47 = vrot.slane %v2370_v39, 3  ;;  %v2778_v14 = vrot.slane %v2732_v9, 5 }
 0x10b   : > { %v2400_v18 = vsel %vm668_vm2, %v2399_v25, %v2398_v3  ;;  %v2776_v23 = vrot.slane %v2731_v32, 6  ;;  %v2372_v56 = vld [vmem:[%s6626_s27 + $0xf4] sm:$0x1]  ;;  %v2734_v39 = vld [vmem:[%s6626_s27 + $0xb9] sm:$0x1]  ;;  %2740 = vrot.lane.b32.xlu0 %v2609_v38, %s10382_s28 }
 0x10c   : > { %1734 = vmatpush.bf16.msra.mxu3 %v6891_v7  ;;  %1751 = vmatpush.bf16.msra.mxu1 %v10610_v63  ;;  %v2407_v25 = vrot.slane %v2372_v56, 1  ;;  %v2735_v3 = vld [vmem:[%s6626_s27 + $0xd9] sm:$0x1]  ;;  %v2544_v9 = vld [vmem:[%s6626_s27 + $0x36] sm:$0x1] }
 0x10d   : > { %v2736_v32 = vld [vmem:[%s6626_s27 + $0xf9] sm:$0x1] }
 0x10e   : > { %1625 = vmatpush.bf16.msra.mxu2 %v7179_v30  ;;  %1912 = vmatpush.bf16.msra.mxu0 %v6891_v7 }
 0x10f   : > { %5712 = vmatmul.msk.bf16.vlgmr.msra.gmra.mxu1 %vm808_vm8, %v7506_v10  ;;  %2610 = vrot.lane.b32.xlu1 %v2609_v38, %s6537_s29 }
 0x110   : > { %1783 = vmatpush.bf16.msrb.mxu1 %v7008_v60  ;;  %1735 = vmatpush.bf16.msra.mxu3 %v6946_v33 }
 0x111   : > { %5711 = vmatmul.msk.bf16.vlgmr.msra.gmra.mxu2 %vm808_vm8, %v7433_v46  ;;  %v1901_v46 = vsel %vm808_vm8, %v7423_v2, %v1848_v31  ;;  %v2775_v2 = vsel %vm662_vm0, %v2774_v52, %v2729_v51  ;;  %v1723_v31 = vsel %vm808_vm8, %v7417_v61, %v1670_v37  ;;  %v2402_v52 = vsel %vm671_vm3, %v2401_v11, %v2400_v18  ;;  %v2733_v37 = vld [vmem:[%s6626_s27 + $0x99] sm:$0x1] }
 0x112   : > { %1757 = vmatpush.bf16.msrb.mxu2 %v6837_v40  ;;  %1913 = vmatpush.bf16.msra.mxu0 %v6946_v33  ;;  %v1902_v57 = vsel %vm810_vm9, %v1901_v46, %v1851_v42  ;;  %v2405_v61 = vrot.slane %v2371_v62, 2  ;;  %v2404_v51 = vsel %vm674_vm4, %v2403_v47, %v2402_v52  ;;  %v2777_v46 = vsel %vm665_vm1, %v2776_v23, %v2775_v2 }
 0x113   : > { %v2780_v42 = vrot.slane %v2733_v37, 4  ;;  %v2779_v62 = vsel %vm668_vm2, %v2778_v14, %v2777_v46  ;;  %v2782_v18 = vrot.slane %v2734_v39, 3  ;;  %v2784_v47 = vrot.slane %v2735_v3, 2  ;;  %v2722_v37 = vld [vmem:[%s6626_s27 + $0x38] sm:$0x1] }
 0x114   : > { %1784 = vmatpush.bf16.msrb.mxu1 %v7037_v21  ;;  %1736 = vmatpush.bf16.msra.mxu3 %v7005_v59  ;;  %v2406_v11 = vsel %vm677_vm5, %v2405_v61, %v2404_v51  ;;  %v1724_v56 = vsel %vm810_vm9, %v1723_v31, %v7541_v15  ;;  %v2786_v52 = vrot.slane %v2736_v32, 1  ;;  %v2545_v61 = vld [vmem:[%s6626_s27 + $0x56] sm:$0x1]  ;;  %v7631_v51 = vpack.c.bf16 %v1902_v57, %v1902_v57  ;;  %v2721_v46 = vld [vmem:[%s6626_s27 + $0x18] sm:$0x1] }
 0x115   : > { %v7625_v2 = vsel %vm680_vm6, %v2407_v25, %v2406_v11  ;;  %v2781_v23 = vsel %vm671_vm3, %v2780_v42, %v2779_v62  ;;  %v2543_v31 = vld [vmem:[%s6626_s27 + $0x16] sm:$0x1]  ;;  %v2573_v25 = vrot.slane %v2544_v9, 7  ;;  %v2575_v39 = vrot.slane %v2545_v61, 6  ;;  %v2723_v9 = vld [vmem:[%s6626_s27 + $0x58] sm:$0x1] }
 0x116   : > { %1758 = vmatpush.bf16.msrb.mxu2 %v6858_v49  ;;  %1914 = vmatpush.bf16.msra.mxu0 %v7005_v59  ;;  %10614 = vst [vmem:[#allocation4_spill] sm:$0xff] %v7625_v2  ;;  %v2783_v15 = vsel %vm674_vm4, %v2782_v18, %v2781_v23  ;;  %v2546_v14 = vld [vmem:[%s6626_s27 + $0x76] sm:$0x1]  ;;  %v2751_v42 = vrot.slane %v2722_v37, 7 }
 0x117   : > { %2559 = vrot.lane.b32.xlu2 %v7625_v2, %s6538_s30  ;;  %v2785_v38 = vsel %vm677_vm5, %v2784_v47, %v2783_v15  ;;  %v2547_v57 = vld [vmem:[%s6626_s27 + $0x96] sm:$0x1]  ;;  %v2577_v3 = vrot.slane %v2546_v14, 5  ;;  %v2574_v62 = vsel %vm662_vm0, %v2573_v25, %v2543_v31  ;;  %v7651_v47 = vpack.c.bf16 %v1724_v56, %v1724_v56  ;;  %v2725_v25 = vld [vmem:[%s6626_s27 + $0x98] sm:$0x1] }
 0x118   : > { %1785 = vmatpush.bf16.msrb.mxu1 %v7077_v50  ;;  %1737 = vmatpush.bf16.msra.mxu3 %v7034_v20  ;;  %v7646_v11 = vsel %vm680_vm6, %v2786_v52, %v2785_v38  ;;  %v2548_v32 = vld [vmem:[%s6626_s27 + $0xb6] sm:$0x1]  ;;  %v2579_v18 = vrot.slane %v2547_v57, 4  ;;  %v2576_v61 = vsel %vm665_vm1, %v2575_v39, %v2574_v62  ;;  %v2724_v52 = vld [vmem:[%s6626_s27 + $0x78] sm:$0x1]  ;;  %v2752_v15 = vsel %vm662_vm0, %v2751_v42, %v2721_v46 }
 0x119   : > { %v2549_v23 = vld [vmem:[%s6626_s27 + $0xd6] sm:$0x1]  ;;  %v2581_v37 = vrot.slane %v2548_v32, 3  ;;  %2788 = vrot.lane.b32.xlu1 %v7646_v11, %s6537_s29  ;;  %v2578_v31 = vsel %vm668_vm2, %v2577_v3, %v2576_v61  ;;  %v2753_v38 = vrot.slane %v2723_v9, 6  ;;  %v2726_v46 = vld [vmem:[%s6626_s27 + $0xb8] sm:$0x1] }
 0x11a   : > { %1759 = vmatpush.bf16.msrb.mxu2 %v6909_v17  ;;  %1915 = vmatpush.bf16.msra.mxu0 %v7034_v20  ;;  %v2550_v56 = vld [vmem:[%s6626_s27 + $0xf6] sm:$0x1]  ;;  %v2583_v14 = vrot.slane %v2549_v23, 2  ;;  %v2580_v39 = vsel %vm671_vm3, %v2579_v18, %v2578_v31  ;;  %v2727_v42 = vld [vmem:[%s6626_s27 + $0xd8] sm:$0x1]  ;;  %v2755_v32 = vrot.slane %v2724_v52, 5 }
 0x11b   : > { %v2585_v57 = vrot.slane %v2550_v56, 1  ;;  %v2582_v62 = vsel %vm674_vm4, %v2581_v37, %v2580_v39  ;;  %v2728_v2 = vld [vmem:[%s6626_s27 + $0xf8] sm:$0x1]  ;;  %v2754_v3 = vsel %vm665_vm1, %v2753_v38, %v2752_v15  ;;  %v2757_v9 = vrot.slane %v2725_v25, 4  ;;  %v2900_v31 = vld [vmem:[%s6626_s27 + $0x3a] sm:$0x1] }
 0x11c   : > { %1786 = vmatpush.bf16.msrb.mxu1 %v7102_v24  ;;  %1738 = vmatpush.bf16.msra.mxu3 %v10613_v43  ;;  %v2759_v23 = vrot.slane %v2726_v46, 3  ;;  %v2584_v18 = vsel %vm677_vm5, %v2583_v14, %v2582_v62  ;;  %v2756_v61 = vsel %vm668_vm2, %v2755_v32, %v2754_v3  ;;  %v2761_v52 = vrot.slane %v2727_v42, 2  ;;  %v1032_v25 = vpop.f32.mrf.mxu1  ;;  %v2901_v38 = vld [vmem:[%s6626_s27 + $0x5a] sm:$0x1] }
 0x11d   : > { %v2763_v56 = vrot.slane %v2728_v2, 1  ;;  %v7679_v37 = vsel %vm680_vm6, %v2585_v57, %v2584_v18  ;;  %v2758_v15 = vsel %vm671_vm3, %v2757_v9, %v2756_v61  ;;  %v2929_v39 = vrot.slane %v2900_v31, 7  ;;  %v2899_v46 = vld [vmem:[%s6626_s27 + $0x1a] sm:$0x1] }
 0x11e   : > { %1760 = vmatpush.bf16.msrb.mxu2 %v6932_v27  ;;  %1916 = vmatpush.bf16.msra.mxu0 %v10613_v43  ;;  %v2760_v14 = vsel %vm674_vm4, %v2759_v23, %v2758_v15  ;;  %v1019_v2 = vpop.f32.mrf.mxu0  ;;  %v2902_v42 = vld [vmem:[%s6626_s27 + $0x7a] sm:$0x1]  ;;  %v2931_v32 = vrot.slane %v2901_v38, 6 }
 0x11f   : > { %1739 = vmatmul.bf16.vlgmr.msra.gmra.mxu3 %v7651_v47  ;;  %2737 = vrot.lane.b32.xlu2 %v7679_v37, %s6538_s30  ;;  %v2762_v57 = vsel %vm677_vm5, %v2761_v52, %v2760_v14  ;;  %v7694_v62 = vadd.f32 %v1032_v25, %v1019_v2  ;;  %v2903_v9 = vld [vmem:[%s6626_s27 + $0x9a] sm:$0x1]  ;;  %v2933_v23 = vrot.slane %v2902_v42, 5  ;;  %v2930_v61 = vsel %vm662_vm0, %v2929_v39, %v2899_v46  ;;  %v2908_v42 = vld [vmem:[%s6626_s27 + $0x3b] sm:$0x1] }
 0x120   : > { %1800 = vmatpush.bf16.msrb.mxu3 %v7125_v5  ;;  %1787 = vmatpush.bf16.msrb.mxu1 %v7136_v12  ;;  %v7697_v3 = vsel %vm680_vm6, %v2763_v56, %v2762_v57  ;;  %v2904_v18 = vld [vmem:[%s6626_s27 + $0xba] sm:$0x1]  ;;  %v2935_v52 = vrot.slane %v2903_v9, 4  ;;  %v2932_v31 = vsel %vm665_vm1, %v2931_v32, %v2930_v61  ;;  %v1899_v56 = vpop.permute.xlu1 %1898  ;;  %v2952_v61 = vrot.slane %v2908_v42, 7 }
 0x121   : > { %1917 = vmatmul.bf16.vlgmr.msra.gmra.mxu0 %v7631_v51  ;;  %10615 = vst [vmem:[#allocation2_spill] sm:$0xff] %v7694_v62  ;;  %2915 = vrot.lane.b32.xlu1 %v7697_v3, %s6538_s30  ;;  %v2905_v15 = vld [vmem:[%s6626_s27 + $0xda] sm:$0x1]  ;;  %v2937_v25 = vrot.slane %v2904_v18, 3  ;;  %v2934_v38 = vsel %vm668_vm2, %v2933_v23, %v2932_v31  ;;  %v7714_v57 = vsel %vm806_vm7, %v7359_v44, %v1899_v56  ;;  %v2909_v18 = vld [vmem:[%s6626_s27 + $0x5b] sm:$0x1] }
 0x122   : > { %1761 = vmatpush.bf16.msrb.mxu2 %v6993_v54  ;;  %1978 = vmatpush.bf16.msrb.mxu0 %v7125_v5  ;;  %v2906_v14 = vld [vmem:[%s6626_s27 + $0xfa] sm:$0x1]  ;;  %v2939_v2 = vrot.slane %v2905_v15, 2  ;;  %v1058_v39 = vpop.f32.mrf.mxu3  ;;  %v2936_v46 = vsel %vm671_vm3, %v2935_v52, %v2934_v38  ;;  %v2907_v31 = vld [vmem:[%s6626_s27 + $0x1b] sm:$0x1]  ;;  %v2954_v38 = vrot.slane %v2909_v18, 6 }
 0x123   : > { %v2938_v9 = vsel %vm674_vm4, %v2937_v25, %v2936_v46  ;;  %v2941_v23 = vrot.slane %v2906_v14, 1  ;;  %v2910_v56 = vld [vmem:[%s6626_s27 + $0x7b] sm:$0x1]  ;;  %v7732_v14 = vpack.c.bf16 %v7714_v57, %v7714_v57  ;;  %v2953_v46 = vsel %vm662_vm0, %v2952_v61, %v2907_v31 }
 0x124   : > { %1801 = vmatpush.bf16.msrb.mxu3 %v7149_v19  ;;  %1788 = vmatpush.bf16.msrb.mxu1 %v7152_v22  ;;  %v1045_v32 = vpop.f32.mrf.mxu2  ;;  %v1034_v52 = vpop.f32.mrf.mxu1  ;;  %v2940_v15 = vsel %vm677_vm5, %v2939_v2, %v2938_v9  ;;  %v2956_v42 = vrot.slane %v2910_v56, 5  ;;  %v2912_v2 = vld [vmem:[%s6626_s27 + $0xbb] sm:$0x1] }
 0x125   : > { %v7724_v44 = vadd.f32 %v1058_v39, %v1045_v32  ;;  %v2911_v39 = vld [vmem:[%s6626_s27 + $0x9b] sm:$0x1]  ;;  %v2955_v32 = vsel %vm665_vm1, %v2954_v38, %v2953_v46  ;;  %v7744_v18 = vsel %vm680_vm6, %v2941_v23, %v2940_v15 }
 0x126   : > { %1762 = vmatpush.bf16.msrb.mxu2 %v7027_v13  ;;  %1979 = vmatpush.bf16.msrb.mxu0 %v7149_v19  ;;  %v1021_v25 = vpop.f32.mrf.mxu0  ;;  %v2958_v9 = vrot.slane %v2911_v39, 4  ;;  %v2913_v52 = vld [vmem:[%s6626_s27 + $0xdb] sm:$0x1]  ;;  %v3264_v39 = vld [vmem:[%s6626_s27 + $0x3f] sm:$0x1] }
 0x127   : > { %10616 = vst [vmem:[#allocation3_spill] sm:$0xff] %v7724_v44  ;;  %2918 = vrot.lane.b32.xlu2 %v7646_v11, %s10382_s28  ;;  %v2957_v11 = vsel %vm668_vm2, %v2956_v42, %v2955_v32  ;;  %v2960_v25 = vrot.slane %v2912_v2, 3  ;;  %v2914_v61 = vld [vmem:[%s6626_s27 + $0xfb] sm:$0x1]  ;;  %v2962_v56 = vrot.slane %v2913_v52, 2  ;;  %v3308_v2 = vrot.slane %v3264_v39, 7 }
 0x128   : > { %1802 = vmatpush.bf16.msrb.mxu3 %v7162_v29  ;;  %1789 = vmatpush.bf16.msrb.mxu1 %v7171_v36  ;;  %v2959_v31 = vsel %vm671_vm3, %v2958_v9, %v2957_v11  ;;  %v2964_v15 = vrot.slane %v2914_v61, 1  ;;  %v3265_v42 = vld [vmem:[%s6626_s27 + $0x5f] sm:$0x1] }
 0x129   : > { %v2961_v23 = vsel %vm674_vm4, %v2960_v25, %v2959_v31  ;;  %3093 = vrot.lane.b32.xlu1 %v7744_v18, %s6538_s30  ;;  %v3263_v9 = vld [vmem:[%s6626_s27 + $0x1f] sm:$0x1]  ;;  %v3310_v11 = vrot.slane %v3265_v42, 6 }
 0x12a   : > { %1763 = vmatpush.bf16.msrb.mxu2 %v7070_v45  ;;  %1980 = vmatpush.bf16.msrb.mxu0 %v7162_v29  ;;  %v1060_v38 = vpop.f32.mrf.mxu3  ;;  %v3266_v52 = vld [vmem:[%s6626_s27 + $0x7f] sm:$0x1]  ;;  %v3309_v31 = vsel %vm662_vm0, %v3308_v2, %v3263_v9 }
 0x12b   : > { %v3267_v61 = vld [vmem:[%s6626_s27 + $0x9f] sm:$0x1] }
 0x12c   : > { %1803 = vmatpush.bf16.msrb.mxu3 %v7179_v30  ;;  %1790 = vmatpush.bf16.msrb.mxu1 %v7191_v55  ;;  %v1071_v32 = vpop.f32.mrf.mxu1  ;;  %v3314_v38 = vrot.slane %v3267_v61, 4 }
 0x12e   : > { %1764 = vmatpush.bf16.msrb.mxu2 %v7098_v1  ;;  %1981 = vmatpush.bf16.msrb.mxu0 %v7179_v30  ;;  %v1206_v25 = vpop.f32.mrf.mxu0 }
 0x12f   : > { %1791 = vmatmul.bf16.vlgmr.msrb.gmra.mxu1 %v7651_v47  ;;  %5714 = vmatmul.msk.bf16.vlgmr.msrb.gmra.mxu3 %vm808_vm8, %v7506_v10  ;;  %v1047_v10 = vpop.f32.mrf.mxu2 }
 0x130   : > { %1935 = vmatpush.bf16.msra.mxu3 %v6837_v40  ;;  %1952 = vmatpush.bf16.msra.mxu1 %v6964_v41 }
 0x131   : > { %1765 = vmatmul.bf16.vlgmr.msrb.gmra.mxu2 %v7651_v47  ;;  %5717 = vmatmul.msk.bf16.vlgmr.msrb.gmra.mxu0 %vm808_vm8, %v7732_v14  ;;  %v2963_v47 = vsel %vm677_vm5, %v2962_v56, %v2961_v23  ;;  %v3312_v56 = vrot.slane %v3266_v52, 5  ;;  %v3268_v23 = vld [vmem:[%s6626_s27 + $0xbf] sm:$0x1] }
 0x132   : > { %1926 = vmatpush.bf16.msra.mxu2 %v6856_v48  ;;  %2113 = vmatpush.bf16.msra.mxu0 %v6837_v40  ;;  %v2965_v46 = vsel %vm680_vm6, %v2964_v15, %v2963_v47  ;;  %v3311_v15 = vsel %vm665_vm1, %v3310_v11, %v3309_v31  ;;  %v3269_v47 = vld [vmem:[%s6626_s27 + $0xdf] sm:$0x1]  ;;  %v3316_v10 = vrot.slane %v3268_v23, 3  ;;  %v1084_v11 = vpop.f32.mrf.mxu3 }
 0x133   : > { %2966 = vrot.lane.b32.xlu0 %v2965_v46, %s6537_s29  ;;  %3096 = vrot.lane.b32.xlu2 %v2965_v46, %s10382_s28  ;;  %v3313_v39 = vsel %vm668_vm2, %v3312_v56, %v3311_v15  ;;  %v3270_v46 = vld [vmem:[%s6626_s27 + $0xff] sm:$0x1]  ;;  %v3318_v2 = vrot.slane %v3269_v47, 2  ;;  %v7789_v56 = vadd.f32 %v1084_v11, %v1071_v32 }
 0x134   : > { %1936 = vmatpush.bf16.msra.mxu3 %v6858_v49  ;;  %1953 = vmatpush.bf16.msra.mxu1 %v7013_v0  ;;  %v3315_v42 = vsel %vm671_vm3, %v3314_v38, %v3313_v39  ;;  %v3320_v52 = vrot.slane %v3270_v46, 1  ;;  %v1073_v38 = vpop.f32.mrf.mxu1  ;;  %v2026_v39 = vpop.permute.xlu2 %2025  ;;  %v3086_v46 = vld [vmem:[%s6626_s27 + $0x3d] sm:$0x1] }
 0x135   : > { %v3317_v9 = vsel %vm674_vm4, %v3316_v10, %v3315_v42  ;;  %v2079_v32 = vsel %vm808_vm8, %v7493_v4, %v2026_v39 }
 0x136   : > { %1927 = vmatpush.bf16.msra.mxu2 %v6907_v16  ;;  %2114 = vmatpush.bf16.msra.mxu0 %v6858_v49  ;;  %v3319_v61 = vsel %vm677_vm5, %v3318_v2, %v3317_v9  ;;  %v1208_v47 = vpop.f32.mrf.mxu0  ;;  %v3087_v2 = vld [vmem:[%s6626_s27 + $0x5d] sm:$0x1]  ;;  %v3130_v9 = vrot.slane %v3086_v46, 7 }
 0x137   : > { %v1219_v31 = vpop.f32.mrf.mxu2  ;;  %v3321_v23 = vsel %vm680_vm6, %v3320_v52, %v3319_v61  ;;  %v3088_v52 = vld [vmem:[%s6626_s27 + $0x7d] sm:$0x1]  ;;  %v3132_v11 = vrot.slane %v3087_v2, 6 }
 0x138   : > { %1937 = vmatpush.bf16.msra.mxu3 %v6909_v17  ;;  %1954 = vmatpush.bf16.msra.mxu1 %v7051_v35  ;;  %v7794_v15 = vadd.f32 %v1219_v31, %v1206_v25  ;;  %v2029_v25 = vpop.permute.xlu0 %2028  ;;  %v3089_v61 = vld [vmem:[%s6626_s27 + $0x9d] sm:$0x1] }
 0x139   : > { %v2080_v4 = vsel %vm810_vm9, %v2079_v32, %v2029_v25  ;;  %v3090_v47 = vld [vmem:[%s6626_s27 + $0xbd] sm:$0x1] }
 0x13a   : > { %1928 = vmatpush.bf16.msra.mxu2 %v6930_v26  ;;  %2115 = vmatpush.bf16.msra.mxu0 %v6909_v17  ;;  %10617 = vst [vmem:[#allocation5_spill] sm:$0xff] %v7794_v15  ;;  %v1086_v10 = vpop.f32.mrf.mxu3  ;;  %v3138_v32 = vrot.slane %v3090_v47, 3  ;;  %v7826_v25 = vpack.c.bf16 %v2080_v4, %v2080_v4 }
 0x13b   : > { %3322 = vrot.lane.b32.xlu2 %v3321_v23, %s6537_s29  ;;  %v3134_v23 = vrot.slane %v3088_v52, 5  ;;  %v3136_v10 = vrot.slane %v3089_v61, 4 }
 0x13c   : > { %1938 = vmatpush.bf16.msra.mxu3 %v6932_v27  ;;  %1955 = vmatpush.bf16.msra.mxu1 %v7087_v58  ;;  %v1245_v46 = vpop.f32.mrf.mxu1 }
 0x13e   : > { %1929 = vmatpush.bf16.msra.mxu2 %v10610_v63  ;;  %2116 = vmatpush.bf16.msra.mxu0 %v6932_v27  ;;  %v7818_v38 = vpop.f32.mrf.mxu0 }
 0x13f   : > { %5716 = vmatmul.msk.bf16.vlgmr.msra.gmra.mxu1 %vm808_vm8, %v7732_v14  ;;  %v1221_v42 = vpop.f32.mrf.mxu2 }
 0x140   : > { %2087 = vmatpush.bf16.msrb.mxu1 %v6809_v28  ;;  %1939 = vmatpush.bf16.msra.mxu3 %v6993_v54  ;;  %v3091_v42 = vld [vmem:[%s6626_s27 + $0xdd] sm:$0x1] }
 0x141   : > { %5715 = vmatmul.msk.bf16.vlgmr.msra.gmra.mxu2 %vm808_vm8, %v7732_v14  ;;  %v3085_v14 = vld [vmem:[%s6626_s27 + $0x1d] sm:$0x1]  ;;  %v3140_v52 = vrot.slane %v3091_v42, 2 }
 0x142   : > { %1961 = vmatpush.bf16.msrb.mxu2 %v7008_v60  ;;  %2117 = vmatpush.bf16.msra.mxu0 %v6993_v54  ;;  %v3131_v31 = vsel %vm662_vm0, %v3130_v9, %v3085_v14  ;;  %v3092_v9 = vld [vmem:[%s6626_s27 + $0xfd] sm:$0x1]  ;;  %v1232_v47 = vpop.f32.mrf.mxu3 }
 0x143   : > { %v3133_v39 = vsel %vm665_vm1, %v3132_v11, %v3131_v31  ;;  %v3142_v61 = vrot.slane %v3092_v9, 1 }
 0x144   : > { %2088 = vmatpush.bf16.msrb.mxu1 %v6819_v34  ;;  %1940 = vmatpush.bf16.msra.mxu3 %v7027_v13  ;;  %v3135_v2 = vsel %vm668_vm2, %v3134_v23, %v3133_v39  ;;  %v7847_v39 = vadd.f32 %v1245_v46, %v1232_v47  ;;  %v1247_v42 = vpop.f32.mrf.mxu1  ;;  %v2077_v46 = vpop.permute.xlu1 %2076 }
 0x145   : > { %v3137_v14 = vsel %vm671_vm3, %v3136_v10, %v3135_v2  ;;  %v2255_v2 = vpop.permute.xlu0 %2254 }
 0x146   : > { %1962 = vmatpush.bf16.msrb.mxu2 %v7037_v21  ;;  %2118 = vmatpush.bf16.msra.mxu0 %v7027_v13  ;;  %v3139_v11 = vsel %vm674_vm4, %v3138_v32, %v3137_v14  ;;  %v1412_v10 = vpop.f32.mrf.mxu0  ;;  %v7859_v14 = vsel %vm806_vm7, %v7310_v8, %v2077_v46 }
 0x147   : > { %v3141_v4 = vsel %vm677_vm5, %v3140_v52, %v3139_v11  ;;  %v1258_v31 = vpop.f32.mrf.mxu2  ;;  %1279 = vrot.lane.b32.xlu1 %v7847_v39, %s6539_s13  ;;  %v7865_v52 = vsel %vm806_vm7, %v7550_v6, %v2255_v2  ;;  %v2083_v8 = vpack.c.bf16 %v7859_v14, %v7859_v14 }
 0x148   : > { %2089 = vmatpush.bf16.msrb.mxu1 %v6866_v53  ;;  %1941 = vmatpush.bf16.msra.mxu3 %v7070_v45  ;;  %v7840_v23 = vsel %vm680_vm6, %v3142_v61, %v3141_v4  ;;  %v7876_v61 = vpack.c.bf16 %v7865_v52, %v7865_v52 }
 0x149   : > { %3144 = vrot.lane.b32.xlu0 %v7840_v23, %s6537_s29  ;;  %s6540_s29 = smov 88  }
 0x14a   : > { %1963 = vmatpush.bf16.msrb.mxu2 %v7077_v50  ;;  %2119 = vmatpush.bf16.msra.mxu0 %v7070_v45  ;;  %v1234_v9 = vpop.f32.mrf.mxu3 }
 0x14c   : > { %2090 = vmatpush.bf16.msrb.mxu1 %v6891_v7  ;;  %1942 = vmatpush.bf16.msra.mxu3 %v7098_v1  ;;  %v1384_v11 = vpop.f32.mrf.mxu1  ;;  %v2204_v9 = vpop.permute.xlu1 %2203 }
 0x14e   : > { %1964 = vmatpush.bf16.msrb.mxu2 %v7102_v24  ;;  %2120 = vmatpush.bf16.msra.mxu0 %v7098_v1  ;;  %v7878_v6 = vpop.f32.mrf.mxu0 }
 0x14f   : > { %1943 = vmatmul.bf16.vlgmr.msra.gmra.mxu3 %v7631_v51  ;;  %v1260_v32 = vpop.f32.mrf.mxu2 }
 0x150   : > { %2104 = vmatpush.bf16.msrb.mxu3 %v6856_v48  ;;  %2091 = vmatpush.bf16.msrb.mxu1 %v6946_v33 }
 0x151   : > { %2121 = vmatmul.bf16.vlgmr.msra.gmra.mxu0 %v7826_v25 }
 0x152   : > { %1965 = vmatpush.bf16.msrb.mxu2 %v7136_v12  ;;  %2282 = vmatpush.bf16.msrb.mxu0 %v6856_v48  ;;  %v1397_v47 = vpop.f32.mrf.mxu3 }
 0x153   : > { %v7892_v10 = vadd.f32 %v1397_v47, %v1384_v11  ;;  %v2257_v11 = vsel %vm808_vm8, %v7714_v57, %v2204_v9 }
 0x154   : > { %2105 = vmatpush.bf16.msrb.mxu3 %v6907_v16  ;;  %2092 = vmatpush.bf16.msrb.mxu1 %v7005_v59  ;;  %v1386_v42 = vpop.f32.mrf.mxu1 }
 0x156   : > { %1966 = vmatpush.bf16.msrb.mxu2 %v7152_v22  ;;  %2283 = vmatpush.bf16.msrb.mxu0 %v6907_v16  ;;  %v1577_v2 = vpop.f32.mrf.mxu0 }
 0x158   : > { %2106 = vmatpush.bf16.msrb.mxu3 %v6930_v26  ;;  %2093 = vmatpush.bf16.msrb.mxu1 %v7034_v20 }
 0x15a   : > { %1967 = vmatpush.bf16.msrb.mxu2 %v7171_v36  ;;  %2284 = vmatpush.bf16.msrb.mxu0 %v6930_v26  ;;  %v1399_v32 = vpop.f32.mrf.mxu3 }
 0x15c   : > { %2107 = vmatpush.bf16.msrb.mxu3 %v10610_v63  ;;  %2094 = vmatpush.bf16.msrb.mxu1 %v10613_v43  ;;  %v1449_v46 = vpop.f32.mrf.mxu1 }
 0x15e   : > { %1968 = vmatpush.bf16.msrb.mxu2 %v7191_v55  ;;  %2285 = vmatpush.bf16.msrb.mxu0 %v10610_v63 }
 0x15f   : > { %2095 = vmatmul.bf16.vlgmr.msrb.gmra.mxu1 %v7826_v25  ;;  %5718 = vmatmul.msk.bf16.vlgmr.msrb.gmra.mxu3 %vm808_vm8, %v2083_v8 }
 0x160   : > { %2139 = vmatpush.bf16.msra.mxu3 %v7008_v60  ;;  %2156 = vmatpush.bf16.msra.mxu1 %v7125_v5 }
 0x161   : > { %1969 = vmatmul.bf16.vlgmr.msrb.gmra.mxu2 %v7631_v51  ;;  %5721 = vmatmul.msk.bf16.vlgmr.msrb.gmra.mxu0 %vm808_vm8, %v7876_v61  ;;  %v1271_v51 = vpop.f32.mrf.mxu2 }
 0x162   : > { %2130 = vmatpush.bf16.msra.mxu2 %v6964_v41  ;;  %2317 = vmatpush.bf16.msra.mxu0 %v7008_v60  ;;  %v1272_v4 = vadd.f32 %v1271_v51, %v1258_v31  ;;  %v2207_v51 = vpop.permute.xlu2 %2206 }
 0x163   : > { %v2258_v42 = vsel %vm810_vm9, %v2257_v11, %v2207_v51 }
 0x164   : > { %2140 = vmatpush.bf16.msra.mxu3 %v7037_v21  ;;  %2157 = vmatpush.bf16.msra.mxu1 %v7149_v19  ;;  %v1451_v2 = vpop.f32.mrf.mxu1 }
 0x165   : > { %1285 = vrot.lane.b32.xlu2 %v1272_v4, %s6539_s13 }
 0x166   : > { %2131 = vmatpush.bf16.msra.mxu2 %v7013_v0  ;;  %2318 = vmatpush.bf16.msra.mxu0 %v7037_v21 }
 0x167   : > { %v2433_v11 = vpop.permute.xlu0 %2432 }
 0x168   : > { %2141 = vmatpush.bf16.msra.mxu3 %v7077_v50  ;;  %2158 = vmatpush.bf16.msra.mxu1 %v7162_v29 }
 0x169   : > { %v1273_v31 = vpop.f32.mrf.mxu2 }
 0x16a   : > { %2132 = vmatpush.bf16.msra.mxu2 %v7051_v35  ;;  %2319 = vmatpush.bf16.msra.mxu0 %v7077_v50 }
 0x16c   : > { %2142 = vmatpush.bf16.msra.mxu3 %v7102_v24  ;;  %2159 = vmatpush.bf16.msra.mxu1 %v7179_v30 }
 0x16e   : > { %2133 = vmatpush.bf16.msra.mxu2 %v7087_v58  ;;  %2320 = vmatpush.bf16.msra.mxu0 %v7102_v24  ;;  %v7923_v57 = vpop.f32.mrf.mxu0 }
 0x16f   : > { %5720 = vmatmul.msk.bf16.vlgmr.msra.gmra.mxu1 %vm808_vm8, %v2083_v8 }
 0x170   : > { %2291 = vmatpush.bf16.msrb.mxu1 %v6837_v40  ;;  %2143 = vmatpush.bf16.msra.mxu3 %v7136_v12 }
 0x171   : > { %5719 = vmatmul.msk.bf16.vlgmr.msra.gmra.mxu2 %vm808_vm8, %v2083_v8  ;;  %v1423_v4 = vpop.f32.mrf.mxu2  ;;  %v2260_v8 = vpack.c.bf16 %v2258_v42, %v2258_v42 }
 0x172   : > { %2265 = vmatpush.bf16.msrb.mxu2 %v6809_v28  ;;  %2321 = vmatpush.bf16.msra.mxu0 %v7136_v12  ;;  %v7918_v47 = vadd.f32 %v1423_v4, %v7818_v38  ;;  %v1436_v31 = vpop.f32.mrf.mxu3  ;;  %v10619_v4 = vld [vmem:[#allocation4_spill] sm:$0xff] }
 0x173   : > { %v1450_v32 = vadd.f32 %v1449_v46, %v1436_v31  ;;  %v7950_v42 = vsel %vm806_vm7, %v10619_v4, %v2433_v11 }
 0x174   : > { %2292 = vmatpush.bf16.msrb.mxu1 %v6858_v49  ;;  %2144 = vmatpush.bf16.msra.mxu3 %v7152_v22  ;;  %10618 = vst [vmem:[#allocation6_spill] sm:$0xff] %v7918_v47 }
 0x175   : > { %1457 = vrot.lane.b32.xlu0 %v7918_v47, %s6539_s13  ;;  %1463 = vrot.lane.b32.xlu1 %v1450_v32, %s6539_s13  ;;  %v7961_v32 = vpack.c.bf16 %v7950_v42, %v7950_v42 }
 0x176   : > { %2266 = vmatpush.bf16.msrb.mxu2 %v6819_v34  ;;  %2322 = vmatpush.bf16.msra.mxu0 %v7152_v22  ;;  %v1616_v9 = vpop.f32.mrf.mxu0 }
 0x178   : > { %2293 = vmatpush.bf16.msrb.mxu1 %v6909_v17  ;;  %2145 = vmatpush.bf16.msra.mxu3 %v7171_v36 }
 0x179   : > { %v1425_v38 = vpop.f32.mrf.mxu2  ;;  %v2382_v51 = vpop.permute.xlu1 %2381 }
 0x17a   : > { %2267 = vmatpush.bf16.msrb.mxu2 %v6866_v53  ;;  %2323 = vmatpush.bf16.msra.mxu0 %v7171_v36  ;;  %v1438_v46 = vpop.f32.mrf.mxu3 }
 0x17c   : > { %2294 = vmatpush.bf16.msrb.mxu1 %v6932_v27  ;;  %2146 = vmatpush.bf16.msra.mxu3 %v7191_v55  ;;  %v1588_v2 = vpop.f32.mrf.mxu1 }
 0x17e   : > { %2268 = vmatpush.bf16.msrb.mxu2 %v6891_v7  ;;  %2324 = vmatpush.bf16.msra.mxu0 %v7191_v55  ;;  %v7955_v38 = vpop.f32.mrf.mxu0 }
 0x17f   : > { %2147 = vmatmul.bf16.vlgmr.msra.gmra.mxu3 %v7826_v25  ;;  %v7940_v25 = vpop.permute.xlu2 %2384 }
 0x180   : > { %2308 = vmatpush.bf16.msrb.mxu3 %v6964_v41  ;;  %2295 = vmatpush.bf16.msrb.mxu1 %v6993_v54 }
 0x181   : > { %2325 = vmatmul.bf16.vlgmr.msra.gmra.mxu0 %v2260_v8  ;;  %v7974_v46 = vpop.permute.xlu1 %2610 }
 0x182   : > { %2269 = vmatpush.bf16.msrb.mxu2 %v6946_v33  ;;  %2486 = vmatpush.bf16.msrb.mxu0 %v6964_v41 }
 0x184   : > { %2309 = vmatpush.bf16.msrb.mxu3 %v7013_v0  ;;  %2296 = vmatpush.bf16.msrb.mxu1 %v7027_v13  ;;  %v1562_v31 = vpop.f32.mrf.mxu2  ;;  %v1590_v4 = vpop.f32.mrf.mxu1 }
 0x185   : > { %v7965_v9 = vadd.f32 %v7878_v6, %v1562_v31 }
 0x186   : > { %2270 = vmatpush.bf16.msrb.mxu2 %v7005_v59  ;;  %2487 = vmatpush.bf16.msrb.mxu0 %v7013_v0  ;;  %v1781_v31 = vpop.f32.mrf.mxu0 }
 0x187   : > { %v2560_v11 = vpop.permute.xlu2 %2559 }
 0x188   : > { %2310 = vmatpush.bf16.msrb.mxu3 %v7051_v35  ;;  %2297 = vmatpush.bf16.msrb.mxu1 %v7070_v45 }
 0x18a   : > { %2271 = vmatpush.bf16.msrb.mxu2 %v7034_v20  ;;  %2488 = vmatpush.bf16.msrb.mxu0 %v7051_v35 }
 0x18b   : > { %v2789_v4 = vpop.permute.xlu1 %2788 }
 0x18c   : > { %2311 = vmatpush.bf16.msrb.mxu3 %v7087_v58  ;;  %2298 = vmatpush.bf16.msrb.mxu1 %v7098_v1  ;;  %v1564_v62 = vpop.f32.mrf.mxu2 }
 0x18d   : > { %v7995_v62 = vpop.f32.mrf.mxu1 }
 0x18e   : > { %2272 = vmatpush.bf16.msrb.mxu2 %v10613_v43  ;;  %2489 = vmatpush.bf16.msrb.mxu0 %v7087_v58 }
 0x18f   : > { %2299 = vmatmul.bf16.vlgmr.msrb.gmra.mxu1 %v2260_v8  ;;  %5722 = vmatmul.msk.bf16.vlgmr.msrb.gmra.mxu3 %vm808_vm8, %v7876_v61 }
 0x190   : > { %2443 = vmatpush.bf16.msra.mxu3 %v6809_v28  ;;  %2460 = vmatpush.bf16.msra.mxu1 %v6856_v48 }
 0x191   : > { %2273 = vmatmul.bf16.vlgmr.msrb.gmra.mxu2 %v2260_v8  ;;  %5725 = vmatmul.msk.bf16.vlgmr.msrb.gmra.mxu0 %vm808_vm8, %v7961_v32  ;;  %v1601_v8 = vpop.f32.mrf.mxu3 }
 0x192   : > { %2334 = vmatpush.bf16.msra.mxu2 %v7125_v5  ;;  %2621 = vmatpush.bf16.msra.mxu0 %v6809_v28  ;;  %v7977_v6 = vadd.f32 %v1601_v8, %v1588_v2  ;;  %v7989_v2 = vpop.permute.xlu2 %2737 }
 0x194   : > { %2444 = vmatpush.bf16.msra.mxu3 %v6819_v34  ;;  %2461 = vmatpush.bf16.msra.mxu1 %v6907_v16  ;;  %10620 = vst [vmem:[#allocation4_spill] sm:$0xff] %v7977_v6  ;;  %v1627_v31 = vpop.f32.mrf.mxu2 }
 0x195   : > { %1635 = vrot.lane.b32.xlu2 %v7977_v6, %s6539_s13  ;;  %v1628_v6 = vadd.f32 %v1627_v31, %v7923_v57  ;;  %v8013_v57 = vpop.permute.xlu1 %2915 }
 0x196   : > { %2335 = vmatpush.bf16.msra.mxu2 %v7149_v19  ;;  %2622 = vmatpush.bf16.msra.mxu0 %v6819_v34  ;;  %10621 = vst [vmem:[#allocation7_spill] sm:$0xff] %v8013_v57 }
 0x197   : > { %1641 = vrot.lane.b32.xlu0 %v1628_v6, %s6539_s13 }
 0x198   : > { %2445 = vmatpush.bf16.msra.mxu3 %v6866_v53  ;;  %2462 = vmatpush.bf16.msra.mxu1 %v6930_v26 }
 0x199   : > { %v1603_v8 = vpop.f32.mrf.mxu3 }
 0x19a   : > { %2336 = vmatpush.bf16.msra.mxu2 %v7162_v29  ;;  %2623 = vmatpush.bf16.msra.mxu0 %v6866_v53  ;;  %v2435_v8 = vsel %vm808_vm8, %v7859_v14, %v2382_v51  ;;  %v8015_v31 = vpop.permute.xlu2 %2918  ;;  %v1755_v14 = vpop.f32.mrf.mxu1 }
 0x19b   : > { %10622 = vst [vmem:[#allocation8_spill] sm:$0xff] %v8015_v31 }
 0x19c   : > { %2446 = vmatpush.bf16.msra.mxu3 %v6891_v7  ;;  %2463 = vmatpush.bf16.msra.mxu1 %v10610_v63  ;;  %v1629_v6 = vpop.f32.mrf.mxu2 }
 0x19d   : > { %v8036_v6 = vsel %vm806_vm7, %v7697_v3, %v2789_v4  ;;  %v3094_v31 = vpop.permute.xlu1 %3093 }
 0x19e   : > { %2337 = vmatpush.bf16.msra.mxu2 %v7179_v30  ;;  %2624 = vmatpush.bf16.msra.mxu0 %v6891_v7  ;;  %v8019_v44 = vpop.f32.mrf.mxu0 }
 0x19f   : > { %5724 = vmatmul.msk.bf16.vlgmr.msra.gmra.mxu1 %vm808_vm8, %v7961_v32 }
 0x1a0   : > { %2495 = vmatpush.bf16.msrb.mxu1 %v7008_v60  ;;  %2447 = vmatpush.bf16.msra.mxu3 %v6946_v33 }
 0x1a1   : > { %5723 = vmatmul.msk.bf16.vlgmr.msra.gmra.mxu2 %vm808_vm8, %v7876_v61  ;;  %v2436_v61 = vsel %vm810_vm9, %v2435_v8, %v7940_v25  ;;  %v2613_v25 = vsel %vm808_vm8, %v7865_v52, %v2560_v11  ;;  %v3147_v11 = vsel %vm808_vm8, %v8036_v6, %v3094_v31 }
 0x1a2   : > { %2469 = vmatpush.bf16.msrb.mxu2 %v6837_v40  ;;  %2625 = vmatpush.bf16.msra.mxu0 %v6946_v33  ;;  %v2438_v51 = vpack.c.bf16 %v2436_v61, %v2436_v61  ;;  %v8031_v8 = vpop.f32.mrf.mxu3  ;;  %v2563_v61 = vpop.permute.xlu0 %2562 }
 0x1a3   : > { %v2614_v57 = vsel %vm810_vm9, %v2613_v25, %v2563_v61  ;;  %v3097_v52 = vpop.permute.xlu2 %3096 }
 0x1a4   : > { %2496 = vmatpush.bf16.msrb.mxu1 %v7037_v21  ;;  %2448 = vmatpush.bf16.msra.mxu3 %v7005_v59  ;;  %v8043_v47 = vpack.c.bf16 %v2614_v57, %v2614_v57 }
 0x1a6   : > { %2470 = vmatpush.bf16.msrb.mxu2 %v6858_v49  ;;  %2626 = vmatpush.bf16.msra.mxu0 %v7005_v59  ;;  %v1920_v14 = vpop.f32.mrf.mxu0 }
 0x1a7   : > { %v8047_v14 = vsel %vm810_vm9, %v3147_v11, %v3097_v52 }
 0x1a8   : > { %2497 = vmatpush.bf16.msrb.mxu1 %v7077_v50  ;;  %2449 = vmatpush.bf16.msra.mxu3 %v7034_v20  ;;  %10623 = vst [vmem:[#allocation9_spill] sm:$0xff] %v8047_v14 }
 0x1aa   : > { %2471 = vmatpush.bf16.msrb.mxu2 %v6909_v17  ;;  %2627 = vmatpush.bf16.msra.mxu0 %v7034_v20  ;;  %v1742_v3 = vpop.f32.mrf.mxu3 }
 0x1ac   : > { %2498 = vmatpush.bf16.msrb.mxu1 %v7102_v24  ;;  %2450 = vmatpush.bf16.msra.mxu3 %v10613_v43  ;;  %v1792_v4 = vpop.f32.mrf.mxu1 }
 0x1ae   : > { %2472 = vmatpush.bf16.msrb.mxu2 %v6932_v27  ;;  %2628 = vmatpush.bf16.msra.mxu0 %v10613_v43  ;;  %v8060_v57 = vpop.f32.mrf.mxu0 }
 0x1af   : > { %2451 = vmatmul.bf16.vlgmr.msra.gmra.mxu3 %v2438_v51 }
 0x1b0   : > { %2512 = vmatpush.bf16.msrb.mxu3 %v7125_v5  ;;  %2499 = vmatpush.bf16.msrb.mxu1 %v7136_v12 }
 0x1b1   : > { %2629 = vmatmul.bf16.vlgmr.msra.gmra.mxu0 %v8043_v47 }
 0x1b2   : > { %2473 = vmatpush.bf16.msrb.mxu2 %v6993_v54  ;;  %2690 = vmatpush.bf16.msrb.mxu0 %v7125_v5 }
 0x1b4   : > { %2513 = vmatpush.bf16.msrb.mxu3 %v7149_v19  ;;  %2500 = vmatpush.bf16.msrb.mxu1 %v7152_v22  ;;  %v1766_v31 = vpop.f32.mrf.mxu2 }
 0x1b5   : > { %v8065_v25 = vadd.f32 %v7955_v38, %v1766_v31  ;;  %v1805_v38 = vpop.f32.mrf.mxu3 }
 0x1b6   : > { %2474 = vmatpush.bf16.msrb.mxu2 %v7027_v13  ;;  %2691 = vmatpush.bf16.msrb.mxu0 %v7149_v19  ;;  %v1806_v61 = vadd.f32 %v1805_v38, %v1792_v4  ;;  %v1985_v52 = vpop.f32.mrf.mxu0  ;;  %v3079_v38 = vld [vmem:[%s6626_s27 + $0x5c] sm:$0x1] }
 0x1b7   : > { %10624 = vst [vmem:[#allocation10_spill] sm:$0xff] %v8065_v25  ;;  %1813 = vrot.lane.b32.xlu1 %v8065_v25, %s6539_s13  ;;  %v3080_v52 = vld [vmem:[%s6626_s27 + $0x7c] sm:$0x1] }
 0x1b8   : > { %2514 = vmatpush.bf16.msrb.mxu3 %v7162_v29  ;;  %2501 = vmatpush.bf16.msrb.mxu1 %v7171_v36  ;;  %v3111_v25 = vrot.slane %v3080_v52, 5 }
 0x1b9   : > { %1819 = vrot.lane.b32.xlu2 %v1806_v61, %s6539_s13 }
 0x1ba   : > { %2475 = vmatpush.bf16.msrb.mxu2 %v7070_v45  ;;  %2692 = vmatpush.bf16.msrb.mxu0 %v7162_v29 }
 0x1bc   : > { %2515 = vmatpush.bf16.msrb.mxu3 %v7179_v30  ;;  %2502 = vmatpush.bf16.msrb.mxu1 %v7191_v55  ;;  %v1768_v3 = vpop.f32.mrf.mxu2 }
 0x1bd   : > { %v3109_v3 = vrot.slane %v3079_v38, 6 }
 0x1be   : > { %2476 = vmatpush.bf16.msrb.mxu2 %v7098_v1  ;;  %2693 = vmatpush.bf16.msrb.mxu0 %v7179_v30 }
 0x1bf   : > { %2503 = vmatmul.bf16.vlgmr.msrb.gmra.mxu1 %v2438_v51  ;;  %5726 = vmatmul.msk.bf16.vlgmr.msrb.gmra.mxu3 %vm808_vm8, %v7961_v32  ;;  %v1794_v32 = vpop.f32.mrf.mxu1 }
 0x1c0   : > { %2647 = vmatpush.bf16.msra.mxu3 %v6837_v40  ;;  %2664 = vmatpush.bf16.msra.mxu1 %v6964_v41  ;;  %v3077_v32 = vld [vmem:[%s6626_s27 + $0x1c] sm:$0x1] }
 0x1c1   : > { %2477 = vmatmul.bf16.vlgmr.msrb.gmra.mxu2 %v2438_v51  ;;  %v8078_v51 = vsel %vm806_vm7, %v7679_v37, %v7974_v46  ;;  %v1807_v37 = vpop.f32.mrf.mxu3  ;;  %v3078_v46 = vld [vmem:[%s6626_s27 + $0x3c] sm:$0x1]  ;;  %1277 = vrot.lane.b32.xlu2 %v7794_v15, %s6539_s13 }
 0x1c2   : > { %2638 = vmatpush.bf16.msra.mxu2 %v6856_v48  ;;  %2825 = vmatpush.bf16.msra.mxu0 %v6837_v40  ;;  %v2617_v11 = vpack.c.bf16 %v8078_v51, %v8078_v51  ;;  %v3107_v61 = vrot.slane %v3078_v46, 7  ;;  %v3081_v15 = vld [vmem:[%s6626_s27 + $0x9c] sm:$0x1] }
 0x1c3   : > { %v3113_v52 = vrot.slane %v3081_v15, 4 }
 0x1c4   : > { %2648 = vmatpush.bf16.msra.mxu3 %v6858_v49  ;;  %2665 = vmatpush.bf16.msra.mxu1 %v7013_v0  ;;  %v8101_v31 = vpop.f32.mrf.mxu2  ;;  %v3108_v37 = vsel %vm662_vm0, %v3107_v61, %v3077_v32  ;;  %v8124_v61 = vpop.permute.xlu2 %3322  ;;  %v3082_v32 = vld [vmem:[%s6626_s27 + $0xbc] sm:$0x1] }
 0x1c5   : > { %5729 = vmatmul.msk.bf16.vlgmr.msrb.gmra.mxu0 %vm808_vm8, %v2617_v11  ;;  %v3110_v38 = vsel %vm665_vm1, %v3109_v3, %v3108_v37  ;;  %10626 = vst [vmem:[#allocation12_spill] sm:$0xff] %v8124_v61  ;;  %v2741_v37 = vpop.permute.xlu0 %2740  ;;  %v3084_v61 = vld [vmem:[%s6626_s27 + $0xfc] sm:$0x1] }
 0x1c6   : > { %2639 = vmatpush.bf16.msra.mxu2 %v6907_v16  ;;  %2826 = vmatpush.bf16.msra.mxu0 %v6858_v49  ;;  %v3112_v3 = vsel %vm668_vm2, %v3111_v25, %v3110_v38 }
 0x1c7   : > { %v1957_v4 = vpop.f32.mrf.mxu1  ;;  %v3114_v15 = vsel %vm671_vm3, %v3113_v52, %v3112_v3 }
 0x1c8   : > { %2649 = vmatpush.bf16.msra.mxu3 %v6909_v17  ;;  %2666 = vmatpush.bf16.msra.mxu1 %v7051_v35 }
 0x1ca   : > { %2640 = vmatpush.bf16.msra.mxu2 %v6930_v26  ;;  %2827 = vmatpush.bf16.msra.mxu0 %v6909_v17 }
 0x1cc   : > { %2650 = vmatpush.bf16.msra.mxu3 %v6932_v27  ;;  %2667 = vmatpush.bf16.msra.mxu1 %v7087_v58 }
 0x1ce   : > { %2641 = vmatpush.bf16.msra.mxu2 %v10610_v63  ;;  %2828 = vmatpush.bf16.msra.mxu0 %v6932_v27  ;;  %v8121_v14 = vpop.f32.mrf.mxu0 }
 0x1cf   : > { %5728 = vmatmul.msk.bf16.vlgmr.msra.gmra.mxu1 %vm808_vm8, %v2617_v11  ;;  %v1959_v46 = vpop.f32.mrf.mxu1 }
 0x1d0   : > { %2799 = vmatpush.bf16.msrb.mxu1 %v6809_v28  ;;  %2651 = vmatpush.bf16.msra.mxu3 %v6993_v54 }
 0x1d1   : > { %5727 = vmatmul.msk.bf16.vlgmr.msra.gmra.mxu2 %vm808_vm8, %v2617_v11  ;;  %v8115_v11 = vadd.f32 %v7995_v62, %v8031_v8  ;;  %v1933_v62 = vpop.f32.mrf.mxu2  ;;  %v2791_v8 = vsel %vm808_vm8, %v7950_v42, %v7989_v2  ;;  %v3115_v42 = vrot.slane %v3082_v32, 3  ;;  %v8151_v32 = vpop.permute.xlu1 %1279 }
 0x1d2   : > { %2673 = vmatpush.bf16.msrb.mxu2 %v7008_v60  ;;  %2829 = vmatpush.bf16.msra.mxu0 %v6993_v54  ;;  %v2792_v46 = vsel %vm810_vm9, %v2791_v8, %v2741_v37  ;;  %v3083_v62 = vld [vmem:[%s6626_s27 + $0xdc] sm:$0x1]  ;;  %v1944_v2 = vpop.f32.mrf.mxu3  ;;  %v2795_v37 = vpack.c.bf16 %v8036_v6, %v8036_v6 }
 0x1d3   : > { %10625 = vst [vmem:[#allocation11_spill] sm:$0xff] %v8115_v11  ;;  %1811 = vrot.lane.b32.xlu2 %v8115_v11, %s6539_s13  ;;  %v8145_v25 = vpack.c.bf16 %v2792_v46, %v2792_v46  ;;  %v8147_v38 = vadd.f32 %v1957_v4, %v1944_v2  ;;  %v3117_v8 = vrot.slane %v3083_v62, 2  ;;  %v3116_v52 = vsel %vm674_vm4, %v3115_v42, %v3114_v15  ;;  %v1286_v4 = vpop.permute.xlu2 %1285  ;;  %v2967_v42 = vpop.permute.xlu0 %2966 }
 0x1d4   : > { %2800 = vmatpush.bf16.msrb.mxu1 %v6819_v34  ;;  %2652 = vmatpush.bf16.msra.mxu3 %v7027_v13  ;;  %v1287_v3 = vsel %vm1094_vm10, %v8151_v32, %v1286_v4  ;;  %v8192_v15 = vsel %vm806_vm7, %v7744_v18, %v2967_v42 }
 0x1d5   : > { %1991 = vrot.lane.b32.xlu0 %v8147_v38, %s6539_s13 }
 0x1d6   : > { %2674 = vmatpush.bf16.msrb.mxu2 %v7037_v21  ;;  %2830 = vmatpush.bf16.msra.mxu0 %v7027_v13  ;;  %v2124_v11 = vpop.f32.mrf.mxu0 }
 0x1d7   : > { %v3119_v11 = vrot.slane %v3084_v61, 1  ;;  %v1289_v61 = vmax.f32 %v7847_v39, %v1287_v3 }
 0x1d8   : > { %2801 = vmatpush.bf16.msrb.mxu1 %v6866_v53  ;;  %2653 = vmatpush.bf16.msra.mxu3 %v7070_v45 }
 0x1da   : > { %2675 = vmatpush.bf16.msrb.mxu2 %v7077_v50  ;;  %2831 = vmatpush.bf16.msra.mxu0 %v7070_v45  ;;  %v1946_v46 = vpop.f32.mrf.mxu3 }
 0x1db   : > { %1099 = vrot.lane.b32.xlu2 %v7789_v56, %s6539_s13  ;;  %v3118_v56 = vsel %vm677_vm5, %v3117_v8, %v3116_v52  ;;  %v8203_v8 = vpack.c.bf16 %v8192_v15, %v8192_v15  ;;  %v8212_v4 = vpop.permute.xlu0 %3144 }
 0x1dc   : > { %2802 = vmatpush.bf16.msrb.mxu1 %v6891_v7  ;;  %2654 = vmatpush.bf16.msra.mxu3 %v7098_v1  ;;  %v8175_v62 = vsel %vm680_vm6, %v3119_v11, %v3118_v56  ;;  %v8181_v6 = vpop.f32.mrf.mxu1  ;;  %v8228_v56 = vadd.f32 %v8101_v31, %v8019_v44 }
 0x1dd   : > { %3271 = vrot.lane.b32.xlu0 %v8175_v62, %s6538_s30  ;;  %s10778_s30 = smov 124  }
 0x1de   : > { %2676 = vmatpush.bf16.msrb.mxu2 %v7102_v24  ;;  %2832 = vmatpush.bf16.msra.mxu0 %v7098_v1  ;;  %v8186_v39 = vpop.f32.mrf.mxu0 }
 0x1df   : > { %2655 = vmatmul.bf16.vlgmr.msra.gmra.mxu3 %v8043_v47 }
 0x1e0   : > { %2816 = vmatpush.bf16.msrb.mxu3 %v6856_v48  ;;  %2803 = vmatpush.bf16.msrb.mxu1 %v6946_v33 }
 0x1e1   : > { %2833 = vmatmul.bf16.vlgmr.msra.gmra.mxu0 %v8145_v25 }
 0x1e2   : > { %2677 = vmatpush.bf16.msrb.mxu2 %v7136_v12  ;;  %2994 = vmatpush.bf16.msrb.mxu0 %v6856_v48  ;;  %v8205_v18 = vpop.f32.mrf.mxu3 }
 0x1e3   : > { %1291 = vrot.lane.b32.xlu2 %v1289_v61, %s6540_s29 }
 0x1e4   : > { %2817 = vmatpush.bf16.msrb.mxu3 %v6907_v16  ;;  %2804 = vmatpush.bf16.msrb.mxu1 %v7005_v59 }
 0x1e5   : > { %1455 = vrot.lane.b32.xlu0 %v7892_v10, %s6539_s13 }
 0x1e6   : > { %2678 = vmatpush.bf16.msrb.mxu2 %v7152_v22  ;;  %2995 = vmatpush.bf16.msrb.mxu0 %v6907_v16  ;;  %v2289_v52 = vpop.f32.mrf.mxu0 }
 0x1e7   : > { %v8239_v46 = vpop.permute.xlu0 %1457  ;;  %v1464_v31 = vpop.permute.xlu1 %1463  ;;  %v10628_v52 = vld [vmem:[#allocation7_spill] sm:$0xff] }
 0x1e8   : > { %2818 = vmatpush.bf16.msrb.mxu3 %v6930_v26  ;;  %2805 = vmatpush.bf16.msrb.mxu1 %v7034_v20  ;;  %v1465_v42 = vsel %vm1094_vm10, %v8239_v46, %v1464_v31 }
 0x1ea   : > { %2679 = vmatpush.bf16.msrb.mxu2 %v7171_v36  ;;  %2996 = vmatpush.bf16.msrb.mxu0 %v6930_v26  ;;  %v2111_v3 = vpop.f32.mrf.mxu3 }
 0x1eb   : > { %v10629_v3 = vld [vmem:[#allocation3_spill] sm:$0xff] }
 0x1ec   : > { %2819 = vmatpush.bf16.msrb.mxu3 %v10610_v63  ;;  %2806 = vmatpush.bf16.msrb.mxu1 %v10613_v43 }
 0x1ed   : > { %1989 = vrot.lane.b32.xlu0 %v8228_v56, %s6539_s13 }
 0x1ee   : > { %2680 = vmatpush.bf16.msrb.mxu2 %v7191_v55  ;;  %2997 = vmatpush.bf16.msrb.mxu0 %v10610_v63 }
 0x1ef   : > { %2807 = vmatmul.bf16.vlgmr.msrb.gmra.mxu1 %v8145_v25  ;;  %5730 = vmatmul.msk.bf16.vlgmr.msrb.gmra.mxu3 %vm808_vm8, %v2795_v37 }
 0x1f0   : > { %2851 = vmatpush.bf16.msra.mxu3 %v7008_v60  ;;  %2868 = vmatpush.bf16.msra.mxu1 %v7125_v5 }
 0x1f1   : > { %2681 = vmatmul.bf16.vlgmr.msrb.gmra.mxu2 %v8043_v47  ;;  %v1970_v47 = vpop.f32.mrf.mxu2  ;;  %5733 = vmatmul.msk.bf16.vlgmr.msrb.gmra.mxu0 %vm808_vm8, %v8203_v8 }
 0x1f2   : > { %2842 = vmatpush.bf16.msra.mxu2 %v6964_v41  ;;  %v1984_v2 = vadd.f32 %v8060_v57, %v1970_v47  ;;  %3029 = vmatpush.bf16.msra.mxu0 %v7008_v60  ;;  %v2098_v57 = vpop.f32.mrf.mxu1 }
 0x1f4   : > { %2852 = vmatpush.bf16.msra.mxu3 %v7037_v21  ;;  %2869 = vmatpush.bf16.msra.mxu1 %v7149_v19 }
 0x1f5   : > { %1997 = vrot.lane.b32.xlu1 %v1984_v2, %s6539_s13 }
 0x1f6   : > { %2843 = vmatpush.bf16.msra.mxu2 %v7013_v0  ;;  %3030 = vmatpush.bf16.msra.mxu0 %v7037_v21 }
 0x1f8   : > { %2853 = vmatpush.bf16.msra.mxu3 %v7077_v50  ;;  %2870 = vmatpush.bf16.msra.mxu1 %v7162_v29 }
 0x1f9   : > { %v1972_v11 = vpop.f32.mrf.mxu2 }
 0x1fa   : > { %2844 = vmatpush.bf16.msra.mxu2 %v7051_v35  ;;  %3031 = vmatpush.bf16.msra.mxu0 %v7077_v50  ;;  %v8234_v61 = vpop.f32.mrf.mxu1  ;;  %v2969_v11 = vsel %vm808_vm8, %v8078_v51, %v10628_v52  ;;  %v3149_v52 = vsel %vm806_vm7, %v8175_v62, %v8212_v4  ;;  %v10631_v4 = vld [vmem:[#allocation4_spill] sm:$0xff] }
 0x1fc   : > { %2854 = vmatpush.bf16.msra.mxu3 %v7102_v24  ;;  %2871 = vmatpush.bf16.msra.mxu1 %v7179_v30 }
 0x1fd   : > { %3274 = vrot.lane.b32.xlu1 %v7840_v23, %s10382_s28 }
 0x1fe   : > { %2845 = vmatpush.bf16.msra.mxu2 %v7087_v58  ;;  %3032 = vmatpush.bf16.msra.mxu0 %v7102_v24  ;;  %v8259_v2 = vpop.f32.mrf.mxu0 }
 0x1ff   : > { %5732 = vmatmul.msk.bf16.vlgmr.msra.gmra.mxu1 %vm808_vm8, %v2795_v37 }
 0x200   : > { %3003 = vmatpush.bf16.msrb.mxu1 %v6837_v40  ;;  %2855 = vmatpush.bf16.msra.mxu3 %v7136_v12 }
 0x201   : > { %5731 = vmatmul.msk.bf16.vlgmr.msra.gmra.mxu2 %vm808_vm8, %v2795_v37  ;;  %v2135_v23 = vpop.f32.mrf.mxu2 }
 0x202   : > { %2977 = vmatpush.bf16.msrb.mxu2 %v6809_v28  ;;  %v8242_v44 = vadd.f32 %v2135_v23, %v8121_v14  ;;  %3033 = vmatpush.bf16.msra.mxu0 %v7136_v12  ;;  %v10627_v14 = vld [vmem:[#allocation6_spill] sm:$0xff]  ;;  %v2163_v47 = vpop.f32.mrf.mxu1  ;;  %v10630_v23 = vld [vmem:[#allocation8_spill] sm:$0xff] }
 0x203   : > { %v1467_v37 = vmax.f32 %v10627_v14, %v1465_v42  ;;  %v2970_v31 = vsel %vm810_vm9, %v2969_v11, %v10630_v23  ;;  %v8276_v42 = vpop.f32.mrf.mxu3  ;;  %v8305_v11 = vpop.permute.xlu2 %1635 }
 0x204   : > { %3004 = vmatpush.bf16.msrb.mxu1 %v6858_v49  ;;  %2856 = vmatpush.bf16.msra.mxu3 %v7152_v22  ;;  %v2972_v51 = vpack.c.bf16 %v2970_v31, %v2970_v31  ;;  %v8309_v31 = vpack.c.bf16 %v3149_v52, %v3149_v52 }
 0x205   : > { %2169 = vrot.lane.b32.xlu2 %v8242_v44, %s6539_s13  ;;  %1633 = vrot.lane.b32.xlu1 %v7965_v9, %s6539_s13 }
 0x206   : > { %2978 = vmatpush.bf16.msrb.mxu2 %v6819_v34  ;;  %3034 = vmatpush.bf16.msra.mxu0 %v7152_v22 }
 0x207   : > { %1469 = vrot.lane.b32.xlu0 %v1467_v37, %s6540_s29 }
 0x208   : > { %3005 = vmatpush.bf16.msrb.mxu1 %v6909_v17  ;;  %2857 = vmatpush.bf16.msra.mxu3 %v7171_v36 }
 0x209   : > { %v2137_v57 = vpop.f32.mrf.mxu2 }
 0x20a   : > { %2979 = vmatpush.bf16.msrb.mxu2 %v6866_v53  ;;  %3035 = vmatpush.bf16.msra.mxu0 %v7171_v36 }
 0x20b   : > { %v2150_v14 = vpop.f32.mrf.mxu3 }
 0x20c   : > { %3006 = vmatpush.bf16.msrb.mxu1 %v6932_v27  ;;  %2858 = vmatpush.bf16.msra.mxu3 %v7191_v55  ;;  %v2300_v37 = vpop.f32.mrf.mxu1 }
 0x20d   : > { %1092 = vrot.lane.b32.xlu1 %v10629_v3, %s6539_s13 }
 0x20e   : > { %2980 = vmatpush.bf16.msrb.mxu2 %v6891_v7  ;;  %3036 = vmatpush.bf16.msra.mxu0 %v7191_v55 }
 0x20f   : > { %2859 = vmatmul.bf16.vlgmr.msra.gmra.mxu3 %v8145_v25  ;;  %v2328_v25 = vpop.f32.mrf.mxu0 }
 0x210   : > { %3020 = vmatpush.bf16.msrb.mxu3 %v6964_v41  ;;  %3007 = vmatpush.bf16.msrb.mxu1 %v6993_v54  ;;  %v1642_v25 = vpop.permute.xlu0 %1641 }
 0x211   : > { %3037 = vmatmul.bf16.vlgmr.msra.gmra.mxu0 %v2972_v51  ;;  %v1643_v62 = vsel %vm1094_vm10, %v8305_v11, %v1642_v25  ;;  %v10632_v25 = vld [vmem:[#allocation9_spill] sm:$0xff] }
 0x212   : > { %2981 = vmatpush.bf16.msrb.mxu2 %v6946_v33  ;;  %3198 = vmatpush.bf16.msrb.mxu0 %v6964_v41  ;;  %v1645_v14 = vmax.f32 %v10631_v4, %v1643_v62  ;;  %v3150_v62 = vpack.c.bf16 %v10632_v25, %v10632_v25  ;;  %v3255_v4 = vld [vmem:[%s6626_s27 + $0x1e] sm:$0x1] }
 0x213   : > { %v2313_v23 = vpop.f32.mrf.mxu3 }
 0x214   : > { %3021 = vmatpush.bf16.msrb.mxu3 %v7013_v0  ;;  %3008 = vmatpush.bf16.msrb.mxu1 %v7027_v13  ;;  %v2274_v47 = vpop.f32.mrf.mxu2 }
 0x215   : > { %v8297_v57 = vadd.f32 %v8186_v39, %v2274_v47  ;;  %v8311_v39 = vadd.f32 %v2313_v23, %v2300_v37  ;;  %1647 = vrot.lane.b32.xlu1 %v1645_v14, %s6540_s29  ;;  %v1820_v47 = vpop.permute.xlu2 %1819  ;;  %v3257_v23 = vld [vmem:[%s6626_s27 + $0x5e] sm:$0x1] }
 0x216   : > { %2982 = vmatpush.bf16.msrb.mxu2 %v7005_v59  ;;  %3199 = vmatpush.bf16.msrb.mxu0 %v7013_v0 }
 0x218   : > { %3022 = vmatpush.bf16.msrb.mxu3 %v7051_v35  ;;  %3009 = vmatpush.bf16.msrb.mxu1 %v7070_v45 }
 0x21a   : > { %2983 = vmatpush.bf16.msrb.mxu2 %v7034_v20  ;;  %3200 = vmatpush.bf16.msrb.mxu0 %v7051_v35 }
 0x21b   : > { %v2315_v37 = vpop.f32.mrf.mxu3 }
 0x21c   : > { %3023 = vmatpush.bf16.msrb.mxu3 %v7087_v58  ;;  %3010 = vmatpush.bf16.msrb.mxu1 %v7098_v1 }
 0x21e   : > { %2984 = vmatpush.bf16.msrb.mxu2 %v10613_v43  ;;  %3201 = vmatpush.bf16.msrb.mxu0 %v7087_v58 }
 0x21f   : > { %3011 = vmatmul.bf16.vlgmr.msrb.gmra.mxu1 %v2972_v51  ;;  %5734 = vmatmul.msk.bf16.vlgmr.msrb.gmra.mxu3 %vm808_vm8, %v8203_v8 }
 0x220   : > { %3155 = vmatpush.bf16.msra.mxu3 %v6809_v28  ;;  %3172 = vmatpush.bf16.msra.mxu1 %v6856_v48 }
 0x221   : > { %2985 = vmatmul.bf16.vlgmr.msrb.gmra.mxu2 %v2972_v51  ;;  %v2302_v51 = vpop.f32.mrf.mxu1  ;;  %5737 = vmatmul.msk.bf16.vlgmr.msrb.gmra.mxu0 %vm808_vm8, %v8309_v31 }
 0x222   : > { %3046 = vmatpush.bf16.msra.mxu2 %v7125_v5  ;;  %3333 = vmatpush.bf16.msra.mxu0 %v6809_v28  ;;  %v2276_v28 = vpop.f32.mrf.mxu2 }
 0x223   : > { %v3287_v28 = vrot.slane %v3257_v23, 6 }
 0x224   : > { %3156 = vmatpush.bf16.msra.mxu3 %v6819_v34  ;;  %3173 = vmatpush.bf16.msra.mxu1 %v6907_v16 }
 0x226   : > { %3047 = vmatpush.bf16.msra.mxu2 %v7149_v19  ;;  %3334 = vmatpush.bf16.msra.mxu0 %v6819_v34 }
 0x228   : > { %3157 = vmatpush.bf16.msra.mxu3 %v6866_v53  ;;  %3174 = vmatpush.bf16.msra.mxu1 %v6930_v26 }
 0x229   : > { %v2465_v34 = vpop.f32.mrf.mxu1 }
 0x22a   : > { %3048 = vmatpush.bf16.msra.mxu2 %v7162_v29  ;;  %3335 = vmatpush.bf16.msra.mxu0 %v6866_v53  ;;  %v2339_v52 = vpop.f32.mrf.mxu2  ;;  %v3256_v53 = vld [vmem:[%s6626_s27 + $0x3e] sm:$0x1] }
 0x22b   : > { %v3285_v51 = vrot.slane %v3256_v53, 7  ;;  %v3259_v53 = vld [vmem:[%s6626_s27 + $0x9e] sm:$0x1] }
 0x22c   : > { %3158 = vmatpush.bf16.msra.mxu3 %v6891_v7  ;;  %3175 = vmatpush.bf16.msra.mxu1 %v10610_v63  ;;  %v3291_v23 = vrot.slane %v3259_v53, 4 }
 0x22e   : > { %3049 = vmatpush.bf16.msra.mxu2 %v7179_v30  ;;  %3336 = vmatpush.bf16.msra.mxu0 %v6891_v7  ;;  %v8346_v7 = vpop.permute.xlu2 %1277 }
 0x22f   : > { %5736 = vmatmul.msk.bf16.vlgmr.msra.gmra.mxu1 %vm808_vm8, %v8309_v31 }
 0x230   : > { %3207 = vmatpush.bf16.msrb.mxu1 %v7008_v60  ;;  %3159 = vmatpush.bf16.msra.mxu3 %v6946_v33 }
 0x231   : > { %5735 = vmatmul.msk.bf16.vlgmr.msra.gmra.mxu2 %vm808_vm8, %v8203_v8  ;;  %v2340_v8 = vadd.f32 %v2339_v52, %v8259_v2  ;;  %v8349_v2 = vpop.f32.mrf.mxu0  ;;  %v2467_v14 = vpop.f32.mrf.mxu1  ;;  %v3286_v52 = vsel %vm662_vm0, %v3285_v51, %v3255_v4  ;;  %vm3461_vm0 = vcmask 293888  }
 0x232   : > { %3181 = vmatpush.bf16.msrb.mxu2 %v6837_v40  ;;  %3337 = vmatpush.bf16.msra.mxu0 %v6946_v33  ;;  %v3258_v33 = vld [vmem:[%s6626_s27 + $0x7e] sm:$0x1]  ;;  %v2341_v37 = vpop.f32.mrf.mxu2  ;;  %v2452_v51 = vpop.f32.mrf.mxu3 }
 0x233   : > { %2353 = vrot.lane.b32.xlu2 %v2340_v8, %s6539_s13  ;;  %v8360_v8 = vadd.f32 %v8205_v18, %v8181_v6  ;;  %v3289_v25 = vrot.slane %v3258_v33, 5  ;;  %v3260_v18 = vld [vmem:[%s6626_s27 + $0xbe] sm:$0x1]  ;;  %v8374_v33 = vadd.f32 %v2465_v34, %v2452_v51  ;;  %v1814_v37 = vpop.permute.xlu1 %1813 }
 0x234   : > { %3208 = vmatpush.bf16.msrb.mxu1 %v7037_v21  ;;  %3160 = vmatpush.bf16.msra.mxu3 %v7005_v59  ;;  %v3293_v53 = vrot.slane %v3260_v18, 3 }
 0x235   : > { %10633 = vst [vmem:[#allocation6_spill] sm:$0xff] %v8360_v8 }
 0x236   : > { %3182 = vmatpush.bf16.msrb.mxu2 %v6858_v49  ;;  %3338 = vmatpush.bf16.msra.mxu0 %v7005_v59  ;;  %v3288_v59 = vsel %vm665_vm1, %v3287_v28, %v3286_v52  ;;  %v1812_v14 = vpop.permute.xlu2 %1811  ;;  %10634 = vst [vmem:[#allocation7_spill] sm:$0xff] %v8374_v33  ;;  %v3261_v52 = vld [vmem:[%s6626_s27 + $0xde] sm:$0x1]  ;;  %vm3971_vm1 = vcmask 982016  }
 0x237   : > { %v3290_v4 = vsel %vm668_vm2, %v3289_v25, %v3288_v59  ;;  %v8378_v28 = vsel %vm1094_vm10, %v1812_v14, %v1814_v37  ;;  %v3262_v25 = vld [vmem:[%s6626_s27 + $0xfe] sm:$0x1]  ;;  %vm4147_vm2 = vcmask 392192   ;;  %s5554_s27 = sshll.u32 %s10964_s22, 3 }
 0x238   : > { %3209 = vmatpush.bf16.msrb.mxu1 %v7077_v50  ;;  %3161 = vmatpush.bf16.msra.mxu3 %v7034_v20  ;;  %v3292_v34 = vsel %vm671_vm3, %v3291_v23, %v3290_v4  ;;  %vm5430_vm3 = vcmask 1041408  }
 0x239   : > { %v2493_v6 = vpop.f32.mrf.mxu0 }
 0x23a   : > { %3183 = vmatpush.bf16.msrb.mxu2 %v6909_v17  ;;  %3339 = vmatpush.bf16.msra.mxu0 %v7034_v20  ;;  %v1821_v20 = vsel %vm1094_vm10, %v1814_v37, %v1820_v47  ;;  %v10635_v6 = vld [vmem:[#allocation10_spill] sm:$0xff]  ;;  %v3295_v47 = vrot.slane %v3261_v52, 2  ;;  %v2454_v59 = vpop.f32.mrf.mxu3 }
 0x23b   : > { %2167 = vrot.lane.b32.xlu2 %v8360_v8, %s6539_s13  ;;  %v1823_v8 = vmax.f32 %v10635_v6, %v1821_v20  ;;  %v10640_v20 = vld [vmem:[#allocation5_spill] sm:$0xff] }
 0x23c   : > { %3210 = vmatpush.bf16.msrb.mxu1 %v7102_v24  ;;  %3162 = vmatpush.bf16.msra.mxu3 %v10613_v43  ;;  %v2504_v18 = vpop.f32.mrf.mxu1 }
 0x23d   : > { %1825 = vrot.lane.b32.xlu0 %v1823_v8, %s6540_s29  ;;  %v3297_v8 = vrot.slane %v3262_v25, 1 }
 0x23e   : > { %3184 = vmatpush.bf16.msrb.mxu2 %v6932_v27  ;;  %3340 = vmatpush.bf16.msra.mxu0 %v10613_v43  ;;  %v3294_v43 = vsel %vm674_vm4, %v3293_v53, %v3292_v34  ;;  %vm5447_vm4 = vcmask 80896  }
 0x23f   : > { %3163 = vmatmul.bf16.vlgmr.msra.gmra.mxu3 %v3150_v62  ;;  %v3296_v23 = vsel %vm677_vm5, %v3295_v47, %v3294_v43 }
 0x240   : > { %3224 = vmatpush.bf16.msrb.mxu3 %v7125_v5  ;;  %3211 = vmatpush.bf16.msrb.mxu1 %v7136_v12 }
 0x242   : > { %3185 = vmatpush.bf16.msrb.mxu2 %v6993_v54  ;;  %3402 = vmatpush.bf16.msrb.mxu0 %v7125_v5  ;;  %v2630_v5 = vpop.f32.mrf.mxu0 }
 0x244   : > { %3225 = vmatpush.bf16.msrb.mxu3 %v7149_v19  ;;  %3212 = vmatpush.bf16.msrb.mxu1 %v7152_v22 }
 0x246   : > { %3186 = vmatpush.bf16.msrb.mxu2 %v7027_v13  ;;  %3403 = vmatpush.bf16.msrb.mxu0 %v7149_v19 }
 0x248   : > { %3226 = vmatpush.bf16.msrb.mxu3 %v7162_v29  ;;  %3213 = vmatpush.bf16.msrb.mxu1 %v7171_v36 }
 0x24a   : > { %3187 = vmatpush.bf16.msrb.mxu2 %v7070_v45  ;;  %3404 = vmatpush.bf16.msrb.mxu0 %v7162_v29 }
 0x24c   : > { %3227 = vmatpush.bf16.msrb.mxu3 %v7179_v30  ;;  %3214 = vmatpush.bf16.msrb.mxu1 %v7191_v55 }
 0x24e   : > { %3188 = vmatpush.bf16.msrb.mxu2 %v7098_v1  ;;  %3405 = vmatpush.bf16.msrb.mxu0 %v7179_v30 }
 0x24f   : > { %3215 = vmatmul.bf16.vlgmr.msrb.gmra.mxu1 %v3150_v62  ;;  %5738 = vmatmul.msk.bf16.vlgmr.msrb.gmra.mxu3 %vm808_vm8, %v8309_v31  ;;  %v2517_v31 = vpop.f32.mrf.mxu3 }
 0x250   : > { %3359 = vmatpush.bf16.msra.mxu3 %v6837_v40  ;;  %3376 = vmatpush.bf16.msra.mxu1 %v6964_v41  ;;  %v2162_v40 = vadd.f32 %v8234_v61, %v8276_v42  ;;  %v3298_v41 = vsel %vm680_vm6, %v3297_v8, %v3296_v23  ;;  %v10636_v61 = vld [vmem:[#allocation12_spill] sm:$0xff] }
 0x251   : > { %3189 = vmatmul.bf16.vlgmr.msrb.gmra.mxu2 %v3150_v62  ;;  %v3327_v42 = vsel %vm806_vm7, %v3298_v41, %v10636_v61 }
 0x252   : > { %3350 = vmatpush.bf16.msra.mxu2 %v6856_v48  ;;  %v2478_v48 = vpop.f32.mrf.mxu2  ;;  %2175 = vrot.lane.b32.xlu0 %v2162_v40, %s6539_s13  ;;  %v8420_v62 = vpack.c.bf16 %v3327_v42, %v3327_v42 }
 0x253   : > { %v8408_v19 = vadd.f32 %v8349_v2, %v2478_v48 }
 0x254   : > { %3377 = vmatpush.bf16.msra.mxu1 %v7013_v0  ;;  %3360 = vmatpush.bf16.msra.mxu3 %v6858_v49  ;;  %v2506_v49 = vpop.f32.mrf.mxu1  ;;  %v8416_v0 = vadd.f32 %v2517_v31, %v2504_v18 }
 0x256   : > { %3351 = vmatpush.bf16.msra.mxu2 %v6907_v16  ;;  %v2632_v16 = vpop.f32.mrf.mxu0 }
 0x257   : > { %v2519_v29 = vpop.f32.mrf.mxu3 }
 0x258   : > { %3378 = vmatpush.bf16.msra.mxu1 %v7051_v35  ;;  %3361 = vmatpush.bf16.msra.mxu3 %v6909_v17  ;;  %v10637_v35 = vld [vmem:[#allocation2_spill] sm:$0xff] }
 0x25a   : > { %3352 = vmatpush.bf16.msra.mxu2 %v6930_v26  ;;  %v2480_v26 = vpop.f32.mrf.mxu2  ;;  %1090 = vrot.lane.b32.xlu0 %v10637_v35, %s6539_s13 }
 0x25c   : > { %3379 = vmatpush.bf16.msra.mxu1 %v7087_v58  ;;  %3362 = vmatpush.bf16.msra.mxu3 %v6932_v27 }
 0x25e   : > { %3353 = vmatpush.bf16.msra.mxu2 %v10610_v63  ;;  %v2695_v17 = vpop.f32.mrf.mxu0  ;;  %v1992_v63 = vpop.permute.xlu0 %1991 }
 0x25f   : > { %5740 = vmatmul.msk.bf16.vlgmr.msra.gmra.mxu1 %vm808_vm8, %v8420_v62 }
 0x260   : > { %3363 = vmatpush.bf16.msra.mxu3 %v6993_v54 }
 0x261   : > { %5739 = vmatmul.msk.bf16.vlgmr.msra.gmra.mxu2 %vm808_vm8, %v8420_v62 }
 0x262   : > { %3385 = vmatpush.bf16.msrb.mxu2 %v7008_v60  ;;  %v2669_v60 = vpop.f32.mrf.mxu1  ;;  %v2643_v58 = vpop.f32.mrf.mxu2 }
 0x263   : > { %v8435_v27 = vadd.f32 %v2643_v58, %v2630_v5  ;;  %v2656_v51 = vpop.f32.mrf.mxu3 }
 0x264   : > { %3364 = vmatpush.bf16.msra.mxu3 %v7027_v13  ;;  %v8442_v13 = vadd.f32 %v2669_v60, %v2656_v51 }
 0x265   : > { %10638 = vst [vmem:[#allocation3_spill] sm:$0xff] %v8435_v27 }
 0x266   : > { %3386 = vmatpush.bf16.msrb.mxu2 %v7037_v21  ;;  %v2697_v30 = vpop.f32.mrf.mxu0  ;;  %v3272_v2 = vpop.permute.xlu0 %3271  ;;  %10639 = vst [vmem:[#allocation8_spill] sm:$0xff] %v8442_v13 }
 0x267   : > { %v1998_v4 = vpop.permute.xlu1 %1997 }
 0x268   : > { %3365 = vmatpush.bf16.msra.mxu3 %v7070_v45 }
 0x26a   : > { %3387 = vmatpush.bf16.msrb.mxu2 %v7077_v50  ;;  %v2671_v21 = vpop.f32.mrf.mxu1  ;;  %v2645_v54 = vpop.f32.mrf.mxu2 }
 0x26b   : > { %v1100_v50 = vpop.permute.xlu2 %1099 }
 0x26c   : > { %3366 = vmatpush.bf16.msra.mxu3 %v7098_v1  ;;  %v1281_v1 = vsel %vm1094_vm10, %v8346_v7, %v8151_v32 }
 0x26d   : > { %v1283_v52 = vmax.f32 %v10640_v20, %v1281_v1 }
 0x26e   : > { %3388 = vmatpush.bf16.msrb.mxu2 %v7102_v24  ;;  %v1999_v24 = vsel %vm1094_vm10, %v1992_v63, %v1998_v4  ;;  %v2834_v14 = vpop.f32.mrf.mxu0 }
 0x26f   : > { %v2001_v45 = vmax.f32 %v8147_v38, %v1999_v24  ;;  %v3275_v6 = vpop.permute.xlu1 %3274  ;;  %v8458_v38 = vld [vmem:[%s10356_s2] ss:$0 sm:$0xff] }
 0x271   : > { %2003 = vrot.lane.b32.xlu1 %v2001_v45, %s6540_s29 }
 0x272   : > { %3389 = vmatpush.bf16.msrb.mxu2 %v7136_v12  ;;  %v1456_v12 = vpop.permute.xlu0 %1455  ;;  %v2808_v53 = vpop.f32.mrf.mxu1 }
 0x273   : > { %v1292_v37 = vpop.permute.xlu2 %1291  ;;  %v1459_v23 = vsel %vm1094_vm10, %v1456_v12, %v8239_v46 }
 0x274   : > { %v2682_v25 = vpop.f32.mrf.mxu2  ;;  %v1461_v16 = vmax.f32 %v7892_v10, %v1459_v23  ;;  %v5804_v23 = vld [vmem:[%s10357_s3 + $0x78] sm:$0xf] }
 0x275   : > { %v8461_v7 = vadd.f32 %v2695_v17, %v2682_v25 }
 0x276   : > { %3390 = vmatpush.bf16.msrb.mxu2 %v7152_v22  ;;  %v2658_v22 = vpop.f32.mrf.mxu3  ;;  %v2836_v47 = vpop.f32.mrf.mxu0 }
 0x277   : > { %v1634_v40 = vpop.permute.xlu1 %1633  ;;  %v6382_v47 = vld [vmem:[%s10357_s3 + $0x98] sm:$0xf0] }
 0x278   : > { %v1637_v51 = vsel %vm1094_vm10, %v1634_v40, %v8305_v11  ;;  %v6379_v40 = vld [vmem:[%s10357_s3 + $0x80] sm:$0xf0] }
 0x279   : > { %2347 = vrot.lane.b32.xlu1 %v8311_v39, %s6539_s13  ;;  %v1639_v4 = vmax.f32 %v7965_v9, %v1637_v51 }
 0x27a   : > { %3391 = vmatpush.bf16.msrb.mxu2 %v7171_v36  ;;  %v3325_v36 = vsel %vm808_vm8, %v8192_v15, %v3272_v2  ;;  %v1990_v43 = vpop.permute.xlu0 %1989  ;;  %v2810_v18 = vpop.f32.mrf.mxu1 }
 0x27b   : > { %v3326_v34 = vsel %vm810_vm9, %v3325_v36, %v3275_v6  ;;  %v8467_v5 = vsel %vm1094_vm10, %v1990_v43, %v1992_v63  ;;  %v5828_v36 = vld [vmem:[%s10357_s3 + $0xa8] sm:$0xf]  ;;  %v6385_v6 = vld [vmem:[%s10357_s3 + $0xb0] sm:$0xf0] }
 0x27c   : > { %v3328_v32 = vpack.c.bf16 %v3326_v34, %v3326_v34  ;;  %v2684_v41 = vpop.f32.mrf.mxu2  ;;  %v8518_v34 = vor.u32 %v6385_v6, %v5828_v36  ;;  %v6409_v6 = vld [vmem:[%s10357_s3 + $0x170] sm:$0xf0] }
 0x27d   : > { %v8538_v41 = vor.u32 %v6379_v40, %v5804_v23  ;;  %v6406_v23 = vld [vmem:[%s10357_s3 + $0x158] sm:$0xf0]  ;;  %v6384_v40 = vld [vmem:[%s10357_s3 + $0xac] sm:$0xf] }
 0x27e   : > { %3392 = vmatpush.bf16.msrb.mxu2 %v7191_v55  ;;  %v1294_v55 = vmax.f32 %v1283_v52, %v1292_v37  ;;  %3341 = vmatmul.bf16.vlgmr.msra.gmra.mxu0 %v3328_v32  ;;  %v2821_v59 = vpop.f32.mrf.mxu3  ;;  %v2999_v42 = vpop.f32.mrf.mxu0  ;;  %10645 = vst [vmem:[#allocation2_spill] sm:$0xff] %v8518_v34 }
 0x27f   : > { %3367 = vmatmul.bf16.vlgmr.msra.gmra.mxu3 %v3328_v32  ;;  %v8469_v8 = vadd.f32 %v2821_v59, %v2808_v53  ;;  %v8478_v29 = vpop.permute.xlu1 %1092  ;;  %3985 = vmatpush.bf16.msrb.mxu1 %v8518_v34  ;;  %10648 = vst [vmem:[#allocation14_spill] sm:$0xff] %v8538_v41 }
 0x280   : > { %v1295_v15 = vadd.f32 %v8458_v38, %v1294_v55  ;;  %v1101_v60 = vsel %vm1094_vm10, %v8478_v29, %v1100_v50 }
 0x281   : > { %3393 = vmatmul.bf16.vlgmr.msrb.gmra.mxu2 %v3328_v32  ;;  %10641 = vst [vmem:[#allocation4_spill] sm:$0xff] %v8469_v8  ;;  %v1103_v30 = vmax.f32 %v10629_v3, %v1101_v60  ;;  %v5816_v32 = vld [vmem:[%s10357_s3 + $0x90] sm:$0xf] }
 0x282   : > { %v1296_v48 = vmax.f32 %v1295_v15, 0.0  ;;  %v1470_v61 = vpop.permute.xlu0 %1469  ;;  %v2873_v17 = vpop.f32.mrf.mxu1  ;;  %v8527_v15 = vor.u32 %v6382_v47, %v5816_v32  ;;  %v6364_v32 = vld [vmem:[%s10357_s3 + $0x8] sm:$0xf0]  ;;  %v5912_v47 = vld [vmem:[%s10357_s3 + $0x150] sm:$0xf] }
 0x283   : > { %v1472_v31 = vmax.f32 %v1461_v16, %v1470_v61  ;;  %1105 = vrot.lane.b32.xlu0 %v1103_v30, %s6540_s29  ;;  %v5792_v16 = vld [vmem:[%s10357_s3 + $0x60] sm:$0xf]  ;;  %v6376_v61 = vld [vmem:[%s10357_s3 + $0x68] sm:$0xf0] }
 0x284   : > { %3434 = vrot.lane.b32.xlu1 %v1296_v48, %s6541_s14  ;;  %v2847_v58 = vpop.f32.mrf.mxu2  ;;  %10646 = vst [vmem:[#allocation5_spill] sm:$0xff] %v8527_v15  ;;  %3986 = vmatpush.bf16.msrb.mxu1 %v8527_v15 }
 0x285   : > { %v8476_v26 = vadd.f32 %v8458_v38, %v1472_v31  ;;  %v8484_v63 = vadd.f32 %v2847_v58, %v2834_v14  ;;  %v10650_v31 = vld [vmem:[#allocation11_spill] sm:$0xff] }
 0x286   : > { %v2823_v49 = vpop.f32.mrf.mxu3  ;;  %v3001_v10 = vpop.f32.mrf.mxu0 }
 0x287   : > { %v10384_v46 = vmax.f32 %v8476_v26, 0.0  ;;  %10642 = vst [vmem:[#allocation9_spill] sm:$0xff] %v8484_v63  ;;  %v1648_v45 = vpop.permute.xlu1 %1647  ;;  %v1817_v49 = vmax.f32 %v10650_v31, %v8378_v28  ;;  %v5780_v10 = vld [vmem:[%s10357_s3 + $0x48] sm:$0xf]  ;;  %v5768_v28 = vld [vmem:[%s10357_s3 + $0x30] sm:$0xf] }
 0x288   : > { %v1650_v14 = vmax.f32 %v1639_v4, %v1648_v45  ;;  %3987 = vmatpush.bf16.msrb.mxu1 %v8538_v41  ;;  %v8574_v45 = vpop.permute.xlu2 %2169  ;;  %v6451_v63 = vld [vmem:[%s10357_s3 + $0x2c0] sm:$0xf0] }
 0x289   : > { %3438 = vrot.lane.b32.xlu2 %v10384_v46, %s10431_s15  ;;  %v6421_v46 = vld [vmem:[%s10357_s3 + $0x1d0] sm:$0xf0] }
 0x28a   : > { %v2875_v21 = vpop.f32.mrf.mxu1  ;;  %v8500_v12 = vadd.f32 %v8458_v38, %v1650_v14 }
 0x28b   : > { %2345 = vrot.lane.b32.xlu0 %v8297_v57, %s6539_s13  ;;  %v6373_v21 = vld [vmem:[%s10357_s3 + $0x50] sm:$0xf0] }
 0x28c   : > { %v2849_v54 = vpop.f32.mrf.mxu2  ;;  %v1652_v20 = vmax.f32 %v8500_v12, 0.0  ;;  %v6372_v12 = vld [vmem:[%s10357_s3 + $0x4c] sm:$0xf] }
 0x28e   : > { %5741 = vmatmul.msk.bf16.vlgmr.msrb.gmra.mxu0 %vm808_vm8, %v8420_v62  ;;  %v3038_v50 = vpop.f32.mrf.mxu0  ;;  %3442 = vrot.lane.b32.xlu1 %v1652_v20, %s10425_s16 }
 0x292   : > { %v2860_v2 = vpop.f32.mrf.mxu3 }
 0x293   : > { %v8494_v3 = vadd.f32 %v2873_v17, %v2860_v2  ;;  %v8559_v2 = vor.u32 %v6373_v21, %v5780_v10  ;;  %v5818_v10 = vld [vmem:[%s10357_s3 + $0x9c] sm:$0xf0] }
 0x295   : > { %10651 = vst [vmem:[#allocation11_spill] sm:$0xff] %v8559_v2 }
 0x296   : > { %v3040_v1 = vpop.f32.mrf.mxu0 }
 0x29a   : > { %v2862_v24 = vpop.f32.mrf.mxu3 }
 0x29c   : > { %v3012_v62 = vpop.f32.mrf.mxu1 }
 0x29e   : > { %v8516_v55 = vpop.f32.mrf.mxu0 }
 0x2a2   : > { %v3025_v11 = vpop.f32.mrf.mxu3 }
 0x2a3   : > { %v8508_v9 = vadd.f32 %v3025_v11, %v3012_v62  ;;  %v5756_v11 = vld [vmem:[%s10357_s3 + $0x18] sm:$0xf] }
 0x2a4   : > { %v2986_v22 = vpop.f32.mrf.mxu2  ;;  %v3014_v52 = vpop.f32.mrf.mxu1 }
 0x2a5   : > { %v8502_v37 = vadd.f32 %v2999_v42, %v2986_v22  ;;  %10644 = vst [vmem:[#allocation12_spill] sm:$0xff] %v8508_v9  ;;  %v8547_v42 = vor.u32 %v6376_v61, %v5792_v16  ;;  %v6367_v52 = vld [vmem:[%s10357_s3 + $0x20] sm:$0xf0]  ;;  %v8621_v61 = vor.u32 %v6406_v23, %v5912_v47  ;;  %v5794_v47 = vld [vmem:[%s10357_s3 + $0x6c] sm:$0xf0] }
 0x2a6   : > { %v3205_v48 = vpop.f32.mrf.mxu0  ;;  %v8591_v36 = vor.u32 %v6367_v52, %v5756_v11  ;;  %v5876_v52 = vld [vmem:[%s10357_s3 + $0x108] sm:$0xf]  ;;  %v5864_v23 = vld [vmem:[%s10357_s3 + $0xf0] sm:$0xf]  ;;  %v6092_v9 = vld [vmem:[%s10357_s3 + $0x2b8] sm:$0xf] }
 0x2a7   : > { %10643 = vst [vmem:[#allocation10_spill] sm:$0xff] %v8502_v37  ;;  %3988 = vmatpush.bf16.msrb.mxu1 %v8547_v42  ;;  %v5830_v48 = vld [vmem:[%s10357_s3 + $0xb4] sm:$0xf0] }
 0x2a8   : > { %10649 = vst [vmem:[#allocation15_spill] sm:$0xff] %v8547_v42  ;;  %v8623_v31 = vor.u32 %v6384_v40, %v5830_v48  ;;  %v6394_v40 = vld [vmem:[%s10357_s3 + $0xf8] sm:$0xf0] }
 0x2a9   : > { %10655 = vst [vmem:[#allocation19_spill] sm:$0xff] %v8591_v36 }
 0x2aa   : > { %v3027_v25 = vpop.f32.mrf.mxu3  ;;  %10658 = vst [vmem:[#allocation22_spill] sm:$0xff] %v8621_v61 }
 0x2ab   : > { %3989 = vmatpush.bf16.msrb.mxu1 %v8559_v2  ;;  %v5744_v25 = vld [vmem:[%s10357_s3] sm:$0xf]  ;;  %10659 = vst [vmem:[#allocation23_spill] sm:$0xff] %v8623_v31 }
 0x2ac   : > { %v2988_v53 = vpop.f32.mrf.mxu2  ;;  %v3177_v43 = vpop.f32.mrf.mxu1 }
 0x2ad   : > { %v5924_v53 = vld [vmem:[%s10357_s3 + $0x168] sm:$0xf] }
 0x2af   : > { %v1826_v60 = vpop.permute.xlu0 %1825 }
 0x2b0   : > { %v1828_v58 = vmax.f32 %v1817_v49, %v1826_v60  ;;  %v5900_v49 = vld [vmem:[%s10357_s3 + $0x138] sm:$0xf] }
 0x2b2   : > { %v1829_v54 = vadd.f32 %v8458_v38, %v1828_v58 }
 0x2b4   : > { %v3051_v59 = vpop.f32.mrf.mxu2  ;;  %v3179_v17 = vpop.f32.mrf.mxu1  ;;  %v8567_v51 = vmax.f32 %v1829_v54, 0.0 }
 0x2b5   : > { %v8530_v18 = vadd.f32 %v3051_v59, %v3038_v50  ;;  %v6370_v50 = vld [vmem:[%s10357_s3 + $0x38] sm:$0xf0]  ;;  %v8610_v59 = vor.u32 %v6364_v32, %v5744_v25  ;;  %v6403_v17 = vld [vmem:[%s10357_s3 + $0x140] sm:$0xf0] }
 0x2b6   : > { %10652 = vst [vmem:[#allocation16_spill] sm:$0xff] %v8567_v51  ;;  %v8570_v4 = vor.u32 %v6370_v50, %v5768_v28  ;;  %3446 = vrot.lane.b32.xlu1 %v8567_v51, %s6544_s23  ;;  %v8634_v58 = vor.u32 %v6403_v17, %v5900_v49  ;;  %v5888_v28 = vld [vmem:[%s10357_s3 + $0x120] sm:$0xf]  ;;  %v6400_v50 = vld [vmem:[%s10357_s3 + $0x128] sm:$0xf0] }
 0x2b7   : > { %10647 = vst [vmem:[#allocation13_spill] sm:$0xff] %v8530_v18  ;;  %v6375_v32 = vld [vmem:[%s10357_s3 + $0x64] sm:$0xf] }
 0x2b8   : > { %10653 = vst [vmem:[#allocation17_spill] sm:$0xff] %v8570_v4  ;;  %3990 = vmatpush.bf16.msrb.mxu1 %v8570_v4 }
 0x2b9   : > { %10657 = vst [vmem:[#allocation21_spill] sm:$0xff] %v8610_v59 }
 0x2ba   : > { %10660 = vst [vmem:[#allocation24_spill] sm:$0xff] %v8634_v58 }
 0x2bc   : > { %v3053_v30 = vpop.f32.mrf.mxu2  ;;  %3991 = vmatpush.bf16.msrb.mxu1 %v8591_v36 }
 0x2bd   : > { %v6381_v30 = vld [vmem:[%s10357_s3 + $0x94] sm:$0xf] }
 0x2be   : > { %v8647_v54 = vor.u32 %v6381_v30, %v5818_v10  ;;  %v6391_v30 = vld [vmem:[%s10357_s3 + $0xe0] sm:$0xf0] }
 0x2c0   : > { %3992 = vmatpush.bf16.msrb.mxu1 %v8610_v59  ;;  %10662 = vst [vmem:[#allocation26_spill] sm:$0xff] %v8647_v54 }
 0x2c2   : > { %v3164_v24 = vpop.f32.mrf.mxu3 }
 0x2c3   : > { %v8576_v62 = vadd.f32 %v3177_v43, %v3164_v24  ;;  %v8657_v24 = vor.u32 %v6400_v50, %v5888_v28  ;;  %v6369_v50 = vld [vmem:[%s10357_s3 + $0x34] sm:$0xf] }
 0x2c4   : > { %v2176_v14 = vpop.permute.xlu0 %2175  ;;  %4037 = vmatpush.bf16.msra.mxu1 %v8623_v31 }
 0x2c5   : > { %10654 = vst [vmem:[#allocation18_spill] sm:$0xff] %v8576_v62  ;;  %v2177_v1 = vsel %vm1094_vm10, %v8574_v45, %v2176_v14  ;;  %v5806_v14 = vld [vmem:[%s10357_s3 + $0x84] sm:$0xf0] }
 0x2c6   : > { %v2179_v22 = vmax.f32 %v8242_v44, %v2177_v1  ;;  %v8597_v44 = vor.u32 %v6409_v6, %v5924_v53  ;;  %10663 = vst [vmem:[#allocation27_spill] sm:$0xff] %v8657_v24  ;;  %v6397_v53 = vld [vmem:[%s10357_s3 + $0x110] sm:$0xf0] }
 0x2c7   : > { %v8677_v25 = vor.u32 %v6397_v53, %v5876_v52  ;;  %v5840_v53 = vld [vmem:[%s10357_s3 + $0xc0] sm:$0xf] }
 0x2c8   : > { %2181 = vrot.lane.b32.xlu0 %v2179_v22, %s6540_s29  ;;  %10656 = vst [vmem:[#allocation20_spill] sm:$0xff] %v8597_v44  ;;  %3998 = vmatpush.bf16.msrb.mxu3 %v8597_v44 }
 0x2c9   : > { %4038 = vmatpush.bf16.msra.mxu1 %v8647_v54  ;;  %10665 = vst [vmem:[#allocation29_spill] sm:$0xff] %v8677_v25 }
 0x2ca   : > { %v3166_v43 = vpop.f32.mrf.mxu3 }
 0x2cb   : > { %v8688_v43 = vor.u32 %v6375_v32, %v5794_v47  ;;  %v6366_v47 = vld [vmem:[%s10357_s3 + $0x1c] sm:$0xf] }
 0x2cc   : > { %v3216_v16 = vpop.f32.mrf.mxu1  ;;  %3999 = vmatpush.bf16.msrb.mxu3 %v8621_v61  ;;  %v1091_v37 = vpop.permute.xlu0 %1090 }
 0x2cd   : > { %10666 = vst [vmem:[#allocation30_spill] sm:$0xff] %v8688_v43 }
 0x2d0   : > { %2531 = vrot.lane.b32.xlu0 %v8416_v0, %s6539_s13  ;;  %4000 = vmatpush.bf16.msrb.mxu3 %v8634_v58  ;;  %v6378_v0 = vld [vmem:[%s10357_s3 + $0x7c] sm:$0xf] }
 0x2d1   : > { %v8667_v11 = vor.u32 %v6378_v0, %v5806_v14  ;;  %v6020_v14 = vld [vmem:[%s10357_s3 + $0x228] sm:$0xf] }
 0x2d3   : > { %4039 = vmatpush.bf16.msra.mxu1 %v8667_v11 }
 0x2d4   : > { %v3190_v60 = vpop.f32.mrf.mxu2  ;;  %v3218_v22 = vpop.f32.mrf.mxu1  ;;  %4001 = vmatpush.bf16.msrb.mxu3 %v8657_v24 }
 0x2d5   : > { %v8643_v21 = vadd.f32 %v8516_v55, %v3190_v60  ;;  %v3229_v55 = vpop.f32.mrf.mxu3  ;;  %v5852_v60 = vld [vmem:[%s10357_s3 + $0xd8] sm:$0xf]  ;;  %v6433_v22 = vld [vmem:[%s10357_s3 + $0x230] sm:$0xf0] }
 0x2d6   : > { %v8665_v1 = vadd.f32 %v3229_v55, %v3216_v16  ;;  %v8698_v16 = vor.u32 %v6394_v40, %v5864_v23  ;;  %v8720_v28 = vor.u32 %v6391_v30, %v5852_v60  ;;  %v5770_v55 = vld [vmem:[%s10357_s3 + $0x3c] sm:$0xf0]  ;;  %v8738_v52 = vor.u32 %v6433_v22, %v6020_v14  ;;  %v5758_v23 = vld [vmem:[%s10357_s3 + $0x24] sm:$0xf0]  ;;  %v6408_v40 = vld [vmem:[%s10357_s3 + $0x16c] sm:$0xf] }
 0x2d7   : > { %10661 = vst [vmem:[#allocation25_spill] sm:$0xff] %v8643_v21  ;;  %4040 = vmatpush.bf16.msra.mxu1 %v8688_v43  ;;  %v8730_v0 = vor.u32 %v6369_v50, %v5770_v55  ;;  %v6008_v60 = vld [vmem:[%s10357_s3 + $0x210] sm:$0xf]  ;;  %v6430_v30 = vld [vmem:[%s10357_s3 + $0x218] sm:$0xf0]  ;;  %v1995_v14 = vmax.f32 %v8228_v56, %v8467_v5  ;;  %v8855_v21 = vld [vmem:[%s10357_s3 + $0x2e8] sm:$0xff] }
 0x2d8   : > { %10664 = vst [vmem:[#allocation28_spill] sm:$0xff] %v8665_v1  ;;  %4167 = vrot.lane.b32.xlu0 %v1652_v20, %s6541_s14  ;;  %4002 = vmatpush.bf16.msrb.mxu3 %v8677_v25  ;;  %v5782_v20 = vld [vmem:[%s10357_s3 + $0x54] sm:$0xf0]  ;;  %v8773_v55 = vor.u32 %v6430_v30, %v6008_v60  ;;  %v6405_v56 = vld [vmem:[%s10357_s3 + $0x154] sm:$0xf] }
 0x2d9   : > { %10667 = vst [vmem:[#allocation31_spill] sm:$0xff] %v8698_v16  ;;  %v8708_v17 = vor.u32 %v6372_v12, %v5782_v20  ;;  %4011 = vmatpush.bf16.msra.mxu0 %v8738_v52  ;;  %v8760_v12 = vor.u32 %v6366_v47, %v5758_v23  ;;  %v5926_v20 = vld [vmem:[%s10357_s3 + $0x174] sm:$0xf0]  ;;  %v5746_v47 = vld [vmem:[%s10357_s3 + $0xc] sm:$0xf0] }
 0x2da   : > { %10669 = vst [vmem:[#allocation33_spill] sm:$0xff] %v8720_v28  ;;  %v8771_v50 = vor.u32 %v6408_v40, %v5926_v20  ;;  %v5914_v40 = vld [vmem:[%s10357_s3 + $0x15c] sm:$0xf0]  ;;  %v6427_v20 = vld [vmem:[%s10357_s3 + $0x200] sm:$0xf0] }
 0x2db   : > { %10668 = vst [vmem:[#allocation32_spill] sm:$0xff] %v8708_v17  ;;  %4041 = vmatpush.bf16.msra.mxu1 %v8708_v17  ;;  %v8801_v60 = vor.u32 %v6405_v56, %v5914_v40  ;;  %v5984_v56 = vld [vmem:[%s10357_s3 + $0x1e0] sm:$0xf] }
 0x2dc   : > { %v3192_v6 = vpop.f32.mrf.mxu2  ;;  %v8706_v49 = vpop.f32.mrf.mxu1  ;;  %4003 = vmatpush.bf16.msrb.mxu3 %v8698_v16  ;;  %10670 = vst [vmem:[#allocation34_spill] sm:$0xff] %v8730_v0 }
 0x2dd   : > { %v3231_v48 = vpop.f32.mrf.mxu3  ;;  %10671 = vst [vmem:[#allocation35_spill] sm:$0xff] %v8738_v52  ;;  %v6388_v6 = vld [vmem:[%s10357_s3 + $0xc8] sm:$0xf0]  ;;  %4012 = vmatpush.bf16.msra.mxu0 %v8773_v55 }
 0x2de   : > { %v8749_v32 = vor.u32 %v6388_v6, %v5840_v53  ;;  %10673 = vst [vmem:[#allocation37_spill] sm:$0xff] %v8760_v12  ;;  %v6363_v6 = vld [vmem:[%s10357_s3 + $0x4] sm:$0xf] }
 0x2df   : > { %4042 = vmatpush.bf16.msra.mxu1 %v8730_v0  ;;  %10674 = vst [vmem:[#allocation38_spill] sm:$0xff] %v8771_v50  ;;  %v8790_v23 = vor.u32 %v6363_v6, %v5746_v47 }
 0x2e0   : > { %2523 = vrot.lane.b32.xlu0 %v8374_v33, %s6539_s13  ;;  %4004 = vmatpush.bf16.msrb.mxu3 %v8720_v28  ;;  %10672 = vst [vmem:[#allocation36_spill] sm:$0xff] %v8749_v32  ;;  %v3779_v33 = vunpack.c.l.b16 %v8855_v21 }
 0x2e1   : > { %10675 = vst [vmem:[#allocation39_spill] sm:$0xff] %v8773_v55 }
 0x2e2   : > { %10676 = vst [vmem:[#allocation40_spill] sm:$0xff] %v8790_v23 }
 0x2e3   : > { %4043 = vmatpush.bf16.msra.mxu1 %v8760_v12  ;;  %v2004_v53 = vpop.permute.xlu1 %2003  ;;  %10677 = vst [vmem:[#allocation41_spill] sm:$0xff] %v8801_v60 }
 0x2e4   : > { %v8718_v10 = vpop.f32.mrf.mxu2  ;;  %v3383_v48 = vpop.f32.mrf.mxu1  ;;  %4005 = vmatpush.bf16.msrb.mxu3 %v8749_v32  ;;  %v2006_v5 = vmax.f32 %v1995_v14, %v2004_v53  ;;  %v5902_v53 = vld [vmem:[%s10357_s3 + $0x144] sm:$0xf0] }
 0x2e5   : > { %v5996_v48 = vld [vmem:[%s10357_s3 + $0x1f8] sm:$0xf] }
 0x2e6   : > { %v8803_v30 = vor.u32 %v6427_v20, %v5996_v48  ;;  %v2007_v14 = vadd.f32 %v8458_v38, %v2006_v5  ;;  %v6424_v5 = vld [vmem:[%s10357_s3 + $0x1e8] sm:$0xf0]  ;;  %v2354_v48 = vpop.permute.xlu2 %2353 }
 0x2e7   : > { %4044 = vmatpush.bf16.msra.mxu1 %v8790_v23  ;;  %v8825_v40 = vor.u32 %v6424_v5, %v5984_v56 }
 0x2e8   : > { %4050 = vmatpush.bf16.msra.mxu3 %v8771_v50  ;;  %10678 = vst [vmem:[#allocation42_spill] sm:$0xff] %v8803_v30  ;;  %4013 = vmatpush.bf16.msra.mxu0 %v8803_v30  ;;  %v8815_v6 = vmax.f32 %v2007_v14, 0.0  ;;  %v6399_v14 = vld [vmem:[%s10357_s3 + $0x124] sm:$0xf] }
 0x2ea   : > { %3450 = vrot.lane.b32.xlu2 %v8815_v6, %s10433_s25  ;;  %s10774_s25 = smov 40  }
 0x2eb   : > { %v8829_v20 = vpop.permute.xlu1 %2347 }
 0x2ec   : > { %v3357_v22 = vpop.f32.mrf.mxu2  ;;  %4051 = vmatpush.bf16.msra.mxu3 %v8801_v60  ;;  %4014 = vmatpush.bf16.msra.mxu0 %v8825_v40  ;;  %v2355_v56 = vsel %vm1094_vm10, %v8829_v20, %v2354_v48  ;;  %v6396_v48 = vld [vmem:[%s10357_s3 + $0x10c] sm:$0xf] }
 0x2ed   : > { %v6402_v22 = vld [vmem:[%s10357_s3 + $0x13c] sm:$0xf]  ;;  %v2357_v62 = vmax.f32 %v8311_v39, %v2355_v56  ;;  %v5878_v39 = vld [vmem:[%s10357_s3 + $0x114] sm:$0xf0] }
 0x2ee   : > { %v8817_v47 = vor.u32 %v6402_v22, %v5902_v53  ;;  %v5890_v22 = vld [vmem:[%s10357_s3 + $0x12c] sm:$0xf0]  ;;  %v5972_v53 = vld [vmem:[%s10357_s3 + $0x1c8] sm:$0xf] }
 0x2ef   : > { %v8844_v5 = vor.u32 %v6399_v14, %v5890_v22  ;;  %v8850_v1 = vor.u32 %v6421_v46, %v5972_v53  ;;  %2359 = vrot.lane.b32.xlu1 %v2357_v62, %s6540_s29  ;;  %v3875_v46 = vpack.c.b16 %v3779_v33, %v3779_v33  ;;  %v8867_v14 = vor.u32 %v6396_v48, %v5878_v39  ;;  %v5960_v62 = vld [vmem:[%s10357_s3 + $0x1b0] sm:$0xf]  ;;  %v6418_v22 = vld [vmem:[%s10357_s3 + $0x1b8] sm:$0xf0] }
 0x2f0   : > { %10679 = vst [vmem:[#allocation43_spill] sm:$0xff] %v8817_v47  ;;  %4052 = vmatpush.bf16.msra.mxu3 %v8817_v47  ;;  %v8875_v53 = vor.u32 %v6418_v22, %v5960_v62  ;;  %v6104_v33 = vld [vmem:[%s10357_s3 + $0x2d0] sm:$0xf]  ;;  %v6454_v48 = vld [vmem:[%s10357_s3 + $0x2d8] sm:$0xf0] }
 0x2f1   : > { %10680 = vst [vmem:[#allocation44_spill] sm:$0xff] %v8850_v1  ;;  %4015 = vmatpush.bf16.msra.mxu0 %v8850_v1  ;;  %v8880_v56 = vsel %vm3975_vm11, %v3875_v46, 0  ;;  %v8890_v39 = vor.u32 %v6454_v48, %v6104_v33  ;;  %v6393_v62 = vld [vmem:[%s10357_s3 + $0xf4] sm:$0xf]  ;;  %v5866_v46 = vld [vmem:[%s10357_s3 + $0xfc] sm:$0xf0] }
 0x2f2   : > { %10681 = vst [vmem:[#allocation45_spill] sm:$0xff] %v8867_v14  ;;  %2525 = vrot.lane.b32.xlu2 %v8408_v19, %s6539_s13  ;;  %4024 = vmatpush.bf16.msra.mxu2 %v8880_v56  ;;  %v5948_v22 = vld [vmem:[%s10357_s3 + $0x198] sm:$0xf]  ;;  %v8902_v18 = vor.u32 %v6393_v62, %v5866_v46  ;;  %v6415_v33 = vld [vmem:[%s10357_s3 + $0x1a0] sm:$0xf0]  ;;  %v8918_v62 = vor.u32 %v6451_v63, %v6092_v9 }
 0x2f3   : > { %10682 = vst [vmem:[#allocation46_spill] sm:$0xff] %v8875_v53  ;;  %v8907_v48 = vor.u32 %v6415_v33, %v5948_v22  ;;  %v6390_v46 = vld [vmem:[%s10357_s3 + $0xdc] sm:$0xf]  ;;  %v5854_v22 = vld [vmem:[%s10357_s3 + $0xe4] sm:$0xf0]  ;;  %v1095_v33 = vsel %vm1094_vm10, %v1091_v37, %v8478_v29 }
 0x2f4   : > { %4053 = vmatpush.bf16.msra.mxu3 %v8844_v5  ;;  %10683 = vst [vmem:[#allocation47_spill] sm:$0xff] %v8880_v56  ;;  %v8933_v63 = vor.u32 %v6390_v46, %v5854_v22  ;;  %v5936_v9 = vld [vmem:[%s10357_s3 + $0x180] sm:$0xf]  ;;  %v6432_v29 = vld [vmem:[%s10357_s3 + $0x22c] sm:$0xf]  ;;  %v1097_v46 = vmax.f32 %v10637_v35, %v1095_v33 }
 0x2f5   : > { %10684 = vst [vmem:[#allocation48_spill] sm:$0xff] %v8890_v39  ;;  %4016 = vmatpush.bf16.msra.mxu0 %v8875_v53  ;;  %v6022_v37 = vld [vmem:[%s10357_s3 + $0x234] sm:$0xf0] }
 0x2f6   : > { %10685 = vst [vmem:[#allocation49_spill] sm:$0xff] %v8902_v18  ;;  %4025 = vmatpush.bf16.msra.mxu2 %v8890_v39  ;;  %v6412_v39 = vld [vmem:[%s10357_s3 + $0x188] sm:$0xf0] }
 0x2f7   : > { %10686 = vst [vmem:[#allocation50_spill] sm:$0xff] %v8907_v48  ;;  %2703 = vrot.lane.b32.xlu1 %v8442_v13, %s6539_s13  ;;  %v8941_v13 = vor.u32 %v6412_v39, %v5936_v9  ;;  %v6448_v39 = vld [vmem:[%s10357_s3 + $0x2a8] sm:$0xf0]  ;;  %v5842_v9 = vld [vmem:[%s10357_s3 + $0xcc] sm:$0xf0] }
 0x2f8   : > { %4054 = vmatpush.bf16.msra.mxu3 %v8867_v14  ;;  %10687 = vst [vmem:[#allocation51_spill] sm:$0xff] %v8918_v62 }
 0x2f9   : > { %4017 = vmatpush.bf16.msra.mxu0 %v8907_v48  ;;  %10689 = vst [vmem:[#allocation53_spill] sm:$0xff] %v8933_v63 }
 0x2fa   : > { %10690 = vst [vmem:[#allocation54_spill] sm:$0xff] %v8941_v13  ;;  %2709 = vrot.lane.b32.xlu2 %v8461_v7, %s6539_s13  ;;  %4026 = vmatpush.bf16.msra.mxu2 %v8918_v62  ;;  %v6387_v7 = vld [vmem:[%s10357_s3 + $0xc4] sm:$0xf] }
 0x2fb   : > { %v3342_v14 = vpop.f32.mrf.mxu0 }
 0x2fc   : > { %v8929_v8 = vadd.f32 %v8718_v10, %v3342_v14  ;;  %4055 = vmatpush.bf16.msra.mxu3 %v8902_v18  ;;  %v8951_v10 = vor.u32 %v6432_v29, %v6022_v37  ;;  %v6080_v14 = vld [vmem:[%s10357_s3 + $0x2a0] sm:$0xf]  ;;  %v1106_v29 = vpop.permute.xlu0 %1105  ;;  %v8971_v37 = vor.u32 %v6387_v7, %v5842_v9  ;;  %v6445_v7 = vld [vmem:[%s10357_s3 + $0x290] sm:$0xf0] }
 0x2fd   : > { %v8961_v22 = vor.u32 %v6448_v39, %v6080_v14  ;;  %4018 = vmatpush.bf16.msra.mxu0 %v8941_v13  ;;  %v1108_v35 = vmax.f32 %v1097_v46, %v1106_v29  ;;  %v6429_v14 = vld [vmem:[%s10357_s3 + $0x214] sm:$0xf]  ;;  %v6010_v39 = vld [vmem:[%s10357_s3 + $0x21c] sm:$0xf0]  ;;  %v6068_v46 = vld [vmem:[%s10357_s3 + $0x288] sm:$0xf] }
 0x2fe   : > { %10688 = vst [vmem:[#allocation52_spill] sm:$0xff] %v8929_v8  ;;  %v8983_v62 = vor.u32 %v6429_v14, %v6010_v39  ;;  %v6386_v14 = vld [vmem:[%s10357_s3 + $0xb8] sm:$0xf0]  ;;  %v5938_v13 = vld [vmem:[%s10357_s3 + $0x18c] sm:$0xf0] }
 0x2ff   : > { %10691 = vst [vmem:[#allocation55_spill] sm:$0xff] %v8951_v10  ;;  %v1112_v9 = vadd.f32 %v8458_v38, %v1108_v35  ;;  %4170 = vrot.lane.b32.xlu1 %v8567_v51, %s10431_s15  ;;  %4027 = vmatpush.bf16.msra.mxu2 %v8961_v22  ;;  %v6426_v39 = vld [vmem:[%s10357_s3 + $0x1fc] sm:$0xf]  ;;  %s10750_s15 = smov 36  }
 0x300   : > { %10692 = vst [vmem:[#allocation56_spill] sm:$0xff] %v8961_v22  ;;  %4056 = vmatpush.bf16.msra.mxu3 %v8933_v63 }
 0x301   : > { %10693 = vst [vmem:[#allocation57_spill] sm:$0xff] %v8971_v37  ;;  %4063 = vmatpush.bf16.msrb.mxu0 %v8951_v10  ;;  %v1113_v35 = vmax.f32 %v1112_v9, 0.0  ;;  %v6056_v9 = vld [vmem:[%s10357_s3 + $0x270] sm:$0xf] }
 0x302   : > { %v3368_v33 = vpop.f32.mrf.mxu3  ;;  %10695 = vst [vmem:[#allocation59_spill] sm:$0xff] %v8983_v62  ;;  %4173 = vrot.lane.b32.xlu2 %v8815_v6, %s10425_s16 }
 0x303   : > { %v8981_v8 = vadd.f32 %v8706_v49, %v3368_v33  ;;  %v3344_v29 = vpop.f32.mrf.mxu0  ;;  %v8995_v49 = vor.u32 %v6445_v7, %v6068_v46  ;;  %v5836_v33 = vld [vmem:[%s10357_s3 + $0xb0] sm:$0xf]  ;;  %v5998_v46 = vld [vmem:[%s10357_s3 + $0x204] sm:$0xf0]  ;;  %v9011_v7 = vpop.permute.xlu1 %3434 }
 0x304   : > { %v3394_v63 = vpop.f32.mrf.mxu2  ;;  %4057 = vmatpush.bf16.msra.mxu3 %v8971_v37  ;;  %v9015_v29 = vor.u32 %v6426_v39, %v5998_v46  ;;  %v3454_v51 = vsel %vm3453_vm12, %v1113_v35, %v9011_v7  ;;  %v9025_v37 = vor.u32 %v6386_v14, %v5836_v33  ;;  %v5824_v39 = vld [vmem:[%s10357_s3 + $0x98] sm:$0xf]  ;;  %v6383_v46 = vld [vmem:[%s10357_s3 + $0xa0] sm:$0xf0] }
 0x305   : > { %10694 = vst [vmem:[#allocation58_spill] sm:$0xff] %v8981_v8  ;;  %4064 = vmatpush.bf16.msrb.mxu0 %v8983_v62  ;;  %v6442_v8 = vld [vmem:[%s10357_s3 + $0x278] sm:$0xf0]  ;;  %4028 = vmatpush.bf16.msra.mxu2 %v8995_v49  ;;  %v9028_v62 = vpack.c.bf16 %v3454_v51, %v3454_v51  ;;  %v6423_v33 = vld [vmem:[%s10357_s3 + $0x1e4] sm:$0xf] }
 0x306   : > { %10696 = vst [vmem:[#allocation60_spill] sm:$0xff] %v8995_v49  ;;  %v9036_v22 = vor.u32 %v6442_v8, %v6056_v9  ;;  %v5986_v51 = vld [vmem:[%s10357_s3 + $0x1ec] sm:$0xf0]  ;;  %v6044_v8 = vld [vmem:[%s10357_s3 + $0x258] sm:$0xf] }
 0x307   : > { %10697 = vst [vmem:[#allocation61_spill] sm:$0xff] %v9015_v29  ;;  %3993 = vmatmul.bf16.vlgmr.msrb.gmra.mxu1 %v9028_v62  ;;  %v9046_v35 = vor.u32 %v6423_v33, %v5986_v51  ;;  %2701 = vrot.lane.b32.xlu1 %v8435_v27, %s6539_s13  ;;  %v5812_v33 = vld [vmem:[%s10357_s3 + $0x80] sm:$0xf]  ;;  %v6380_v51 = vld [vmem:[%s10357_s3 + $0x88] sm:$0xf0] }
 0x308   : > { %10698 = vst [vmem:[#allocation62_spill] sm:$0xff] %v9036_v22  ;;  %4089 = vmatpush.bf16.msrb.mxu1 %v9025_v37  ;;  %v6420_v27 = vld [vmem:[%s10357_s3 + $0x1cc] sm:$0xf] }
 0x309   : > { %4065 = vmatpush.bf16.msrb.mxu0 %v9015_v29  ;;  %10699 = vst [vmem:[#allocation63_spill] sm:$0xff] %v9046_v35  ;;  %v9057_v29 = vor.u32 %v6383_v46, %v5824_v39  ;;  %4029 = vmatpush.bf16.msra.mxu2 %v9036_v22  ;;  %v3780_v39 = vunpack.c.h.b16 %v8855_v21 }
 0x30a   : > { %v3370_v10 = vpop.f32.mrf.mxu3 }
 0x30b   : > { %v6439_v10 = vld [vmem:[%s10357_s3 + $0x260] sm:$0xf0]  ;;  %v3407_v9 = vpop.f32.mrf.mxu0  ;;  %10700 = vst [vmem:[#allocation64_spill] sm:$0xff] %v9057_v29 }
 0x30c   : > { %v3396_v14 = vpop.f32.mrf.mxu2  ;;  %v9068_v49 = vor.u32 %v6439_v10, %v6044_v8  ;;  %v6436_v8 = vld [vmem:[%s10357_s3 + $0x248] sm:$0xf0]  ;;  %4090 = vmatpush.bf16.msrb.mxu1 %v9057_v29  ;;  %v9087_v10 = vor.u32 %v6380_v51, %v5812_v33  ;;  %v5962_v33 = vld [vmem:[%s10357_s3 + $0x1bc] sm:$0xf0]  ;;  %v9105_v51 = vpop.permute.xlu2 %2167 }
 0x30d   : > { %v9059_v14 = vadd.f32 %v3407_v9, %v3394_v63  ;;  %4066 = vmatpush.bf16.msrb.mxu0 %v9046_v35  ;;  %v5974_v63 = vld [vmem:[%s10357_s3 + $0x1d4] sm:$0xf0]  ;;  %v6032_v9 = vld [vmem:[%s10357_s3 + $0x240] sm:$0xf]  ;;  %v5800_v35 = vld [vmem:[%s10357_s3 + $0x68] sm:$0xf] }
 0x30e   : > { %10702 = vst [vmem:[#allocation66_spill] sm:$0xff] %v9068_v49  ;;  %v9078_v46 = vor.u32 %v6420_v27, %v5974_v63  ;;  %v6377_v27 = vld [vmem:[%s10357_s3 + $0x70] sm:$0xf0]  ;;  %4030 = vmatpush.bf16.msra.mxu2 %v9068_v49  ;;  %v9096_v21 = vor.u32 %v6436_v8, %v6032_v9  ;;  %v6106_v49 = vld [vmem:[%s10357_s3 + $0x2dc] sm:$0xf0] }
 0x30f   : > { %10701 = vst [vmem:[#allocation65_spill] sm:$0xff] %v9059_v14  ;;  %v3876_v14 = vpack.c.b16 %v3780_v39, %v3780_v39  ;;  %v6417_v63 = vld [vmem:[%s10357_s3 + $0x1b4] sm:$0xf]  ;;  %v9113_v8 = vor.u32 %v6377_v27, %v5800_v35  ;;  %v6414_v35 = vld [vmem:[%s10357_s3 + $0x19c] sm:$0xf] }
 0x310   : > { %10703 = vst [vmem:[#allocation67_spill] sm:$0xff] %v9078_v46  ;;  %v9110_v22 = vor.u32 %v6417_v63, %v5962_v33  ;;  %4091 = vmatpush.bf16.msrb.mxu1 %v9087_v10  ;;  %v6374_v63 = vld [vmem:[%s10357_s3 + $0x58] sm:$0xf0]  ;;  %v5950_v33 = vld [vmem:[%s10357_s3 + $0x1a4] sm:$0xf0] }
 0x311   : > { %10704 = vst [vmem:[#allocation68_spill] sm:$0xff] %v9096_v21  ;;  %4067 = vmatpush.bf16.msrb.mxu0 %v9078_v46  ;;  %v9108_v39 = vsel %vm3975_vm11, %v3876_v14, 0  ;;  %v6453_v46 = vld [vmem:[%s10357_s3 + $0x2d4] sm:$0xf]  ;;  %v5788_v14 = vld [vmem:[%s10357_s3 + $0x50] sm:$0xf] }
 0x312   : > { %10705 = vst [vmem:[#allocation69_spill] sm:$0xff] %v9108_v39  ;;  %4031 = vmatpush.bf16.msra.mxu2 %v9096_v21  ;;  %v9133_v27 = vor.u32 %v6453_v46, %v6106_v49  ;;  %v9141_v21 = vor.u32 %v6374_v63, %v5788_v14  ;;  %v6094_v49 = vld [vmem:[%s10357_s3 + $0x2c4] sm:$0xf0]  ;;  %v5776_v46 = vld [vmem:[%s10357_s3 + $0x38] sm:$0xf] }
 0x313   : > { %10706 = vst [vmem:[#allocation70_spill] sm:$0xff] %v9110_v22  ;;  %v3409_v9 = vpop.f32.mrf.mxu0  ;;  %v5932_v14 = vld [vmem:[%s10357_s3 + $0x170] sm:$0xf]  ;;  %v6410_v63 = vld [vmem:[%s10357_s3 + $0x178] sm:$0xf0] }
 0x314   : > { %10707 = vst [vmem:[#allocation71_spill] sm:$0xff] %v9113_v8  ;;  %v9138_v9 = vor.u32 %v6414_v35, %v5950_v33  ;;  %4092 = vmatpush.bf16.msrb.mxu1 %v9113_v8  ;;  %v6371_v35 = vld [vmem:[%s10357_s3 + $0x40] sm:$0xf0]  ;;  %v3439_v18 = vpop.permute.xlu2 %3438  ;;  %v6082_v8 = vld [vmem:[%s10357_s3 + $0x2ac] sm:$0xf0] }
 0x315   : > { %4068 = vmatpush.bf16.msrb.mxu0 %v9110_v22  ;;  %10708 = vst [vmem:[#allocation72_spill] sm:$0xff] %v9133_v27  ;;  %v6411_v22 = vld [vmem:[%s10357_s3 + $0x184] sm:$0xf] }
 0x316   : > { %4076 = vmatpush.bf16.msrb.mxu2 %v9108_v39  ;;  %10709 = vst [vmem:[#allocation73_spill] sm:$0xff] %v9138_v9  ;;  %v6450_v39 = vld [vmem:[%s10357_s3 + $0x2bc] sm:$0xf]  ;;  %v9172_v48 = vor.u32 %v6411_v22, %v5938_v13  ;;  %v6368_v22 = vld [vmem:[%s10357_s3 + $0x28] sm:$0xf0] }
 0x317   : > { %10710 = vst [vmem:[#allocation74_spill] sm:$0xff] %v9141_v21  ;;  %v9163_v33 = vor.u32 %v6450_v39, %v6094_v49  ;;  %4045 = vmatmul.bf16.vlgmr.msra.gmra.mxu1 %v9028_v62  ;;  %v9177_v39 = vpop.permute.xlu1 %3442  ;;  %v9179_v49 = vor.u32 %v6371_v35, %v5776_v46  ;;  %v5920_v35 = vld [vmem:[%s10357_s3 + $0x158] sm:$0xf] }
 0x318   : > { %10712 = vst [vmem:[#allocation76_spill] sm:$0xff] %v9172_v48  ;;  %4093 = vmatpush.bf16.msrb.mxu1 %v9141_v21 }
 0x319   : > { %4069 = vmatpush.bf16.msrb.mxu0 %v9138_v9  ;;  %10711 = vst [vmem:[#allocation75_spill] sm:$0xff] %v9163_v33  ;;  %v6447_v9 = vld [vmem:[%s10357_s3 + $0x2a4] sm:$0xf] }
 0x31a   : > { %4077 = vmatpush.bf16.msrb.mxu2 %v9133_v27  ;;  %v3456_v27 = vsel %vm3455_vm13, %v9011_v7, %v3439_v18  ;;  %10713 = vst [vmem:[#allocation77_spill] sm:$0xff] %v9179_v49  ;;  %v5764_v18 = vld [vmem:[%s10357_s3 + $0x20] sm:$0xf]  ;;  %v9195_v7 = vor.u32 %v6410_v63, %v5932_v14  ;;  %v9207_v21 = vor.u32 %v6447_v9, %v6082_v8  ;;  %v6444_v63 = vld [vmem:[%s10357_s3 + $0x28c] sm:$0xf] }
 0x31b   : > { %v3458_v13 = vsel %vm3457_vm14, %v3456_v27, %v9177_v39  ;;  %v6407_v27 = vld [vmem:[%s10357_s3 + $0x160] sm:$0xf0]  ;;  %v9211_v14 = vor.u32 %v6368_v22, %v5764_v18  ;;  %v5752_v8 = vld [vmem:[%s10357_s3 + $0x8] sm:$0xf]  ;;  %v6365_v9 = vld [vmem:[%s10357_s3 + $0x10] sm:$0xf0] }
 0x31c   : > { %10714 = vst [vmem:[#allocation78_spill] sm:$0xff] %v9195_v7  ;;  %v9197_v46 = vpack.c.bf16 %v3458_v13, %v3458_v13  ;;  %4094 = vmatpush.bf16.msrb.mxu1 %v9179_v49  ;;  %v6070_v13 = vld [vmem:[%s10357_s3 + $0x294] sm:$0xf0]  ;;  %v9226_v18 = vor.u32 %v6407_v27, %v5920_v35  ;;  %v5908_v22 = vld [vmem:[%s10357_s3 + $0x140] sm:$0xf] }
 0x31d   : > { %4070 = vmatpush.bf16.msrb.mxu0 %v9172_v48  ;;  %10715 = vst [vmem:[#allocation79_spill] sm:$0xff] %v9207_v21  ;;  %v9235_v48 = vor.u32 %v6444_v63, %v6070_v13  ;;  %v6441_v35 = vld [vmem:[%s10357_s3 + $0x274] sm:$0xf]  ;;  %v6058_v27 = vld [vmem:[%s10357_s3 + $0x27c] sm:$0xf0] }
 0x31e   : > { %4078 = vmatpush.bf16.msrb.mxu2 %v9163_v33  ;;  %4006 = vmatmul.bf16.vlgmr.msrb.gmra.mxu3 %v9197_v46  ;;  %10716 = vst [vmem:[#allocation80_spill] sm:$0xff] %v9211_v14  ;;  %v6404_v33 = vld [vmem:[%s10357_s3 + $0x148] sm:$0xf0]  ;;  %v5896_v63 = vld [vmem:[%s10357_s3 + $0x128] sm:$0xf] }
 0x31f   : > { %4102 = vmatpush.bf16.msrb.mxu3 %v9195_v7  ;;  %10717 = vst [vmem:[#allocation81_spill] sm:$0xff] %v9226_v18  ;;  %v9238_v7 = vor.u32 %v6365_v9, %v5752_v8  ;;  %v9247_v49 = vor.u32 %v6404_v33, %v5908_v22  ;;  %v6401_v13 = vld [vmem:[%s10357_s3 + $0x130] sm:$0xf0]  ;;  %v9256_v8 = vor.u32 %v6441_v35, %v6058_v27  ;;  %v6438_v9 = vld [vmem:[%s10357_s3 + $0x25c] sm:$0xf] }
 0x320   : > { %10718 = vst [vmem:[#allocation82_spill] sm:$0xff] %v9235_v48  ;;  %4095 = vmatpush.bf16.msrb.mxu1 %v9211_v14  ;;  %v6046_v33 = vld [vmem:[%s10357_s3 + $0x264] sm:$0xf0]  ;;  %v9267_v22 = vor.u32 %v6401_v13, %v5896_v63  ;;  %v5884_v35 = vld [vmem:[%s10357_s3 + $0x110] sm:$0xf] }
 0x321   : > { %10719 = vst [vmem:[#allocation83_spill] sm:$0xff] %v9238_v7  ;;  %v6398_v27 = vld [vmem:[%s10357_s3 + $0x118] sm:$0xf0]  ;;  %v6034_v63 = vld [vmem:[%s10357_s3 + $0x24c] sm:$0xf0] }
 0x322   : > { %4079 = vmatpush.bf16.msrb.mxu2 %v9207_v21  ;;  %10720 = vst [vmem:[#allocation84_spill] sm:$0xff] %v9247_v49  ;;  %v6435_v21 = vld [vmem:[%s10357_s3 + $0x244] sm:$0xf]  ;;  %v9287_v13 = vor.u32 %v6398_v27, %v5884_v35  ;;  %v5860_v27 = vld [vmem:[%s10357_s3 + $0xe0] sm:$0xf] }
 0x323   : > { %4103 = vmatpush.bf16.msrb.mxu3 %v9226_v18  ;;  %10721 = vst [vmem:[#allocation85_spill] sm:$0xff] %v9256_v8 }
 0x324   : > { %4096 = vmatpush.bf16.msrb.mxu1 %v9238_v7  ;;  %10722 = vst [vmem:[#allocation86_spill] sm:$0xff] %v9267_v22 }
 0x325   : > { %10724 = vst [vmem:[#allocation88_spill] sm:$0xff] %v9287_v13 }
 0x326   : > { %4080 = vmatpush.bf16.msrb.mxu2 %v9235_v48  ;;  %v9276_v48 = vor.u32 %v6438_v9, %v6046_v33  ;;  %v5872_v9 = vld [vmem:[%s10357_s3 + $0xf8] sm:$0xf]  ;;  %v9296_v33 = vor.u32 %v6435_v21, %v6034_v63  ;;  %v9310_v21 = vpop.permute.xlu0 %2345  ;;  %v6028_v63 = vld [vmem:[%s10357_s3 + $0x230] sm:$0xf] }
 0x327   : > { %4104 = vmatpush.bf16.msrb.mxu3 %v9247_v49  ;;  %4097 = vmatmul.bf16.vlgmr.msrb.gmra.mxu1 %v9028_v62  ;;  %v6395_v62 = vld [vmem:[%s10357_s3 + $0x100] sm:$0xf0]  ;;  %v6004_v49 = vld [vmem:[%s10357_s3 + $0x200] sm:$0xf] }
 0x328   : > { %4196 = vmatpush.bf16.msra.mxu1 %v8518_v34  ;;  %10723 = vst [vmem:[#allocation87_spill] sm:$0xff] %v9276_v48  ;;  %v9301_v35 = vor.u32 %v6395_v62, %v5872_v9  ;;  %v6434_v9 = vld [vmem:[%s10357_s3 + $0x238] sm:$0xf0] }
 0x329   : > { %10725 = vst [vmem:[#allocation89_spill] sm:$0xff] %v9296_v33 }
 0x32a   : > { %4081 = vmatpush.bf16.msrb.mxu2 %v9256_v8  ;;  %10726 = vst [vmem:[#allocation90_spill] sm:$0xff] %v9301_v35  ;;  %v6392_v8 = vld [vmem:[%s10357_s3 + $0xe8] sm:$0xf0] }
 0x32b   : > { %4105 = vmatpush.bf16.msrb.mxu3 %v9267_v22  ;;  %v9320_v62 = vor.u32 %v6392_v8, %v5860_v27  ;;  %v2171_v22 = vsel %vm1094_vm10, %v9105_v51, %v8574_v45  ;;  %v6016_v27 = vld [vmem:[%s10357_s3 + $0x218] sm:$0xf]  ;;  %v10730_v51 = vld [vmem:[#allocation6_spill] sm:$0xff] }
 0x32c   : > { %4197 = vmatpush.bf16.msra.mxu1 %v8527_v15 }
 0x32d   : > { %10727 = vst [vmem:[#allocation91_spill] sm:$0xff] %v9320_v62 }
 0x32e   : > { %4082 = vmatpush.bf16.msrb.mxu2 %v9276_v48  ;;  %4058 = vmatmul.bf16.vlgmr.msra.gmra.mxu3 %v9197_v46  ;;  %v3447_v48 = vpop.permute.xlu1 %3446 }
 0x32f   : > { %4106 = vmatpush.bf16.msrb.mxu3 %v9287_v13  ;;  %v6389_v13 = vld [vmem:[%s10357_s3 + $0xd0] sm:$0xf0] }
 0x330   : > { %4198 = vmatpush.bf16.msra.mxu1 %v8538_v41  ;;  %v9333_v41 = vor.u32 %v6434_v9, %v6028_v63 }
 0x332   : > { %4083 = vmatpush.bf16.msrb.mxu2 %v9296_v33  ;;  %v5848_v33 = vld [vmem:[%s10357_s3 + $0xc8] sm:$0xf]  ;;  %10728 = vst [vmem:[#allocation92_spill] sm:$0xff] %v9333_v41 }
 0x333   : > { %4107 = vmatpush.bf16.msrb.mxu3 %v9301_v35  ;;  %v6431_v35 = vld [vmem:[%s10357_s3 + $0x220] sm:$0xf0]  ;;  %v9345_v45 = vor.u32 %v6389_v13, %v5848_v33  ;;  %v5992_v33 = vld [vmem:[%s10357_s3 + $0x1e8] sm:$0xf] }
 0x334   : > { %4199 = vmatpush.bf16.msra.mxu1 %v8547_v42  ;;  %v3460_v42 = vsel %vm3459_vm15, %v9177_v39, %v3447_v48  ;;  %v2173_v39 = vmax.f32 %v10730_v51, %v2171_v22  ;;  %v9350_v63 = vor.u32 %v6431_v35, %v6016_v27  ;;  %v6425_v27 = vld [vmem:[%s10357_s3 + $0x1f0] sm:$0xf0]  ;;  %v5980_v51 = vld [vmem:[%s10357_s3 + $0x1d0] sm:$0xf] }
 0x335   : > { %v9335_v8 = vpack.c.bf16 %v3460_v42, %v3460_v42  ;;  %10729 = vst [vmem:[#allocation93_spill] sm:$0xff] %v9345_v45 }
 0x336   : > { %10731 = vst [vmem:[#allocation6_spill] sm:$0xff] %v9350_v63 }
 0x337   : > { %4108 = vmatpush.bf16.msrb.mxu3 %v9320_v62  ;;  %4019 = vmatmul.bf16.vlgmr.msra.gmra.mxu0 %v9335_v8  ;;  %v6428_v62 = vld [vmem:[%s10357_s3 + $0x208] sm:$0xf0] }
 0x338   : > { %4200 = vmatpush.bf16.msra.mxu1 %v8559_v2  ;;  %4115 = vmatpush.bf16.msra.mxu0 %v9333_v41  ;;  %v9363_v13 = vor.u32 %v6428_v62, %v6004_v49  ;;  %v9382_v62 = vor.u32 %v6425_v27, %v5992_v33  ;;  %v6419_v33 = vld [vmem:[%s10357_s3 + $0x1c0] sm:$0xf0] }
 0x33a   : > { %v2182_v42 = vpop.permute.xlu0 %2181  ;;  %10732 = vst [vmem:[#allocation94_spill] sm:$0xff] %v9363_v13 }
 0x33b   : > { %v2184_v9 = vmax.f32 %v2173_v39, %v2182_v42  ;;  %4109 = vmatpush.bf16.msrb.mxu3 %v9345_v45  ;;  %10734 = vst [vmem:[#allocation96_spill] sm:$0xff] %v9382_v62  ;;  %v6422_v39 = vld [vmem:[%s10357_s3 + $0x1d8] sm:$0xf0] }
 0x33c   : > { %4201 = vmatpush.bf16.msra.mxu1 %v8570_v4  ;;  %4116 = vmatpush.bf16.msra.mxu0 %v9350_v63  ;;  %v9394_v42 = vor.u32 %v6422_v39, %v5980_v51 }
 0x33d   : > { %v2185_v22 = vadd.f32 %v8458_v38, %v2184_v9  ;;  %v602_v38 = vld [vmem:[%s10357_s3 + $0x2f0] sm:$0xf] }
 0x33e   : > { %4110 = vmatmul.bf16.vlgmr.msrb.gmra.mxu3 %v9197_v46  ;;  %v3781_v46 = vunpack.c.l.b16 %v602_v38  ;;  %10735 = vst [vmem:[#allocation97_spill] sm:$0xff] %v9394_v42 }
 0x33f   : > { %4209 = vmatpush.bf16.msra.mxu3 %v8597_v44  ;;  %v9368_v35 = vmax.f32 %v2185_v22, 0.0  ;;  %v5968_v22 = vld [vmem:[%s10357_s3 + $0x1b8] sm:$0xf] }
 0x340   : > { %4202 = vmatpush.bf16.msra.mxu1 %v8591_v36  ;;  %4117 = vmatpush.bf16.msra.mxu0 %v9363_v13  ;;  %v3877_v9 = vpack.c.b16 %v3781_v46, %v3781_v46  ;;  %v9414_v39 = vor.u32 %v6419_v33, %v5968_v22  ;;  %v6416_v22 = vld [vmem:[%s10357_s3 + $0x1a8] sm:$0xf0] }
 0x341   : > { %10733 = vst [vmem:[#allocation95_spill] sm:$0xff] %v9368_v35  ;;  %4177 = vrot.lane.b32.xlu2 %v9368_v35, %s6544_s23  ;;  %v6452_v13 = vld [vmem:[%s10357_s3 + $0x2c8] sm:$0xf0] }
 0x342   : > { %v2532_v49 = vpop.permute.xlu0 %2531  ;;  %v9411_v46 = vsel %vm3975_vm11, %v3877_v9, 0  ;;  %10737 = vst [vmem:[#allocation99_spill] sm:$0xff] %v9414_v39  ;;  %v5956_v9 = vld [vmem:[%s10357_s3 + $0x1a0] sm:$0xf] }
 0x343   : > { %4210 = vmatpush.bf16.msra.mxu3 %v8621_v61  ;;  %10736 = vst [vmem:[#allocation98_spill] sm:$0xff] %v9411_v46 }
 0x344   : > { %4203 = vmatpush.bf16.msra.mxu1 %v8610_v59  ;;  %4118 = vmatpush.bf16.msra.mxu0 %v9382_v62  ;;  %v3451_v27 = vpop.permute.xlu2 %3450 }
 0x345   : > { %v3462_v38 = vsel %vm3461_vm0, %v3447_v48, %v3451_v27  ;;  %v6112_v48 = vld [vmem:[%s10357_s3 + $0x2d8] sm:$0xf]  ;;  %v6455_v27 = vld [vmem:[%s10357_s3 + $0x2e0] sm:$0xf0] }
 0x346   : > { %v9405_v62 = vpack.c.bf16 %v3462_v38, %v3462_v38  ;;  %v10738_v38 = vmax.f32 %v8476_v26, 0.0  ;;  %v9438_v26 = vor.u32 %v6455_v27, %v6112_v48  ;;  %v5944_v48 = vld [vmem:[%s10357_s3 + $0x188] sm:$0xf]  ;;  %v6413_v27 = vld [vmem:[%s10357_s3 + $0x190] sm:$0xf0] }
 0x347   : > { %4211 = vmatpush.bf16.msra.mxu3 %v8634_v58  ;;  %4071 = vmatmul.bf16.vlgmr.msrb.gmra.mxu0 %v9335_v8 }
 0x348   : > { %4248 = vmatpush.bf16.msrb.mxu1 %v8623_v31  ;;  %4119 = vmatpush.bf16.msra.mxu0 %v9394_v42  ;;  %10739 = vst [vmem:[#allocation100_spill] sm:$0xff] %v9438_v26 }
 0x349   : > { %6114 = vmatmul.msk.bf16.vlgmr.msra.gmra.mxu2 %vm3971_vm1, %v9405_v62 }
 0x34a   : > { %v9407_v51 = vpop.permute.xlu0 %4167  ;;  %4128 = vmatpush.bf16.msra.mxu2 %v9411_v46 }
 0x34b   : > { %4212 = vmatpush.bf16.msra.mxu3 %v8657_v24  ;;  %v4184_v42 = vsel %vm3453_vm12, %v10738_v38, %v9407_v51  ;;  %v9442_v38 = vor.u32 %v6416_v22, %v5956_v9  ;;  %v6088_v24 = vld [vmem:[%s10357_s3 + $0x2a8] sm:$0xf] }
 0x34c   : > { %4249 = vmatpush.bf16.msrb.mxu1 %v8647_v54  ;;  %v9432_v33 = vpack.c.bf16 %v4184_v42, %v4184_v42  ;;  %4120 = vmatpush.bf16.msra.mxu0 %v9414_v39  ;;  %v6100_v42 = vld [vmem:[%s10357_s3 + $0x2c0] sm:$0xf]  ;;  %v9457_v9 = vpop.permute.xlu2 %2525 }
 0x34d   : > { %10740 = vst [vmem:[#allocation101_spill] sm:$0xff] %v9442_v38  ;;  %v2533_v22 = vsel %vm1094_vm10, %v9457_v9, %v2532_v49  ;;  %v9463_v46 = vor.u32 %v6452_v13, %v6100_v42  ;;  %v6076_v13 = vld [vmem:[%s10357_s3 + $0x290] sm:$0xf]  ;;  %v6446_v49 = vld [vmem:[%s10357_s3 + $0x298] sm:$0xf0] }
 0x34e   : > { %4204 = vmatmul.bf16.vlgmr.msra.gmra.mxu1 %v9432_v33  ;;  %4129 = vmatpush.bf16.msra.mxu2 %v9438_v26  ;;  %v2535_v39 = vmax.f32 %v8408_v19, %v2533_v22  ;;  %v6052_v42 = vld [vmem:[%s10357_s3 + $0x260] sm:$0xf]  ;;  %v6040_v22 = vld [vmem:[%s10357_s3 + $0x248] sm:$0xf]  ;;  %v10766_v26 = vld [vmem:[#allocation12_spill] sm:$0xff] }
 0x34f   : > { %4213 = vmatpush.bf16.msra.mxu3 %v8677_v25  ;;  %10741 = vst [vmem:[#allocation102_spill] sm:$0xff] %v9463_v46  ;;  %v9467_v25 = vor.u32 %v6413_v27, %v5944_v48  ;;  %v6440_v48 = vld [vmem:[%s10357_s3 + $0x268] sm:$0xf0] }
 0x350   : > { %4250 = vmatpush.bf16.msrb.mxu1 %v8667_v11  ;;  %4121 = vmatpush.bf16.msra.mxu0 %v9442_v38  ;;  %v9524_v27 = vor.u32 %v6440_v48, %v6052_v42  ;;  %v10749_v48 = vld [vmem:[#allocation4_spill] sm:$0xff] }
 0x351   : > { %10742 = vst [vmem:[#allocation103_spill] sm:$0xff] %v9467_v25  ;;  %2537 = vrot.lane.b32.xlu1 %v2535_v39, %s6540_s29  ;;  %v6443_v39 = vld [vmem:[%s10357_s3 + $0x280] sm:$0xf0] }
 0x352   : > { %4130 = vmatpush.bf16.msra.mxu2 %v9463_v46  ;;  %10746 = vst [vmem:[#allocation107_spill] sm:$0xff] %v9524_v27  ;;  %v10764_v46 = vld [vmem:[#allocation56_spill] sm:$0xff] }
 0x353   : > { %4214 = vmatpush.bf16.msra.mxu3 %v8698_v16 }
 0x354   : > { %4251 = vmatpush.bf16.msrb.mxu1 %v8688_v43  ;;  %v6449_v43 = vld [vmem:[%s10357_s3 + $0x2b0] sm:$0xf0]  ;;  %4122 = vmatpush.bf16.msra.mxu0 %v9467_v25  ;;  %v2710_v42 = vpop.permute.xlu2 %2709 }
 0x355   : > { %v9479_v19 = vor.u32 %v6449_v43, %v6088_v24  ;;  %v9492_v24 = vor.u32 %v6446_v49, %v6076_v13  ;;  %v6064_v43 = vld [vmem:[%s10357_s3 + $0x278] sm:$0xf]  ;;  %v6437_v13 = vld [vmem:[%s10357_s3 + $0x250] sm:$0xf0] }
 0x356   : > { %v9540_v49 = vor.u32 %v6437_v13, %v6040_v22  ;;  %v10751_v22 = vld [vmem:[#allocation71_spill] sm:$0xff] }
 0x357   : > { %10743 = vst [vmem:[#allocation104_spill] sm:$0xff] %v9479_v19  ;;  %4215 = vmatpush.bf16.msra.mxu3 %v8720_v28  ;;  %4131 = vmatpush.bf16.msra.mxu2 %v9479_v19 }
 0x358   : > { %4252 = vmatpush.bf16.msrb.mxu1 %v8708_v17  ;;  %4222 = vmatpush.bf16.msrb.mxu0 %v8738_v52  ;;  %10744 = vst [vmem:[#allocation105_spill] sm:$0xff] %v9492_v24 }
 0x359   : > { %4123 = vmatmul.bf16.vlgmr.msra.gmra.mxu0 %v9335_v8  ;;  %2887 = vrot.lane.b32.xlu1 %v8494_v3, %s6539_s13  ;;  %v9509_v8 = vor.u32 %v6443_v39, %v6064_v43  ;;  %v2349_v3 = vsel %vm1094_vm10, %v9310_v21, %v8829_v20  ;;  %10747 = vst [vmem:[#allocation108_spill] sm:$0xff] %v9540_v49  ;;  %v9548_v39 = vld [vmem:[%s10356_s2] ss:$0 sm:$0xff] }
 0x35a   : > { %6115 = vmatmul.msk.bf16.vlgmr.msrb.gmra.mxu2 %vm3971_vm1, %v9405_v62  ;;  %v2351_v20 = vmax.f32 %v8297_v57, %v2349_v3 }
 0x35b   : > { %4216 = vmatpush.bf16.msra.mxu3 %v8749_v32  ;;  %4132 = vmatpush.bf16.msra.mxu2 %v9492_v24  ;;  %10745 = vst [vmem:[#allocation106_spill] sm:$0xff] %v9509_v8  ;;  %v10762_v24 = vld [vmem:[#allocation77_spill] sm:$0xff] }
 0x35c   : > { %4253 = vmatpush.bf16.msrb.mxu1 %v8730_v0  ;;  %4223 = vmatpush.bf16.msrb.mxu0 %v8773_v55 }
 0x35f   : > { %4261 = vmatpush.bf16.msrb.mxu3 %v8771_v50  ;;  %4133 = vmatpush.bf16.msra.mxu2 %v9509_v8  ;;  %v10760_v8 = vld [vmem:[#allocation55_spill] sm:$0xff] }
 0x360   : > { %4254 = vmatpush.bf16.msrb.mxu1 %v8760_v12  ;;  %4224 = vmatpush.bf16.msrb.mxu0 %v8803_v30 }
 0x361   : > { %4374 = vrot.lane.b32.xlu1 %v8815_v6, %s6541_s14  ;;  %v2360_v21 = vpop.permute.xlu1 %2359 }
 0x362   : > { %v2362_v43 = vmax.f32 %v2351_v20, %v2360_v21  ;;  %v10752_v20 = vld [vmem:[#allocation45_spill] sm:$0xff]  ;;  %v10753_v21 = vld [vmem:[#allocation8_spill] sm:$0xff] }
 0x363   : > { %4262 = vmatpush.bf16.msrb.mxu3 %v8801_v60  ;;  %4134 = vmatpush.bf16.msra.mxu2 %v9524_v27  ;;  %v10759_v27 = vld [vmem:[#allocation51_spill] sm:$0xff] }
 0x364   : > { %4255 = vmatpush.bf16.msrb.mxu1 %v8790_v23  ;;  %4225 = vmatpush.bf16.msrb.mxu0 %v8825_v40  ;;  %v2363_v6 = vadd.f32 %v9548_v39, %v2362_v43 }
 0x366   : > { %v9552_v57 = vmax.f32 %v2363_v6, 0.0  ;;  %v10754_v6 = vld [vmem:[#allocation50_spill] sm:$0xff] }
 0x367   : > { %4256 = vmatmul.bf16.vlgmr.msrb.gmra.mxu1 %v9432_v33  ;;  %4263 = vmatpush.bf16.msrb.mxu3 %v8817_v47 }
 0x368   : > { %4300 = vmatpush.bf16.msra.mxu1 %v9025_v37  ;;  %4226 = vmatpush.bf16.msrb.mxu0 %v8850_v1  ;;  %10748 = vst [vmem:[#allocation109_spill] sm:$0xff] %v9552_v57 }
 0x369   : > { %4135 = vmatpush.bf16.msra.mxu2 %v9540_v49  ;;  %2879 = vrot.lane.b32.xlu1 %v10749_v48, %s6539_s13  ;;  %v9564_v3 = vpop.permute.xlu1 %2703  ;;  %v10755_v48 = vld [vmem:[#allocation48_spill] sm:$0xff]  ;;  %v10758_v49 = vld [vmem:[#allocation54_spill] sm:$0xff] }
 0x36a   : > { %4181 = vrot.lane.b32.xlu0 %v9552_v57, %s10750_s15  ;;  %v2711_v13 = vsel %vm1094_vm10, %v9564_v3, %v2710_v42  ;;  %v10761_v42 = vld [vmem:[#allocation9_spill] sm:$0xff] }
 0x36b   : > { %4264 = vmatpush.bf16.msrb.mxu3 %v8844_v5  ;;  %v2713_v43 = vmax.f32 %v10753_v21, %v2711_v13  ;;  %v4174_v21 = vpop.permute.xlu2 %4173 }
 0x36c   : > { %4301 = vmatpush.bf16.msra.mxu1 %v9057_v29  ;;  %4227 = vmatpush.bf16.msrb.mxu0 %v8875_v53 }
 0x36d   : > { %4235 = vmatpush.bf16.msrb.mxu2 %v8880_v56  ;;  %2715 = vrot.lane.b32.xlu2 %v2713_v43, %s6540_s29  ;;  %v10757_v56 = vld [vmem:[#allocation49_spill] sm:$0xff] }
 0x36e   : > { %6116 = vmatmul.msk.bf16.vlgmr.msra.gmra.mxu2 %vm3971_vm1, %v9405_v62  ;;  %v10756_v62 = vld [vmem:[#allocation74_spill] sm:$0xff] }
 0x36f   : > { %4265 = vmatpush.bf16.msrb.mxu3 %v10752_v20 }
 0x370   : > { %4302 = vmatpush.bf16.msra.mxu1 %v9087_v10  ;;  %4228 = vmatpush.bf16.msrb.mxu0 %v10754_v6 }
 0x371   : > { %4236 = vmatpush.bf16.msrb.mxu2 %v10755_v48  ;;  %v4171_v13 = vpop.permute.xlu1 %4170  ;;  %v10763_v48 = vld [vmem:[#allocation53_spill] sm:$0xff] }
 0x372   : > { %2881 = vrot.lane.b32.xlu0 %v10761_v42, %s6539_s13  ;;  %v4185_v43 = vsel %vm3455_vm13, %v9407_v51, %v4171_v13  ;;  %v10767_v42 = vld [vmem:[#allocation57_spill] sm:$0xff]  ;;  %v10769_v51 = vld [vmem:[#allocation78_spill] sm:$0xff] }
 0x373   : > { %4266 = vmatpush.bf16.msrb.mxu3 %v10757_v56  ;;  %v4186_v19 = vsel %vm3457_vm14, %v4185_v43, %v4174_v21  ;;  %v10770_v13 = vld [vmem:[#allocation61_spill] sm:$0xff] }
 0x374   : > { %4303 = vmatpush.bf16.msra.mxu1 %v10751_v22  ;;  %4229 = vmatpush.bf16.msrb.mxu0 %v10758_v49  ;;  %v10771_v43 = vld [vmem:[#allocation13_spill] sm:$0xff] }
 0x375   : > { %4237 = vmatpush.bf16.msrb.mxu2 %v10759_v27  ;;  %v10765_v27 = vld [vmem:[#allocation59_spill] sm:$0xff]  ;;  %3059 = vrot.lane.b32.xlu2 %v10766_v26, %s6539_s13 }
 0x376   : > { %v10791_v26 = vld [vmem:[#allocation75_spill] sm:$0xff] }
 0x377   : > { %4267 = vmatpush.bf16.msrb.mxu3 %v10763_v48 }
 0x378   : > { %4304 = vmatpush.bf16.msra.mxu1 %v10756_v62  ;;  %4274 = vmatpush.bf16.msra.mxu0 %v10760_v8  ;;  %v4190_v62 = vpack.c.bf16 %v4186_v19, %v4186_v19  ;;  %v10772_v19 = vld [vmem:[#allocation62_spill] sm:$0xff] }
 0x379   : > { %4238 = vmatpush.bf16.msrb.mxu2 %v10764_v46  ;;  %v10773_v46 = vld [vmem:[#allocation63_spill] sm:$0xff] }
 0x37a   : > { %4217 = vmatmul.bf16.vlgmr.msra.gmra.mxu3 %v4190_v62  ;;  %3065 = vrot.lane.b32.xlu0 %v10771_v43, %s6539_s13  ;;  %v10776_v43 = vld [vmem:[#allocation84_spill] sm:$0xff] }
 0x37b   : > { %4268 = vmatpush.bf16.msrb.mxu3 %v10767_v42 }
 0x37c   : > { %4305 = vmatpush.bf16.msra.mxu1 %v10762_v24  ;;  %4275 = vmatpush.bf16.msra.mxu0 %v10765_v27  ;;  %v10768_v24 = vld [vmem:[#allocation60_spill] sm:$0xff] }
 0x37d   : > { %4239 = vmatpush.bf16.msrb.mxu2 %v10768_v24  ;;  %4377 = vrot.lane.b32.xlu2 %v9368_v35, %s10774_s25  ;;  %v10775_v24 = vld [vmem:[#allocation66_spill] sm:$0xff] }
 0x37e   : > { %v10783_v35 = vld [vmem:[#allocation10_spill] sm:$0xff] }
 0x37f   : > { %4313 = vmatpush.bf16.msra.mxu3 %v10769_v51  ;;  %v10777_v51 = vld [vmem:[#allocation67_spill] sm:$0xff] }
 0x380   : > { %4306 = vmatpush.bf16.msra.mxu1 %v9211_v14  ;;  %4276 = vmatpush.bf16.msra.mxu0 %v10770_v13  ;;  %v10788_v14 = vld [vmem:[#allocation72_spill] sm:$0xff] }
 0x381   : > { %4240 = vmatpush.bf16.msrb.mxu2 %v10772_v19 }
 0x382   : > { %4380 = vrot.lane.b32.xlu0 %v9552_v57, %s10778_s30  ;;  %v10787_v57 = vld [vmem:[#allocation73_spill] sm:$0xff] }
 0x383   : > { %4314 = vmatpush.bf16.msra.mxu3 %v9226_v18  ;;  %v10779_v18 = vld [vmem:[#allocation14_spill] sm:$0xff] }
 0x384   : > { %4307 = vmatpush.bf16.msra.mxu1 %v9238_v7  ;;  %4277 = vmatpush.bf16.msra.mxu0 %v10773_v46  ;;  %v3994_v19 = vpop.f32.mrf.mxu1  ;;  %v10782_v7 = vld [vmem:[#allocation70_spill] sm:$0xff] }
 0x385   : > { %4241 = vmatpush.bf16.msrb.mxu2 %v10775_v24  ;;  %3057 = vrot.lane.b32.xlu2 %v10783_v35, %s6539_s13  ;;  %v10784_v24 = vld [vmem:[#allocation69_spill] sm:$0xff]  ;;  %v10792_v35 = vld [vmem:[#allocation91_spill] sm:$0xff] }
 0x387   : > { %4308 = vmatmul.bf16.vlgmr.msra.gmra.mxu1 %v9432_v33  ;;  %4315 = vmatpush.bf16.msra.mxu3 %v10776_v43  ;;  %v10781_v33 = vld [vmem:[#allocation86_spill] sm:$0xff]  ;;  %v10785_v43 = vld [vmem:[#allocation15_spill] sm:$0xff] }
 0x388   : > { %4403 = vmatpush.bf16.msrb.mxu1 %v8518_v34  ;;  %4278 = vmatpush.bf16.msra.mxu0 %v10777_v51  ;;  %v10780_v34 = vld [vmem:[#allocation68_spill] sm:$0xff] }
 0x389   : > { %4242 = vmatpush.bf16.msrb.mxu2 %v10780_v34  ;;  %v10789_v34 = vld [vmem:[#allocation90_spill] sm:$0xff] }
 0x38a   : > { %4269 = vmatmul.bf16.vlgmr.msrb.gmra.mxu3 %v4190_v62 }
 0x38b   : > { %4316 = vmatpush.bf16.msra.mxu3 %v10781_v33  ;;  %v10790_v33 = vld [vmem:[#allocation76_spill] sm:$0xff] }
 0x38c   : > { %4404 = vmatpush.bf16.msrb.mxu1 %v8527_v15  ;;  %4279 = vmatpush.bf16.msra.mxu0 %v10782_v7  ;;  %v10786_v15 = vld [vmem:[#allocation88_spill] sm:$0xff] }
 0x38d   : > { %4287 = vmatpush.bf16.msra.mxu2 %v10784_v24  ;;  %v10793_v24 = vld [vmem:[#allocation79_spill] sm:$0xff] }
 0x38f   : > { %4317 = vmatpush.bf16.msra.mxu3 %v10786_v15 }
 0x390   : > { %4405 = vmatpush.bf16.msrb.mxu1 %v10779_v18  ;;  %4280 = vmatpush.bf16.msra.mxu0 %v10787_v57  ;;  %v3996_v18 = vpop.f32.mrf.mxu1 }
 0x391   : > { %4288 = vmatpush.bf16.msra.mxu2 %v10788_v14  ;;  %v10794_v18 = vld [vmem:[#allocation82_spill] sm:$0xff] }
 0x393   : > { %4318 = vmatpush.bf16.msra.mxu3 %v10789_v34 }
 0x394   : > { %4406 = vmatpush.bf16.msrb.mxu1 %v10785_v43  ;;  %4281 = vmatpush.bf16.msra.mxu0 %v10790_v33 }
 0x395   : > { %4289 = vmatpush.bf16.msra.mxu2 %v10791_v26 }
 0x397   : > { %4319 = vmatpush.bf16.msra.mxu3 %v10792_v35  ;;  %v10795_v35 = vld [vmem:[#allocation85_spill] sm:$0xff] }
 0x398   : > { %4407 = vmatpush.bf16.msrb.mxu1 %v8559_v2  ;;  %v4046_v15 = vpop.f32.mrf.mxu1 }
 0x399   : > { %4290 = vmatpush.bf16.msra.mxu2 %v10793_v24 }
 0x39b   : > { %4320 = vmatpush.bf16.msra.mxu3 %v9345_v45  ;;  %v9633_v14 = vpop.permute.xlu2 %4177 }
 0x39c   : > { %4408 = vmatpush.bf16.msrb.mxu1 %v8570_v4  ;;  %v4187_v26 = vsel %vm3459_vm15, %v4174_v21, %v9633_v14  ;;  %v10798_v21 = vld [vmem:[#allocation89_spill] sm:$0xff] }
 0x39d   : > { %4291 = vmatpush.bf16.msra.mxu2 %v10794_v18  ;;  %v4191_v24 = vpack.c.bf16 %v4187_v26, %v4187_v26  ;;  %v10797_v26 = vld [vmem:[#allocation27_spill] sm:$0xff] }
 0x39e   : > { %4321 = vmatmul.bf16.vlgmr.msra.gmra.mxu3 %v4190_v62  ;;  %v10796_v62 = vld [vmem:[#allocation87_spill] sm:$0xff] }
 0x39f   : > { %4416 = vmatpush.bf16.msrb.mxu3 %v8597_v44  ;;  %4230 = vmatmul.bf16.vlgmr.msrb.gmra.mxu0 %v4191_v24 }
 0x3a0   : > { %4409 = vmatpush.bf16.msrb.mxu1 %v8591_v36  ;;  %v4048_v45 = vpop.f32.mrf.mxu1  ;;  %4326 = vmatpush.bf16.msrb.mxu0 %v9333_v41  ;;  %v10800_v41 = vld [vmem:[#allocation30_spill] sm:$0xff] }
 0x3a1   : > { %4292 = vmatpush.bf16.msra.mxu2 %v10795_v35  ;;  %v4007_v18 = vpop.f32.mrf.mxu3  ;;  %v10799_v35 = vld [vmem:[#allocation94_spill] sm:$0xff] }
 0x3a2   : > { %v4008_v44 = vadd.f32 %v4007_v18, %v3994_v19  ;;  %v10803_v18 = vld [vmem:[#allocation97_spill] sm:$0xff] }
 0x3a3   : > { %4417 = vmatpush.bf16.msrb.mxu3 %v8621_v61  ;;  %v10801_v61 = vld [vmem:[#allocation29_spill] sm:$0xff] }
 0x3a4   : > { %4410 = vmatpush.bf16.msrb.mxu1 %v8610_v59  ;;  %4327 = vmatpush.bf16.msrb.mxu0 %v9350_v63 }
 0x3a5   : > { %4293 = vmatpush.bf16.msra.mxu2 %v10796_v62 }
 0x3a7   : > { %4418 = vmatpush.bf16.msrb.mxu3 %v8634_v58 }
 0x3a8   : > { %4455 = vmatpush.bf16.msra.mxu1 %v8623_v31  ;;  %v4098_v45 = vpop.f32.mrf.mxu1  ;;  %4328 = vmatpush.bf16.msrb.mxu0 %v10799_v35 }
 0x3a9   : > { %4294 = vmatpush.bf16.msra.mxu2 %v10798_v21  ;;  %v4009_v58 = vpop.f32.mrf.mxu3  ;;  %v10804_v21 = vld [vmem:[#allocation99_spill] sm:$0xff] }
 0x3ab   : > { %4419 = vmatpush.bf16.msrb.mxu3 %v10797_v26 }
 0x3ac   : > { %4456 = vmatpush.bf16.msra.mxu1 %v8647_v54  ;;  %v10802_v54 = vld [vmem:[#allocation96_spill] sm:$0xff] }
 0x3ad   : > { %4329 = vmatpush.bf16.msrb.mxu0 %v10802_v54 }
 0x3af   : > { %4420 = vmatpush.bf16.msrb.mxu3 %v10801_v61  ;;  %4282 = vmatmul.bf16.vlgmr.msra.gmra.mxu0 %v4191_v24 }
 0x3b0   : > { %4457 = vmatpush.bf16.msra.mxu1 %v8667_v11  ;;  %v4100_v19 = vpop.f32.mrf.mxu1 }
 0x3b1   : > { %4330 = vmatpush.bf16.msrb.mxu0 %v10803_v18  ;;  %v4059_v35 = vpop.f32.mrf.mxu3 }
 0x3b2   : > { %v4060_v63 = vadd.f32 %v4059_v35, %v4046_v15  ;;  %v2702_v15 = vpop.permute.xlu1 %2701 }
 0x3b3   : > { %4421 = vmatpush.bf16.msrb.mxu3 %v8698_v16 }
 0x3b4   : > { %4458 = vmatpush.bf16.msra.mxu1 %v10800_v41  ;;  %v4020_v58 = vpop.f32.mrf.mxu0 }
 0x3b5   : > { %4331 = vmatpush.bf16.msrb.mxu0 %v10804_v21  ;;  %v4021_v54 = vadd.f32 %v4020_v58, %v4008_v44  ;;  %v2524_v21 = vpop.permute.xlu0 %2523 }
 0x3b6   : > { %v2527_v44 = vsel %vm1094_vm10, %v2524_v21, %v9457_v9  ;;  %v10806_v21 = vld [vmem:[#allocation3_spill] sm:$0xff] }
 0x3b7   : > { %4422 = vmatpush.bf16.msrb.mxu3 %v8720_v28 }
 0x3b8   : > { %4459 = vmatpush.bf16.msra.mxu1 %v8708_v17 }
 0x3b9   : > { %4332 = vmatpush.bf16.msrb.mxu0 %v9442_v38  ;;  %v4061_v19 = vpop.f32.mrf.mxu3  ;;  %v10805_v38 = vld [vmem:[#allocation7_spill] sm:$0xff] }
 0x3ba   : > { %v2529_v18 = vmax.f32 %v10805_v38, %v2527_v44 }
 0x3bb   : > { %4423 = vmatpush.bf16.msrb.mxu3 %v8749_v32 }
 0x3bc   : > { %4460 = vmatpush.bf16.msra.mxu1 %v8730_v0  ;;  %v4022_v35 = vpop.f32.mrf.mxu0 }
 0x3bd   : > { %4333 = vmatpush.bf16.msrb.mxu0 %v9467_v25 }
 0x3bf   : > { %4468 = vmatpush.bf16.msra.mxu3 %v8771_v50 }
 0x3c0   : > { %4461 = vmatpush.bf16.msra.mxu1 %v8760_v12  ;;  %4334 = vmatmul.bf16.vlgmr.msrb.gmra.mxu0 %v4191_v24  ;;  %v2705_v24 = vsel %vm1094_vm10, %v2702_v15, %v9564_v3 }
 0x3c1   : > { %4429 = vmatpush.bf16.msra.mxu0 %v8738_v52  ;;  %v4111_v58 = vpop.f32.mrf.mxu3 }
 0x3c2   : > { %v4112_v19 = vadd.f32 %v4111_v58, %v4098_v45  ;;  %v2707_v45 = vmax.f32 %v10806_v21, %v2705_v24  ;;  %v10810_v24 = vld [vmem:[#allocation16_spill] sm:$0xff] }
 0x3c3   : > { %4469 = vmatpush.bf16.msra.mxu3 %v8801_v60  ;;  %v2538_v52 = vpop.permute.xlu1 %2537 }
 0x3c4   : > { %4462 = vmatpush.bf16.msra.mxu1 %v8790_v23  ;;  %v4072_v25 = vpop.f32.mrf.mxu0  ;;  %v2540_v35 = vmax.f32 %v2529_v18, %v2538_v52 }
 0x3c5   : > { %4430 = vmatpush.bf16.msra.mxu0 %v8773_v55  ;;  %v4073_v55 = vadd.f32 %v4072_v25, %v4060_v63 }
 0x3c7   : > { %4470 = vmatpush.bf16.msra.mxu3 %v8817_v47  ;;  %v2541_v47 = vadd.f32 %v9548_v39, %v2540_v35  ;;  %v2716_v44 = vpop.permute.xlu2 %2715 }
 0x3c9   : > { %4431 = vmatpush.bf16.msra.mxu0 %v8803_v30  ;;  %v4113_v9 = vpop.f32.mrf.mxu3  ;;  %v9681_v38 = vmax.f32 %v2541_v47, 0.0  ;;  %v2718_v30 = vmax.f32 %v2707_v45, %v2716_v44 }
 0x3cb   : > { %4471 = vmatpush.bf16.msra.mxu3 %v8844_v5  ;;  %10807 = vst [vmem:[#allocation71_spill] sm:$0xff] %v9681_v38  ;;  %v9683_v58 = vpop.f32.mrf.mxu1  ;;  %4384 = vrot.lane.b32.xlu0 %v9681_v38, %s6544_s23  ;;  %v2719_v25 = vadd.f32 %v9548_v39, %v2718_v30  ;;  %v2888_v52 = vpop.permute.xlu1 %2887 }
 0x3cc   : > { %v4074_v63 = vpop.f32.mrf.mxu0  ;;  %v4033_v3 = vpop.f32.mrf.mxu2 }
 0x3cd   : > { %4432 = vmatpush.bf16.msra.mxu0 %v8825_v40  ;;  %v9690_v18 = vmax.f32 %v2719_v25, 0.0  ;;  %v9692_v47 = vadd.f32 %v4033_v3, %v4021_v54  ;;  %v10811_v54 = vld [vmem:[#allocation25_spill] sm:$0xff] }
 0x3cf   : > { %4472 = vmatpush.bf16.msra.mxu3 %v10752_v20  ;;  %10808 = vst [vmem:[#allocation45_spill] sm:$0xff] %v9690_v18  ;;  %4388 = vrot.lane.b32.xlu1 %v9690_v18, %s10750_s15 }
 0x3d0   : > { %10809 = vst [vmem:[#allocation8_spill] sm:$0xff] %v9692_v47 }
 0x3d1   : > { %4433 = vmatpush.bf16.msra.mxu0 %v8850_v1 }
 0x3d3   : > { %4473 = vmatpush.bf16.msra.mxu3 %v10757_v56  ;;  %v4207_v15 = vpop.f32.mrf.mxu1  ;;  %v4375_v30 = vpop.permute.xlu1 %4374 }
 0x3d4   : > { %v4391_v35 = vsel %vm3453_vm12, %v10810_v24, %v4375_v30  ;;  %v4035_v9 = vpop.f32.mrf.mxu2 }
 0x3d5   : > { %4434 = vmatpush.bf16.msra.mxu0 %v8875_v53  ;;  %v4396_v45 = vpack.c.bf16 %v4391_v35, %v4391_v35  ;;  %v10813_v9 = vld [vmem:[#allocation65_spill] sm:$0xff]  ;;  %v10836_v53 = vld [vmem:[#allocation47_spill] sm:$0xff] }
 0x3d6   : > { %v4124_v21 = vpop.f32.mrf.mxu0 }
 0x3d7   : > { %4474 = vmatpush.bf16.msra.mxu3 %v10763_v48  ;;  %v4125_v44 = vadd.f32 %v4124_v21, %v4112_v19  ;;  %3237 = vrot.lane.b32.xlu1 %v10811_v54, %s6539_s13  ;;  %v10814_v21 = vld [vmem:[#allocation98_spill] sm:$0xff] }
 0x3d8   : > { %4411 = vmatmul.bf16.vlgmr.msrb.gmra.mxu1 %v4396_v45 }
 0x3d9   : > { %4435 = vmatpush.bf16.msra.mxu0 %v10754_v6  ;;  %4507 = vmatpush.bf16.msrb.mxu1 %v9025_v37  ;;  %v10825_v6 = vld [vmem:[#allocation80_spill] sm:$0xff] }
 0x3db   : > { %4475 = vmatpush.bf16.msra.mxu3 %v10767_v42 }
 0x3dc   : > { %v4182_v25 = vpop.permute.xlu0 %4181 }
 0x3dd   : > { %4436 = vmatpush.bf16.msra.mxu0 %v10758_v49  ;;  %v4085_v63 = vpop.f32.mrf.mxu2  ;;  %4508 = vmatpush.bf16.msrb.mxu1 %v9057_v29  ;;  %v4188_v3 = vsel %vm3461_vm0, %v9633_v14, %v4182_v25  ;;  %v10815_v25 = vld [vmem:[#allocation100_spill] sm:$0xff]  ;;  %v10824_v49 = vld [vmem:[#allocation105_spill] sm:$0xff] }
 0x3de   : > { %v9710_v19 = vadd.f32 %v4085_v63, %v4073_v55  ;;  %v4126_v15 = vpop.f32.mrf.mxu0  ;;  %v4192_v24 = vpack.c.bf16 %v4188_v3, %v4188_v3  ;;  %v10816_v63 = vld [vmem:[#allocation9_spill] sm:$0xff] }
 0x3df   : > { %3421 = vrot.lane.b32.xlu1 %v10813_v9, %s6539_s13  ;;  %v9728_v9 = vpop.permute.xlu2 %3059 }
 0x3e0   : > { %10812 = vst [vmem:[#allocation49_spill] sm:$0xff] %v9710_v19  ;;  %6117 = vmatmul.msk.bf16.vlgmr.msrb.gmra.mxu2 %vm3971_vm1, %v4192_v24  ;;  %v10818_v19 = vld [vmem:[#allocation102_spill] sm:$0xff] }
 0x3e1   : > { %4481 = vmatpush.bf16.msrb.mxu0 %v10760_v8  ;;  %4509 = vmatpush.bf16.msrb.mxu1 %v9087_v10  ;;  %v10823_v8 = vld [vmem:[#allocation28_spill] sm:$0xff] }
 0x3e2   : > { %4339 = vmatpush.bf16.msrb.mxu2 %v10814_v21 }
 0x3e4   : > { %v9712_v35 = vpop.f32.mrf.mxu1  ;;  %v9720_v47 = vpop.permute.xlu0 %2881 }
 0x3e5   : > { %4482 = vmatpush.bf16.msrb.mxu0 %v10765_v27  ;;  %v4087_v14 = vpop.f32.mrf.mxu2  ;;  %4510 = vmatpush.bf16.msrb.mxu1 %v10751_v22  ;;  %v2889_v55 = vsel %vm1094_vm10, %v9720_v47, %v2888_v52 }
 0x3e6   : > { %4340 = vmatpush.bf16.msrb.mxu2 %v10815_v25  ;;  %v2891_v3 = vmax.f32 %v10816_v63, %v2889_v55  ;;  %v10817_v14 = vld [vmem:[#allocation74_spill] sm:$0xff] }
 0x3e7   : > { %4587 = vrot.lane.b32.xlu1 %v9690_v18, %s10778_s30  ;;  %v10837_v18 = vld [vmem:[#allocation14_spill] sm:$0xff] }
 0x3e8   : > { %4463 = vmatmul.bf16.vlgmr.msra.gmra.mxu1 %v4396_v45  ;;  %2893 = vrot.lane.b32.xlu2 %v2891_v3, %s6540_s29  ;;  %v10822_v3 = vld [vmem:[#allocation12_spill] sm:$0xff] }
 0x3e9   : > { %4483 = vmatpush.bf16.msrb.mxu0 %v10770_v13  ;;  %4511 = vmatpush.bf16.msrb.mxu1 %v10817_v14 }
 0x3ea   : > { %4341 = vmatpush.bf16.msrb.mxu2 %v10818_v19 }
 0x3ec   : > { %v4259_v15 = vpop.f32.mrf.mxu1  ;;  %v3066_v52 = vpop.permute.xlu0 %3065 }
 0x3ed   : > { %4484 = vmatpush.bf16.msrb.mxu0 %v10773_v46  ;;  %v10819_v46 = vld [vmem:[#allocation77_spill] sm:$0xff]  ;;  %v3067_v55 = vsel %vm1094_vm10, %v9728_v9, %v3066_v52  ;;  %v10821_v15 = vld [vmem:[#allocation104_spill] sm:$0xff] }
 0x3ee   : > { %4512 = vmatpush.bf16.msrb.mxu1 %v10819_v46  ;;  %4342 = vmatpush.bf16.msrb.mxu2 %v10821_v15  ;;  %v3069_v27 = vmax.f32 %v10822_v3, %v3067_v55  ;;  %v10826_v3 = vld [vmem:[#allocation106_spill] sm:$0xff] }
 0x3f0   : > { %6118 = vmatmul.msk.bf16.vlgmr.msra.gmra.mxu2 %vm3971_vm1, %v4192_v24  ;;  %3071 = vrot.lane.b32.xlu0 %v3069_v27, %s6540_s29 }
 0x3f1   : > { %4485 = vmatpush.bf16.msrb.mxu0 %v10777_v51  ;;  %v4137_v13 = vpop.f32.mrf.mxu2  ;;  %v4378_v51 = vpop.permute.xlu2 %4377  ;;  %3243 = vrot.lane.b32.xlu2 %v10823_v8, %s6539_s13  ;;  %v10828_v8 = vld [vmem:[#allocation2_spill] sm:$0xff] }
 0x3f2   : > { %v9739_v63 = vadd.f32 %v4137_v13, %v4125_v44  ;;  %4343 = vmatpush.bf16.msrb.mxu2 %v10824_v49  ;;  %4513 = vmatpush.bf16.msrb.mxu1 %v10825_v6  ;;  %v4392_v13 = vsel %vm3455_vm13, %v4375_v30, %v4378_v51  ;;  %v10830_v51 = vld [vmem:[#allocation109_spill] sm:$0xff]  ;;  %v10831_v30 = vld [vmem:[#allocation107_spill] sm:$0xff] }
 0x3f4   : > { %10820 = vst [vmem:[#allocation53_spill] sm:$0xff] %v9739_v63  ;;  %v9752_v44 = vpop.permute.xlu0 %4380  ;;  %v10829_v63 = vld [vmem:[#allocation58_spill] sm:$0xff] }
 0x3f5   : > { %4486 = vmatpush.bf16.msrb.mxu0 %v10782_v7  ;;  %v4393_v55 = vsel %vm3457_vm14, %v4392_v13, %v9752_v44  ;;  %v10827_v7 = vld [vmem:[#allocation83_spill] sm:$0xff]  ;;  %v10832_v13 = vld [vmem:[#allocation78_spill] sm:$0xff] }
 0x3f6   : > { %4344 = vmatpush.bf16.msrb.mxu2 %v10826_v3  ;;  %v4397_v27 = vpack.c.bf16 %v4393_v55, %v4393_v55  ;;  %4514 = vmatpush.bf16.msrb.mxu1 %v10827_v7  ;;  %v10833_v7 = vld [vmem:[#allocation5_spill] sm:$0xff] }
 0x3f8   : > { %3415 = vrot.lane.b32.xlu0 %v10829_v63, %s6539_s13  ;;  %4424 = vmatmul.bf16.vlgmr.msrb.gmra.mxu3 %v4397_v27 }
 0x3f9   : > { %4487 = vmatpush.bf16.msrb.mxu0 %v10787_v57  ;;  %v4139_v52 = vpop.f32.mrf.mxu2  ;;  %4581 = vrot.lane.b32.xlu2 %v10830_v51, %s6541_s14  ;;  %v10839_v51 = vld [vmem:[#allocation84_spill] sm:$0xff] }
 0x3fa   : > { %4610 = vmatpush.bf16.msra.mxu1 %v10828_v8  ;;  %4345 = vmatpush.bf16.msrb.mxu2 %v10831_v30  ;;  %v10835_v8 = vld [vmem:[#allocation81_spill] sm:$0xff] }
 0x3fb   : > { %4515 = vmatmul.bf16.vlgmr.msrb.gmra.mxu1 %v4396_v45  ;;  %4520 = vmatpush.bf16.msrb.mxu3 %v10832_v13  ;;  %v10838_v45 = vld [vmem:[#allocation18_spill] sm:$0xff]  ;;  %v10842_v13 = vld [vmem:[#allocation51_spill] sm:$0xff] }
 0x3fd   : > { %4488 = vmatpush.bf16.msrb.mxu0 %v10790_v33  ;;  %v4218_v52 = vpop.f32.mrf.mxu3  ;;  %v10834_v33 = vld [vmem:[#allocation108_spill] sm:$0xff] }
 0x3fe   : > { %v4219_v57 = vadd.f32 %v4218_v52, %v9683_v58  ;;  %4611 = vmatpush.bf16.msra.mxu1 %v10833_v7  ;;  %4346 = vmatpush.bf16.msrb.mxu2 %v10834_v33  ;;  %v10840_v7 = vld [vmem:[#allocation48_spill] sm:$0xff] }
 0x3ff   : > { %4521 = vmatpush.bf16.msrb.mxu3 %v10835_v8  ;;  %v10841_v8 = vld [vmem:[#allocation86_spill] sm:$0xff] }
 0x400   : > { %4584 = vrot.lane.b32.xlu0 %v9681_v38, %s10774_s25  ;;  %v10843_v38 = vld [vmem:[#allocation52_spill] sm:$0xff] }
 0x401   : > { %6119 = vmatmul.msk.bf16.vlgmr.msrb.gmra.mxu2 %vm3971_vm1, %v4192_v24  ;;  %3235 = vrot.lane.b32.xlu2 %v10838_v45, %s6539_s13  ;;  %v10844_v24 = vld [vmem:[#allocation88_spill] sm:$0xff] }
 0x402   : > { %4442 = vmatpush.bf16.msra.mxu2 %v10836_v53  ;;  %4612 = vmatpush.bf16.msra.mxu1 %v10837_v18  ;;  %v10855_v18 = vld [vmem:[#allocation69_spill] sm:$0xff] }
 0x403   : > { %4522 = vmatpush.bf16.msrb.mxu3 %v10839_v51  ;;  %v10854_v51 = vld [vmem:[#allocation22_spill] sm:$0xff] }
 0x404   : > { %v4309_v55 = vpop.f32.mrf.mxu1 }
 0x405   : > { %v4220_v58 = vpop.f32.mrf.mxu3 }
 0x406   : > { %4443 = vmatpush.bf16.msra.mxu2 %v10840_v7  ;;  %4613 = vmatpush.bf16.msra.mxu1 %v10785_v43 }
 0x407   : > { %4523 = vmatpush.bf16.msrb.mxu3 %v10841_v8  ;;  %v10846_v8 = vld [vmem:[#allocation60_spill] sm:$0xff] }
 0x408   : > { %3413 = vrot.lane.b32.xlu0 %v10843_v38, %s6539_s13  ;;  %4476 = vmatmul.bf16.vlgmr.msra.gmra.mxu3 %v4397_v27  ;;  %v10848_v38 = vld [vmem:[#allocation62_spill] sm:$0xff]  ;;  %s6546_s13 = smov 48  }
 0x40a   : > { %4444 = vmatpush.bf16.msra.mxu2 %v10842_v13  ;;  %4614 = vmatpush.bf16.msra.mxu1 %v8559_v2  ;;  %v10847_v2 = vld [vmem:[#allocation91_spill] sm:$0xff] }
 0x40b   : > { %4524 = vmatpush.bf16.msrb.mxu3 %v10844_v24 }
 0x40c   : > { %v4311_v52 = vpop.f32.mrf.mxu1 }
 0x40d   : > { %v4270_v45 = vpop.f32.mrf.mxu3  ;;  %v10845_v52 = vld [vmem:[#allocation56_spill] sm:$0xff] }
 0x40e   : > { %v4271_v58 = vadd.f32 %v4270_v45, %v9712_v35  ;;  %4445 = vmatpush.bf16.msra.mxu2 %v10845_v52  ;;  %4615 = vmatpush.bf16.msra.mxu1 %v8570_v4  ;;  %v10849_v35 = vld [vmem:[#allocation93_spill] sm:$0xff]  ;;  %v10850_v45 = vld [vmem:[#allocation66_spill] sm:$0xff]  ;;  %v10851_v4 = vld [vmem:[#allocation20_spill] sm:$0xff] }
 0x40f   : > { %4525 = vmatpush.bf16.msrb.mxu3 %v10789_v34  ;;  %v10852_v34 = vld [vmem:[#allocation26_spill] sm:$0xff] }
 0x412   : > { %4446 = vmatpush.bf16.msra.mxu2 %v10846_v8  ;;  %4616 = vmatpush.bf16.msra.mxu1 %v8591_v36 }
 0x413   : > { %4526 = vmatpush.bf16.msrb.mxu3 %v10847_v2 }
 0x415   : > { %v4272_v43 = vpop.f32.mrf.mxu3 }
 0x416   : > { %4447 = vmatpush.bf16.msra.mxu2 %v10848_v38  ;;  %4617 = vmatpush.bf16.msra.mxu1 %v8610_v59  ;;  %v10853_v43 = vld [vmem:[#allocation68_spill] sm:$0xff] }
 0x417   : > { %4527 = vmatpush.bf16.msrb.mxu3 %v10849_v35  ;;  %v10856_v35 = vld [vmem:[#allocation24_spill] sm:$0xff] }
 0x41a   : > { %4662 = vmatpush.bf16.msrb.mxu1 %v8623_v31  ;;  %4448 = vmatpush.bf16.msra.mxu2 %v10850_v45  ;;  %v10857_v31 = vld [vmem:[#allocation72_spill] sm:$0xff] }
 0x41b   : > { %4623 = vmatpush.bf16.msra.mxu3 %v10851_v4 }
 0x41c   : > { %4528 = vmatmul.bf16.vlgmr.msrb.gmra.mxu3 %v4397_v27  ;;  %v4231_v24 = vpop.f32.mrf.mxu0 }
 0x41d   : > { %v9800_v36 = vadd.f32 %v4231_v24, %v4219_v57  ;;  %v10858_v57 = vld [vmem:[#allocation75_spill] sm:$0xff] }
 0x41e   : > { %4663 = vmatpush.bf16.msrb.mxu1 %v10852_v34  ;;  %4449 = vmatpush.bf16.msra.mxu2 %v10853_v43 }
 0x41f   : > { %4624 = vmatpush.bf16.msra.mxu3 %v10854_v51 }
 0x421   : > { %v4322_v2 = vpop.f32.mrf.mxu3 }
 0x422   : > { %v4323_v59 = vadd.f32 %v4322_v2, %v4309_v55  ;;  %4494 = vmatpush.bf16.msrb.mxu2 %v10855_v18  ;;  %4664 = vmatpush.bf16.msrb.mxu1 %v8667_v11  ;;  %v10859_v2 = vld [vmem:[#allocation79_spill] sm:$0xff] }
 0x423   : > { %4625 = vmatpush.bf16.msra.mxu3 %v10856_v35 }
 0x424   : > { %v4233_v27 = vpop.f32.mrf.mxu0 }
 0x426   : > { %4495 = vmatpush.bf16.msrb.mxu2 %v10857_v31  ;;  %4665 = vmatpush.bf16.msrb.mxu1 %v10800_v41  ;;  %v10860_v41 = vld [vmem:[#allocation82_spill] sm:$0xff] }
 0x427   : > { %4626 = vmatpush.bf16.msra.mxu3 %v10797_v26 }
 0x429   : > { %v4324_v34 = vpop.f32.mrf.mxu3 }
 0x42a   : > { %4496 = vmatpush.bf16.msrb.mxu2 %v10858_v57  ;;  %4666 = vmatpush.bf16.msrb.mxu1 %v8708_v17  ;;  %v10861_v34 = vld [vmem:[#allocation85_spill] sm:$0xff] }
 0x42b   : > { %4627 = vmatpush.bf16.msra.mxu3 %v10801_v61  ;;  %v10863_v61 = vld [vmem:[#allocation43_spill] sm:$0xff] }
 0x42c   : > { %v4283_v55 = vpop.f32.mrf.mxu0 }
 0x42d   : > { %v9815_v24 = vadd.f32 %v4283_v55, %v4271_v58  ;;  %v10862_v58 = vld [vmem:[#allocation89_spill] sm:$0xff]  ;;  %v2880_v55 = vpop.permute.xlu1 %2879 }
 0x42e   : > { %4497 = vmatpush.bf16.msrb.mxu2 %v10859_v2  ;;  %4667 = vmatpush.bf16.msrb.mxu1 %v8730_v0 }
 0x42f   : > { %4628 = vmatpush.bf16.msra.mxu3 %v8698_v16 }
 0x432   : > { %4498 = vmatpush.bf16.msrb.mxu2 %v10860_v41  ;;  %4668 = vmatpush.bf16.msrb.mxu1 %v8760_v12  ;;  %v3058_v12 = vpop.permute.xlu2 %3057 }
 0x433   : > { %4629 = vmatpush.bf16.msra.mxu3 %v8720_v28 }
 0x434   : > { %v4285_v27 = vpop.f32.mrf.mxu0 }
 0x436   : > { %4499 = vmatpush.bf16.msrb.mxu2 %v10861_v34  ;;  %4669 = vmatpush.bf16.msrb.mxu1 %v8790_v23 }
 0x437   : > { %4630 = vmatpush.bf16.msra.mxu3 %v8749_v32  ;;  %v2883_v32 = vsel %vm1094_vm10, %v2880_v55, %v9720_v47  ;;  %v10866_v47 = vld [vmem:[#allocation6_spill] sm:$0xff] }
 0x43a   : > { %4500 = vmatpush.bf16.msrb.mxu2 %v10796_v62 }
 0x43b   : > { %4675 = vmatpush.bf16.msrb.mxu3 %v8771_v50  ;;  %v10864_v50 = vld [vmem:[#allocation92_spill] sm:$0xff] }
 0x43d   : > { %v4335_v16 = vpop.f32.mrf.mxu0  ;;  %v4385_v28 = vpop.permute.xlu0 %4384 }
 0x43e   : > { %4501 = vmatpush.bf16.msrb.mxu2 %v10862_v58  ;;  %v9828_v0 = vadd.f32 %v4335_v16, %v4323_v59  ;;  %v4394_v27 = vsel %vm3459_vm15, %v9752_v44, %v4385_v28 }
 0x43f   : > { %4676 = vmatpush.bf16.msrb.mxu3 %v8801_v60  ;;  %v4398_v23 = vpack.c.bf16 %v4394_v27, %v4394_v27  ;;  %v10865_v60 = vld [vmem:[#allocation4_spill] sm:$0xff] }
 0x440   : > { %v2885_v17 = vmax.f32 %v10865_v60, %v2883_v32  ;;  %v10867_v32 = vld [vmem:[#allocation94_spill] sm:$0xff] }
 0x441   : > { %4437 = vmatmul.bf16.vlgmr.msra.gmra.mxu0 %v4398_v23  ;;  %v4389_v26 = vpop.permute.xlu1 %4388 }
 0x442   : > { %4533 = vmatpush.bf16.msra.mxu0 %v10864_v50  ;;  %v2894_v16 = vpop.permute.xlu2 %2893  ;;  %v4395_v58 = vsel %vm3461_vm0, %v4385_v28, %v4389_v26  ;;  %v10868_v26 = vld [vmem:[#allocation96_spill] sm:$0xff] }
 0x443   : > { %4677 = vmatpush.bf16.msrb.mxu3 %v10863_v61  ;;  %v2896_v61 = vmax.f32 %v2885_v17, %v2894_v16  ;;  %v4399_v35 = vpack.c.bf16 %v4395_v58, %v4395_v58  ;;  %v10869_v58 = vld [vmem:[#allocation97_spill] sm:$0xff] }
 0x445   : > { %v4337_v59 = vpop.f32.mrf.mxu0  ;;  %v2897_v44 = vadd.f32 %v9548_v39, %v2896_v61  ;;  %6120 = vmatmul.msk.bf16.vlgmr.msra.gmra.mxu2 %vm3971_vm1, %v4399_v35 }
 0x446   : > { %4534 = vmatpush.bf16.msra.mxu0 %v10866_v47  ;;  %4546 = vmatpush.bf16.msra.mxu2 %v10814_v21  ;;  %v10870_v59 = vld [vmem:[#allocation95_spill] sm:$0xff] }
 0x447   : > { %4678 = vmatpush.bf16.msrb.mxu3 %v8844_v5  ;;  %v2898_v55 = vmax.f32 %v2897_v44, 0.0 }
 0x449   : > { %4591 = vrot.lane.b32.xlu1 %v2898_v55, %s6544_s23  ;;  %v9847_v28 = vpop.permute.xlu1 %3237 }
 0x44a   : > { %4535 = vmatpush.bf16.msra.mxu0 %v10867_v32  ;;  %4547 = vmatpush.bf16.msra.mxu2 %v10815_v25 }
 0x44b   : > { %4679 = vmatpush.bf16.msrb.mxu3 %v10752_v20  ;;  %v3244_v17 = vpop.permute.xlu2 %3243 }
 0x44c   : > { %v3245_v61 = vsel %vm1094_vm10, %v9847_v28, %v3244_v17  ;;  %v10871_v17 = vld [vmem:[#allocation99_spill] sm:$0xff] }
 0x44d   : > { %v3247_v60 = vmax.f32 %v10811_v54, %v3245_v61  ;;  %v10872_v61 = vld [vmem:[#allocation101_spill] sm:$0xff] }
 0x44e   : > { %4536 = vmatpush.bf16.msra.mxu0 %v10868_v26  ;;  %4548 = vmatpush.bf16.msra.mxu2 %v10818_v19 }
 0x44f   : > { %4680 = vmatpush.bf16.msrb.mxu3 %v10757_v56  ;;  %3249 = vrot.lane.b32.xlu0 %v3247_v60, %s6540_s29 }
 0x451   : > { %4489 = vmatmul.bf16.vlgmr.msrb.gmra.mxu0 %v4398_v23 }
 0x452   : > { %4537 = vmatpush.bf16.msra.mxu0 %v10869_v58  ;;  %4549 = vmatpush.bf16.msra.mxu2 %v10821_v15 }
 0x453   : > { %4681 = vmatpush.bf16.msrb.mxu3 %v10763_v48  ;;  %v4582_v27 = vpop.permute.xlu2 %4581 }
 0x454   : > { %v4598_v16 = vsel %vm3453_vm12, %v10870_v59, %v4582_v27  ;;  %v10873_v59 = vld [vmem:[#allocation103_spill] sm:$0xff] }
 0x455   : > { %v9862_v44 = vpop.f32.mrf.mxu1  ;;  %v4603_v54 = vpack.c.bf16 %v4598_v16, %v4598_v16  ;;  %6121 = vmatmul.msk.bf16.vlgmr.msrb.gmra.mxu2 %vm3971_vm1, %v4399_v35  ;;  %v3061_v16 = vsel %vm1094_vm10, %v3058_v12, %v9728_v9 }
 0x456   : > { %4538 = vmatpush.bf16.msra.mxu0 %v10871_v17  ;;  %4550 = vmatpush.bf16.msra.mxu2 %v10824_v49  ;;  %v10874_v49 = vld [vmem:[#allocation35_spill] sm:$0xff] }
 0x457   : > { %4682 = vmatpush.bf16.msrb.mxu3 %v10767_v42  ;;  %4618 = vmatmul.bf16.vlgmr.msra.gmra.mxu1 %v4603_v54 }
 0x458   : > { %4791 = vrot.lane.b32.xlu0 %v2898_v55, %s10774_s25  ;;  %4714 = vmatpush.bf16.msra.mxu1 %v9025_v37  ;;  %v10875_v55 = vld [vmem:[#allocation10_spill] sm:$0xff] }
 0x459   : > { %v3063_v15 = vmax.f32 %v10875_v55, %v3061_v16  ;;  %v10878_v16 = vld [vmem:[#allocation42_spill] sm:$0xff] }
 0x45a   : > { %4539 = vmatpush.bf16.msra.mxu0 %v10872_v61  ;;  %4551 = vmatpush.bf16.msra.mxu2 %v10826_v3  ;;  %v10876_v3 = vld [vmem:[#allocation39_spill] sm:$0xff] }
 0x45c   : > { %4715 = vmatpush.bf16.msra.mxu1 %v9057_v29 }
 0x45d   : > { %v4414_v60 = vpop.f32.mrf.mxu1 }
 0x45e   : > { %4540 = vmatpush.bf16.msra.mxu0 %v10873_v59  ;;  %4552 = vmatpush.bf16.msra.mxu2 %v10831_v30 }
 0x460   : > { %4716 = vmatpush.bf16.msra.mxu1 %v9087_v10 }
 0x461   : > { %4541 = vmatmul.bf16.vlgmr.msra.gmra.mxu0 %v4398_v23 }
 0x462   : > { %4636 = vmatpush.bf16.msrb.mxu0 %v10874_v49  ;;  %v3072_v61 = vpop.permute.xlu0 %3071  ;;  %4553 = vmatpush.bf16.msra.mxu2 %v10834_v33 }
 0x463   : > { %v3074_v60 = vmax.f32 %v3063_v15, %v3072_v61  ;;  %v4244_v29 = vpop.f32.mrf.mxu2  ;;  %v3422_v15 = vpop.permute.xlu1 %3421 }
 0x464   : > { %v9883_v12 = vadd.f32 %v4244_v29, %v9800_v36  ;;  %4717 = vmatpush.bf16.msra.mxu1 %v10751_v22 }
 0x465   : > { %v9886_v9 = vpop.f32.mrf.mxu1  ;;  %v3075_v23 = vadd.f32 %v9548_v39, %v3074_v60  ;;  %6122 = vmatmul.msk.bf16.vlgmr.msra.gmra.mxu2 %vm3971_vm1, %v4399_v35 }
 0x466   : > { %4637 = vmatpush.bf16.msrb.mxu0 %v10876_v3  ;;  %4649 = vmatpush.bf16.msrb.mxu2 %v10836_v53  ;;  %10877 = vst [vmem:[#allocation57_spill] sm:$0xff] %v9883_v12 }
 0x467   : > { %v3076_v55 = vmax.f32 %v3075_v23, 0.0  ;;  %4670 = vmatmul.bf16.vlgmr.msrb.gmra.mxu1 %v4603_v54  ;;  %v10879_v23 = vld [vmem:[#allocation45_spill] sm:$0xff] }
 0x468   : > { %4718 = vmatpush.bf16.msra.mxu1 %v10817_v14 }
 0x469   : > { %4595 = vrot.lane.b32.xlu2 %v3076_v55, %s10750_s15 }
 0x46a   : > { %4638 = vmatpush.bf16.msrb.mxu0 %v10878_v16  ;;  %4650 = vmatpush.bf16.msrb.mxu2 %v10840_v7  ;;  %v9894_v36 = vpop.permute.xlu0 %3415 }
 0x46b   : > { %v3423_v29 = vsel %vm1094_vm10, %v9894_v36, %v3422_v15  ;;  %v4246_v61 = vpop.f32.mrf.mxu2  ;;  %v9909_v12 = vpop.permute.xlu1 %4587 }
 0x46c   : > { %v3425_v35 = vmax.f32 %v10829_v63, %v3423_v29  ;;  %4719 = vmatpush.bf16.msra.mxu1 %v10819_v46  ;;  %v10880_v61 = vld [vmem:[#allocation46_spill] sm:$0xff] }
 0x46d   : > { %v4466_v60 = vpop.f32.mrf.mxu1 }
 0x46e   : > { %4639 = vmatpush.bf16.msrb.mxu0 %v8825_v40  ;;  %4651 = vmatpush.bf16.msrb.mxu2 %v10842_v13  ;;  %v10881_v60 = vld [vmem:[#allocation83_spill] sm:$0xff]  ;;  %v10882_v13 = vld [vmem:[#allocation2_spill] sm:$0xff] }
 0x46f   : > { %3427 = vrot.lane.b32.xlu1 %v3425_v35, %s6540_s29  ;;  %s427_s29 = scalar_lea.vmem %s10366_s12, %s5554_s27 }
 0x470   : > { %4720 = vmatpush.bf16.msra.mxu1 %v10825_v6 }
 0x471   : > { %4788 = vrot.lane.b32.xlu2 %v10879_v23, %s6541_s14  ;;  %v10883_v23 = vld [vmem:[#allocation50_spill] sm:$0xff] }
 0x472   : > { %4640 = vmatpush.bf16.msrb.mxu0 %v8850_v1  ;;  %4652 = vmatpush.bf16.msrb.mxu2 %v10845_v52  ;;  %v4585_v15 = vpop.permute.xlu0 %4584 }
 0x473   : > { %v4599_v63 = vsel %vm3455_vm13, %v4582_v27, %v4585_v15  ;;  %v4296_v29 = vpop.f32.mrf.mxu2  ;;  %v10885_v27 = vld [vmem:[#allocation5_spill] sm:$0xff]  ;;  %v10886_v15 = vld [vmem:[#allocation54_spill] sm:$0xff] }
 0x474   : > { %v4600_v35 = vsel %vm3457_vm14, %v4599_v63, %v9909_v12  ;;  %4721 = vmatpush.bf16.msra.mxu1 %v10881_v60 }
 0x475   : > { %v4604_v52 = vpack.c.bf16 %v4600_v35, %v4600_v35  ;;  %v10887_v35 = vld [vmem:[#allocation55_spill] sm:$0xff] }
 0x476   : > { %4641 = vmatpush.bf16.msrb.mxu0 %v10880_v61  ;;  %4653 = vmatpush.bf16.msrb.mxu2 %v10846_v8  ;;  %v10884_v61 = vld [vmem:[#allocation78_spill] sm:$0xff] }
 0x477   : > { %4794 = vrot.lane.b32.xlu1 %v3076_v55, %s10778_s30  ;;  %4722 = vmatmul.bf16.vlgmr.msra.gmra.mxu1 %v4603_v54  ;;  %v10888_v55 = vld [vmem:[#allocation81_spill] sm:$0xff]  ;;  %v10889_v54 = vld [vmem:[#allocation14_spill] sm:$0xff]  ;;  %s423_s30 = scalar_lea.vmem %s10365_s11, %s5554_s27 }
 0x478   : > { %4817 = vmatpush.bf16.msrb.mxu1 %v10882_v13  ;;  %v4516_v1 = vpop.f32.mrf.mxu1  ;;  %4631 = vmatmul.bf16.vlgmr.msra.gmra.mxu3 %v4604_v52 }
 0x479   : > { %4727 = vmatpush.bf16.msra.mxu3 %v10884_v61 }
 0x47a   : > { %4642 = vmatpush.bf16.msrb.mxu0 %v10883_v23  ;;  %4654 = vmatpush.bf16.msrb.mxu2 %v10848_v38  ;;  %v10890_v38 = vld [vmem:[#allocation53_spill] sm:$0xff] }
 0x47b   : > { %v4298_v63 = vpop.f32.mrf.mxu2  ;;  %v4425_v8 = vpop.f32.mrf.mxu3 }
 0x47c   : > { %4818 = vmatpush.bf16.msrb.mxu1 %v10885_v27  ;;  %v9925_v13 = vadd.f32 %v4425_v8, %v9862_v44  ;;  %v10891_v27 = vld [vmem:[#allocation59_spill] sm:$0xff]  ;;  %v10892_v63 = vld [vmem:[#allocation84_spill] sm:$0xff]  ;;  %v10894_v44 = vld [vmem:[#allocation61_spill] sm:$0xff] }
 0x47d   : > { %4728 = vmatpush.bf16.msra.mxu3 %v10888_v55 }
 0x47e   : > { %4643 = vmatpush.bf16.msrb.mxu0 %v10886_v15  ;;  %4655 = vmatpush.bf16.msrb.mxu2 %v10850_v45  ;;  %v10896_v45 = vld [vmem:[#allocation86_spill] sm:$0xff] }
 0x47f   : > { %4152 = vrot.lane.b32.xlu1 %v10890_v38, %s6546_s13 }
 0x480   : > { %4819 = vmatpush.bf16.msrb.mxu1 %v10889_v54  ;;  %v4518_v23 = vpop.f32.mrf.mxu1  ;;  %v9939_v54 = vadd.f32 %v4296_v29, %v9815_v24  ;;  %v10900_v24 = vld [vmem:[#allocation17_spill] sm:$0xff] }
 0x481   : > { %4729 = vmatpush.bf16.msra.mxu3 %v10892_v63 }
 0x482   : > { %4688 = vmatpush.bf16.msra.mxu0 %v10887_v35  ;;  %4656 = vmatpush.bf16.msrb.mxu2 %v10853_v43  ;;  %v10893_v35 = vld [vmem:[#allocation15_spill] sm:$0xff]  ;;  %10895 = vst [vmem:[#allocation13_spill] sm:$0xff] %v9939_v54 }
 0x483   : > { %v4427_v8 = vpop.f32.mrf.mxu3 }
 0x484   : > { %4820 = vmatpush.bf16.msrb.mxu1 %v10893_v35  ;;  %v4348_v23 = vpop.f32.mrf.mxu2  ;;  %v10898_v35 = vld [vmem:[#allocation63_spill] sm:$0xff]  ;;  %v10899_v8 = vld [vmem:[#allocation88_spill] sm:$0xff] }
 0x485   : > { %4730 = vmatpush.bf16.msra.mxu3 %v10896_v45  ;;  %v9943_v38 = vadd.f32 %v4348_v23, %v9828_v0  ;;  %v10902_v23 = vld [vmem:[#allocation90_spill] sm:$0xff] }
 0x486   : > { %4689 = vmatpush.bf16.msra.mxu0 %v10891_v27  ;;  %4701 = vmatpush.bf16.msra.mxu2 %v10855_v18  ;;  %v10897_v27 = vld [vmem:[#allocation11_spill] sm:$0xff] }
 0x487   : > { %4356 = vrot.lane.b32.xlu1 %v9939_v54, %s6546_s13  ;;  %v10901_v18 = vld [vmem:[#allocation67_spill] sm:$0xff]  ;;  %v10904_v54 = vld [vmem:[#allocation70_spill] sm:$0xff] }
 0x488   : > { %4821 = vmatpush.bf16.msrb.mxu1 %v10897_v27  ;;  %4683 = vmatmul.bf16.vlgmr.msrb.gmra.mxu3 %v4604_v52 }
 0x489   : > { %4731 = vmatpush.bf16.msra.mxu3 %v10899_v8 }
 0x48a   : > { %4690 = vmatpush.bf16.msra.mxu0 %v10894_v44  ;;  %4702 = vmatpush.bf16.msra.mxu2 %v10857_v31  ;;  %v10903_v31 = vld [vmem:[#allocation19_spill] sm:$0xff] }
 0x48b   : > { %v4477_v29 = vpop.f32.mrf.mxu3 }
 0x48c   : > { %4822 = vmatpush.bf16.msrb.mxu1 %v10900_v24  ;;  %v4350_v0 = vpop.f32.mrf.mxu2  ;;  %v9955_v27 = vadd.f32 %v4477_v29, %v9886_v9  ;;  %v10906_v24 = vld [vmem:[#allocation21_spill] sm:$0xff]  ;;  %v10911_v29 = vld [vmem:[#allocation76_spill] sm:$0xff] }
 0x48d   : > { %4732 = vmatpush.bf16.msra.mxu3 %v10902_v23  ;;  %v10909_v9 = vld [vmem:[#allocation93_spill] sm:$0xff] }
 0x48e   : > { %4691 = vmatpush.bf16.msra.mxu0 %v10898_v35  ;;  %4703 = vmatpush.bf16.msra.mxu2 %v10858_v57  ;;  %v10905_v35 = vld [vmem:[#allocation91_spill] sm:$0xff] }
 0x48f   : > { %v10907_v57 = vld [vmem:[#allocation23_spill] sm:$0xff] }
 0x490   : > { %4823 = vmatpush.bf16.msrb.mxu1 %v10903_v31  ;;  %v10910_v31 = vld [vmem:[#allocation26_spill] sm:$0xff] }
 0x491   : > { %4733 = vmatpush.bf16.msra.mxu3 %v10905_v35 }
 0x492   : > { %4692 = vmatpush.bf16.msra.mxu0 %v10901_v18  ;;  %4704 = vmatpush.bf16.msra.mxu2 %v10859_v2  ;;  %v10908_v18 = vld [vmem:[#allocation73_spill] sm:$0xff] }
 0x493   : > { %v4479_v0 = vpop.f32.mrf.mxu3 }
 0x494   : > { %4824 = vmatpush.bf16.msrb.mxu1 %v10906_v24  ;;  %v10912_v0 = vld [vmem:[#allocation24_spill] sm:$0xff] }
 0x495   : > { %4734 = vmatpush.bf16.msra.mxu3 %v10909_v9 }
 0x496   : > { %4693 = vmatpush.bf16.msra.mxu0 %v10904_v54  ;;  %4705 = vmatpush.bf16.msra.mxu2 %v10860_v41  ;;  %v10913_v41 = vld [vmem:[#allocation89_spill] sm:$0xff] }
 0x498   : > { %4869 = vmatpush.bf16.msra.mxu1 %v10907_v57  ;;  %4735 = vmatmul.bf16.vlgmr.msra.gmra.mxu3 %v4604_v52  ;;  %v10916_v52 = vld [vmem:[#allocation32_spill] sm:$0xff] }
 0x499   : > { %4830 = vmatpush.bf16.msrb.mxu3 %v10851_v4  ;;  %v10914_v4 = vld [vmem:[#allocation30_spill] sm:$0xff] }
 0x49a   : > { %4694 = vmatpush.bf16.msra.mxu0 %v10908_v18  ;;  %4706 = vmatpush.bf16.msra.mxu2 %v10861_v34  ;;  %v10915_v34 = vld [vmem:[#allocation27_spill] sm:$0xff] }
 0x49c   : > { %4870 = vmatpush.bf16.msra.mxu1 %v10910_v31 }
 0x49d   : > { %4831 = vmatpush.bf16.msrb.mxu3 %v10854_v51  ;;  %v10918_v51 = vld [vmem:[#allocation34_spill] sm:$0xff] }
 0x49e   : > { %4695 = vmatpush.bf16.msra.mxu0 %v10911_v29  ;;  %4707 = vmatpush.bf16.msra.mxu2 %v10796_v62  ;;  %v10917_v29 = vld [vmem:[#allocation29_spill] sm:$0xff]  ;;  %v10919_v62 = vld [vmem:[#allocation31_spill] sm:$0xff] }
 0x49f   : > { %v4529_v57 = vpop.f32.mrf.mxu3 }
 0x4a0   : > { %4871 = vmatpush.bf16.msra.mxu1 %v8667_v11  ;;  %v9974_v24 = vadd.f32 %v4529_v57, %v4516_v1  ;;  %v10920_v11 = vld [vmem:[#allocation37_spill] sm:$0xff]  ;;  %v10922_v57 = vld [vmem:[#allocation40_spill] sm:$0xff] }
 0x4a1   : > { %4832 = vmatpush.bf16.msrb.mxu3 %v10912_v0  ;;  %v10921_v1 = vld [vmem:[#allocation33_spill] sm:$0xff]  ;;  %v10923_v0 = vld [vmem:[#allocation36_spill] sm:$0xff] }
 0x4a2   : > { %4708 = vmatpush.bf16.msra.mxu2 %v10913_v41  ;;  %v10926_v41 = vld [vmem:[#allocation43_spill] sm:$0xff] }
 0x4a4   : > { %4872 = vmatpush.bf16.msra.mxu1 %v10914_v4  ;;  %v10924_v4 = vld [vmem:[#allocation38_spill] sm:$0xff] }
 0x4a5   : > { %4833 = vmatpush.bf16.msrb.mxu3 %v10915_v34  ;;  %v10925_v34 = vld [vmem:[#allocation41_spill] sm:$0xff] }
 0x4a7   : > { %v4531_v31 = vpop.f32.mrf.mxu3 }
 0x4a8   : > { %4873 = vmatpush.bf16.msra.mxu1 %v10916_v52  ;;  %v3414_v52 = vpop.permute.xlu0 %3413  ;;  %v3236_v31 = vpop.permute.xlu2 %3235 }
 0x4a9   : > { %4834 = vmatpush.bf16.msrb.mxu3 %v10917_v29 }
 0x4ac   : > { %4874 = vmatpush.bf16.msra.mxu1 %v10918_v51  ;;  %v3239_v51 = vsel %vm1094_vm10, %v3236_v31, %v9847_v28 }
 0x4ad   : > { %4835 = vmatpush.bf16.msrb.mxu3 %v10919_v62 }
 0x4b0   : > { %4875 = vmatpush.bf16.msra.mxu1 %v10920_v11 }
 0x4b1   : > { %4836 = vmatpush.bf16.msrb.mxu3 %v10921_v1 }
 0x4b4   : > { %4876 = vmatpush.bf16.msra.mxu1 %v10922_v57 }
 0x4b5   : > { %4837 = vmatpush.bf16.msrb.mxu3 %v10923_v0  ;;  %v10927_v0 = vld [vmem:[#allocation18_spill] sm:$0xff] }
 0x4b9   : > { %4882 = vmatpush.bf16.msra.mxu3 %v10924_v4  ;;  %v3241_v4 = vmax.f32 %v10927_v0, %v3239_v51 }
 0x4bb   : > { %v4592_v29 = vpop.permute.xlu1 %4591 }
 0x4bc   : > { %v4601_v62 = vsel %vm3459_vm15, %v9909_v12, %v4592_v29 }
 0x4bd   : > { %4883 = vmatpush.bf16.msra.mxu3 %v10925_v34  ;;  %v4605_v11 = vpack.c.bf16 %v4601_v62, %v4601_v62 }
 0x4be   : > { %v4438_v1 = vpop.f32.mrf.mxu0 }
 0x4bf   : > { %v4439_v57 = vadd.f32 %v4438_v1, %v9925_v13  ;;  %4644 = vmatmul.bf16.vlgmr.msrb.gmra.mxu0 %v4605_v11 }
 0x4c0   : > { %4740 = vmatpush.bf16.msrb.mxu0 %v10864_v50 }
 0x4c1   : > { %4884 = vmatpush.bf16.msra.mxu3 %v10926_v41  ;;  %v3250_v34 = vpop.permute.xlu0 %3249 }
 0x4c2   : > { %v3252_v41 = vmax.f32 %v3241_v4, %v3250_v34 }
 0x4c3   : > { %v4596_v18 = vpop.permute.xlu2 %4595 }
 0x4c4   : > { %v3253_v12 = vadd.f32 %v9548_v39, %v3252_v41  ;;  %v4602_v28 = vsel %vm3461_vm0, %v4592_v29, %v4596_v18  ;;  %4741 = vmatpush.bf16.msrb.mxu0 %v10866_v47  ;;  %v10928_v29 = vld [vmem:[#allocation71_spill] sm:$0xff]  ;;  %v10932_v41 = vld [vmem:[#allocation105_spill] sm:$0xff] }
 0x4c5   : > { %4885 = vmatpush.bf16.msra.mxu3 %v8844_v5  ;;  %v10003_v31 = vpack.c.bf16 %v4602_v28, %v4602_v28 }
 0x4c6   : > { %v4440_v13 = vpop.f32.mrf.mxu0  ;;  %v3254_v5 = vmax.f32 %v3253_v12, 0.0  ;;  %v3417_v12 = vsel %vm1094_vm10, %v3414_v52, %v9894_v36 }
 0x4c7   : > { %6123 = vmatmul.msk.bf16.vlgmr.msrb.gmra.mxu2 %vm3971_vm1, %v10003_v31 }
 0x4c8   : > { %4798 = vrot.lane.b32.xlu2 %v3254_v5, %s6544_s23  ;;  %4742 = vmatpush.bf16.msrb.mxu0 %v10867_v32  ;;  %s10958_s23 = smov 96  }
 0x4c9   : > { %4886 = vmatpush.bf16.msra.mxu3 %v10752_v20  ;;  %v4451_v20 = vpop.f32.mrf.mxu2  ;;  %4753 = vmatpush.bf16.msrb.mxu2 %v10814_v21 }
 0x4ca   : > { %v10011_v39 = vadd.f32 %v4451_v20, %v4439_v57  ;;  %v10929_v57 = vld [vmem:[#allocation104_spill] sm:$0xff] }
 0x4cb   : > { %v4789_v18 = vpop.permute.xlu2 %4788 }
 0x4cc   : > { %v4805_v62 = vsel %vm3453_vm12, %v10928_v29, %v4789_v18  ;;  %4743 = vmatpush.bf16.msrb.mxu0 %v10868_v26 }
 0x4cd   : > { %4887 = vmatpush.bf16.msra.mxu3 %v10757_v56  ;;  %v10017_v56 = vpack.c.bf16 %v4805_v62, %v4805_v62  ;;  %4754 = vmatpush.bf16.msrb.mxu2 %v10815_v25 }
 0x4ce   : > { %v4490_v51 = vpop.f32.mrf.mxu0 }
 0x4cf   : > { %4825 = vmatmul.bf16.vlgmr.msrb.gmra.mxu1 %v10017_v56  ;;  %4696 = vmatmul.bf16.vlgmr.msra.gmra.mxu0 %v4605_v11  ;;  %v4491_v4 = vadd.f32 %v4490_v51, %v9955_v27  ;;  %v10933_v27 = vld [vmem:[#allocation106_spill] sm:$0xff] }
 0x4d0   : > { %4362 = vrot.lane.b32.xlu2 %v9943_v38, %s6546_s13  ;;  %4744 = vmatpush.bf16.msrb.mxu0 %v10869_v58  ;;  %v10931_v38 = vld [vmem:[#allocation101_spill] sm:$0xff] }
 0x4d1   : > { %4888 = vmatpush.bf16.msra.mxu3 %v10763_v48  ;;  %v4453_v48 = vpop.f32.mrf.mxu2  ;;  %4755 = vmatpush.bf16.msrb.mxu2 %v10818_v19 }
 0x4d2   : > { %4921 = vmatpush.bf16.msrb.mxu1 %v9025_v37 }
 0x4d4   : > { %v10027_v1 = vpop.f32.mrf.mxu1  ;;  %4745 = vmatpush.bf16.msrb.mxu0 %v10871_v17 }
 0x4d5   : > { %4889 = vmatpush.bf16.msra.mxu3 %v10767_v42  ;;  %4756 = vmatpush.bf16.msrb.mxu2 %v10929_v57  ;;  %v10930_v42 = vld [vmem:[#allocation64_spill] sm:$0xff] }
 0x4d6   : > { %4922 = vmatpush.bf16.msrb.mxu1 %v10930_v42  ;;  %v4492_v0 = vpop.f32.mrf.mxu0 }
 0x4d7   : > { %6124 = vmatmul.msk.bf16.vlgmr.msra.gmra.mxu2 %vm3971_vm1, %v10003_v31 }
 0x4d8   : > { %4746 = vmatpush.bf16.msrb.mxu0 %v10931_v38 }
 0x4d9   : > { %v4503_v34 = vpop.f32.mrf.mxu2  ;;  %4757 = vmatpush.bf16.msrb.mxu2 %v10932_v41 }
 0x4da   : > { %4923 = vmatpush.bf16.msrb.mxu1 %v9087_v10  ;;  %v10038_v37 = vadd.f32 %v4503_v34, %v4491_v4  ;;  %v10934_v10 = vld [vmem:[#allocation52_spill] sm:$0xff] }
 0x4db   : > { %v3419_v20 = vmax.f32 %v10934_v10, %v3417_v12  ;;  %v10943_v12 = vld [vmem:[#allocation55_spill] sm:$0xff] }
 0x4dc   : > { %4563 = vrot.lane.b32.xlu1 %v10038_v37, %s6546_s13  ;;  %v4621_v28 = vpop.f32.mrf.mxu1  ;;  %4747 = vmatpush.bf16.msrb.mxu0 %v10873_v59 }
 0x4dd   : > { %4758 = vmatpush.bf16.msrb.mxu2 %v10933_v27 }
 0x4de   : > { %4924 = vmatpush.bf16.msrb.mxu1 %v10751_v22  ;;  %v4542_v13 = vpop.f32.mrf.mxu0  ;;  %v6527_v22 = vld [vmem:[%s10356_s2] ss:$0 sm:$0xff] }
 0x4df   : > { %v4543_v5 = vadd.f32 %v4542_v13, %v9974_v24  ;;  %4748 = vmatmul.bf16.vlgmr.msrb.gmra.mxu0 %v4605_v11  ;;  %4877 = vmatmul.bf16.vlgmr.msra.gmra.mxu1 %v10017_v56  ;;  %v10945_v13 = vld [vmem:[#allocation59_spill] sm:$0xff] }
 0x4e0   : > { %4843 = vmatpush.bf16.msra.mxu0 %v10874_v49 }
 0x4e1   : > { %v3428_v29 = vpop.permute.xlu1 %3427  ;;  %v4505_v62 = vpop.f32.mrf.mxu2  ;;  %4759 = vmatpush.bf16.msrb.mxu2 %v10831_v30 }
 0x4e2   : > { %4925 = vmatpush.bf16.msrb.mxu1 %v10817_v14  ;;  %v3430_v36 = vmax.f32 %v3419_v20, %v3428_v29  ;;  %v4792_v14 = vpop.permute.xlu0 %4791  ;;  %v10949_v20 = vld [vmem:[#allocation67_spill] sm:$0xff]  ;;  %v10953_v29 = vld [vmem:[#allocation76_spill] sm:$0xff]  ;;  %v10954_v62 = vld [vmem:[#allocation85_spill] sm:$0xff] }
 0x4e4   : > { %4844 = vmatpush.bf16.msra.mxu0 %v10876_v3  ;;  %v3431_v24 = vadd.f32 %v6527_v22, %v3430_v36  ;;  %v4671_v49 = vpop.f32.mrf.mxu1  ;;  %v4806_v3 = vsel %vm3455_vm13, %v4789_v18, %v4792_v14  ;;  %v10936_v18 = vld [vmem:[#allocation51_spill] sm:$0xff] }
 0x4e5   : > { %4760 = vmatpush.bf16.msrb.mxu2 %v10834_v33  ;;  %v10955_v22 = vld [vmem:[#allocation87_spill] sm:$0xff] }
 0x4e6   : > { %v3432_v52 = vmax.f32 %v3431_v24, 0.0  ;;  %4926 = vmatpush.bf16.msrb.mxu1 %v10819_v46  ;;  %v4544_v11 = vpop.f32.mrf.mxu0  ;;  %v10956_v24 = vld [vmem:[#allocation89_spill] sm:$0xff] }
 0x4e8   : > { %4845 = vmatpush.bf16.msra.mxu0 %v10878_v16  ;;  %4802 = vrot.lane.b32.xlu0 %v3432_v52, %s10750_s15 }
 0x4e9   : > { %4856 = vmatpush.bf16.msra.mxu2 %v10836_v53  ;;  %v10065_v51 = vpop.permute.xlu1 %4794  ;;  %v4555_v48 = vpop.f32.mrf.mxu2 }
 0x4ea   : > { %6125 = vmatmul.msk.bf16.vlgmr.msrb.gmra.mxu2 %vm3971_vm1, %v10003_v31  ;;  %4927 = vmatpush.bf16.msrb.mxu1 %v10825_v6  ;;  %v4807_v46 = vsel %vm3457_vm14, %v4806_v3, %v10065_v51  ;;  %v10070_v42 = vadd.f32 %v4555_v48, %v4543_v5  ;;  %v10935_v31 = vld [vmem:[#allocation44_spill] sm:$0xff]  ;;  %v10937_v6 = vld [vmem:[#allocation49_spill] sm:$0xff] }
 0x4eb   : > { %v4811_v16 = vpack.c.bf16 %v4807_v46, %v4807_v46  ;;  %v10948_v5 = vld [vmem:[#allocation72_spill] sm:$0xff] }
 0x4ec   : > { %4846 = vmatpush.bf16.msra.mxu0 %v8825_v40  ;;  %v4673_v53 = vpop.f32.mrf.mxu1  ;;  %v10938_v40 = vld [vmem:[#allocation46_spill] sm:$0xff] }
 0x4ed   : > { %4857 = vmatpush.bf16.msra.mxu2 %v10840_v7  ;;  %4838 = vmatmul.bf16.vlgmr.msrb.gmra.mxu3 %v4811_v16  ;;  %v10939_v7 = vld [vmem:[#allocation56_spill] sm:$0xff] }
 0x4ee   : > { %4928 = vmatpush.bf16.msrb.mxu1 %v10881_v60  ;;  %4934 = vmatpush.bf16.msrb.mxu3 %v10884_v61  ;;  %v10940_v61 = vld [vmem:[#allocation50_spill] sm:$0xff]  ;;  %v10941_v60 = vld [vmem:[#allocation60_spill] sm:$0xff] }
 0x4f0   : > { %4847 = vmatpush.bf16.msra.mxu0 %v10935_v31  ;;  %4145 = vrot.lane.b32.xlu0 %v10937_v6, %s6546_s13 }
 0x4f1   : > { %4858 = vmatpush.bf16.msra.mxu2 %v10936_v18  ;;  %4929 = vmatmul.bf16.vlgmr.msrb.gmra.mxu1 %v10017_v56  ;;  %v4557_v0 = vpop.f32.mrf.mxu2  ;;  %v10942_v56 = vld [vmem:[#allocation62_spill] sm:$0xff] }
 0x4f2   : > { %4935 = vmatpush.bf16.msrb.mxu3 %v10888_v55 }
 0x4f4   : > { %4848 = vmatpush.bf16.msra.mxu0 %v10938_v40  ;;  %v4723_v4 = vpop.f32.mrf.mxu1 }
 0x4f5   : > { %4859 = vmatpush.bf16.msra.mxu2 %v10939_v7 }
 0x4f6   : > { %4936 = vmatpush.bf16.msrb.mxu3 %v10892_v63  ;;  %v10944_v63 = vld [vmem:[#allocation66_spill] sm:$0xff] }
 0x4f8   : > { %4849 = vmatpush.bf16.msra.mxu0 %v10940_v61 }
 0x4f9   : > { %4860 = vmatpush.bf16.msra.mxu2 %v10941_v60 }
 0x4fa   : > { %4937 = vmatpush.bf16.msrb.mxu3 %v10896_v45 }
 0x4fb   : > { %v4632_v34 = vpop.f32.mrf.mxu3 }
 0x4fc   : > { %4850 = vmatpush.bf16.msra.mxu0 %v10886_v15  ;;  %v4633_v55 = vadd.f32 %v4632_v34, %v10027_v1  ;;  %v4725_v28 = vpop.f32.mrf.mxu1  ;;  %v10946_v15 = vld [vmem:[#allocation69_spill] sm:$0xff]  ;;  %v10947_v1 = vld [vmem:[#allocation63_spill] sm:$0xff] }
 0x4fd   : > { %4861 = vmatpush.bf16.msra.mxu2 %v10942_v56  ;;  %4890 = vmatmul.bf16.vlgmr.msra.gmra.mxu3 %v4811_v16 }
 0x4fe   : > { %4938 = vmatpush.bf16.msrb.mxu3 %v10899_v8 }
 0x500   : > { %4895 = vmatpush.bf16.msrb.mxu0 %v10943_v12 }
 0x501   : > { %4862 = vmatpush.bf16.msra.mxu2 %v10944_v63 }
 0x502   : > { %4939 = vmatpush.bf16.msrb.mxu3 %v10902_v23  ;;  %v10950_v23 = vld [vmem:[#allocation75_spill] sm:$0xff] }
 0x503   : > { %v4634_v45 = vpop.f32.mrf.mxu3 }
 0x504   : > { %4896 = vmatpush.bf16.msrb.mxu0 %v10945_v13 }
 0x505   : > { %4863 = vmatpush.bf16.msra.mxu2 %v10853_v43 }
 0x506   : > { %4940 = vmatpush.bf16.msrb.mxu3 %v10905_v35  ;;  %v10952_v35 = vld [vmem:[#allocation82_spill] sm:$0xff] }
 0x508   : > { %4897 = vmatpush.bf16.msrb.mxu0 %v10894_v44  ;;  %v10951_v44 = vld [vmem:[#allocation73_spill] sm:$0xff] }
 0x509   : > { %4908 = vmatpush.bf16.msrb.mxu2 %v10946_v15 }
 0x50a   : > { %4941 = vmatpush.bf16.msrb.mxu3 %v10909_v9 }
 0x50b   : > { %v4684_v8 = vpop.f32.mrf.mxu3 }
 0x50c   : > { %4898 = vmatpush.bf16.msrb.mxu0 %v10947_v1  ;;  %v4685_v10 = vadd.f32 %v4684_v8, %v4671_v49 }
 0x50d   : > { %4909 = vmatpush.bf16.msrb.mxu2 %v10948_v5  ;;  %4942 = vmatmul.bf16.vlgmr.msrb.gmra.mxu3 %v4811_v16 }
 0x510   : > { %4899 = vmatpush.bf16.msrb.mxu0 %v10949_v20 }
 0x511   : > { %4910 = vmatpush.bf16.msrb.mxu2 %v10950_v23 }
 0x513   : > { %v4686_v43 = vpop.f32.mrf.mxu3 }
 0x514   : > { %4900 = vmatpush.bf16.msrb.mxu0 %v10904_v54 }
 0x515   : > { %4911 = vmatpush.bf16.msrb.mxu2 %v10859_v2 }
 0x518   : > { %4901 = vmatpush.bf16.msrb.mxu0 %v10951_v44 }
 0x519   : > { %4912 = vmatpush.bf16.msrb.mxu2 %v10952_v35 }
 0x51b   : > { %v4736_v9 = vpop.f32.mrf.mxu3 }
 0x51c   : > { %4902 = vmatpush.bf16.msrb.mxu0 %v10953_v29  ;;  %v4737_v36 = vadd.f32 %v4736_v9, %v4723_v4 }
 0x51d   : > { %4913 = vmatpush.bf16.msrb.mxu2 %v10954_v62 }
 0x521   : > { %4914 = vmatpush.bf16.msrb.mxu2 %v10955_v22 }
 0x522   : > { %v4799_v49 = vpop.permute.xlu2 %4798 }
 0x523   : > { %v4738_v52 = vpop.f32.mrf.mxu3  ;;  %v4808_v2 = vsel %vm3459_vm15, %v10065_v51, %v4799_v49 }
 0x524   : > { %v4812_v54 = vpack.c.bf16 %v4808_v2, %v4808_v2  ;;  %v6465_v2 = vld [vmem:[%s10359_s5 + $0x48] sm:$0xff] }
 0x525   : > { %4915 = vmatpush.bf16.msrb.mxu2 %v10956_v24  ;;  %v10959_v24 = vld [vmem:[#allocation13_spill] sm:$0xff]  ;;  %5054 = vmatpush.bf16.msra.mxu1 %v6465_v2 }
 0x526   : > { %4851 = vmatmul.bf16.vlgmr.msra.gmra.mxu0 %v4812_v54 }
 0x527   : > { %4947 = vmatpush.bf16.msra.mxu0 %v10864_v50 }
 0x52a   : > { %v4363_v29 = vpop.permute.xlu2 %4362 }
 0x52b   : > { %4948 = vmatpush.bf16.msra.mxu0 %v10866_v47 }
 0x52f   : > { %4949 = vmatpush.bf16.msra.mxu0 %v10867_v32 }
 0x533   : > { %4950 = vmatpush.bf16.msra.mxu0 %v10868_v26 }
 0x536   : > { %4903 = vmatmul.bf16.vlgmr.msrb.gmra.mxu0 %v4812_v54 }
 0x537   : > { %4951 = vmatpush.bf16.msra.mxu0 %v10869_v58 }
 0x53b   : > { %4952 = vmatpush.bf16.msra.mxu0 %v10871_v17 }
 0x53c   : > { %v4645_v11 = vpop.f32.mrf.mxu0 }
 0x53d   : > { %v4646_v14 = vadd.f32 %v4645_v11, %v4633_v55 }
 0x53f   : > { %4953 = vmatpush.bf16.msra.mxu0 %v10931_v38 }
 0x543   : > { %4954 = vmatpush.bf16.msra.mxu0 %v10873_v59 }
 0x544   : > { %v4647_v3 = vpop.f32.mrf.mxu0 }
 0x546   : > { %4955 = vmatmul.bf16.vlgmr.msra.gmra.mxu0 %v4812_v54 }
 0x54a   : > { %v4658_v50 = vpop.f32.mrf.mxu2 }
 0x54b   : > { %v10123_v51 = vadd.f32 %v4658_v50, %v4646_v14 }
 0x54c   : > { %v4697_v47 = vpop.f32.mrf.mxu0  ;;  %v4826_v32 = vpop.f32.mrf.mxu1 }
 0x54d   : > { %v4698_v16 = vadd.f32 %v4697_v47, %v4685_v10 }
 0x552   : > { %v4660_v48 = vpop.f32.mrf.mxu2 }
 0x554   : > { %v4699_v26 = vpop.f32.mrf.mxu0  ;;  %v4828_v46 = vpop.f32.mrf.mxu1 }
 0x555   : > { %v10960_v46 = vld [vmem:[#allocation8_spill] sm:$0xff] }
 0x55a   : > { %v4803_v58 = vpop.permute.xlu0 %4802  ;;  %v4710_v53 = vpop.f32.mrf.mxu2 }
 0x55b   : > { %v4809_v17 = vsel %vm3461_vm0, %v4799_v49, %v4803_v58  ;;  %v10126_v18 = vadd.f32 %v4710_v53, %v4698_v16  ;;  %v6463_v53 = vld [vmem:[%s10359_s5 + $0x38] sm:$0xff] }
 0x55c   : > { %v4813_v31 = vpack.c.bf16 %v4809_v17, %v4809_v17  ;;  %v4749_v38 = vpop.f32.mrf.mxu0  ;;  %v4878_v59 = vpop.f32.mrf.mxu1 }
 0x55d   : > { %4770 = vrot.lane.b32.xlu2 %v10126_v18, %s6546_s13  ;;  %v4750_v4 = vadd.f32 %v4749_v38, %v4737_v36  ;;  %v6470_v38 = vld [vmem:[%s10359_s5 + $0x70] sm:$0xff] }
 0x55e   : > { %6126 = vmatmul.msk.bf16.vlgmr.msra.gmra.mxu2 %vm3971_vm1, %v4813_v31  ;;  %5158 = vmatpush.bf16.msrb.mxu0 %v6470_v38 }
 0x55f   : > { %4960 = vmatpush.bf16.msra.mxu2 %v10814_v21  ;;  %v10957_v21 = vld [vmem:[#allocation57_spill] sm:$0xff] }
 0x562   : > { %v4712_v0 = vpop.f32.mrf.mxu2  ;;  %v10137_v34 = vpop.permute.xlu0 %4145 }
 0x563   : > { %4961 = vmatpush.bf16.msra.mxu2 %v10815_v25  ;;  %v4153_v25 = vpop.permute.xlu1 %4152  ;;  %v6469_v0 = vld [vmem:[%s10359_s5 + $0x68] sm:$0xff] }
 0x564   : > { %v4751_v40 = vpop.f32.mrf.mxu0  ;;  %v4880_v7 = vpop.f32.mrf.mxu1  ;;  %5159 = vmatpush.bf16.msrb.mxu0 %v6469_v0 }
 0x565   : > { %4569 = vrot.lane.b32.xlu2 %v10070_v42, %s6546_s13  ;;  %v6459_v40 = vld [vmem:[%s10359_s5 + $0x18] sm:$0xff]  ;;  %v6468_v7 = vld [vmem:[%s10359_s5 + $0x60] sm:$0xff] }
 0x567   : > { %4962 = vmatpush.bf16.msra.mxu2 %v10818_v19 }
 0x568   : > { %5160 = vmatpush.bf16.msrb.mxu0 %v6468_v7 }
 0x56b   : > { %4963 = vmatpush.bf16.msra.mxu2 %v10929_v57  ;;  %v4154_v57 = vsel %vm4147_vm2, %v10137_v34, %v4153_v25  ;;  %v10158_v9 = vpop.permute.xlu1 %4356  ;;  %v6457_v25 = vld [vmem:[%s10359_s5 + $0x8] sm:$0xff] }
 0x56c   : > { %v4156_v55 = vmax.f32 %v10937_v6, %v4154_v57  ;;  %v4364_v36 = vsel %vm4147_vm2, %v10158_v9, %v4363_v29  ;;  %v6466_v57 = vld [vmem:[%s10359_s5 + $0x50] sm:$0xff] }
 0x56d   : > { %v4762_v61 = vpop.f32.mrf.mxu2  ;;  %4354 = vrot.lane.b32.xlu2 %v10957_v21, %s6546_s13  ;;  %v4366_v49 = vmax.f32 %v10959_v24, %v4364_v36 }
 0x56e   : > { %v4763_v60 = vadd.f32 %v4762_v61, %v4750_v4  ;;  %v4930_v56 = vpop.f32.mrf.mxu1  ;;  %6127 = vmatmul.msk.bf16.vlgmr.msrb.gmra.mxu2 %vm3971_vm1, %v4813_v31  ;;  %v6475_v4 = vld [vmem:[%s10359_s5 + $0x98] sm:$0xff]  ;;  %v6458_v61 = vld [vmem:[%s10359_s5 + $0x10] sm:$0xff] }
 0x56f   : > { %4964 = vmatpush.bf16.msra.mxu2 %v10932_v41 }
 0x570   : > { %4776 = vrot.lane.b32.xlu0 %v4763_v60, %s6546_s13  ;;  %v4839_v19 = vpop.f32.mrf.mxu3  ;;  %v6467_v60 = vld [vmem:[%s10359_s5 + $0x58] sm:$0xff] }
 0x571   : > { %v4840_v42 = vadd.f32 %v4839_v19, %v4826_v32  ;;  %5161 = vmatpush.bf16.msrb.mxu0 %v6467_v60 }
 0x573   : > { %4965 = vmatpush.bf16.msra.mxu2 %v10933_v27  ;;  %v10172_v50 = vpop.permute.xlu1 %4563 }
 0x575   : > { %v4764_v12 = vpop.f32.mrf.mxu2  ;;  %4158 = vrot.lane.b32.xlu2 %v4156_v55, %s10958_s23  ;;  %5162 = vmatpush.bf16.msrb.mxu0 %v6466_v57 }
 0x576   : > { %v4932_v28 = vpop.f32.mrf.mxu1  ;;  %v6456_v12 = vld [vmem:[%s10359_s5] sm:$0xff] }
 0x577   : > { %4966 = vmatpush.bf16.msra.mxu2 %v10831_v30  ;;  %v6472_v28 = vld [vmem:[%s10359_s5 + $0x80] sm:$0xff] }
 0x578   : > { %v4841_v63 = vpop.f32.mrf.mxu3 }
 0x57b   : > { %4967 = vmatpush.bf16.msra.mxu2 %v10834_v33 }
 0x57d   : > { %4561 = vrot.lane.b32.xlu2 %v10011_v39, %s6546_s13 }
 0x57e   : > { %6128 = vmatmul.msk.bf16.vlgmr.msra.gmra.mxu2 %vm3971_vm1, %v4813_v31  ;;  %v6462_v31 = vld [vmem:[%s10359_s5 + $0x30] sm:$0xff] }
 0x57f   : > { %5217 = vmatpush.bf16.msrb.mxu2 %v6475_v4 }
 0x580   : > { %v4891_v41 = vpop.f32.mrf.mxu3 }
 0x581   : > { %v4892_v13 = vadd.f32 %v4891_v41, %v4878_v59  ;;  %v6460_v59 = vld [vmem:[%s10359_s5 + $0x20] sm:$0xff]  ;;  %v6471_v41 = vld [vmem:[%s10359_s5 + $0x78] sm:$0xff] }
 0x582   : > { %5100 = vmatpush.bf16.msra.mxu3 %v6460_v59 }
 0x586   : > { %5101 = vmatpush.bf16.msra.mxu3 %v6459_v40  ;;  %v5308_v40 = vld [vmem:[%s10361_s7 + $0x38] sm:$0xf] }
 0x587   : > { %v5342_v7 = vunpack.c.l.b16 %v5308_v40 }
 0x588   : > { %v4893_v45 = vpop.f32.mrf.mxu3 }
 0x589   : > { %v6518_v45 = vld [vmem:[%s10358_s4] ss:$0 sm:$0xff] }
 0x58a   : > { %5102 = vmatpush.bf16.msra.mxu3 %v6458_v61  ;;  %v5350_v61 = vpack.c.b16 %v5342_v7, %v5342_v7 }
 0x58c   : > { %v5362_v60 = vsel %vm3975_vm11, %v5350_v61, 0 }
 0x58e   : > { %5103 = vmatpush.bf16.msra.mxu3 %v6457_v25  ;;  %v6486_v25 = vld [vmem:[%s10361_s7 + $0x28] sm:$0xff] }
 0x590   : > { %v4943_v27 = vpop.f32.mrf.mxu3 }
 0x591   : > { %v4944_v15 = vadd.f32 %v4943_v27, %v4930_v56  ;;  %v6474_v56 = vld [vmem:[%s10359_s5 + $0x90] sm:$0xff] }
 0x592   : > { %5218 = vmatpush.bf16.msrb.mxu2 %v6474_v56  ;;  %5104 = vmatpush.bf16.msra.mxu3 %v6456_v12 }
 0x596   : > { %5364 = vmatpush.bf16.msrb.mxu3 %v5362_v60 }
 0x598   : > { %v4945_v6 = vpop.f32.mrf.mxu3 }
 0x5a3   : > { %v4852_v1 = vpop.f32.mrf.mxu0 }
 0x5a4   : > { %v4853_v5 = vadd.f32 %v4852_v1, %v4840_v42  ;;  %v6473_v42 = vld [vmem:[%s10359_s5 + $0x88] sm:$0xff]  ;;  %v6480_v1 = vld [vmem:[%s10359_s5 + $0xc0] sm:$0xff] }
 0x5a5   : > { %5219 = vmatpush.bf16.msrb.mxu2 %v6473_v42  ;;  %v6484_v42 = vld [vmem:[%s10361_s7 + $0x18] sm:$0xff] }
 0x5a9   : > { %5220 = vmatpush.bf16.msrb.mxu2 %v6472_v28 }
 0x5ab   : > { %v4854_v8 = vpop.f32.mrf.mxu0 }
 0x5ac   : > { %v6479_v8 = vld [vmem:[%s10359_s5 + $0xb8] sm:$0xff] }
 0x5ad   : > { %5221 = vmatpush.bf16.msrb.mxu2 %v6471_v41 }
 0x5b3   : > { %v4904_v10 = vpop.f32.mrf.mxu0 }
 0x5b4   : > { %v4905_v44 = vadd.f32 %v4904_v10, %v4892_v13 }
 0x5b7   : > { %v10163_v52 = vpop.permute.xlu2 %4770 }
 0x5bb   : > { %v4906_v20 = vpop.f32.mrf.mxu0 }
 0x5bf   : > { %v4570_v3 = vpop.permute.xlu2 %4569 }
 0x5c0   : > { %v4571_v47 = vsel %vm4147_vm2, %v10172_v50, %v4570_v3 }
 0x5c1   : > { %v4573_v48 = vmax.f32 %v10038_v37, %v4571_v47  ;;  %v6464_v37 = vld [vmem:[%s10359_s5 + $0x40] sm:$0xff] }
 0x5c2   : > { %5055 = vmatpush.bf16.msra.mxu1 %v6464_v37 }
 0x5c3   : > { %v4956_v30 = vpop.f32.mrf.mxu0 }
 0x5c4   : > { %v4957_v54 = vadd.f32 %v4956_v30, %v4944_v15 }
 0x5c6   : > { %5056 = vmatpush.bf16.msra.mxu1 %v6463_v53 }
 0x5c7   : > { %v4355_v19 = vpop.permute.xlu2 %4354 }
 0x5c8   : > { %v4358_v63 = vsel %vm4147_vm2, %v4355_v19, %v10158_v9  ;;  %v6485_v19 = vld [vmem:[%s10361_s7 + $0x20] sm:$0xff] }
 0x5c9   : > { %v4360_v27 = vmax.f32 %v10957_v21, %v4358_v63  ;;  %v6478_v21 = vld [vmem:[%s10359_s5 + $0xb0] sm:$0xff] }
 0x5ca   : > { %5057 = vmatpush.bf16.msra.mxu1 %v6462_v31  ;;  %v6483_v63 = vld [vmem:[%s10361_s7 + $0x10] sm:$0xff] }
 0x5cb   : > { %v4958_v23 = vpop.f32.mrf.mxu0 }
 0x5cf   : > { %v4159_v13 = vpop.permute.xlu2 %4158 }
 0x5e1   : > { %v4865_v43 = vpop.f32.mrf.mxu2 }
 0x5e2   : > { %v4777_v26 = vpop.permute.xlu0 %4776  ;;  %v10184_v17 = vadd.f32 %v4865_v43, %v4853_v5  ;;  %v4562_v43 = vpop.permute.xlu2 %4561 }
 0x5e3   : > { %v4778_v16 = vsel %vm4147_vm2, %v10163_v52, %v4777_v26 }
 0x5e4   : > { %v4780_v58 = vmax.f32 %v10126_v18, %v4778_v16  ;;  %v6461_v18 = vld [vmem:[%s10359_s5 + $0x28] sm:$0xff] }
 0x5e5   : > { %5058 = vmatpush.bf16.msra.mxu1 %v6461_v18 }
 0x5e9   : > { %v4867_v33 = vpop.f32.mrf.mxu2  ;;  %5276 = vmatpush.bf16.msrb.mxu1 %v6480_v1  ;;  %v5389_v1 = vld [vmem:[%s10363_s9 + $0x28] sm:$0x3] }
 0x5ed   : > { %5277 = vmatpush.bf16.msrb.mxu1 %v6479_v8 }
 0x5f1   : > { %v4917_v35 = vpop.f32.mrf.mxu2  ;;  %5278 = vmatpush.bf16.msrb.mxu1 %v6478_v21  ;;  %v6491_v21 = vld [vmem:[%s10363_s9 + $0x18] sm:$0xff] }
 0x5f2   : > { %v10154_v62 = vadd.f32 %v4917_v35, %v4905_v44  ;;  %v4565_v35 = vsel %vm4147_vm2, %v4562_v43, %v10172_v50 }
 0x5f3   : > { %v4567_v29 = vmax.f32 %v10011_v39, %v4565_v35 }
 0x5f4   : > { %4977 = vrot.lane.b32.xlu0 %v10154_v62, %s6546_s13 }
 0x5f9   : > { %v4919_v22 = vpop.f32.mrf.mxu2 }
 0x5fc   : > { %4368 = vrot.lane.b32.xlu0 %v4366_v49, %s10958_s23 }
 0x601   : > { %v4969_v11 = vpop.f32.mrf.mxu2 }
 0x602   : > { %v4970_v14 = vadd.f32 %v4969_v11, %v4957_v54 }
 0x604   : > { %4983 = vrot.lane.b32.xlu1 %v4970_v14, %s6546_s13  ;;  %4768 = vrot.lane.b32.xlu0 %v10123_v51, %s6546_s13 }
 0x609   : > { %v4971_v32 = vpop.f32.mrf.mxu2 }
 0x60c   : > { %4143 = vrot.lane.b32.xlu1 %v10960_v46, %s6546_s13  ;;  %4575 = vrot.lane.b32.xlu0 %v4573_v48, %s10958_s23 }
 0x614   : > { %4782 = vrot.lane.b32.xlu1 %v4780_v58, %s10958_s23 }
 0x61c   : > { %4975 = vrot.lane.b32.xlu1 %v10184_v17, %s6546_s13 }
 0x666   : > { %v4978_v55 = vpop.permute.xlu0 %4977 }
 0x66e   : > { %v4369_v15 = vpop.permute.xlu0 %4368 }
 0x66f   : > { %v4371_v6 = vmax.f32 %v4360_v27, %v4369_v15  ;;  %v6482_v15 = vld [vmem:[%s10361_s7 + $0x8] sm:$0xff] }
 0x671   : > { %v4372_v5 = vadd.f32 %v6518_v45, %v4371_v6  ;;  %v6481_v6 = vld [vmem:[%s10361_s7] sm:$0xff] }
 0x673   : > { %v4373_v10 = vmax.f32 %v4372_v5, 0.0  ;;  %v5415_v5 = vunpack.c.l.b16 %v5389_v1 }
 0x675   : > { %v5006_v20 = vpack.c.bf16 %v4373_v10, %v4373_v10  ;;  %v5421_v8 = vpack.c.b16 %v5415_v5, %v5415_v5 }
 0x676   : > { %v4769_v30 = vpop.permute.xlu0 %4768  ;;  %v4984_v23 = vpop.permute.xlu1 %4983 }
 0x677   : > { %v4985_v33 = vsel %vm4147_vm2, %v4978_v55, %v4984_v23  ;;  %6159 = vmatmul.msk.bf16.vlgmr.msra.gmra.mxu1 %vm3459_vm15, %v5006_v20  ;;  %v5432_v10 = vsel %vm5430_vm3, %v5421_v8, 0  ;;  %v6492_v20 = vld [vmem:[%s10363_s9 + $0x20] sm:$0xff] }
 0x678   : > { %v4987_v44 = vmax.f32 %v10154_v62, %v4985_v33  ;;  %v4772_v62 = vsel %vm4147_vm2, %v4769_v30, %v10163_v52  ;;  %v6477_v52 = vld [vmem:[%s10359_s5 + $0xa8] sm:$0xff]  ;;  %5436 = vmatpush.bf16.msra.mxu0 %v5432_v10  ;;  %v6490_v30 = vld [vmem:[%s10363_s9 + $0x10] sm:$0xff]  ;;  %v6519_v23 = vld [vmem:[%s10360_s6] ss:$0 sm:$0xff] }
 0x679   : > { %v4774_v50 = vmax.f32 %v10123_v51, %v4772_v62  ;;  %5279 = vmatpush.bf16.msrb.mxu1 %v6477_v52  ;;  %v6476_v51 = vld [vmem:[%s10359_s5 + $0xa0] sm:$0xff] }
 0x67a   : > { %4989 = vrot.lane.b32.xlu2 %v4987_v44, %s10958_s23 }
 0x67c   : > { %5437 = vmatpush.bf16.msra.mxu0 %v6492_v20 }
 0x67d   : > { %5280 = vmatpush.bf16.msrb.mxu1 %v6476_v51 }
 0x67e   : > { %v4576_v9 = vpop.permute.xlu0 %4575  ;;  %v4144_v36 = vpop.permute.xlu1 %4143 }
 0x67f   : > { %v4578_v22 = vmax.f32 %v4567_v29, %v4576_v9  ;;  %v4148_v24 = vsel %vm4147_vm2, %v4144_v36, %v10137_v34  ;;  %v6489_v36 = vld [vmem:[%s10363_s9 + $0x8] sm:$0xff] }
 0x680   : > { %v4150_v49 = vmax.f32 %v10960_v46, %v4148_v24  ;;  %5438 = vmatpush.bf16.msra.mxu0 %v6491_v21  ;;  %v6520_v24 = vld [vmem:[%s10362_s8] ss:$0 sm:$0xff] }
 0x681   : > { %v4579_v2 = vadd.f32 %v6518_v45, %v4578_v22  ;;  %v6488_v22 = vld [vmem:[%s10363_s9] sm:$0xff] }
 0x682   : > { %v4161_v54 = vmax.f32 %v4150_v49, %v4159_v13 }
 0x683   : > { %v4580_v11 = vmax.f32 %v4579_v2, 0.0 }
 0x684   : > { %v4165_v14 = vadd.f32 %v6518_v45, %v4161_v54  ;;  %5439 = vmatpush.bf16.msra.mxu0 %v6490_v30 }
 0x685   : > { %v5110_v3 = vpack.c.bf16 %v4580_v11, %v4580_v11 }
 0x686   : > { %v4166_v47 = vmax.f32 %v4165_v14, 0.0  ;;  %v4783_v39 = vpop.permute.xlu1 %4782  ;;  %v6521_v14 = vld [vmem:[%s10364_s10] ss:$0 sm:$0xff] }
 0x687   : > { %v4785_v32 = vmax.f32 %v4774_v50, %v4783_v39  ;;  %6211 = vmatmul.msk.bf16.vlgmr.msrb.gmra.mxu0 %vm3459_vm15, %v5110_v3 }
 0x688   : > { %v4995_v48 = vpack.c.bf16 %v4166_v47, %v4166_v47  ;;  %5440 = vmatpush.bf16.msra.mxu0 %v6489_v36 }
 0x689   : > { %v4786_v26 = vadd.f32 %v6518_v45, %v4785_v32 }
 0x68a   : > { %6180 = vmatmul.msk.bf16.vlgmr.msra.gmra.mxu3 %vm3459_vm15, %v4995_v48 }
 0x68b   : > { %v4787_v34 = vmax.f32 %v4786_v26, 0.0 }
 0x68c   : > { %5441 = vmatpush.bf16.msra.mxu0 %v6488_v22 }
 0x68d   : > { %v5169_v46 = vpack.c.bf16 %v4787_v34, %v4787_v34 }
 0x68e   : > { %v4976_v16 = vpop.permute.xlu1 %4975 }
 0x68f   : > { %6242 = vmatmul.msk.bf16.vlgmr.msrb.gmra.mxu2 %vm3459_vm15, %v5169_v46  ;;  %v4979_v58 = vsel %vm4147_vm2, %v4976_v16, %v4978_v55 }
 0x690   : > { %v4981_v37 = vmax.f32 %v10184_v17, %v4979_v58  ;;  %v6487_v17 = vld [vmem:[%s10361_s7 + $0x30] sm:$0xff] }
 0x691   : > { %5365 = vmatpush.bf16.msrb.mxu3 %v6487_v17 }
 0x695   : > { %5366 = vmatpush.bf16.msrb.mxu3 %v6486_v25 }
 0x699   : > { %5367 = vmatpush.bf16.msrb.mxu3 %v6485_v19 }
 0x69d   : > { %5368 = vmatpush.bf16.msrb.mxu3 %v6484_v42 }
 0x6a1   : > { %5369 = vmatpush.bf16.msrb.mxu3 %v6483_v63 }
 0x6a5   : > { %5370 = vmatpush.bf16.msrb.mxu3 %v6482_v15 }
 0x6a9   : > { %5371 = vmatpush.bf16.msrb.mxu3 %v6481_v6 }
 0x6d4   : > { %v4990_v53 = vpop.permute.xlu2 %4989 }
 0x6d5   : > { %v4992_v31 = vmax.f32 %v4981_v37, %v4990_v53 }
 0x6d7   : > { %v4993_v18 = vadd.f32 %v6518_v45, %v4992_v31 }
 0x6d9   : > { %v4994_v38 = vmax.f32 %v4993_v18, 0.0 }
 0x6db   : > { %v5228_v59 = vpack.c.bf16 %v4994_v38, %v4994_v38 }
 0x6dd   : > { %6273 = vmatmul.msk.bf16.vlgmr.msrb.gmra.mxu1 %vm3459_vm15, %v5228_v59 }
 0x6f4   : > { %v5060_v0 = vpop.f32.mrf.mxu1 }
 0x6fc   : > { %v5062_v4 = vpop.f32.mrf.mxu1 }
 0x704   : > { %v5164_v56 = vpop.f32.mrf.mxu0 }
 0x70c   : > { %v5166_v57 = vpop.f32.mrf.mxu0 }
 0x70d   : > { %v5106_v55 = vpop.f32.mrf.mxu3 }
 0x70e   : > { %v5107_v12 = vadd.f32 %v5106_v55, %v5060_v0 }
 0x710   : > { %v5168_v28 = vadd.f32 %v5164_v56, %v5107_v12 }
 0x712   : > { %v5223_v41 = vpop.f32.mrf.mxu2 }
 0x713   : > { %v5227_v13 = vadd.f32 %v5223_v41, %v5168_v28 }
 0x715   : > { %v5108_v45 = vpop.f32.mrf.mxu3 }
 0x71a   : > { %v5225_v27 = vpop.f32.mrf.mxu2 }
 0x75a   : > { %v5282_v43 = vpop.f32.mrf.mxu1 }
 0x75b   : > { %v5286_v33 = vadd.f32 %v5282_v43, %v5227_v13 }
 0x75d   : > { %v5291_v44 = vadd.f32 %v6519_v23, %v5286_v33 }
 0x75f   : > { %v5292_v35 = vmax.f32 %v5291_v44, 0.0 }
 0x761   : > { %v5293_v29 = vpack.c.bf16 %v5292_v35, %v5292_v35 }
 0x762   : > { %v5284_v9 = vpop.f32.mrf.mxu1 }
 0x763   : > { %6302 = vmatmul.msk.bf16.vlgmr.msrb.gmra.mxu3 %vm3971_vm1, %v5293_v29 }
 0x7e6   : > { %v5373_v49 = vpop.f32.mrf.mxu3 }
 0x7e7   : > { %v5374_v2 = vadd.f32 %v6520_v24, %v5373_v49 }
 0x7e9   : > { %v5377_v62 = vmax.f32 %v5374_v2, 0.0 }
 0x7eb   : > { %v5378_v54 = vpack.c.bf16 %v5377_v62, %v5377_v62 }
 0x7ed   : > { %6323 = vmatmul.msk.bf16.vlgmr.msra.gmra.mxu0 %vm3453_vm12, %v5378_v54 }
 0x7ee   : > { %v5375_v11 = vpop.f32.mrf.mxu3 }
 0x86a   : > { %v5443_v3 = vpop.f32.mrf.mxu0 }
 0x86b   : > { %v5444_v50 = vadd.f32 %v6521_v14, %v5443_v3 }
 0x86d   : > { %v5449_v47 = vsel %vm5447_vm4, %v5444_v50, -inf  ;;  %5448 = vst.msk [vmem:[%s423_s30] sm:$0xff] %vm5447_vm4, %v5444_v50 }
 0x86e   : > { %5450 = vmax.xlane.f32.xlu0 %v5449_v47 }
 0x872   : > { %v5445_v39 = vpop.f32.mrf.mxu0 }
 0x8e1   : > { %v5451_v32 = vpop.xlane.xlu0 %5450 }
 0x8e2   : > { %v5452_v48 = vsub.f32 %v5444_v50, %v5451_v32 }
 0x8e4   : > { %v5453_v26 = vmul.f32 1.442695, %v5452_v48 }
 0x8e6   : > { %6522 = vpow2.f32 %v5453_v26 }
 0x8ec   : > { %v6523_v34 = vpop.eup %6522 }
 0x8ed   : > { %v5455_v46 = vsel %vm5447_vm4, %v6523_v34, 0.0 }
 0x8ee   : > { %5456 = vadd.xlane.f32.xlu1 %v5455_v46 }
 0x961   : > { %v5457_v52 = vpop.xlane.xlu1 %5456 }
 0x962   : > { %6524 = vlog2.f32 %v5457_v52 }
 0x968   : > { %v6525_v51 = vpop.eup %6524 }
 0x969   : > { %v5459_v16 = vmul.f32 0.6931472, %v6525_v51 }
 0x96b   : > { %v5460_v58 = vsub.f32 %v5452_v48, %v5459_v16 }
 0x96d   : > { %5461 = vst.msk [vmem:[%s427_s29] sm:$0xff] %vm5447_vm4, %v5460_v58 }
 0x96e PF: > { %s23_s21 = sadd.s32 1, %s6534_s21  }
 0x96f   : > { %p20_p5 = scmp.ge.s32.totalorder %s23_s21, 6  }
 0x971   :  { %22 = sbr.rel (!%p20_p5) target bundleno = 1 (0x1), region = 110 }

</bundles_post_ra>
